<compile_context>
chip_gen: v7x
topology: tpu7x:2x2x1
jax: 0.10.0
libtpu: 0.0.40
codegen_flags: <defaults>
</compile_context>

<pallas_src>
import functools

import jax
import jax.numpy as jnp
from jax.experimental import pallas as pl
from jax.experimental.pallas import tpu as pltpu

C_PAD = 128           # lane-dense channel padding (matches v5e 128-wide MXU)
EPS = 1e-5


# ----------------------------------------------------------------------------
# Pallas kernels
# ----------------------------------------------------------------------------
def _matmul_bn_act_kernel(x_ref, w_ref, s_ref, b_ref, o_ref, *, relu):
    """One (TM, K) x (K, C_PAD) matmul + folded-BN (+ReLU) epilogue."""
    y = jnp.dot(x_ref[...], w_ref[...], preferred_element_type=jnp.float32)
    y = y * s_ref[...] + b_ref[...]
    if relu:
        y = jnp.maximum(y, 0.0)
    o_ref[...] = y.astype(o_ref.dtype)


def _block_tail_kernel(x2_ref, w2_ref, s2_ref, b2_ref,
                       xd_ref, wd_ref, sd_ref, bd_ref, o_ref):
    """conv2 (3x3) + downsample (1x1) + BN on both + residual add + ReLU."""
    y = jnp.dot(x2_ref[...], w2_ref[...], preferred_element_type=jnp.float32)
    y = y * s2_ref[...] + b2_ref[...]
    r = jnp.dot(xd_ref[...], wd_ref[...], preferred_element_type=jnp.float32)
    r = r * sd_ref[...] + bd_ref[...]
    o_ref[...] = jnp.maximum(y + r, 0.0).astype(o_ref.dtype)


def _pool_fc_kernel(x_ref, w_ref, o_ref, *, inv_hw):
    """Global average pool over spatial, then (N, C) x (C, NC_PAD) matmul."""
    pooled = jnp.sum(x_ref[...].astype(jnp.float32), axis=1) * inv_hw   # (N, C)
    o_ref[...] = jnp.dot(pooled.astype(jnp.bfloat16), w_ref[...],
                         preferred_element_type=jnp.float32)


# ----------------------------------------------------------------------------
# Pallas wrappers
# ----------------------------------------------------------------------------
def _choose_tile_m(m, cap=512):
    """Largest multiple-of-8 tile <= cap that divides m (m is a multiple of 8)."""
    assert m % 8 == 0, m
    tm = min(m, cap)
    while m % tm:
        tm -= 8
    return tm


def _matmul_bn_act(slab, w, scale, bias, *, relu):
    m, kdim = slab.shape
    tm = _choose_tile_m(m)
    return pl.pallas_call(
        functools.partial(_matmul_bn_act_kernel, relu=relu),
        out_shape=jax.ShapeDtypeStruct((m, C_PAD), jnp.bfloat16),
        grid_spec=pltpu.PrefetchScalarGridSpec(
            num_scalar_prefetch=0,
            grid=(m // tm,),
            in_specs=[
                pl.BlockSpec((tm, kdim), lambda i: (i, 0)),
                pl.BlockSpec((kdim, C_PAD), lambda i: (0, 0)),
                pl.BlockSpec((1, C_PAD), lambda i: (0, 0)),
                pl.BlockSpec((1, C_PAD), lambda i: (0, 0)),
            ],
            out_specs=pl.BlockSpec((tm, C_PAD), lambda i: (i, 0)),
        ),
        compiler_params=pltpu.CompilerParams(
            dimension_semantics=("parallel",)),
    )(slab, w, scale, bias)


def _block_tail(slab2, cp2, slabd, cpd):
    m, k2 = slab2.shape
    kd = slabd.shape[1]
    tm = _choose_tile_m(m)
    return pl.pallas_call(
        _block_tail_kernel,
        out_shape=jax.ShapeDtypeStruct((m, C_PAD), jnp.bfloat16),
        grid_spec=pltpu.PrefetchScalarGridSpec(
            num_scalar_prefetch=0,
            grid=(m // tm,),
            in_specs=[
                pl.BlockSpec((tm, k2), lambda i: (i, 0)),
                pl.BlockSpec((k2, C_PAD), lambda i: (0, 0)),
                pl.BlockSpec((1, C_PAD), lambda i: (0, 0)),
                pl.BlockSpec((1, C_PAD), lambda i: (0, 0)),
                pl.BlockSpec((tm, kd), lambda i: (i, 0)),
                pl.BlockSpec((kd, C_PAD), lambda i: (0, 0)),
                pl.BlockSpec((1, C_PAD), lambda i: (0, 0)),
                pl.BlockSpec((1, C_PAD), lambda i: (0, 0)),
            ],
            out_specs=pl.BlockSpec((tm, C_PAD), lambda i: (i, 0)),
        ),
        compiler_params=pltpu.CompilerParams(
            dimension_semantics=("parallel",)),
    )(slab2, cp2["w"], cp2["s"], cp2["b"],
      slabd, cpd["w"], cpd["s"], cpd["b"])


def _avgpool_fc(x_nhwc, fc_w):
    n, h, w, c = x_nhwc.shape
    x2 = x_nhwc.reshape(n, h * w, c)
    return pl.pallas_call(
        functools.partial(_pool_fc_kernel, inv_hw=1.0 / (h * w)),
        out_shape=jax.ShapeDtypeStruct((n, fc_w.shape[1]), jnp.float32),
    )(x2, fc_w)


# ----------------------------------------------------------------------------
# Plain-JAX glue: im2col slab construction (per-conv, single copy)
# ----------------------------------------------------------------------------
def _im2col(x_nhwc, k, stride, padding):
    """Return ((N*Ho*Wo, k*k*C) slab, Ho, Wo)."""
    n, h, w, c = x_nhwc.shape
    xp = x_nhwc
    if padding:
        xp = jnp.pad(x_nhwc, ((0, 0), (padding, padding), (padding, padding), (0, 0)))
    ho = (h + 2 * padding - k) // stride + 1
    wo = (w + 2 * padding - k) // stride + 1
    cols = []
    for i in range(k):
        for j in range(k):
            cols.append(xp[:, i:i + stride * (ho - 1) + 1:stride,
                              j:j + stride * (wo - 1) + 1:stride, :])
    slab = jnp.concatenate(cols, axis=-1) if len(cols) > 1 else cols[0]
    return slab.reshape(n * ho * wo, k * k * c), ho, wo


def _conv_bn_act(x_nhwc, cp, *, k, stride, padding, relu):
    n = x_nhwc.shape[0]
    slab, ho, wo = _im2col(x_nhwc, k, stride, padding)
    out = _matmul_bn_act(slab, cp["w"], cp["s"], cp["b"], relu=relu)
    return out.reshape(n, ho, wo, C_PAD)


# ----------------------------------------------------------------------------
# Model: parameter init, one-time kernel-param preparation, forward
# ----------------------------------------------------------------------------
def _block_configs(len_list, rngs):
    cfgs = []
    for layer_idx, (base, rbase) in enumerate([(0, 1), (6, 7), (12, 13)]):
        for b in range(3):
            cfgs.append(dict(
                max_in=max(len_list[base + 2 * b]),
                max_mid=max(len_list[base + 2 * b + 1]),
                mid_sel=rngs[rbase + 2 * b],
                out_sel=rngs[rbase + 2 * b + 1],
                stride=2 if (layer_idx > 0 and b == 0) else 1,
            ))
    return cfgs


def init_params(key, len_list, rngs, num_classes=100):
    keys = iter(jax.random.split(key, 256))

    def conv_block(max_in, cout, k):
        fan_out = cout * k * k
        std = (2.0 / fan_out) ** 0.5
        w = std * jax.random.normal(next(keys), (k, k, max_in, cout), jnp.float32)
        gamma = 1.0 + 0.1 * jax.random.normal(next(keys), (cout,), jnp.float32)
        beta = 0.1 * jax.random.normal(next(keys), (cout,), jnp.float32)
        mean = 0.1 * jax.random.normal(next(keys), (cout,), jnp.float32)
        var = 1.0 + 0.1 * jax.random.uniform(next(keys), (cout,), jnp.float32)
        return (w, gamma, beta, mean, var)

    params = {"stem": conv_block(3, rngs[0], 3), "blocks": []}
    for cfg in _block_configs(len_list, rngs):
        params["blocks"].append(dict(
            conv1=conv_block(cfg["max_in"], cfg["mid_sel"], 3),
            conv2=conv_block(cfg["max_mid"], cfg["out_sel"], 3),
            down=conv_block(cfg["max_in"], cfg["out_sel"], 1),
        ))
    c_last = max(len_list[18])
    fc_std = (2.0 / num_classes) ** 0.5
    params["fc_w"] = fc_std * jax.random.normal(
        next(keys), (num_classes, c_last), jnp.float32)
    return params


def prepare_kernel_params(params, len_list, rngs, num_classes=100):
    """One-time fold of BN into scale/bias, weight slice/reshape/pad to bf16.

    Activations are kept channel-padded to C_PAD everywhere; padded output
    channels get scale=bias=0 so they stay exactly zero through the network.
    """
    cfgs = _block_configs(len_list, rngs)

    def prep(raw, cin_actual, cin_slab, k):
        w, gamma, beta, mean, var = raw
        cout = w.shape[-1]
        wk = w[:, :, :cin_actual, :]                                # weight slicing
        wk = jnp.pad(wk, ((0, 0), (0, 0),
                          (0, cin_slab - cin_actual), (0, C_PAD - cout)))
        w_slab = wk.reshape(k * k * cin_slab, C_PAD).astype(jnp.bfloat16)
        inv = 1.0 / jnp.sqrt(var + EPS)
        scale = jnp.pad(gamma * inv, (0, C_PAD - cout))
        bias = jnp.pad(beta - mean * gamma * inv, (0, C_PAD - cout))
        return {"w": w_slab,
                "s": scale.reshape(1, C_PAD).astype(jnp.float32),
                "b": bias.reshape(1, C_PAD).astype(jnp.float32)}

    kp = {"stem": prep(params["stem"], 3, 3, 3), "blocks": []}
    meta = {"blocks": [], "num_classes": num_classes}
    cur = rngs[0]
    for bp, cfg in zip(params["blocks"], cfgs):
        kp["blocks"].append({
            "conv1": prep(bp["conv1"], cur, C_PAD, 3),
            "conv2": prep(bp["conv2"], cfg["mid_sel"], C_PAD, 3),
            "down": prep(bp["down"], cur, C_PAD, 1),
        })
        meta["blocks"].append({"stride": cfg["stride"]})
        cur = cfg["out_sel"]

    # FC: forward uses F.linear(x, fc.weight[:, :rngs[18]]) -> no bias term.
    c_sel = rngs[18]
    nc_pad = ((num_classes + 127) // 128) * 128
    wt = jnp.transpose(params["fc_w"][:, :c_sel], (1, 0))           # (C, classes)
    wt = jnp.pad(wt, ((0, C_PAD - c_sel), (0, nc_pad - num_classes)))
    kp["fc_w"] = wt.astype(jnp.bfloat16)
    return kp, meta


def resnet_forward(x_nchw, kp, meta):
    x = jnp.transpose(x_nchw, (0, 2, 3, 1)).astype(jnp.bfloat16)    # NCHW -> NHWC

    x = _conv_bn_act(x, kp["stem"], k=3, stride=1, padding=1, relu=True)

    for bp, bm in zip(kp["blocks"], meta["blocks"]):
        s = bm["stride"]
        n = x.shape[0]
        out1 = _conv_bn_act(x, bp["conv1"], k=3, stride=s, padding=1, relu=True)
        slab2, ho, wo = _im2col(out1, 3, 1, 1)                      # conv2 input
        slabd, _, _ = _im2col(x, 1, s, 0)                           # downsample input
        x = _block_tail(slab2, bp["conv2"], slabd, bp["down"]).reshape(
            n, ho, wo, C_PAD)

    logits = _avgpool_fc(x, kp["fc_w"])
    return logits[:, :meta["num_classes"]]


# ----------------------------------------------------------------------------
if __name__ == "__main__":
    key = jax.random.PRNGKey(0)
    k_x, k_p = jax.random.split(key)

    # Small, consistent slimmable-ResNet-20 style config (blocks = (3, 3, 3)).
    len_list = [[4, 8]] * 7 + [[8, 16]] * 6 + [[16, 32]] * 6        # 19 entries
    rngs = [8, 8, 4, 4, 8, 8, 8, 16, 8, 16, 16, 16, 16, 32, 16, 32, 32, 32, 32]
    assert len(len_list) == 19 and len(rngs) == 19

    x = jax.random.normal(k_x, (2, 3, 16, 16), jnp.float32)         # NCHW like PyTorch
    params = init_params(k_p, len_list, rngs, num_classes=100)
    kp, meta = prepare_kernel_params(params, len_list, rngs, num_classes=100)

    fwd = jax.jit(lambda xx, pp: resnet_forward(xx, pp, meta))
    out = fwd(x, kp)
    out = jax.block_until_ready(out)
    assert out.shape == (2, 100), out.shape
    assert jnp.all(jnp.isfinite(out))
    print("KERNEL_OK")
</pallas_src>

<mosaic_0001>
module attributes {stable_mosaic.version = 11 : i64} {
  func.func @_matmul_bn_act_kernel(%arg0: i32, %arg1: memref<512x27xbf16, #tpu.memory_space<vmem>>, %arg2: memref<27x128xbf16, #tpu.memory_space<vmem>>, %arg3: memref<1x128xf32, #tpu.memory_space<vmem>>, %arg4: memref<1x128xf32, #tpu.memory_space<vmem>>, %arg5: memref<512x128xbf16, #tpu.memory_space<vmem>>) attributes {dimension_semantics = [#tpu.dimension_semantics<parallel>], iteration_bounds = array<i64: 1>, scalar_prefetch = 0 : i64, scratch_operands = 0 : i64, tpu.core_type = #tpu.core_type<tc>, window_params = [{transform_indices = @transform_0, window_bounds = array<i64: 512, 27>}, {pipeline_mode = #tpu.pipeline_mode<synchronous>, transform_indices = @transform_1, window_bounds = array<i64: 27, 128>}, {pipeline_mode = #tpu.pipeline_mode<synchronous>, transform_indices = @transform_2, window_bounds = array<i64: 1, 128>}, {pipeline_mode = #tpu.pipeline_mode<synchronous>, transform_indices = @transform_3, window_bounds = array<i64: 1, 128>}, {transform_indices = @transform_4, window_bounds = array<i64: 512, 128>}]} {
    %c0 = arith.constant 0 : index
    %c0_0 = arith.constant 0 : index
    %0 = vector.load %arg1[%c0, %c0_0] : memref<512x27xbf16, #tpu.memory_space<vmem>>, vector<512x27xbf16>
    %c0_1 = arith.constant 0 : index
    %c0_2 = arith.constant 0 : index
    %1 = vector.load %arg2[%c0_1, %c0_2] : memref<27x128xbf16, #tpu.memory_space<vmem>>, vector<27x128xbf16>
    %cst = arith.constant dense<0.000000e+00> : vector<512x128xf32>
    %2 = tpu.matmul %0, %1, %cst {dimension_numbers = #tpu.dot_dimension_numbers<[1], [0], [0], [1], [0, 0, 1, 1], [], []>} : vector<512x27xbf16>, vector<27x128xbf16>, vector<512x128xf32> -> vector<512x128xf32>
    %c0_3 = arith.constant 0 : index
    %c0_4 = arith.constant 0 : index
    %3 = vector.load %arg3[%c0_3, %c0_4] : memref<1x128xf32, #tpu.memory_space<vmem>>, vector<1x128xf32>
    %4 = vector.broadcast %3 : vector<1x128xf32> to vector<512x128xf32>
    %5 = arith.mulf %2, %4 : vector<512x128xf32>
    %c0_5 = arith.constant 0 : index
    %c0_6 = arith.constant 0 : index
    %6 = vector.load %arg4[%c0_5, %c0_6] : memref<1x128xf32, #tpu.memory_space<vmem>>, vector<1x128xf32>
    %7 = vector.broadcast %6 : vector<1x128xf32> to vector<512x128xf32>
    %8 = arith.addf %5, %7 : vector<512x128xf32>
    %cst_7 = arith.constant 0.000000e+00 : f32
    %9 = vector.broadcast %cst_7 : f32 to vector<512x128xf32>
    %10 = arith.maximumf %8, %9 : vector<512x128xf32>
    %11 = arith.truncf %10 : vector<512x128xf32> to vector<512x128xbf16>
    %c0_8 = arith.constant 0 : index
    %c0_9 = arith.constant 0 : index
    %12 = vector.load %arg5[%c0_8, %c0_9] : memref<512x128xbf16, #tpu.memory_space<vmem>>, vector<512x128xbf16>
    tpu.vector_store %arg5[%c0_8, %c0_9], %11 {strides = array<i32>} : memref<512x128xbf16, #tpu.memory_space<vmem>>, vector<512x128xbf16>,
    return
  }
  func.func @transform_0(%arg0: i32) -> (i32, i32) {
    %c0_i32 = arith.constant 0 : i32
    %c0_i32_0 = arith.constant 0 : i32
    return %arg0, %c0_i32 : i32, i32
  }
  func.func @transform_1(%arg0: i32) -> (i32, i32) {
    %c0_i32 = arith.constant 0 : i32
    %c0_i32_0 = arith.constant 0 : i32
    %c0_i32_1 = arith.constant 0 : i32
    return %c0_i32, %c0_i32_0 : i32, i32
  }
  func.func @transform_2(%arg0: i32) -> (i32, i32) {
    %c0_i32 = arith.constant 0 : i32
    %c0_i32_0 = arith.constant 0 : i32
    %c0_i32_1 = arith.constant 0 : i32
    return %c0_i32, %c0_i32_0 : i32, i32
  }
  func.func @transform_3(%arg0: i32) -> (i32, i32) {
    %c0_i32 = arith.constant 0 : i32
    %c0_i32_0 = arith.constant 0 : i32
    %c0_i32_1 = arith.constant 0 : i32
    return %c0_i32, %c0_i32_0 : i32, i32
  }
  func.func @transform_4(%arg0: i32) -> (i32, i32) {
    %c0_i32 = arith.constant 0 : i32
    %c0_i32_0 = arith.constant 0 : i32
    return %arg0, %c0_i32 : i32, i32
  }
}

module attributes {stable_mosaic.version = 11 : i64} {
  func.func @_matmul_bn_act_kernel(%arg0: i32, %arg1: memref<512x1152xbf16, #tpu.memory_space<vmem>>, %arg2: memref<1152x128xbf16, #tpu.memory_space<vmem>>, %arg3: memref<1x128xf32, #tpu.memory_space<vmem>>, %arg4: memref<1x128xf32, #tpu.memory_space<vmem>>, %arg5: memref<512x128xbf16, #tpu.memory_space<vmem>>) attributes {dimension_semantics = [#tpu.dimension_semantics<parallel>], iteration_bounds = array<i64: 1>, scalar_prefetch = 0 : i64, scratch_operands = 0 : i64, tpu.core_type = #tpu.core_type<tc>, window_params = [{transform_indices = @transform_0, window_bounds = array<i64: 512, 1152>}, {pipeline_mode = #tpu.pipeline_mode<synchronous>, transform_indices = @transform_1, window_bounds = array<i64: 1152, 128>}, {pipeline_mode = #tpu.pipeline_mode<synchronous>, transform_indices = @transform_2, window_bounds = array<i64: 1, 128>}, {pipeline_mode = #tpu.pipeline_mode<synchronous>, transform_indices = @transform_3, window_bounds = array<i64: 1, 128>}, {transform_indices = @transform_4, window_bounds = array<i64: 512, 128>}]} {
    %c0 = arith.constant 0 : index
    %c0_0 = arith.constant 0 : index
    %0 = vector.load %arg1[%c0, %c0_0] : memref<512x1152xbf16, #tpu.memory_space<vmem>>, vector<512x1152xbf16>
    %c0_1 = arith.constant 0 : index
    %c0_2 = arith.constant 0 : index
    %1 = vector.load %arg2[%c0_1, %c0_2] : memref<1152x128xbf16, #tpu.memory_space<vmem>>, vector<1152x128xbf16>
    %cst = arith.constant dense<0.000000e+00> : vector<512x128xf32>
    %2 = tpu.matmul %0, %1, %cst {dimension_numbers = #tpu.dot_dimension_numbers<[1], [0], [0], [1], [0, 0, 1, 1], [], []>} : vector<512x1152xbf16>, vector<1152x128xbf16>, vector<512x128xf32> -> vector<512x128xf32>
    %c0_3 = arith.constant 0 : index
    %c0_4 = arith.constant 0 : index
    %3 = vector.load %arg3[%c0_3, %c0_4] : memref<1x128xf32, #tpu.memory_space<vmem>>, vector<1x128xf32>
    %4 = vector.broadcast %3 : vector<1x128xf32> to vector<512x128xf32>
    %5 = arith.mulf %2, %4 : vector<512x128xf32>
    %c0_5 = arith.constant 0 : index
    %c0_6 = arith.constant 0 : index
    %6 = vector.load %arg4[%c0_5, %c0_6] : memref<1x128xf32, #tpu.memory_space<vmem>>, vector<1x128xf32>
    %7 = vector.broadcast %6 : vector<1x128xf32> to vector<512x128xf32>
    %8 = arith.addf %5, %7 : vector<512x128xf32>
    %cst_7 = arith.constant 0.000000e+00 : f32
    %9 = vector.broadcast %cst_7 : f32 to vector<512x128xf32>
    %10 = arith.maximumf %8, %9 : vector<512x128xf32>
    %11 = arith.truncf %10 : vector<512x128xf32> to vector<512x128xbf16>
    %c0_8 = arith.constant 0 : index
    %c0_9 = arith.constant 0 : index
    %12 = vector.load %arg5[%c0_8, %c0_9] : memref<512x128xbf16, #tpu.memory_space<vmem>>, vector<512x128xbf16>
    tpu.vector_store %arg5[%c0_8, %c0_9], %11 {strides = array<i32>} : memref<512x128xbf16, #tpu.memory_space<vmem>>, vector<512x128xbf16>,
    return
  }
  func.func @transform_0(%arg0: i32) -> (i32, i32) {
    %c0_i32 = arith.constant 0 : i32
    %c0_i32_0 = arith.constant 0 : i32
    return %arg0, %c0_i32 : i32, i32
  }
  func.func @transform_1(%arg0: i32) -> (i32, i32) {
    %c0_i32 = arith.constant 0 : i32
    %c0_i32_0 = arith.constant 0 : i32
    %c0_i32_1 = arith.constant 0 : i32
    return %c0_i32, %c0_i32_0 : i32, i32
  }
  func.func @transform_2(%arg0: i32) -> (i32, i32) {
    %c0_i32 = arith.constant 0 : i32
    %c0_i32_0 = arith.constant 0 : i32
    %c0_i32_1 = arith.constant 0 : i32
    return %c0_i32, %c0_i32_0 : i32, i32
  }
  func.func @transform_3(%arg0: i32) -> (i32, i32) {
    %c0_i32 = arith.constant 0 : i32
    %c0_i32_0 = arith.constant 0 : i32
    %c0_i32_1 = arith.constant 0 : i32
    return %c0_i32, %c0_i32_0 : i32, i32
  }
  func.func @transform_4(%arg0: i32) -> (i32, i32) {
    %c0_i32 = arith.constant 0 : i32
    %c0_i32_0 = arith.constant 0 : i32
    return %arg0, %c0_i32 : i32, i32
  }
}

module attributes {stable_mosaic.version = 11 : i64} {
  func.func @_block_tail_kernel(%arg0: i32, %arg1: memref<512x1152xbf16, #tpu.memory_space<vmem>>, %arg2: memref<1152x128xbf16, #tpu.memory_space<vmem>>, %arg3: memref<1x128xf32, #tpu.memory_space<vmem>>, %arg4: memref<1x128xf32, #tpu.memory_space<vmem>>, %arg5: memref<512x128xbf16, #tpu.memory_space<vmem>>, %arg6: memref<128x128xbf16, #tpu.memory_space<vmem>>, %arg7: memref<1x128xf32, #tpu.memory_space<vmem>>, %arg8: memref<1x128xf32, #tpu.memory_space<vmem>>, %arg9: memref<512x128xbf16, #tpu.memory_space<vmem>>) attributes {dimension_semantics = [#tpu.dimension_semantics<parallel>], iteration_bounds = array<i64: 1>, scalar_prefetch = 0 : i64, scratch_operands = 0 : i64, tpu.core_type = #tpu.core_type<tc>, window_params = [{transform_indices = @transform_0, window_bounds = array<i64: 512, 1152>}, {pipeline_mode = #tpu.pipeline_mode<synchronous>, transform_indices = @transform_1, window_bounds = array<i64: 1152, 128>}, {pipeline_mode = #tpu.pipeline_mode<synchronous>, transform_indices = @transform_2, window_bounds = array<i64: 1, 128>}, {pipeline_mode = #tpu.pipeline_mode<synchronous>, transform_indices = @transform_3, window_bounds = array<i64: 1, 128>}, {transform_indices = @transform_4, window_bounds = array<i64: 512, 128>}, {pipeline_mode = #tpu.pipeline_mode<synchronous>, transform_indices = @transform_5, window_bounds = array<i64: 128, 128>}, {pipeline_mode = #tpu.pipeline_mode<synchronous>, transform_indices = @transform_6, window_bounds = array<i64: 1, 128>}, {pipeline_mode = #tpu.pipeline_mode<synchronous>, transform_indices = @transform_7, window_bounds = array<i64: 1, 128>}, {transform_indices = @transform_8, window_bounds = array<i64: 512, 128>}]} {
    %c0 = arith.constant 0 : index
    %c0_0 = arith.constant 0 : index
    %0 = vector.load %arg1[%c0, %c0_0] : memref<512x1152xbf16, #tpu.memory_space<vmem>>, vector<512x1152xbf16>
    %c0_1 = arith.constant 0 : index
    %c0_2 = arith.constant 0 : index
    %1 = vector.load %arg2[%c0_1, %c0_2] : memref<1152x128xbf16, #tpu.memory_space<vmem>>, vector<1152x128xbf16>
    %cst = arith.constant dense<0.000000e+00> : vector<512x128xf32>
    %2 = tpu.matmul %0, %1, %cst {dimension_numbers = #tpu.dot_dimension_numbers<[1], [0], [0], [1], [0, 0, 1, 1], [], []>} : vector<512x1152xbf16>, vector<1152x128xbf16>, vector<512x128xf32> -> vector<512x128xf32>
    %c0_3 = arith.constant 0 : index
    %c0_4 = arith.constant 0 : index
    %3 = vector.load %arg3[%c0_3, %c0_4] : memref<1x128xf32, #tpu.memory_space<vmem>>, vector<1x128xf32>
    %4 = vector.broadcast %3 : vector<1x128xf32> to vector<512x128xf32>
    %5 = arith.mulf %2, %4 : vector<512x128xf32>
    %c0_5 = arith.constant 0 : index
    %c0_6 = arith.constant 0 : index
    %6 = vector.load %arg4[%c0_5, %c0_6] : memref<1x128xf32, #tpu.memory_space<vmem>>, vector<1x128xf32>
    %7 = vector.broadcast %6 : vector<1x128xf32> to vector<512x128xf32>
    %8 = arith.addf %5, %7 : vector<512x128xf32>
    %c0_7 = arith.constant 0 : index
    %c0_8 = arith.constant 0 : index
    %9 = vector.load %arg5[%c0_7, %c0_8] : memref<512x128xbf16, #tpu.memory_space<vmem>>, vector<512x128xbf16>
    %c0_9 = arith.constant 0 : index
    %c0_10 = arith.constant 0 : index
    %10 = vector.load %arg6[%c0_9, %c0_10] : memref<128x128xbf16, #tpu.memory_space<vmem>>, vector<128x128xbf16>
    %cst_11 = arith.constant dense<0.000000e+00> : vector<512x128xf32>
    %11 = tpu.matmul %9, %10, %cst_11 {dimension_numbers = #tpu.dot_dimension_numbers<[1], [0], [0], [1], [0, 0, 1, 1], [], []>} : vector<512x128xbf16>, vector<128x128xbf16>, vector<512x128xf32> -> vector<512x128xf32>
    %c0_12 = arith.constant 0 : index
    %c0_13 = arith.constant 0 : index
    %12 = vector.load %arg7[%c0_12, %c0_13] : memref<1x128xf32, #tpu.memory_space<vmem>>, vector<1x128xf32>
    %13 = vector.broadcast %12 : vector<1x128xf32> to vector<512x128xf32>
    %14 = arith.mulf %11, %13 : vector<512x128xf32>
    %c0_14 = arith.constant 0 : index
    %c0_15 = arith.constant 0 : index
    %15 = vector.load %arg8[%c0_14, %c0_15] : memref<1x128xf32, #tpu.memory_space<vmem>>, vector<1x128xf32>
    %16 = vector.broadcast %15 : vector<1x128xf32> to vector<512x128xf32>
    %17 = arith.addf %14, %16 : vector<512x128xf32>
    %18 = arith.addf %8, %17 : vector<512x128xf32>
    %cst_16 = arith.constant 0.000000e+00 : f32
    %19 = vector.broadcast %cst_16 : f32 to vector<512x128xf32>
    %20 = arith.maximumf %18, %19 : vector<512x128xf32>
    %21 = arith.truncf %20 : vector<512x128xf32> to vector<512x128xbf16>
    %c0_17 = arith.constant 0 : index
    %c0_18 = arith.constant 0 : index
    %22 = vector.load %arg9[%c0_17, %c0_18] : memref<512x128xbf16, #tpu.memory_space<vmem>>, vector<512x128xbf16>
    tpu.vector_store %arg9[%c0_17, %c0_18], %21 {strides = array<i32>} : memref<512x128xbf16, #tpu.memory_space<vmem>>, vector<512x128xbf16>,
    return
  }
  func.func @transform_0(%arg0: i32) -> (i32, i32) {
    %c0_i32 = arith.constant 0 : i32
    %c0_i32_0 = arith.constant 0 : i32
    return %arg0, %c0_i32 : i32, i32
  }
  func.func @transform_1(%arg0: i32) -> (i32, i32) {
    %c0_i32 = arith.constant 0 : i32
    %c0_i32_0 = arith.constant 0 : i32
    %c0_i32_1 = arith.constant 0 : i32
    return %c0_i32, %c0_i32_0 : i32, i32
  }
  func.func @transform_2(%arg0: i32) -> (i32, i32) {
    %c0_i32 = arith.constant 0 : i32
    %c0_i32_0 = arith.constant 0 : i32
    %c0_i32_1 = arith.constant 0 : i32
    return %c0_i32, %c0_i32_0 : i32, i32
  }
  func.func @transform_3(%arg0: i32) -> (i32, i32) {
    %c0_i32 = arith.constant 0 : i32
    %c0_i32_0 = arith.constant 0 : i32
    %c0_i32_1 = arith.constant 0 : i32
    return %c0_i32, %c0_i32_0 : i32, i32
  }
  func.func @transform_4(%arg0: i32) -> (i32, i32) {
    %c0_i32 = arith.constant 0 : i32
    %c0_i32_0 = arith.constant 0 : i32
    return %arg0, %c0_i32 : i32, i32
  }
  func.func @transform_5(%arg0: i32) -> (i32, i32) {
    %c0_i32 = arith.constant 0 : i32
    %c0_i32_0 = arith.constant 0 : i32
    %c0_i32_1 = arith.constant 0 : i32
    return %c0_i32, %c0_i32_0 : i32, i32
  }
  func.func @transform_6(%arg0: i32) -> (i32, i32) {
    %c0_i32 = arith.constant 0 : i32
    %c0_i32_0 = arith.constant 0 : i32
    %c0_i32_1 = arith.constant 0 : i32
    return %c0_i32, %c0_i32_0 : i32, i32
  }
  func.func @transform_7(%arg0: i32) -> (i32, i32) {
    %c0_i32 = arith.constant 0 : i32
    %c0_i32_0 = arith.constant 0 : i32
    %c0_i32_1 = arith.constant 0 : i32
    return %c0_i32, %c0_i32_0 : i32, i32
  }
  func.func @transform_8(%arg0: i32) -> (i32, i32) {
    %c0_i32 = arith.constant 0 : i32
    %c0_i32_0 = arith.constant 0 : i32
    return %arg0, %c0_i32 : i32, i32
  }
}

module attributes {stable_mosaic.version = 11 : i64} {
  func.func @_matmul_bn_act_kernel(%arg0: i32, %arg1: memref<128x1152xbf16, #tpu.memory_space<vmem>>, %arg2: memref<1152x128xbf16, #tpu.memory_space<vmem>>, %arg3: memref<1x128xf32, #tpu.memory_space<vmem>>, %arg4: memref<1x128xf32, #tpu.memory_space<vmem>>, %arg5: memref<128x128xbf16, #tpu.memory_space<vmem>>) attributes {dimension_semantics = [#tpu.dimension_semantics<parallel>], iteration_bounds = array<i64: 1>, scalar_prefetch = 0 : i64, scratch_operands = 0 : i64, tpu.core_type = #tpu.core_type<tc>, window_params = [{transform_indices = @transform_0, window_bounds = array<i64: 128, 1152>}, {pipeline_mode = #tpu.pipeline_mode<synchronous>, transform_indices = @transform_1, window_bounds = array<i64: 1152, 128>}, {pipeline_mode = #tpu.pipeline_mode<synchronous>, transform_indices = @transform_2, window_bounds = array<i64: 1, 128>}, {pipeline_mode = #tpu.pipeline_mode<synchronous>, transform_indices = @transform_3, window_bounds = array<i64: 1, 128>}, {transform_indices = @transform_4, window_bounds = array<i64: 128, 128>}]} {
    %c0 = arith.constant 0 : index
    %c0_0 = arith.constant 0 : index
    %0 = vector.load %arg1[%c0, %c0_0] : memref<128x1152xbf16, #tpu.memory_space<vmem>>, vector<128x1152xbf16>
    %c0_1 = arith.constant 0 : index
    %c0_2 = arith.constant 0 : index
    %1 = vector.load %arg2[%c0_1, %c0_2] : memref<1152x128xbf16, #tpu.memory_space<vmem>>, vector<1152x128xbf16>
    %cst = arith.constant dense<0.000000e+00> : vector<128x128xf32>
    %2 = tpu.matmul %0, %1, %cst {dimension_numbers = #tpu.dot_dimension_numbers<[1], [0], [0], [1], [0, 0, 1, 1], [], []>} : vector<128x1152xbf16>, vector<1152x128xbf16>, vector<128x128xf32> -> vector<128x128xf32>
    %c0_3 = arith.constant 0 : index
    %c0_4 = arith.constant 0 : index
    %3 = vector.load %arg3[%c0_3, %c0_4] : memref<1x128xf32, #tpu.memory_space<vmem>>, vector<1x128xf32>
    %4 = vector.broadcast %3 : vector<1x128xf32> to vector<128x128xf32>
    %5 = arith.mulf %2, %4 : vector<128x128xf32>
    %c0_5 = arith.constant 0 : index
    %c0_6 = arith.constant 0 : index
    %6 = vector.load %arg4[%c0_5, %c0_6] : memref<1x128xf32, #tpu.memory_space<vmem>>, vector<1x128xf32>
    %7 = vector.broadcast %6 : vector<1x128xf32> to vector<128x128xf32>
    %8 = arith.addf %5, %7 : vector<128x128xf32>
    %cst_7 = arith.constant 0.000000e+00 : f32
    %9 = vector.broadcast %cst_7 : f32 to vector<128x128xf32>
    %10 = arith.maximumf %8, %9 : vector<128x128xf32>
    %11 = arith.truncf %10 : vector<128x128xf32> to vector<128x128xbf16>
    %c0_8 = arith.constant 0 : index
    %c0_9 = arith.constant 0 : index
    %12 = vector.load %arg5[%c0_8, %c0_9] : memref<128x128xbf16, #tpu.memory_space<vmem>>, vector<128x128xbf16>
    tpu.vector_store %arg5[%c0_8, %c0_9], %11 {strides = array<i32>} : memref<128x128xbf16, #tpu.memory_space<vmem>>, vector<128x128xbf16>,
    return
  }
  func.func @transform_0(%arg0: i32) -> (i32, i32) {
    %c0_i32 = arith.constant 0 : i32
    %c0_i32_0 = arith.constant 0 : i32
    return %arg0, %c0_i32 : i32, i32
  }
  func.func @transform_1(%arg0: i32) -> (i32, i32) {
    %c0_i32 = arith.constant 0 : i32
    %c0_i32_0 = arith.constant 0 : i32
    %c0_i32_1 = arith.constant 0 : i32
    return %c0_i32, %c0_i32_0 : i32, i32
  }
  func.func @transform_2(%arg0: i32) -> (i32, i32) {
    %c0_i32 = arith.constant 0 : i32
    %c0_i32_0 = arith.constant 0 : i32
    %c0_i32_1 = arith.constant 0 : i32
    return %c0_i32, %c0_i32_0 : i32, i32
  }
  func.func @transform_3(%arg0: i32) -> (i32, i32) {
    %c0_i32 = arith.constant 0 : i32
    %c0_i32_0 = arith.constant 0 : i32
    %c0_i32_1 = arith.constant 0 : i32
    return %c0_i32, %c0_i32_0 : i32, i32
  }
  func.func @transform_4(%arg0: i32) -> (i32, i32) {
    %c0_i32 = arith.constant 0 : i32
    %c0_i32_0 = arith.constant 0 : i32
    return %arg0, %c0_i32 : i32, i32
  }
}

module attributes {stable_mosaic.version = 11 : i64} {
  func.func @_block_tail_kernel(%arg0: i32, %arg1: memref<128x1152xbf16, #tpu.memory_space<vmem>>, %arg2: memref<1152x128xbf16, #tpu.memory_space<vmem>>, %arg3: memref<1x128xf32, #tpu.memory_space<vmem>>, %arg4: memref<1x128xf32, #tpu.memory_space<vmem>>, %arg5: memref<128x128xbf16, #tpu.memory_space<vmem>>, %arg6: memref<128x128xbf16, #tpu.memory_space<vmem>>, %arg7: memref<1x128xf32, #tpu.memory_space<vmem>>, %arg8: memref<1x128xf32, #tpu.memory_space<vmem>>, %arg9: memref<128x128xbf16, #tpu.memory_space<vmem>>) attributes {dimension_semantics = [#tpu.dimension_semantics<parallel>], iteration_bounds = array<i64: 1>, scalar_prefetch = 0 : i64, scratch_operands = 0 : i64, tpu.core_type = #tpu.core_type<tc>, window_params = [{transform_indices = @transform_0, window_bounds = array<i64: 128, 1152>}, {pipeline_mode = #tpu.pipeline_mode<synchronous>, transform_indices = @transform_1, window_bounds = array<i64: 1152, 128>}, {pipeline_mode = #tpu.pipeline_mode<synchronous>, transform_indices = @transform_2, window_bounds = array<i64: 1, 128>}, {pipeline_mode = #tpu.pipeline_mode<synchronous>, transform_indices = @transform_3, window_bounds = array<i64: 1, 128>}, {transform_indices = @transform_4, window_bounds = array<i64: 128, 128>}, {pipeline_mode = #tpu.pipeline_mode<synchronous>, transform_indices = @transform_5, window_bounds = array<i64: 128, 128>}, {pipeline_mode = #tpu.pipeline_mode<synchronous>, transform_indices = @transform_6, window_bounds = array<i64: 1, 128>}, {pipeline_mode = #tpu.pipeline_mode<synchronous>, transform_indices = @transform_7, window_bounds = array<i64: 1, 128>}, {transform_indices = @transform_8, window_bounds = array<i64: 128, 128>}]} {
    %c0 = arith.constant 0 : index
    %c0_0 = arith.constant 0 : index
    %0 = vector.load %arg1[%c0, %c0_0] : memref<128x1152xbf16, #tpu.memory_space<vmem>>, vector<128x1152xbf16>
    %c0_1 = arith.constant 0 : index
    %c0_2 = arith.constant 0 : index
    %1 = vector.load %arg2[%c0_1, %c0_2] : memref<1152x128xbf16, #tpu.memory_space<vmem>>, vector<1152x128xbf16>
    %cst = arith.constant dense<0.000000e+00> : vector<128x128xf32>
    %2 = tpu.matmul %0, %1, %cst {dimension_numbers = #tpu.dot_dimension_numbers<[1], [0], [0], [1], [0, 0, 1, 1], [], []>} : vector<128x1152xbf16>, vector<1152x128xbf16>, vector<128x128xf32> -> vector<128x128xf32>
    %c0_3 = arith.constant 0 : index
    %c0_4 = arith.constant 0 : index
    %3 = vector.load %arg3[%c0_3, %c0_4] : memref<1x128xf32, #tpu.memory_space<vmem>>, vector<1x128xf32>
    %4 = vector.broadcast %3 : vector<1x128xf32> to vector<128x128xf32>
    %5 = arith.mulf %2, %4 : vector<128x128xf32>
    %c0_5 = arith.constant 0 : index
    %c0_6 = arith.constant 0 : index
    %6 = vector.load %arg4[%c0_5, %c0_6] : memref<1x128xf32, #tpu.memory_space<vmem>>, vector<1x128xf32>
    %7 = vector.broadcast %6 : vector<1x128xf32> to vector<128x128xf32>
    %8 = arith.addf %5, %7 : vector<128x128xf32>
    %c0_7 = arith.constant 0 : index
    %c0_8 = arith.constant 0 : index
    %9 = vector.load %arg5[%c0_7, %c0_8] : memref<128x128xbf16, #tpu.memory_space<vmem>>, vector<128x128xbf16>
    %c0_9 = arith.constant 0 : index
    %c0_10 = arith.constant 0 : index
    %10 = vector.load %arg6[%c0_9, %c0_10] : memref<128x128xbf16, #tpu.memory_space<vmem>>, vector<128x128xbf16>
    %cst_11 = arith.constant dense<0.000000e+00> : vector<128x128xf32>
    %11 = tpu.matmul %9, %10, %cst_11 {dimension_numbers = #tpu.dot_dimension_numbers<[1], [0], [0], [1], [0, 0, 1, 1], [], []>} : vector<128x128xbf16>, vector<128x128xbf16>, vector<128x128xf32> -> vector<128x128xf32>
    %c0_12 = arith.constant 0 : index
    %c0_13 = arith.constant 0 : index
    %12 = vector.load %arg7[%c0_12, %c0_13] : memref<1x128xf32, #tpu.memory_space<vmem>>, vector<1x128xf32>
    %13 = vector.broadcast %12 : vector<1x128xf32> to vector<128x128xf32>
    %14 = arith.mulf %11, %13 : vector<128x128xf32>
    %c0_14 = arith.constant 0 : index
    %c0_15 = arith.constant 0 : index
    %15 = vector.load %arg8[%c0_14, %c0_15] : memref<1x128xf32, #tpu.memory_space<vmem>>, vector<1x128xf32>
    %16 = vector.broadcast %15 : vector<1x128xf32> to vector<128x128xf32>
    %17 = arith.addf %14, %16 : vector<128x128xf32>
    %18 = arith.addf %8, %17 : vector<128x128xf32>
    %cst_16 = arith.constant 0.000000e+00 : f32
    %19 = vector.broadcast %cst_16 : f32 to vector<128x128xf32>
    %20 = arith.maximumf %18, %19 : vector<128x128xf32>
    %21 = arith.truncf %20 : vector<128x128xf32> to vector<128x128xbf16>
    %c0_17 = arith.constant 0 : index
    %c0_18 = arith.constant 0 : index
    %22 = vector.load %arg9[%c0_17, %c0_18] : memref<128x128xbf16, #tpu.memory_space<vmem>>, vector<128x128xbf16>
    tpu.vector_store %arg9[%c0_17, %c0_18], %21 {strides = array<i32>} : memref<128x128xbf16, #tpu.memory_space<vmem>>, vector<128x128xbf16>,
    return
  }
  func.func @transform_0(%arg0: i32) -> (i32, i32) {
    %c0_i32 = arith.constant 0 : i32
    %c0_i32_0 = arith.constant 0 : i32
    return %arg0, %c0_i32 : i32, i32
  }
  func.func @transform_1(%arg0: i32) -> (i32, i32) {
    %c0_i32 = arith.constant 0 : i32
    %c0_i32_0 = arith.constant 0 : i32
    %c0_i32_1 = arith.constant 0 : i32
    return %c0_i32, %c0_i32_0 : i32, i32
  }
  func.func @transform_2(%arg0: i32) -> (i32, i32) {
    %c0_i32 = arith.constant 0 : i32
    %c0_i32_0 = arith.constant 0 : i32
    %c0_i32_1 = arith.constant 0 : i32
    return %c0_i32, %c0_i32_0 : i32, i32
  }
  func.func @transform_3(%arg0: i32) -> (i32, i32) {
    %c0_i32 = arith.constant 0 : i32
    %c0_i32_0 = arith.constant 0 : i32
    %c0_i32_1 = arith.constant 0 : i32
    return %c0_i32, %c0_i32_0 : i32, i32
  }
  func.func @transform_4(%arg0: i32) -> (i32, i32) {
    %c0_i32 = arith.constant 0 : i32
    %c0_i32_0 = arith.constant 0 : i32
    return %arg0, %c0_i32 : i32, i32
  }
  func.func @transform_5(%arg0: i32) -> (i32, i32) {
    %c0_i32 = arith.constant 0 : i32
    %c0_i32_0 = arith.constant 0 : i32
    %c0_i32_1 = arith.constant 0 : i32
    return %c0_i32, %c0_i32_0 : i32, i32
  }
  func.func @transform_6(%arg0: i32) -> (i32, i32) {
    %c0_i32 = arith.constant 0 : i32
    %c0_i32_0 = arith.constant 0 : i32
    %c0_i32_1 = arith.constant 0 : i32
    return %c0_i32, %c0_i32_0 : i32, i32
  }
  func.func @transform_7(%arg0: i32) -> (i32, i32) {
    %c0_i32 = arith.constant 0 : i32
    %c0_i32_0 = arith.constant 0 : i32
    %c0_i32_1 = arith.constant 0 : i32
    return %c0_i32, %c0_i32_0 : i32, i32
  }
  func.func @transform_8(%arg0: i32) -> (i32, i32) {
    %c0_i32 = arith.constant 0 : i32
    %c0_i32_0 = arith.constant 0 : i32
    return %arg0, %c0_i32 : i32, i32
  }
}

module attributes {stable_mosaic.version = 11 : i64} {
  func.func @_matmul_bn_act_kernel(%arg0: i32, %arg1: memref<32x1152xbf16, #tpu.memory_space<vmem>>, %arg2: memref<1152x128xbf16, #tpu.memory_space<vmem>>, %arg3: memref<1x128xf32, #tpu.memory_space<vmem>>, %arg4: memref<1x128xf32, #tpu.memory_space<vmem>>, %arg5: memref<32x128xbf16, #tpu.memory_space<vmem>>) attributes {dimension_semantics = [#tpu.dimension_semantics<parallel>], iteration_bounds = array<i64: 1>, scalar_prefetch = 0 : i64, scratch_operands = 0 : i64, tpu.core_type = #tpu.core_type<tc>, window_params = [{transform_indices = @transform_0, window_bounds = array<i64: 32, 1152>}, {pipeline_mode = #tpu.pipeline_mode<synchronous>, transform_indices = @transform_1, window_bounds = array<i64: 1152, 128>}, {pipeline_mode = #tpu.pipeline_mode<synchronous>, transform_indices = @transform_2, window_bounds = array<i64: 1, 128>}, {pipeline_mode = #tpu.pipeline_mode<synchronous>, transform_indices = @transform_3, window_bounds = array<i64: 1, 128>}, {transform_indices = @transform_4, window_bounds = array<i64: 32, 128>}]} {
    %c0 = arith.constant 0 : index
    %c0_0 = arith.constant 0 : index
    %0 = vector.load %arg1[%c0, %c0_0] : memref<32x1152xbf16, #tpu.memory_space<vmem>>, vector<32x1152xbf16>
    %c0_1 = arith.constant 0 : index
    %c0_2 = arith.constant 0 : index
    %1 = vector.load %arg2[%c0_1, %c0_2] : memref<1152x128xbf16, #tpu.memory_space<vmem>>, vector<1152x128xbf16>
    %cst = arith.constant dense<0.000000e+00> : vector<32x128xf32>
    %2 = tpu.matmul %0, %1, %cst {dimension_numbers = #tpu.dot_dimension_numbers<[1], [0], [0], [1], [0, 0, 1, 1], [], []>} : vector<32x1152xbf16>, vector<1152x128xbf16>, vector<32x128xf32> -> vector<32x128xf32>
    %c0_3 = arith.constant 0 : index
    %c0_4 = arith.constant 0 : index
    %3 = vector.load %arg3[%c0_3, %c0_4] : memref<1x128xf32, #tpu.memory_space<vmem>>, vector<1x128xf32>
    %4 = vector.broadcast %3 : vector<1x128xf32> to vector<32x128xf32>
    %5 = arith.mulf %2, %4 : vector<32x128xf32>
    %c0_5 = arith.constant 0 : index
    %c0_6 = arith.constant 0 : index
    %6 = vector.load %arg4[%c0_5, %c0_6] : memref<1x128xf32, #tpu.memory_space<vmem>>, vector<1x128xf32>
    %7 = vector.broadcast %6 : vector<1x128xf32> to vector<32x128xf32>
    %8 = arith.addf %5, %7 : vector<32x128xf32>
    %cst_7 = arith.constant 0.000000e+00 : f32
    %9 = vector.broadcast %cst_7 : f32 to vector<32x128xf32>
    %10 = arith.maximumf %8, %9 : vector<32x128xf32>
    %11 = arith.truncf %10 : vector<32x128xf32> to vector<32x128xbf16>
    %c0_8 = arith.constant 0 : index
    %c0_9 = arith.constant 0 : index
    %12 = vector.load %arg5[%c0_8, %c0_9] : memref<32x128xbf16, #tpu.memory_space<vmem>>, vector<32x128xbf16>
    tpu.vector_store %arg5[%c0_8, %c0_9], %11 {strides = array<i32>} : memref<32x128xbf16, #tpu.memory_space<vmem>>, vector<32x128xbf16>,
    return
  }
  func.func @transform_0(%arg0: i32) -> (i32, i32) {
    %c0_i32 = arith.constant 0 : i32
    %c0_i32_0 = arith.constant 0 : i32
    return %arg0, %c0_i32 : i32, i32
  }
  func.func @transform_1(%arg0: i32) -> (i32, i32) {
    %c0_i32 = arith.constant 0 : i32
    %c0_i32_0 = arith.constant 0 : i32
    %c0_i32_1 = arith.constant 0 : i32
    return %c0_i32, %c0_i32_0 : i32, i32
  }
  func.func @transform_2(%arg0: i32) -> (i32, i32) {
    %c0_i32 = arith.constant 0 : i32
    %c0_i32_0 = arith.constant 0 : i32
    %c0_i32_1 = arith.constant 0 : i32
    return %c0_i32, %c0_i32_0 : i32, i32
  }
  func.func @transform_3(%arg0: i32) -> (i32, i32) {
    %c0_i32 = arith.constant 0 : i32
    %c0_i32_0 = arith.constant 0 : i32
    %c0_i32_1 = arith.constant 0 : i32
    return %c0_i32, %c0_i32_0 : i32, i32
  }
  func.func @transform_4(%arg0: i32) -> (i32, i32) {
    %c0_i32 = arith.constant 0 : i32
    %c0_i32_0 = arith.constant 0 : i32
    return %arg0, %c0_i32 : i32, i32
  }
}

module attributes {stable_mosaic.version = 11 : i64} {
  func.func @_pool_fc_kernel(%arg0: memref<2x16x128xbf16, #tpu.memory_space<vmem>>, %arg1: memref<128x128xbf16, #tpu.memory_space<vmem>>, %arg2: memref<2x128xf32, #tpu.memory_space<vmem>>) attributes {dimension_semantics = [], scalar_prefetch = 0 : i64, scratch_operands = 0 : i64, tpu.core_type = #tpu.core_type<tc>} {
    %c0 = arith.constant 0 : index
    %c0_0 = arith.constant 0 : index
    %c0_1 = arith.constant 0 : index
    %0 = vector.load %arg0[%c0, %c0_0, %c0_1] : memref<2x16x128xbf16, #tpu.memory_space<vmem>>, vector<2x16x128xbf16>
    %1 = arith.extf %0 : vector<2x16x128xbf16> to vector<2x16x128xf32>
    %cst = arith.constant dense<0.000000e+00> : vector<2x128xf32>
    %2 = vector.multi_reduction <add>, %1, %cst [1] : vector<2x16x128xf32> to vector<2x128xf32>
    %cst_2 = arith.constant 6.250000e-02 : f32
    %3 = vector.broadcast %cst_2 : f32 to vector<2x128xf32>
    %4 = arith.mulf %2, %3 : vector<2x128xf32>
    %5 = arith.truncf %4 : vector<2x128xf32> to vector<2x128xbf16>
    %c0_3 = arith.constant 0 : index
    %c0_4 = arith.constant 0 : index
    %6 = vector.load %arg1[%c0_3, %c0_4] : memref<128x128xbf16, #tpu.memory_space<vmem>>, vector<128x128xbf16>
    %cst_5 = arith.constant dense<0.000000e+00> : vector<2x128xf32>
    %7 = tpu.matmul %5, %6, %cst_5 {dimension_numbers = #tpu.dot_dimension_numbers<[1], [0], [0], [1], [0, 0, 1, 1], [], []>} : vector<2x128xbf16>, vector<128x128xbf16>, vector<2x128xf32> -> vector<2x128xf32>
    %c0_6 = arith.constant 0 : index
    %c0_7 = arith.constant 0 : index
    %8 = vector.load %arg2[%c0_6, %c0_7] : memref<2x128xf32, #tpu.memory_space<vmem>>, vector<2x128xf32>
    tpu.vector_store %arg2[%c0_6, %c0_7], %7 {strides = array<i32>} : memref<2x128xf32, #tpu.memory_space<vmem>>, vector<2x128xf32>,
    return
  }
}

module attributes {stable_mosaic.version = 11 : i64} {
  func.func @_block_tail_kernel(%arg0: i32, %arg1: memref<32x1152xbf16, #tpu.memory_space<vmem>>, %arg2: memref<1152x128xbf16, #tpu.memory_space<vmem>>, %arg3: memref<1x128xf32, #tpu.memory_space<vmem>>, %arg4: memref<1x128xf32, #tpu.memory_space<vmem>>, %arg5: memref<32x128xbf16, #tpu.memory_space<vmem>>, %arg6: memref<128x128xbf16, #tpu.memory_space<vmem>>, %arg7: memref<1x128xf32, #tpu.memory_space<vmem>>, %arg8: memref<1x128xf32, #tpu.memory_space<vmem>>, %arg9: memref<32x128xbf16, #tpu.memory_space<vmem>>) attributes {dimension_semantics = [#tpu.dimension_semantics<parallel>], iteration_bounds = array<i64: 1>, scalar_prefetch = 0 : i64, scratch_operands = 0 : i64, tpu.core_type = #tpu.core_type<tc>, window_params = [{transform_indices = @transform_0, window_bounds = array<i64: 32, 1152>}, {pipeline_mode = #tpu.pipeline_mode<synchronous>, transform_indices = @transform_1, window_bounds = array<i64: 1152, 128>}, {pipeline_mode = #tpu.pipeline_mode<synchronous>, transform_indices = @transform_2, window_bounds = array<i64: 1, 128>}, {pipeline_mode = #tpu.pipeline_mode<synchronous>, transform_indices = @transform_3, window_bounds = array<i64: 1, 128>}, {transform_indices = @transform_4, window_bounds = array<i64: 32, 128>}, {pipeline_mode = #tpu.pipeline_mode<synchronous>, transform_indices = @transform_5, window_bounds = array<i64: 128, 128>}, {pipeline_mode = #tpu.pipeline_mode<synchronous>, transform_indices = @transform_6, window_bounds = array<i64: 1, 128>}, {pipeline_mode = #tpu.pipeline_mode<synchronous>, transform_indices = @transform_7, window_bounds = array<i64: 1, 128>}, {transform_indices = @transform_8, window_bounds = array<i64: 32, 128>}]} {
    %c0 = arith.constant 0 : index
    %c0_0 = arith.constant 0 : index
    %0 = vector.load %arg1[%c0, %c0_0] : memref<32x1152xbf16, #tpu.memory_space<vmem>>, vector<32x1152xbf16>
    %c0_1 = arith.constant 0 : index
    %c0_2 = arith.constant 0 : index
    %1 = vector.load %arg2[%c0_1, %c0_2] : memref<1152x128xbf16, #tpu.memory_space<vmem>>, vector<1152x128xbf16>
    %cst = arith.constant dense<0.000000e+00> : vector<32x128xf32>
    %2 = tpu.matmul %0, %1, %cst {dimension_numbers = #tpu.dot_dimension_numbers<[1], [0], [0], [1], [0, 0, 1, 1], [], []>} : vector<32x1152xbf16>, vector<1152x128xbf16>, vector<32x128xf32> -> vector<32x128xf32>
    %c0_3 = arith.constant 0 : index
    %c0_4 = arith.constant 0 : index
    %3 = vector.load %arg3[%c0_3, %c0_4] : memref<1x128xf32, #tpu.memory_space<vmem>>, vector<1x128xf32>
    %4 = vector.broadcast %3 : vector<1x128xf32> to vector<32x128xf32>
    %5 = arith.mulf %2, %4 : vector<32x128xf32>
    %c0_5 = arith.constant 0 : index
    %c0_6 = arith.constant 0 : index
    %6 = vector.load %arg4[%c0_5, %c0_6] : memref<1x128xf32, #tpu.memory_space<vmem>>, vector<1x128xf32>
    %7 = vector.broadcast %6 : vector<1x128xf32> to vector<32x128xf32>
    %8 = arith.addf %5, %7 : vector<32x128xf32>
    %c0_7 = arith.constant 0 : index
    %c0_8 = arith.constant 0 : index
    %9 = vector.load %arg5[%c0_7, %c0_8] : memref<32x128xbf16, #tpu.memory_space<vmem>>, vector<32x128xbf16>
    %c0_9 = arith.constant 0 : index
    %c0_10 = arith.constant 0 : index
    %10 = vector.load %arg6[%c0_9, %c0_10] : memref<128x128xbf16, #tpu.memory_space<vmem>>, vector<128x128xbf16>
    %cst_11 = arith.constant dense<0.000000e+00> : vector<32x128xf32>
    %11 = tpu.matmul %9, %10, %cst_11 {dimension_numbers = #tpu.dot_dimension_numbers<[1], [0], [0], [1], [0, 0, 1, 1], [], []>} : vector<32x128xbf16>, vector<128x128xbf16>, vector<32x128xf32> -> vector<32x128xf32>
    %c0_12 = arith.constant 0 : index
    %c0_13 = arith.constant 0 : index
    %12 = vector.load %arg7[%c0_12, %c0_13] : memref<1x128xf32, #tpu.memory_space<vmem>>, vector<1x128xf32>
    %13 = vector.broadcast %12 : vector<1x128xf32> to vector<32x128xf32>
    %14 = arith.mulf %11, %13 : vector<32x128xf32>
    %c0_14 = arith.constant 0 : index
    %c0_15 = arith.constant 0 : index
    %15 = vector.load %arg8[%c0_14, %c0_15] : memref<1x128xf32, #tpu.memory_space<vmem>>, vector<1x128xf32>
    %16 = vector.broadcast %15 : vector<1x128xf32> to vector<32x128xf32>
    %17 = arith.addf %14, %16 : vector<32x128xf32>
    %18 = arith.addf %8, %17 : vector<32x128xf32>
    %cst_16 = arith.constant 0.000000e+00 : f32
    %19 = vector.broadcast %cst_16 : f32 to vector<32x128xf32>
    %20 = arith.maximumf %18, %19 : vector<32x128xf32>
    %21 = arith.truncf %20 : vector<32x128xf32> to vector<32x128xbf16>
    %c0_17 = arith.constant 0 : index
    %c0_18 = arith.constant 0 : index
    %22 = vector.load %arg9[%c0_17, %c0_18] : memref<32x128xbf16, #tpu.memory_space<vmem>>, vector<32x128xbf16>
    tpu.vector_store %arg9[%c0_17, %c0_18], %21 {strides = array<i32>} : memref<32x128xbf16, #tpu.memory_space<vmem>>, vector<32x128xbf16>,
    return
  }
  func.func @transform_0(%arg0: i32) -> (i32, i32) {
    %c0_i32 = arith.constant 0 : i32
    %c0_i32_0 = arith.constant 0 : i32
    return %arg0, %c0_i32 : i32, i32
  }
  func.func @transform_1(%arg0: i32) -> (i32, i32) {
    %c0_i32 = arith.constant 0 : i32
    %c0_i32_0 = arith.constant 0 : i32
    %c0_i32_1 = arith.constant 0 : i32
    return %c0_i32, %c0_i32_0 : i32, i32
  }
  func.func @transform_2(%arg0: i32) -> (i32, i32) {
    %c0_i32 = arith.constant 0 : i32
    %c0_i32_0 = arith.constant 0 : i32
    %c0_i32_1 = arith.constant 0 : i32
    return %c0_i32, %c0_i32_0 : i32, i32
  }
  func.func @transform_3(%arg0: i32) -> (i32, i32) {
    %c0_i32 = arith.constant 0 : i32
    %c0_i32_0 = arith.constant 0 : i32
    %c0_i32_1 = arith.constant 0 : i32
    return %c0_i32, %c0_i32_0 : i32, i32
  }
  func.func @transform_4(%arg0: i32) -> (i32, i32) {
    %c0_i32 = arith.constant 0 : i32
    %c0_i32_0 = arith.constant 0 : i32
    return %arg0, %c0_i32 : i32, i32
  }
  func.func @transform_5(%arg0: i32) -> (i32, i32) {
    %c0_i32 = arith.constant 0 : i32
    %c0_i32_0 = arith.constant 0 : i32
    %c0_i32_1 = arith.constant 0 : i32
    return %c0_i32, %c0_i32_0 : i32, i32
  }
  func.func @transform_6(%arg0: i32) -> (i32, i32) {
    %c0_i32 = arith.constant 0 : i32
    %c0_i32_0 = arith.constant 0 : i32
    %c0_i32_1 = arith.constant 0 : i32
    return %c0_i32, %c0_i32_0 : i32, i32
  }
  func.func @transform_7(%arg0: i32) -> (i32, i32) {
    %c0_i32 = arith.constant 0 : i32
    %c0_i32_0 = arith.constant 0 : i32
    %c0_i32_1 = arith.constant 0 : i32
    return %c0_i32, %c0_i32_0 : i32, i32
  }
  func.func @transform_8(%arg0: i32) -> (i32, i32) {
    %c0_i32 = arith.constant 0 : i32
    %c0_i32_0 = arith.constant 0 : i32
    return %arg0, %c0_i32 : i32, i32
  }
}

</mosaic_0001>

<bundles_post_ra>
// kernel: _lambda_.20
= control target key start
LH: loop header
LB: loop body
LE: loop exit
PB: predicated region body
PF: predicated region fallthrough
CT: control target
= control target key end

     0   :  { %9 = vsyncpa [#allocation3], 0  ;;  %s2252_s0 = inlined_call_operand.vmem [shape: bf16[512,27], index: 0, kind: input, shape index: {}]   ;;  %s2253_s1 = inlined_call_operand.hbm [shape: bf16[27,128], index: 1, kind: input, shape index: {}]   ;;  %s2254_s2 = inlined_call_operand.hbm [shape: f32[1,128], index: 2, kind: input, shape index: {}]   ;;  %s2255_s3 = inlined_call_operand.hbm [shape: f32[1,128], index: 3, kind: input, shape index: {}]   ;;  %s2256_s4 = inlined_call_operand.vmem [shape: bf16[512,128], index: 4, kind: output, shape index: {}]  }
   0x1   :  { %10 = vsyncpa [#allocation5], 0  ;;  %s1822_s15 = smov [#allocation4]   ;;  %s1823_s17 = smov [#allocation2]  }
   0x2   :  { %s31_s16 = sshll.u32 %s1822_s15, 4  ;;  %s18_s18 = sshll.u32 %s1823_s17, 4  ;;  %s32_s16 = int_to_ptr.vmem [resolvable:$true] %s31_s16  ;;  %s1853_s18 = int_to_ptr.vmem [resolvable:$true] %s18_s18 }
   0x3   :  { %s1752_s21 = scalar_lea.hbm %s2254_s2, 16 }
   0x4   :  { %p1753_p0 = scmp.ne.s32.totalorder %s2254_s2, %s1752_s21  ;;  %p1756_p1 = scmp.lt.u32.totalorder %s1752_s21, %s2254_s2 }
   0x6   :  { %p1758_p2 = pnand %p1756_p1, %p1753_p0 }
   0x8   :  { %1761 = shalt.err (!%p1758_p2)
}
   0x9   :  { %s1762_s26 = scalar_lea.vmem %s32_s16, 16  ;;  %s1766_s27 = scalar_lea.vmem %s32_s16, 32 }
   0xa   :  { %p1763_p3 = scmp.ne.s32.totalorder %s32_s16, %s1762_s26  ;;  %p1767_p4 = scmp.lt.s32.totalorder %s32_s16, %s32_s16 }
   0xb   :  { %p1768_p5 = scmp.lt.s32.totalorder %s1766_s27, %s1762_s26 }
   0xd   :  { %p1769_p6 = por %p1768_p5, %p1767_p4 }
   0xf   :  { %p1770_p7 = pnand %p1769_p6, %p1763_p3 }
  0x11   :  { %1773 = shalt.err (!%p1770_p7)
}
  0x12   :  { %34 = dma.hbm_to_vmem [thread:$0]  %s2254_s2, 16, %s32_s16, [#allocation5]  }
  0x13   :  { %s1774_s6 = scalar_lea.hbm %s2253_s1, 256 }
  0x14   :  { %p1775_p8 = scmp.ne.s32.totalorder %s2253_s1, %s1774_s6  ;;  %p1778_p9 = scmp.lt.u32.totalorder %s1774_s6, %s2253_s1 }
  0x16   :  { %p1780_p10 = pnand %p1778_p9, %p1775_p8 }
  0x18   :  { %1783 = shalt.err (!%p1780_p10)
}
  0x19   :  { %s1784_s11 = scalar_lea.vmem %s1853_s18, 256  ;;  %p1789_p12 = scmp.lt.s32.totalorder %s1853_s18, %s1853_s18 }
  0x1a   :  { %p1785_p11 = scmp.ne.s32.totalorder %s1853_s18, %s1784_s11  ;;  %p1790_p13 = scmp.lt.s32.totalorder %s1784_s11, %s1784_s11 }
  0x1c   :  { %p1791_p0 = por %p1790_p13, %p1789_p12 }
  0x1e   :  { %p1792_p1 = pnand %p1791_p0, %p1785_p11 }
  0x20   :  { %1795 = shalt.err (!%p1792_p1)
}
  0x21   :  { %s1824_s2 = smov 64   ;;  %s1825_s12 = smov 4  }
  0x22   :  { %24 = dma.hbm_to_vmem [thread:$0]  %s2253_s1, 256, %s1853_s18, [#allocation3], %s1824_s2, %s1824_s2, %s1825_s12  }
  0x23   :  { %s1826_s15 = smov [#allocation6]   ;;  %s1796_s20 = scalar_lea.hbm %s2255_s3, 16 }
  0x24   :  { %s41_s16 = sshll.u32 %s1826_s15, 4  ;;  %p1797_p2 = scmp.ne.s32.totalorder %s2255_s3, %s1796_s20  ;;  %s42_s16 = int_to_ptr.vmem [resolvable:$true] %s41_s16 }
  0x25   :  { %p1800_p3 = scmp.lt.u32.totalorder %s1796_s20, %s2255_s3 }
  0x27   :  { %p1802_p4 = pnand %p1800_p3, %p1797_p2 }
  0x29   :  { %1805 = shalt.err (!%p1802_p4)
}
  0x2a   :  { %s1806_s25 = scalar_lea.vmem %s42_s16, 16  ;;  %s1810_s1 = scalar_lea.vmem %s42_s16, 32 }
  0x2b   :  { %p1807_p5 = scmp.ne.s32.totalorder %s42_s16, %s1806_s25  ;;  %p1811_p6 = scmp.lt.s32.totalorder %s42_s16, %s42_s16 }
  0x2c   :  { %p1812_p7 = scmp.lt.s32.totalorder %s1810_s1, %s1806_s25 }
  0x2e   :  { %p1813_p8 = por %p1812_p7, %p1811_p6 }
  0x30   :  { %p1814_p9 = pnand %p1813_p8, %p1807_p5 }
  0x32   :  { %1817 = shalt.err (!%p1814_p9)
}
  0x33   :  { %44 = dma.hbm_to_vmem [thread:$0]  %s2255_s3, 16, %s42_s16, [#allocation5]  }
  0x34   :  { %1818 = dma.done.wait [#allocation3], 256  }
  0x35   :  { %1819 = vsyncadd [#allocation3], 4294967040 }
  0x36   :  { %1820 = dma.done.wait [#allocation5], 32  }
  0x37   :  { %1821 = vsyncadd [#allocation5], 4294967264  ;;  %vm391_vm0 = vcmask 1044480   ;;  %vm392_vm1 = vcmask 1045504   ;;  %v1827_v0 = vmov 65535   ;;  %vm294_vm2 = vcmask 220160  }
  0x38   :  { %v393_v1 = vsel %vm391_vm0, 4294967295, %v1827_v0  ;;  %v1718_v2 = vld [vmem:[#allocation2] sm:$0xff]   ;;  %v1719_v4 = vld [vmem:[#allocation2 + $0x8] sm:$0x3f]   ;;  %v1724_v10 = vld [vmem:[%s2252_s0 + $0x10] sm:$0xff]  }
  0x39   :  { %v394_v3 = vsel %vm392_vm1, %v393_v1, 0  ;;  %1640 = vmatprep.subr.bf16.mxu0 %v1718_v2  ;;  %1708 = vmatprep.subr.bf16.mxu1 %v1718_v2  ;;  %v1720_v5 = vld [vmem:[%s2252_s0] sm:$0xff]   ;;  %v1722_v8 = vld [vmem:[%s2252_s0 + $0x8] sm:$0xff]   ;;  %v1725_v11 = vld [vmem:[%s2252_s0 + $0x90] sm:$0xff]  }
  0x3a   :  { %1641 = vmatpush3.bf16.msra.mxu0 %v1718_v2  ;;  %1710 = vmatpush3.bf16.msra.mxu1 %v1718_v2  ;;  %v396_v6 = vand.u32 %v1719_v4, %v394_v3  ;;  %v1721_v7 = vld [vmem:[%s2252_s0 + $0x80] sm:$0xff]   ;;  %v1723_v9 = vld [vmem:[%s2252_s0 + $0x88] sm:$0xff]   ;;  %v1726_v12 = vld [vmem:[%s2252_s0 + $0x18] sm:$0xff]  }
  0x3b   :  { %1644 = vmatprep.mubr.msk.bf16.mxu0 %vm294_vm2, %v1720_v5  ;;  %1676 = vmatprep.mubr.msk.bf16.mxu1 %vm294_vm2, %v1721_v7  ;;  %v1727_v13 = vld [vmem:[%s2252_s0 + $0x98] sm:$0xff]   ;;  %v1728_v14 = vld [vmem:[%s2252_s0 + $0x20] sm:$0xff]   ;;  %v1730_v16 = vld [vmem:[%s2252_s0 + $0x28] sm:$0xff]  }
  0x3c   :  { %1642 = vmatprep.subr.bf16.mxu0 %v396_v6  ;;  %1709 = vmatprep.subr.bf16.mxu1 %v396_v6  ;;  %v1729_v15 = vld [vmem:[%s2252_s0 + $0xa0] sm:$0xff]   ;;  %v1731_v17 = vld [vmem:[%s2252_s0 + $0xa8] sm:$0xff]   ;;  %v1732_v18 = vld [vmem:[%s2252_s0 + $0x30] sm:$0xff]  }
  0x3d   :  { %v1733_v19 = vld [vmem:[%s2252_s0 + $0xb0] sm:$0xff]   ;;  %v1734_v20 = vld [vmem:[%s2252_s0 + $0x38] sm:$0xff]   ;;  %v1736_v22 = vld [vmem:[%s2252_s0 + $0x40] sm:$0xff]  }
  0x3e   :  { %1643 = vmatpush3.bf16.msra.mxu0 %v396_v6  ;;  %1711 = vmatpush3.bf16.msra.mxu1 %v396_v6  ;;  %v1735_v21 = vld [vmem:[%s2252_s0 + $0xb8] sm:$0xff]   ;;  %v1737_v23 = vld [vmem:[%s2252_s0 + $0xc0] sm:$0xff]   ;;  %v1738_v24 = vld [vmem:[%s2252_s0 + $0x48] sm:$0xff]  }
  0x3f   :  { %v1739_v25 = vld [vmem:[%s2252_s0 + $0xc8] sm:$0xff]   ;;  %v1740_v26 = vld [vmem:[%s2252_s0 + $0x50] sm:$0xff]   ;;  %v1742_v28 = vld [vmem:[%s2252_s0 + $0x58] sm:$0xff]  }
  0x40   :  { %v1741_v27 = vld [vmem:[%s2252_s0 + $0xd0] sm:$0xff]   ;;  %v1743_v29 = vld [vmem:[%s2252_s0 + $0xd8] sm:$0xff]   ;;  %v1744_v30 = vld [vmem:[%s2252_s0 + $0x60] sm:$0xff]  }
  0x41   :  { %1645 = vmatmul.mubr.msk.bf16.vlgmr.msra.gmra.mrb[0].mxu0 %vm294_vm2, %v1722_v8  ;;  %1677 = vmatmul.mubr.msk.bf16.vlgmr.msra.gmra.mrb[0].mxu1 %vm294_vm2, %v1723_v9  ;;  %v1745_v31 = vld [vmem:[%s2252_s0 + $0xe0] sm:$0xff]   ;;  %v1746_v32 = vld [vmem:[%s2252_s0 + $0x68] sm:$0xff]   ;;  %v1748_v34 = vld [vmem:[%s2252_s0 + $0x70] sm:$0xff]  }
  0x42   :  { %1648 = vmatprep.mubr.msk.bf16.mxu0 %vm294_vm2, %v1724_v10  ;;  %1680 = vmatprep.mubr.msk.bf16.mxu1 %vm294_vm2, %v1725_v11  ;;  %v1747_v33 = vld [vmem:[%s2252_s0 + $0xe8] sm:$0xff]   ;;  %v1749_v35 = vld [vmem:[%s2252_s0 + $0xf0] sm:$0xff]   ;;  %v1750_v36 = vld [vmem:[%s2252_s0 + $0x78] sm:$0xff]  }
  0x43   :  { %v1751_v37 = vld [vmem:[%s2252_s0 + $0xf8] sm:$0xff]   ;;  %v2024_v38 = vld [vmem:[#allocation4] ss:$0 sm:$0xff]  ;;  %v2026_v40 = vld [vmem:[#allocation6] ss:$0 sm:$0xff] }
  0x49   :  { %1649 = vmatmul.mubr.msk.bf16.gmra.mrb[4].mxu0 %vm294_vm2, %v1726_v12  ;;  %1681 = vmatmul.mubr.msk.bf16.gmra.mrb[4].mxu1 %vm294_vm2, %v1727_v13 }
  0x4a   :  { %1652 = vmatprep.mubr.msk.bf16.mxu0 %vm294_vm2, %v1728_v14  ;;  %1684 = vmatprep.mubr.msk.bf16.mxu1 %vm294_vm2, %v1729_v15 }
  0x51   :  { %1653 = vmatmul.mubr.msk.bf16.gmra.mrb[8].mxu0 %vm294_vm2, %v1730_v16  ;;  %1685 = vmatmul.mubr.msk.bf16.gmra.mrb[8].mxu1 %vm294_vm2, %v1731_v17 }
  0x52   :  { %1656 = vmatprep.mubr.msk.bf16.mxu0 %vm294_vm2, %v1732_v18  ;;  %1688 = vmatprep.mubr.msk.bf16.mxu1 %vm294_vm2, %v1733_v19 }
  0x59   :  { %1657 = vmatmul.mubr.msk.bf16.gmra.mrb[12].mxu0 %vm294_vm2, %v1734_v20  ;;  %1689 = vmatmul.mubr.msk.bf16.gmra.mrb[12].mxu1 %vm294_vm2, %v1735_v21 }
  0x5a   :  { %1660 = vmatprep.mubr.msk.bf16.mxu0 %vm294_vm2, %v1736_v22  ;;  %1692 = vmatprep.mubr.msk.bf16.mxu1 %vm294_vm2, %v1737_v23 }
  0x61   :  { %1661 = vmatmul.mubr.msk.bf16.gmra.mrb[16].mxu0 %vm294_vm2, %v1738_v24  ;;  %1693 = vmatmul.mubr.msk.bf16.gmra.mrb[16].mxu1 %vm294_vm2, %v1739_v25 }
  0x62   :  { %1664 = vmatprep.mubr.msk.bf16.mxu0 %vm294_vm2, %v1740_v26  ;;  %1696 = vmatprep.mubr.msk.bf16.mxu1 %vm294_vm2, %v1741_v27 }
  0x69   :  { %1665 = vmatmul.mubr.msk.bf16.gmra.mrb[20].mxu0 %vm294_vm2, %v1742_v28  ;;  %1697 = vmatmul.mubr.msk.bf16.gmra.mrb[20].mxu1 %vm294_vm2, %v1743_v29 }
  0x6a   :  { %1668 = vmatprep.mubr.msk.bf16.mxu0 %vm294_vm2, %v1744_v30  ;;  %1700 = vmatprep.mubr.msk.bf16.mxu1 %vm294_vm2, %v1745_v31 }
  0x71   :  { %1669 = vmatmul.mubr.msk.bf16.gmra.mrb[24].mxu0 %vm294_vm2, %v1746_v32  ;;  %1701 = vmatmul.mubr.msk.bf16.gmra.mrb[24].mxu1 %vm294_vm2, %v1747_v33 }
  0x72   :  { %1672 = vmatprep.mubr.msk.bf16.mxu0 %vm294_vm2, %v1748_v34  ;;  %1704 = vmatprep.mubr.msk.bf16.mxu1 %vm294_vm2, %v1749_v35 }
  0x79   :  { %1673 = vmatmul.mubr.msk.bf16.gmra.mrb[28].mxu0 %vm294_vm2, %v1750_v36  ;;  %1705 = vmatmul.mubr.msk.bf16.gmra.mrb[28].mxu1 %vm294_vm2, %v1751_v37 }
 0x114   :  { %v1646_v39 = vpop.f32.mrb[0].mxu0  ;;  %v1678_v41 = vpop.f32.mrb[0].mxu1 }
 0x115   :  { %v696_v42 = vmul.f32 %v1646_v39, %v2024_v38  ;;  %v728_v43 = vmul.f32 %v1678_v41, %v2024_v38  ;;  %v432_v44 = vpop.f32.mrb[1].mxu0  ;;  %v560_v45 = vpop.f32.mrb[1].mxu1 }
 0x116   :  { %v694_v46 = vmul.f32 %v2024_v38, %v432_v44  ;;  %v726_v47 = vmul.f32 %v2024_v38, %v560_v45  ;;  %v1647_v48 = vpop.f32.mrb[2].mxu0  ;;  %v1679_v49 = vpop.f32.mrb[2].mxu1 }
 0x117   :  { %v767_v50 = vadd.f32 %v2026_v40, %v696_v42  ;;  %v799_v51 = vadd.f32 %v2026_v40, %v728_v43  ;;  %v697_v52 = vmul.f32 %v1647_v48, %v2024_v38  ;;  %v729_v53 = vmul.f32 %v1679_v49, %v2024_v38  ;;  %v435_v54 = vpop.f32.mrb[3].mxu0  ;;  %v563_v55 = vpop.f32.mrb[3].mxu1 }
 0x118   :  { %v765_v56 = vadd.f32 %v2026_v40, %v694_v46  ;;  %v797_v57 = vadd.f32 %v2026_v40, %v726_v47  ;;  %v695_v58 = vmul.f32 %v2024_v38, %v435_v54  ;;  %v727_v59 = vmul.f32 %v2024_v38, %v563_v55 }
 0x119   :  { %v768_v60 = vadd.f32 %v2026_v40, %v697_v52  ;;  %v800_v61 = vadd.f32 %v2026_v40, %v729_v53  ;;  %v831_v0 = vmax.f32 %v767_v50, 0.0  ;;  %v863_v1 = vmax.f32 %v799_v51, 0.0 }
 0x11a   :  { %v766_v62 = vadd.f32 %v2026_v40, %v695_v58  ;;  %v798_v63 = vadd.f32 %v2026_v40, %v727_v59  ;;  %v829_v4 = vmax.f32 %v765_v56, 0.0  ;;  %v861_v5 = vmax.f32 %v797_v57, 0.0 }
 0x11b   :  { %v832_v2 = vmax.f32 %v768_v60, 0.0  ;;  %v864_v3 = vmax.f32 %v800_v61, 0.0 }
 0x11c   :  { %v830_v6 = vmax.f32 %v766_v62, 0.0  ;;  %v862_v7 = vmax.f32 %v798_v63, 0.0  ;;  %v1650_v8 = vpop.f32.mrb[4].mxu0  ;;  %v1682_v9 = vpop.f32.mrb[4].mxu1 }
 0x11d   :  { %v1423_v10 = vpack.c.bf16 %v832_v2, %v831_v0  ;;  %v1503_v11 = vpack.c.bf16 %v864_v3, %v863_v1  ;;  %v700_v12 = vmul.f32 %v1650_v8, %v2024_v38  ;;  %v732_v13 = vmul.f32 %v1682_v9, %v2024_v38  ;;  %v448_v14 = vpop.f32.mrb[5].mxu0  ;;  %v576_v15 = vpop.f32.mrb[5].mxu1 }
 0x11e   :  { %v1418_v16 = vpack.c.bf16 %v830_v6, %v829_v4  ;;  %v1498_v17 = vpack.c.bf16 %v862_v7, %v861_v5  ;;  %v698_v18 = vmul.f32 %v2024_v38, %v448_v14  ;;  %v730_v19 = vmul.f32 %v2024_v38, %v576_v15  ;;  %v1651_v20 = vpop.f32.mrb[6].mxu0  ;;  %v1683_v21 = vpop.f32.mrb[6].mxu1 }
 0x11f   :  { %1575 = vst [vmem:[%s2256_s4 + $0x8] sm:$0xff] %v1423_v10   ;;  %1591 = vst [vmem:[%s2256_s4 + $0x88] sm:$0xff] %v1503_v11   ;;  %v771_v22 = vadd.f32 %v2026_v40, %v700_v12  ;;  %v803_v23 = vadd.f32 %v2026_v40, %v732_v13  ;;  %v701_v24 = vmul.f32 %v1651_v20, %v2024_v38  ;;  %v451_v26 = vpop.f32.mrb[7].mxu0  ;;  %v579_v27 = vpop.f32.mrb[7].mxu1 }
 0x120   :  { %v733_v25 = vmul.f32 %v1683_v21, %v2024_v38  ;;  %1419 = vst [vmem:[%s2256_s4] sm:$0xff] %v1418_v16   ;;  %1590 = vst [vmem:[%s2256_s4 + $0x80] sm:$0xff] %v1498_v17   ;;  %v769_v28 = vadd.f32 %v2026_v40, %v698_v18  ;;  %v801_v29 = vadd.f32 %v2026_v40, %v730_v19 }
 0x121   :  { %v699_v30 = vmul.f32 %v2024_v38, %v451_v26  ;;  %v731_v31 = vmul.f32 %v2024_v38, %v579_v27  ;;  %v772_v32 = vadd.f32 %v2026_v40, %v701_v24  ;;  %v835_v36 = vmax.f32 %v771_v22, 0.0 }
 0x122   :  { %v804_v33 = vadd.f32 %v2026_v40, %v733_v25  ;;  %v867_v37 = vmax.f32 %v803_v23, 0.0  ;;  %v833_v42 = vmax.f32 %v769_v28, 0.0  ;;  %v865_v43 = vmax.f32 %v801_v29, 0.0 }
 0x123   :  { %v770_v34 = vadd.f32 %v2026_v40, %v699_v30  ;;  %v802_v35 = vadd.f32 %v2026_v40, %v731_v31  ;;  %v836_v39 = vmax.f32 %v772_v32, 0.0 }
 0x124   :  { %v868_v41 = vmax.f32 %v804_v33, 0.0  ;;  %v1654_v46 = vpop.f32.mrb[8].mxu0  ;;  %v1686_v47 = vpop.f32.mrb[8].mxu1 }
 0x125   :  { %v834_v44 = vmax.f32 %v770_v34, 0.0  ;;  %v866_v45 = vmax.f32 %v802_v35, 0.0  ;;  %v1433_v48 = vpack.c.bf16 %v836_v39, %v835_v36  ;;  %v704_v50 = vmul.f32 %v1654_v46, %v2024_v38  ;;  %v464_v52 = vpop.f32.mrb[9].mxu0  ;;  %v592_v53 = vpop.f32.mrb[9].mxu1 }
 0x126   :  { %v1513_v49 = vpack.c.bf16 %v868_v41, %v867_v37  ;;  %v736_v51 = vmul.f32 %v1686_v47, %v2024_v38  ;;  %v702_v56 = vmul.f32 %v2024_v38, %v464_v52  ;;  %v734_v57 = vmul.f32 %v2024_v38, %v592_v53  ;;  %v1655_v58 = vpop.f32.mrb[10].mxu0  ;;  %v1687_v59 = vpop.f32.mrb[10].mxu1 }
 0x127   :  { %v1428_v54 = vpack.c.bf16 %v834_v44, %v833_v42  ;;  %v1508_v55 = vpack.c.bf16 %v866_v45, %v865_v43  ;;  %1577 = vst [vmem:[%s2256_s4 + $0x18] sm:$0xff] %v1433_v48   ;;  %v775_v60 = vadd.f32 %v2026_v40, %v704_v50  ;;  %v705_v62 = vmul.f32 %v1655_v58, %v2024_v38  ;;  %v467_v0 = vpop.f32.mrb[11].mxu0  ;;  %v595_v1 = vpop.f32.mrb[11].mxu1 }
 0x128   :  { %1593 = vst [vmem:[%s2256_s4 + $0x98] sm:$0xff] %v1513_v49   ;;  %v807_v61 = vadd.f32 %v2026_v40, %v736_v51  ;;  %v737_v63 = vmul.f32 %v1687_v59, %v2024_v38  ;;  %v773_v2 = vadd.f32 %v2026_v40, %v702_v56  ;;  %v805_v3 = vadd.f32 %v2026_v40, %v734_v57 }
 0x129   :  { %1576 = vst [vmem:[%s2256_s4 + $0x10] sm:$0xff] %v1428_v54   ;;  %1592 = vst [vmem:[%s2256_s4 + $0x90] sm:$0xff] %v1508_v55   ;;  %v703_v4 = vmul.f32 %v2024_v38, %v467_v0  ;;  %v735_v5 = vmul.f32 %v2024_v38, %v595_v1  ;;  %v776_v6 = vadd.f32 %v2026_v40, %v705_v62  ;;  %v839_v10 = vmax.f32 %v775_v60, 0.0 }
 0x12a   :  { %v808_v7 = vadd.f32 %v2026_v40, %v737_v63  ;;  %v871_v11 = vmax.f32 %v807_v61, 0.0  ;;  %v837_v14 = vmax.f32 %v773_v2, 0.0  ;;  %v869_v15 = vmax.f32 %v805_v3, 0.0 }
 0x12b   :  { %v774_v8 = vadd.f32 %v2026_v40, %v703_v4  ;;  %v806_v9 = vadd.f32 %v2026_v40, %v735_v5  ;;  %v840_v12 = vmax.f32 %v776_v6, 0.0 }
 0x12c   :  { %v872_v13 = vmax.f32 %v808_v7, 0.0  ;;  %v1658_v18 = vpop.f32.mrb[12].mxu0  ;;  %v1690_v19 = vpop.f32.mrb[12].mxu1 }
 0x12d   :  { %v838_v16 = vmax.f32 %v774_v8, 0.0  ;;  %v870_v17 = vmax.f32 %v806_v9, 0.0  ;;  %v1443_v20 = vpack.c.bf16 %v840_v12, %v839_v10  ;;  %v708_v22 = vmul.f32 %v1658_v18, %v2024_v38  ;;  %v480_v24 = vpop.f32.mrb[13].mxu0  ;;  %v608_v25 = vpop.f32.mrb[13].mxu1 }
 0x12e   :  { %v1523_v21 = vpack.c.bf16 %v872_v13, %v871_v11  ;;  %v740_v23 = vmul.f32 %v1690_v19, %v2024_v38  ;;  %v706_v28 = vmul.f32 %v2024_v38, %v480_v24  ;;  %v738_v29 = vmul.f32 %v2024_v38, %v608_v25  ;;  %v1659_v30 = vpop.f32.mrb[14].mxu0  ;;  %v1691_v31 = vpop.f32.mrb[14].mxu1 }
 0x12f   :  { %v1438_v26 = vpack.c.bf16 %v838_v16, %v837_v14  ;;  %v1518_v27 = vpack.c.bf16 %v870_v17, %v869_v15  ;;  %1579 = vst [vmem:[%s2256_s4 + $0x28] sm:$0xff] %v1443_v20   ;;  %v779_v32 = vadd.f32 %v2026_v40, %v708_v22  ;;  %v709_v34 = vmul.f32 %v1659_v30, %v2024_v38  ;;  %v483_v36 = vpop.f32.mrb[15].mxu0  ;;  %v611_v37 = vpop.f32.mrb[15].mxu1 }
 0x130   :  { %1595 = vst [vmem:[%s2256_s4 + $0xa8] sm:$0xff] %v1523_v21   ;;  %v811_v33 = vadd.f32 %v2026_v40, %v740_v23  ;;  %v741_v35 = vmul.f32 %v1691_v31, %v2024_v38  ;;  %v777_v39 = vadd.f32 %v2026_v40, %v706_v28  ;;  %v809_v41 = vadd.f32 %v2026_v40, %v738_v29 }
 0x131   :  { %1578 = vst [vmem:[%s2256_s4 + $0x20] sm:$0xff] %v1438_v26   ;;  %1594 = vst [vmem:[%s2256_s4 + $0xa0] sm:$0xff] %v1518_v27   ;;  %v707_v42 = vmul.f32 %v2024_v38, %v483_v36  ;;  %v739_v43 = vmul.f32 %v2024_v38, %v611_v37  ;;  %v780_v44 = vadd.f32 %v2026_v40, %v709_v34  ;;  %v843_v48 = vmax.f32 %v779_v32, 0.0 }
 0x132   :  { %v812_v45 = vadd.f32 %v2026_v40, %v741_v35  ;;  %v875_v49 = vmax.f32 %v811_v33, 0.0  ;;  %v841_v52 = vmax.f32 %v777_v39, 0.0  ;;  %v873_v53 = vmax.f32 %v809_v41, 0.0 }
 0x133   :  { %v778_v46 = vadd.f32 %v2026_v40, %v707_v42  ;;  %v810_v47 = vadd.f32 %v2026_v40, %v739_v43  ;;  %v844_v50 = vmax.f32 %v780_v44, 0.0 }
 0x134   :  { %v876_v51 = vmax.f32 %v812_v45, 0.0  ;;  %v1662_v56 = vpop.f32.mrb[16].mxu0  ;;  %v1694_v57 = vpop.f32.mrb[16].mxu1 }
 0x135   :  { %v842_v54 = vmax.f32 %v778_v46, 0.0  ;;  %v874_v55 = vmax.f32 %v810_v47, 0.0  ;;  %v1453_v58 = vpack.c.bf16 %v844_v50, %v843_v48  ;;  %v712_v60 = vmul.f32 %v1662_v56, %v2024_v38  ;;  %v496_v62 = vpop.f32.mrb[17].mxu0  ;;  %v624_v63 = vpop.f32.mrb[17].mxu1 }
 0x136   :  { %v1533_v59 = vpack.c.bf16 %v876_v51, %v875_v49  ;;  %v744_v61 = vmul.f32 %v1694_v57, %v2024_v38  ;;  %v710_v2 = vmul.f32 %v2024_v38, %v496_v62  ;;  %v742_v3 = vmul.f32 %v2024_v38, %v624_v63  ;;  %v1663_v4 = vpop.f32.mrb[18].mxu0  ;;  %v1695_v5 = vpop.f32.mrb[18].mxu1 }
 0x137   :  { %v1448_v0 = vpack.c.bf16 %v842_v54, %v841_v52  ;;  %v1528_v1 = vpack.c.bf16 %v874_v55, %v873_v53  ;;  %1581 = vst [vmem:[%s2256_s4 + $0x38] sm:$0xff] %v1453_v58   ;;  %v783_v6 = vadd.f32 %v2026_v40, %v712_v60  ;;  %v713_v8 = vmul.f32 %v1663_v4, %v2024_v38  ;;  %v499_v10 = vpop.f32.mrb[19].mxu0  ;;  %v627_v11 = vpop.f32.mrb[19].mxu1 }
 0x138   :  { %1597 = vst [vmem:[%s2256_s4 + $0xb8] sm:$0xff] %v1533_v59   ;;  %v815_v7 = vadd.f32 %v2026_v40, %v744_v61  ;;  %v745_v9 = vmul.f32 %v1695_v5, %v2024_v38  ;;  %v781_v12 = vadd.f32 %v2026_v40, %v710_v2  ;;  %v813_v13 = vadd.f32 %v2026_v40, %v742_v3 }
 0x139   :  { %1580 = vst [vmem:[%s2256_s4 + $0x30] sm:$0xff] %v1448_v0   ;;  %1596 = vst [vmem:[%s2256_s4 + $0xb0] sm:$0xff] %v1528_v1   ;;  %v711_v14 = vmul.f32 %v2024_v38, %v499_v10  ;;  %v743_v15 = vmul.f32 %v2024_v38, %v627_v11  ;;  %v784_v16 = vadd.f32 %v2026_v40, %v713_v8  ;;  %v847_v20 = vmax.f32 %v783_v6, 0.0 }
 0x13a   :  { %v816_v17 = vadd.f32 %v2026_v40, %v745_v9  ;;  %v879_v21 = vmax.f32 %v815_v7, 0.0  ;;  %v845_v24 = vmax.f32 %v781_v12, 0.0  ;;  %v877_v25 = vmax.f32 %v813_v13, 0.0 }
 0x13b   :  { %v782_v18 = vadd.f32 %v2026_v40, %v711_v14  ;;  %v814_v19 = vadd.f32 %v2026_v40, %v743_v15  ;;  %v848_v22 = vmax.f32 %v784_v16, 0.0 }
 0x13c   :  { %v880_v23 = vmax.f32 %v816_v17, 0.0  ;;  %v1666_v28 = vpop.f32.mrb[20].mxu0  ;;  %v1698_v29 = vpop.f32.mrb[20].mxu1 }
 0x13d   :  { %v846_v26 = vmax.f32 %v782_v18, 0.0  ;;  %v878_v27 = vmax.f32 %v814_v19, 0.0  ;;  %v1463_v30 = vpack.c.bf16 %v848_v22, %v847_v20  ;;  %v716_v32 = vmul.f32 %v1666_v28, %v2024_v38  ;;  %v512_v34 = vpop.f32.mrb[21].mxu0  ;;  %v640_v35 = vpop.f32.mrb[21].mxu1 }
 0x13e   :  { %v1543_v31 = vpack.c.bf16 %v880_v23, %v879_v21  ;;  %v748_v33 = vmul.f32 %v1698_v29, %v2024_v38  ;;  %v714_v39 = vmul.f32 %v2024_v38, %v512_v34  ;;  %v746_v41 = vmul.f32 %v2024_v38, %v640_v35  ;;  %v1667_v42 = vpop.f32.mrb[22].mxu0  ;;  %v1699_v43 = vpop.f32.mrb[22].mxu1 }
 0x13f   :  { %v1458_v36 = vpack.c.bf16 %v846_v26, %v845_v24  ;;  %v1538_v37 = vpack.c.bf16 %v878_v27, %v877_v25  ;;  %1583 = vst [vmem:[%s2256_s4 + $0x48] sm:$0xff] %v1463_v30   ;;  %v787_v44 = vadd.f32 %v2026_v40, %v716_v32  ;;  %v717_v46 = vmul.f32 %v1667_v42, %v2024_v38  ;;  %v515_v48 = vpop.f32.mrb[23].mxu0  ;;  %v643_v49 = vpop.f32.mrb[23].mxu1 }
 0x140   :  { %1599 = vst [vmem:[%s2256_s4 + $0xc8] sm:$0xff] %v1543_v31   ;;  %v819_v45 = vadd.f32 %v2026_v40, %v748_v33  ;;  %v749_v47 = vmul.f32 %v1699_v43, %v2024_v38  ;;  %v785_v50 = vadd.f32 %v2026_v40, %v714_v39  ;;  %v817_v51 = vadd.f32 %v2026_v40, %v746_v41 }
 0x141   :  { %1582 = vst [vmem:[%s2256_s4 + $0x40] sm:$0xff] %v1458_v36   ;;  %1598 = vst [vmem:[%s2256_s4 + $0xc0] sm:$0xff] %v1538_v37   ;;  %v715_v52 = vmul.f32 %v2024_v38, %v515_v48  ;;  %v747_v53 = vmul.f32 %v2024_v38, %v643_v49  ;;  %v788_v54 = vadd.f32 %v2026_v40, %v717_v46  ;;  %v851_v58 = vmax.f32 %v787_v44, 0.0 }
 0x142   :  { %v820_v55 = vadd.f32 %v2026_v40, %v749_v47  ;;  %v883_v59 = vmax.f32 %v819_v45, 0.0  ;;  %v849_v62 = vmax.f32 %v785_v50, 0.0  ;;  %v881_v63 = vmax.f32 %v817_v51, 0.0 }
 0x143   :  { %v786_v56 = vadd.f32 %v2026_v40, %v715_v52  ;;  %v818_v57 = vadd.f32 %v2026_v40, %v747_v53  ;;  %v852_v60 = vmax.f32 %v788_v54, 0.0 }
 0x144   :  { %v884_v61 = vmax.f32 %v820_v55, 0.0  ;;  %v1670_v2 = vpop.f32.mrb[24].mxu0  ;;  %v1702_v3 = vpop.f32.mrb[24].mxu1 }
 0x145   :  { %v850_v0 = vmax.f32 %v786_v56, 0.0  ;;  %v882_v1 = vmax.f32 %v818_v57, 0.0  ;;  %v1473_v4 = vpack.c.bf16 %v852_v60, %v851_v58  ;;  %v720_v6 = vmul.f32 %v1670_v2, %v2024_v38  ;;  %v528_v8 = vpop.f32.mrb[25].mxu0  ;;  %v656_v9 = vpop.f32.mrb[25].mxu1 }
 0x146   :  { %v1553_v5 = vpack.c.bf16 %v884_v61, %v883_v59  ;;  %v752_v7 = vmul.f32 %v1702_v3, %v2024_v38  ;;  %v718_v12 = vmul.f32 %v2024_v38, %v528_v8  ;;  %v750_v13 = vmul.f32 %v2024_v38, %v656_v9  ;;  %v1671_v14 = vpop.f32.mrb[26].mxu0  ;;  %v1703_v15 = vpop.f32.mrb[26].mxu1 }
 0x147   :  { %v1468_v10 = vpack.c.bf16 %v850_v0, %v849_v62  ;;  %v1548_v11 = vpack.c.bf16 %v882_v1, %v881_v63  ;;  %1585 = vst [vmem:[%s2256_s4 + $0x58] sm:$0xff] %v1473_v4   ;;  %v791_v16 = vadd.f32 %v2026_v40, %v720_v6  ;;  %v721_v18 = vmul.f32 %v1671_v14, %v2024_v38  ;;  %v531_v20 = vpop.f32.mrb[27].mxu0  ;;  %v659_v21 = vpop.f32.mrb[27].mxu1 }
 0x148   :  { %1601 = vst [vmem:[%s2256_s4 + $0xd8] sm:$0xff] %v1553_v5   ;;  %v823_v17 = vadd.f32 %v2026_v40, %v752_v7  ;;  %v753_v19 = vmul.f32 %v1703_v15, %v2024_v38  ;;  %v789_v22 = vadd.f32 %v2026_v40, %v718_v12  ;;  %v821_v23 = vadd.f32 %v2026_v40, %v750_v13 }
 0x149   :  { %1584 = vst [vmem:[%s2256_s4 + $0x50] sm:$0xff] %v1468_v10   ;;  %1600 = vst [vmem:[%s2256_s4 + $0xd0] sm:$0xff] %v1548_v11   ;;  %v719_v24 = vmul.f32 %v2024_v38, %v531_v20  ;;  %v751_v25 = vmul.f32 %v2024_v38, %v659_v21  ;;  %v792_v26 = vadd.f32 %v2026_v40, %v721_v18  ;;  %v855_v30 = vmax.f32 %v791_v16, 0.0 }
 0x14a   :  { %v824_v27 = vadd.f32 %v2026_v40, %v753_v19  ;;  %v887_v31 = vmax.f32 %v823_v17, 0.0  ;;  %v853_v34 = vmax.f32 %v789_v22, 0.0  ;;  %v885_v35 = vmax.f32 %v821_v23, 0.0 }
 0x14b   :  { %v790_v28 = vadd.f32 %v2026_v40, %v719_v24  ;;  %v822_v29 = vadd.f32 %v2026_v40, %v751_v25  ;;  %v856_v32 = vmax.f32 %v792_v26, 0.0 }
 0x14c   :  { %v888_v33 = vmax.f32 %v824_v27, 0.0  ;;  %v1674_v39 = vpop.f32.mrb[28].mxu0  ;;  %v1706_v41 = vpop.f32.mrb[28].mxu1 }
 0x14d   :  { %v854_v36 = vmax.f32 %v790_v28, 0.0  ;;  %v886_v37 = vmax.f32 %v822_v29, 0.0  ;;  %v1483_v42 = vpack.c.bf16 %v856_v32, %v855_v30  ;;  %v724_v44 = vmul.f32 %v1674_v39, %v2024_v38  ;;  %v544_v46 = vpop.f32.mrb[29].mxu0  ;;  %v672_v47 = vpop.f32.mrb[29].mxu1 }
 0x14e   :  { %v1563_v43 = vpack.c.bf16 %v888_v33, %v887_v31  ;;  %v756_v45 = vmul.f32 %v1706_v41, %v2024_v38  ;;  %v722_v50 = vmul.f32 %v2024_v38, %v544_v46  ;;  %v754_v51 = vmul.f32 %v2024_v38, %v672_v47  ;;  %v1675_v52 = vpop.f32.mrb[30].mxu0  ;;  %v1707_v53 = vpop.f32.mrb[30].mxu1 }
 0x14f   :  { %v1478_v48 = vpack.c.bf16 %v854_v36, %v853_v34  ;;  %v1558_v49 = vpack.c.bf16 %v886_v37, %v885_v35  ;;  %1587 = vst [vmem:[%s2256_s4 + $0x68] sm:$0xff] %v1483_v42   ;;  %v795_v54 = vadd.f32 %v2026_v40, %v724_v44  ;;  %v725_v56 = vmul.f32 %v1675_v52, %v2024_v38  ;;  %v547_v58 = vpop.f32.mrb[31].mxu0  ;;  %v675_v59 = vpop.f32.mrb[31].mxu1 }
 0x150   :  { %1603 = vst [vmem:[%s2256_s4 + $0xe8] sm:$0xff] %v1563_v43   ;;  %v827_v55 = vadd.f32 %v2026_v40, %v756_v45  ;;  %v757_v57 = vmul.f32 %v1707_v53, %v2024_v38  ;;  %v793_v60 = vadd.f32 %v2026_v40, %v722_v50  ;;  %v825_v61 = vadd.f32 %v2026_v40, %v754_v51 }
 0x151   :  { %1586 = vst [vmem:[%s2256_s4 + $0x60] sm:$0xff] %v1478_v48   ;;  %1602 = vst [vmem:[%s2256_s4 + $0xe0] sm:$0xff] %v1558_v49   ;;  %v723_v62 = vmul.f32 %v2024_v38, %v547_v58  ;;  %v755_v63 = vmul.f32 %v2024_v38, %v675_v59  ;;  %v796_v0 = vadd.f32 %v2026_v40, %v725_v56  ;;  %v859_v4 = vmax.f32 %v795_v54, 0.0 }
 0x152   :  { %v828_v1 = vadd.f32 %v2026_v40, %v757_v57  ;;  %v891_v5 = vmax.f32 %v827_v55, 0.0  ;;  %v857_v8 = vmax.f32 %v793_v60, 0.0  ;;  %v889_v9 = vmax.f32 %v825_v61, 0.0 }
 0x153   :  { %v794_v2 = vadd.f32 %v2026_v40, %v723_v62  ;;  %v826_v3 = vadd.f32 %v2026_v40, %v755_v63  ;;  %v860_v6 = vmax.f32 %v796_v0, 0.0 }
 0x154   :  { %v892_v7 = vmax.f32 %v828_v1, 0.0 }
 0x155   :  { %v858_v10 = vmax.f32 %v794_v2, 0.0  ;;  %v890_v11 = vmax.f32 %v826_v3, 0.0  ;;  %v1493_v12 = vpack.c.bf16 %v860_v6, %v859_v4 }
 0x156   :  { %v1573_v13 = vpack.c.bf16 %v892_v7, %v891_v5 }
 0x157   :  { %v1488_v14 = vpack.c.bf16 %v858_v10, %v857_v8  ;;  %v1568_v38 = vpack.c.bf16 %v890_v11, %v889_v9  ;;  %1589 = vst [vmem:[%s2256_s4 + $0x78] sm:$0xff] %v1493_v12  }
 0x158   :  { %1605 = vst [vmem:[%s2256_s4 + $0xf8] sm:$0xff] %v1573_v13  }
 0x159   :  { %1588 = vst [vmem:[%s2256_s4 + $0x70] sm:$0xff] %v1488_v14   ;;  %1604 = vst [vmem:[%s2256_s4 + $0xf0] sm:$0xff] %v1568_v38  }
 0x15a   :  { %1217 = vsyncpa [#allocation3], 1 }
 0x15b   :  { %1218 = vsyncpa [#allocation5], 1 }

// kernel: _lambda_.27
= control target key start
LH: loop header
LB: loop body
LE: loop exit
PB: predicated region body
PF: predicated region fallthrough
CT: control target
= control target key end

     0   :  { %s3004_s1 = inlined_call_operand.vmem [shape: bf16[1152,128], index: 1, kind: input, shape index: {}]   ;;  %s3005_s0 = inlined_call_operand.vmem [shape: bf16[128,1152], index: 0, kind: input, shape index: {}]   ;;  %s3006_s2 = inlined_call_operand.vmem [shape: f32[1,128], index: 2, kind: input, shape index: {}]   ;;  %s3007_s3 = inlined_call_operand.vmem [shape: f32[1,128], index: 3, kind: input, shape index: {}]   ;;  %s3008_s4 = inlined_call_operand.vmem [shape: bf16[128,128], index: 4, kind: output, shape index: {}]  }
   0x1   :  { %v2218_v0 = vld [vmem:[%s3004_s1 + $0x40] sm:$0xff]   ;;  %v2222_v4 = vld [vmem:[%s3004_s1 + $0x48] sm:$0xff]   ;;  %v2226_v8 = vld [vmem:[%s3004_s1 + $0x50] sm:$0xff]  }
   0x2   :  { %v2219_v1 = vld [vmem:[%s3004_s1 + $0xc0] sm:$0xff]   ;;  %1898 = vmatprep.subr.bf16.mxu0 %v2218_v0  ;;  %v2223_v5 = vld [vmem:[%s3004_s1 + $0xc8] sm:$0xff]   ;;  %v2227_v9 = vld [vmem:[%s3004_s1 + $0xd0] sm:$0xff]  }
   0x3   :  { %v2220_v2 = vld [vmem:[%s3004_s1] sm:$0xff]   ;;  %1962 = vmatprep.subr.bf16.mxu1 %v2219_v1  ;;  %v2224_v6 = vld [vmem:[%s3004_s1 + $0x8] sm:$0xff]   ;;  %v2228_v10 = vld [vmem:[%s3004_s1 + $0x10] sm:$0xff]  }
   0x4   :  { %v2221_v3 = vld [vmem:[%s3004_s1 + $0x80] sm:$0xff]   ;;  %1899 = vmatpush3.bf16.msra.mxu0 %v2220_v2  ;;  %v2225_v7 = vld [vmem:[%s3004_s1 + $0x88] sm:$0xff]   ;;  %v2229_v11 = vld [vmem:[%s3004_s1 + $0x90] sm:$0xff]  }
   0x5   :  { %1963 = vmatpush3.bf16.msra.mxu1 %v2221_v3  ;;  %1900 = vmatprep.subr.bf16.mxu0 %v2222_v4  ;;  %v2230_v12 = vld [vmem:[%s3004_s1 + $0x58] sm:$0xff]   ;;  %v2234_v16 = vld [vmem:[%s3004_s1 + $0x60] sm:$0xff]   ;;  %v2238_v20 = vld [vmem:[%s3004_s1 + $0x68] sm:$0xff]  }
   0x6   :  { %1964 = vmatprep.subr.bf16.mxu1 %v2223_v5  ;;  %v2231_v13 = vld [vmem:[%s3004_s1 + $0xd8] sm:$0xff]   ;;  %v2235_v17 = vld [vmem:[%s3004_s1 + $0xe0] sm:$0xff]   ;;  %v2239_v21 = vld [vmem:[%s3004_s1 + $0xe8] sm:$0xff]  }
   0x7   :  { %v2232_v14 = vld [vmem:[%s3004_s1 + $0x18] sm:$0xff]   ;;  %v2236_v18 = vld [vmem:[%s3004_s1 + $0x20] sm:$0xff]   ;;  %v2240_v22 = vld [vmem:[%s3004_s1 + $0x28] sm:$0xff]  }
   0x8   :  { %1901 = vmatpush3.bf16.msra.mxu0 %v2224_v6  ;;  %v2233_v15 = vld [vmem:[%s3004_s1 + $0x98] sm:$0xff]   ;;  %v2237_v19 = vld [vmem:[%s3004_s1 + $0xa0] sm:$0xff]   ;;  %v2241_v23 = vld [vmem:[%s3004_s1 + $0xa8] sm:$0xff]  }
   0x9   :  { %1965 = vmatpush3.bf16.msra.mxu1 %v2225_v7  ;;  %1902 = vmatprep.subr.bf16.mxu0 %v2226_v8  ;;  %v2242_v24 = vld [vmem:[%s3004_s1 + $0x70] sm:$0xff]   ;;  %v2246_v28 = vld [vmem:[%s3004_s1 + $0x78] sm:$0xff]   ;;  %v2250_v32 = vld [vmem:[%s3005_s0] ss:$36 sps:$4 sm:$0xff]  }
   0xa   :  { %1966 = vmatprep.subr.bf16.mxu1 %v2227_v9  ;;  %v2243_v25 = vld [vmem:[%s3004_s1 + $0xf0] sm:$0xff]   ;;  %v2247_v29 = vld [vmem:[%s3004_s1 + $0xf8] sm:$0xff]   ;;  %v2252_v33 = vld [vmem:[%s3005_s0 + $0x4] ss:$36 sps:$4 sm:$0xff]  }
   0xb   :  { %v2244_v26 = vld [vmem:[%s3004_s1 + $0x30] sm:$0xff]   ;;  %v2248_v30 = vld [vmem:[%s3004_s1 + $0x38] sm:$0xff]   ;;  %v2253_v34 = vld [vmem:[%s3005_s0 + $0x8] ss:$36 sps:$4 sm:$0xff]   ;;  %1074 = vmatprep.mubr.bf16.mxu0 %v2252_v33 }
   0xc   :  { %1903 = vmatpush3.bf16.msra.mxu0 %v2228_v10  ;;  %v2245_v27 = vld [vmem:[%s3004_s1 + $0xb0] sm:$0xff]   ;;  %v2249_v31 = vld [vmem:[%s3004_s1 + $0xb8] sm:$0xff]   ;;  %v2256_v36 = vld [vmem:[%s3004_s1 + $0x140] sm:$0xff]  }
   0xd   :  { %1967 = vmatpush3.bf16.msra.mxu1 %v2229_v11  ;;  %1904 = vmatprep.subr.bf16.mxu0 %v2230_v12  ;;  %v2255_v35 = vld [vmem:[%s3005_s0 + $0xc] ss:$36 sps:$4 sm:$0xff]   ;;  %v2257_v37 = vld [vmem:[%s3004_s1 + $0x1c0] sm:$0xff]   ;;  %v2262_v41 = vld [vmem:[%s3005_s0 + $0x54] ss:$36 sps:$4 sm:$0xff]  }
   0xe   :  { %1968 = vmatprep.subr.bf16.mxu1 %v2231_v13  ;;  %1171 = vmatprep.mubr.bf16.mxu1 %v2255_v35  ;;  %v2258_v38 = vld [vmem:[%s3004_s1 + $0x100] sm:$0xff]   ;;  %v2260_v40 = vld [vmem:[%s3005_s0 + $0x4c] ss:$36 sps:$4 sm:$0xff]   ;;  %v2270_v48 = vld [vmem:[%s3005_s0 + $0x94] ss:$36 sps:$4 sm:$0xff]  }
   0xf   :  { %v2259_v39 = vld [vmem:[%s3004_s1 + $0x180] sm:$0xff]   ;;  %v2264_v42 = vld [vmem:[%s3005_s0 + $0x48] ss:$36 sps:$4 sm:$0xff]   ;;  %v2265_v43 = vld [vmem:[%s3005_s0 + $0x50] ss:$36 sps:$4 sm:$0xff]  }
  0x10   :  { %1905 = vmatpush3.bf16.msra.mxu0 %v2232_v14  ;;  %v2266_v44 = vld [vmem:[%s3004_s1 + $0x148] sm:$0xff]   ;;  %v2272_v49 = vld [vmem:[%s3005_s0 + $0x9c] ss:$36 sps:$4 sm:$0xff]   ;;  %v2274_v50 = vld [vmem:[%s3005_s0 + $0x90] ss:$36 sps:$4 sm:$0xff]  }
  0x11   :  { %1969 = vmatpush3.bf16.msra.mxu1 %v2233_v15  ;;  %1906 = vmatprep.subr.bf16.mxu0 %v2234_v16  ;;  %v2267_v45 = vld [vmem:[%s3004_s1 + $0x1c8] sm:$0xff]   ;;  %v2275_v51 = vld [vmem:[%s3005_s0 + $0x98] ss:$36 sps:$4 sm:$0xff]   ;;  %v2276_v52 = vld [vmem:[%s3004_s1 + $0x150] sm:$0xff]  }
  0x12   :  { %1970 = vmatprep.subr.bf16.mxu1 %v2235_v17  ;;  %v2268_v46 = vld [vmem:[%s3004_s1 + $0x108] sm:$0xff]   ;;  %v2277_v53 = vld [vmem:[%s3004_s1 + $0x1d0] sm:$0xff]   ;;  %v2280_v56 = vld [vmem:[%s3005_s0 + $0xdc] ss:$36 sps:$4 sm:$0xff]  }
  0x13   :  { %v2269_v47 = vld [vmem:[%s3004_s1 + $0x188] sm:$0xff]   ;;  %v2278_v54 = vld [vmem:[%s3004_s1 + $0x110] sm:$0xff]   ;;  %v2284_v58 = vld [vmem:[%s3005_s0 + $0xd8] ss:$36 sps:$4 sm:$0xff]  }
  0x14   :  { %1907 = vmatpush3.bf16.msra.mxu0 %v2236_v18  ;;  %v2279_v55 = vld [vmem:[%s3004_s1 + $0x190] sm:$0xff]   ;;  %v2282_v57 = vld [vmem:[%s3005_s0 + $0xe4] ss:$36 sps:$4 sm:$0xff]   ;;  %v2286_v60 = vld [vmem:[%s3004_s1 + $0x158] sm:$0xff]  }
  0x15   :  { %1971 = vmatpush3.bf16.msra.mxu1 %v2237_v19  ;;  %1908 = vmatprep.subr.bf16.mxu0 %v2238_v20  ;;  %v2285_v59 = vld [vmem:[%s3005_s0 + $0xe0] ss:$36 sps:$4 sm:$0xff]   ;;  %v2287_v61 = vld [vmem:[%s3004_s1 + $0x1d8] sm:$0xff]   ;;  %v2292_v1 = vld [vmem:[%s3005_s0 + $0x12c] ss:$36 sps:$4 sm:$0xff]  }
  0x16   :  { %1972 = vmatprep.subr.bf16.mxu1 %v2239_v21  ;;  %v2288_v62 = vld [vmem:[%s3004_s1 + $0x118] sm:$0xff]   ;;  %v2290_v0 = vld [vmem:[%s3005_s0 + $0x124] ss:$36 sps:$4 sm:$0xff]   ;;  %v2300_v8 = vld [vmem:[%s3005_s0 + $0x16c] ss:$36 sps:$4 sm:$0xff]  }
  0x17   :  { %v2289_v63 = vld [vmem:[%s3004_s1 + $0x198] sm:$0xff]   ;;  %v2294_v2 = vld [vmem:[%s3005_s0 + $0x120] ss:$36 sps:$4 sm:$0xff]   ;;  %v2295_v4 = vld [vmem:[%s3005_s0 + $0x128] ss:$36 sps:$4 sm:$0xff]  }
  0x18   :  { %1909 = vmatpush3.bf16.msra.mxu0 %v2240_v22  ;;  %v2296_v3 = vld [vmem:[%s3004_s1 + $0x160] sm:$0xff]   ;;  %v2302_v9 = vld [vmem:[%s3005_s0 + $0x174] ss:$36 sps:$4 sm:$0xff]   ;;  %v2306_v10 = vld [vmem:[%s3004_s1 + $0x168] sm:$0xff]  }
  0x19   :  { %1973 = vmatpush3.bf16.msra.mxu1 %v2241_v23  ;;  %1910 = vmatprep.subr.bf16.mxu0 %v2242_v24  ;;  %v2297_v5 = vld [vmem:[%s3004_s1 + $0x1e0] sm:$0xff]   ;;  %v2307_v11 = vld [vmem:[%s3004_s1 + $0x1e8] sm:$0xff]   ;;  %v2305_v15 = vld [vmem:[%s3005_s0 + $0x170] ss:$36 sps:$4 sm:$0xff]  }
  0x1a   :  { %1974 = vmatprep.subr.bf16.mxu1 %v2243_v25  ;;  %v2298_v6 = vld [vmem:[%s3004_s1 + $0x120] sm:$0xff]   ;;  %v2304_v12 = vld [vmem:[%s3005_s0 + $0x168] ss:$36 sps:$4 sm:$0xff]   ;;  %v2310_v16 = vld [vmem:[%s3005_s0 + $0x1b4] ss:$36 sps:$4 sm:$0xff]  }
  0x1b   :  { %v2299_v7 = vld [vmem:[%s3004_s1 + $0x1a0] sm:$0xff]   ;;  %v2308_v13 = vld [vmem:[%s3004_s1 + $0x128] sm:$0xff]   ;;  %v2316_v18 = vld [vmem:[%s3004_s1 + $0x170] sm:$0xff]  }
  0x1c   :  { %1911 = vmatpush3.bf16.msra.mxu0 %v2244_v26  ;;  %v2309_v14 = vld [vmem:[%s3004_s1 + $0x1a8] sm:$0xff]   ;;  %v2312_v17 = vld [vmem:[%s3005_s0 + $0x1bc] ss:$36 sps:$4 sm:$0xff]   ;;  %v2317_v19 = vld [vmem:[%s3004_s1 + $0x1f0] sm:$0xff]  }
  0x1d   :  { %1975 = vmatpush3.bf16.msra.mxu1 %v2245_v27  ;;  %1912 = vmatprep.subr.bf16.mxu0 %v2246_v28  ;;  %v2318_v20 = vld [vmem:[%s3004_s1 + $0x130] sm:$0xff]   ;;  %v2315_v23 = vld [vmem:[%s3005_s0 + $0x1b8] ss:$36 sps:$4 sm:$0xff]   ;;  %v2322_v25 = vld [vmem:[%s3005_s0 + $0x204] ss:$36 sps:$4 sm:$0xff]  }
  0x1e   :  { %1976 = vmatprep.subr.bf16.mxu1 %v2247_v29  ;;  %v2319_v21 = vld [vmem:[%s3004_s1 + $0x1b0] sm:$0xff]   ;;  %v2320_v24 = vld [vmem:[%s3005_s0 + $0x1fc] ss:$36 sps:$4 sm:$0xff]  }
  0x1f   :  { %v2314_v22 = vld [vmem:[%s3005_s0 + $0x1b0] ss:$36 sps:$4 sm:$0xff]   ;;  %v2326_v26 = vld [vmem:[%s3004_s1 + $0x178] sm:$0xff]  }
  0x20   :  { %1913 = vmatpush3.bf16.msra.mxu0 %v2248_v30  ;;  %v2327_v27 = vld [vmem:[%s3004_s1 + $0x1f8] sm:$0xff]   ;;  %v2330_v35 = vld [vmem:[%s3005_s0 + $0x10] ss:$36 sps:$4 sm:$0xff]  }
  0x21   :  { %1977 = vmatpush3.bf16.msra.mxu1 %v2249_v31  ;;  %2026 = vmatprep.subr.bf16.mxu0 %v2256_v36  ;;  %v2328_v28 = vld [vmem:[%s3004_s1 + $0x138] sm:$0xff]   ;;  %v2325_v31 = vld [vmem:[%s3005_s0 + $0x200] ss:$36 sps:$4 sm:$0xff]  }
  0x22   :  { %2090 = vmatprep.subr.bf16.mxu1 %v2257_v37  ;;  %v2329_v29 = vld [vmem:[%s3004_s1 + $0x1b8] sm:$0xff]  }
  0x23   :  { %1075 = vmatmul.mubr.bf16.vlgmr.msra.gmra.mrb[0].mxu0 %v2250_v32  ;;  %v2324_v30 = vld [vmem:[%s3005_s0 + $0x1f8] ss:$36 sps:$4 sm:$0xff]   ;;  %v2336_v32 = vld [vmem:[%s3004_s1 + $0x200] sm:$0xff]  }
  0x24   :  { %1172 = vmatmul.mubr.bf16.vlgmr.msra.gmra.mrb[0].mxu1 %v2253_v34  ;;  %2027 = vmatpush3.bf16.msra.mxu0 %v2258_v38  ;;  %v2332_v33 = vld [vmem:[%s3005_s0 + $0x14] ss:$36 sps:$4 sm:$0xff]   ;;  %v2335_v34 = vld [vmem:[%s3005_s0 + $0x1c] ss:$36 sps:$4 sm:$0xff]   ;;  %v2339_v38 = vld [vmem:[%s3005_s0 + $0x64] ss:$36 sps:$4 sm:$0xff]  }
  0x25   :  { %2091 = vmatpush3.bf16.msra.mxu1 %v2259_v39  ;;  %1082 = vmatprep.mubr.bf16.mxu0 %v2260_v40  ;;  %v2333_v36 = vld [vmem:[%s3005_s0 + $0x18] ss:$36 sps:$4 sm:$0xff]   ;;  %v2343_v39 = vld [vmem:[%s3004_s1 + $0x208] sm:$0xff]   ;;  %v2350_v40 = vld [vmem:[%s3004_s1 + $0x210] sm:$0xff]  }
  0x26   :  { %1179 = vmatprep.mubr.bf16.mxu1 %v2262_v41  ;;  %2028 = vmatprep.subr.bf16.mxu0 %v2266_v44  ;;  %v2337_v37 = vld [vmem:[%s3005_s0 + $0x5c] ss:$36 sps:$4 sm:$0xff]   ;;  %v2346_v44 = vld [vmem:[%s3005_s0 + $0xac] ss:$36 sps:$4 sm:$0xff]  }
  0x27   :  { %2092 = vmatprep.subr.bf16.mxu1 %v2267_v45  ;;  %v2341_v41 = vld [vmem:[%s3005_s0 + $0x58] ss:$36 sps:$4 sm:$0xff]  }
  0x28   :  { %2029 = vmatpush3.bf16.msra.mxu0 %v2268_v46  ;;  %v2357_v45 = vld [vmem:[%s3004_s1 + $0x218] sm:$0xff]   ;;  %v2364_v46 = vld [vmem:[%s3004_s1 + $0x220] sm:$0xff]  }
  0x29   :  { %2093 = vmatpush3.bf16.msra.mxu1 %v2269_v47  ;;  %2030 = vmatprep.subr.bf16.mxu0 %v2276_v52  ;;  %v2348_v47 = vld [vmem:[%s3005_s0 + $0xa0] ss:$36 sps:$4 sm:$0xff]   ;;  %v2355_v52 = vld [vmem:[%s3005_s0 + $0xe8] ss:$36 sps:$4 sm:$0xff]  }
  0x2a   :  { %2094 = vmatprep.subr.bf16.mxu1 %v2277_v53  ;;  %v2378_v53 = vld [vmem:[%s3004_s1 + $0x230] sm:$0xff]  }
  0x2b   :  { %1083 = vmatmul.mubr.bf16.gmra.mrb[4].mxu0 %v2264_v42  ;;  %v2342_v42 = vld [vmem:[%s3005_s0 + $0x60] ss:$36 sps:$4 sm:$0xff]  }
  0x2c   :  { %1180 = vmatmul.mubr.bf16.gmra.mrb[4].mxu1 %v2265_v43  ;;  %1090 = vmatprep.mubr.bf16.mxu0 %v2270_v48  ;;  %v2344_v43 = vld [vmem:[%s3005_s0 + $0xa4] ss:$36 sps:$4 sm:$0xff]  }
  0x2d   :  { %1187 = vmatprep.mubr.bf16.mxu1 %v2272_v49  ;;  %2031 = vmatpush3.bf16.msra.mxu0 %v2278_v54  ;;  %v2349_v48 = vld [vmem:[%s3005_s0 + $0xa8] ss:$36 sps:$4 sm:$0xff]   ;;  %v2356_v54 = vld [vmem:[%s3005_s0 + $0xf0] ss:$36 sps:$4 sm:$0xff]  }
  0x2e   :  { %2095 = vmatpush3.bf16.msra.mxu1 %v2279_v55  ;;  %2032 = vmatprep.subr.bf16.mxu0 %v2286_v60  ;;  %v2351_v49 = vld [vmem:[%s3005_s0 + $0xec] ss:$36 sps:$4 sm:$0xff]   ;;  %v2358_v55 = vld [vmem:[%s3005_s0 + $0x134] ss:$36 sps:$4 sm:$0xff]   ;;  %v2365_v60 = vld [vmem:[%s3005_s0 + $0x17c] ss:$36 sps:$4 sm:$0xff]  }
  0x2f   :  { %2096 = vmatprep.subr.bf16.mxu1 %v2287_v61  ;;  %v2367_v61 = vld [vmem:[%s3005_s0 + $0x184] ss:$36 sps:$4 sm:$0xff]  }
  0x31   :  { %2033 = vmatpush3.bf16.msra.mxu0 %v2288_v62  ;;  %v2369_v62 = vld [vmem:[%s3005_s0 + $0x178] ss:$36 sps:$4 sm:$0xff]  }
  0x32   :  { %2097 = vmatpush3.bf16.msra.mxu1 %v2289_v63  ;;  %2034 = vmatprep.subr.bf16.mxu0 %v2296_v3  ;;  %v2370_v63 = vld [vmem:[%s3005_s0 + $0x180] ss:$36 sps:$4 sm:$0xff]   ;;  %v2377_v3 = vld [vmem:[%s3005_s0 + $0x1c8] ss:$36 sps:$4 sm:$0xff]  }
  0x33   :  { %1091 = vmatmul.mubr.bf16.gmra.mrb[8].mxu0 %v2274_v50  ;;  %2098 = vmatprep.subr.bf16.mxu1 %v2297_v5  ;;  %v2353_v50 = vld [vmem:[%s3005_s0 + $0xf4] ss:$36 sps:$4 sm:$0xff]  }
  0x34   :  { %1188 = vmatmul.mubr.bf16.gmra.mrb[8].mxu1 %v2275_v51  ;;  %1098 = vmatprep.mubr.bf16.mxu0 %v2280_v56  ;;  %v2371_v51 = vld [vmem:[%s3004_s1 + $0x228] sm:$0xff]   ;;  %v2360_v56 = vld [vmem:[%s3005_s0 + $0x13c] ss:$36 sps:$4 sm:$0xff]   ;;  %v2381_v5 = vld [vmem:[%s3005_s0 + $0x214] ss:$36 sps:$4 sm:$0xff]  }
  0x35   :  { %1195 = vmatprep.mubr.bf16.mxu1 %v2282_v57  ;;  %2035 = vmatpush3.bf16.msra.mxu0 %v2298_v6  ;;  %v2385_v57 = vld [vmem:[%s3004_s1 + $0x238] sm:$0xff]   ;;  %v2383_v6 = vld [vmem:[%s3005_s0 + $0x208] ss:$36 sps:$4 sm:$0xff]  }
  0x36   :  { %2099 = vmatpush3.bf16.msra.mxu1 %v2299_v7  ;;  %2036 = vmatprep.subr.bf16.mxu0 %v2306_v10  ;;  %v2384_v7 = vld [vmem:[%s3005_s0 + $0x210] ss:$36 sps:$4 sm:$0xff]   ;;  %v2388_v10 = vld [vmem:[%s3005_s0 + $0x68] ss:$36 sps:$4 sm:$0xff]  }
  0x37   :  { %2100 = vmatprep.subr.bf16.mxu1 %v2307_v11  ;;  %v2389_v11 = vld [vmem:[%s3005_s0 + $0x188] ss:$36 sps:$4 sm:$0xff]  }
  0x39   :  { %2037 = vmatpush3.bf16.msra.mxu0 %v2308_v13  ;;  %v2391_v13 = vld [vmem:[%s3005_s0 + $0x1d0] ss:$36 sps:$4 sm:$0xff]  }
  0x3a   :  { %2101 = vmatpush3.bf16.msra.mxu1 %v2309_v14  ;;  %2038 = vmatprep.subr.bf16.mxu0 %v2316_v18  ;;  %v2392_v14 = vld [vmem:[%s3005_s0 + $0xf8] ss:$36 sps:$4 sm:$0xff]  }
  0x3b   :  { %1099 = vmatmul.mubr.bf16.gmra.mrb[12].mxu0 %v2284_v58  ;;  %2102 = vmatprep.subr.bf16.mxu1 %v2317_v19  ;;  %v2362_v58 = vld [vmem:[%s3005_s0 + $0x130] ss:$36 sps:$4 sm:$0xff]  }
  0x3c   :  { %1196 = vmatmul.mubr.bf16.gmra.mrb[12].mxu1 %v2285_v59  ;;  %1106 = vmatprep.mubr.bf16.mxu0 %v2290_v0  ;;  %v2363_v59 = vld [vmem:[%s3005_s0 + $0x138] ss:$36 sps:$4 sm:$0xff]   ;;  %v2372_v0 = vld [vmem:[%s3005_s0 + $0x1c4] ss:$36 sps:$4 sm:$0xff]  }
  0x3d   :  { %1203 = vmatprep.mubr.bf16.mxu1 %v2292_v1  ;;  %2039 = vmatpush3.bf16.msra.mxu0 %v2318_v20  ;;  %v2374_v1 = vld [vmem:[%s3005_s0 + $0x1cc] ss:$36 sps:$4 sm:$0xff]  }
  0x3e   :  { %2103 = vmatpush3.bf16.msra.mxu1 %v2319_v21  ;;  %2040 = vmatprep.subr.bf16.mxu0 %v2326_v26 }
  0x3f   :  { %2104 = vmatprep.subr.bf16.mxu1 %v2327_v27 }
  0x41   :  { %2041 = vmatpush3.bf16.msra.mxu0 %v2328_v28 }
  0x42   :  { %2105 = vmatpush3.bf16.msra.mxu1 %v2329_v29  ;;  %2170 = vmatprep.subr.bf16.mxu0 %v2336_v32 }
  0x43   :  { %1107 = vmatmul.mubr.bf16.gmra.mrb[16].mxu0 %v2294_v2  ;;  %2202 = vmatprep.subr.bf16.mxu1 %v2336_v32  ;;  %v2376_v2 = vld [vmem:[%s3005_s0 + $0x1c0] ss:$36 sps:$4 sm:$0xff]  }
  0x44   :  { %1204 = vmatmul.mubr.bf16.gmra.mrb[16].mxu1 %v2295_v4  ;;  %1114 = vmatprep.mubr.bf16.mxu0 %v2300_v8  ;;  %v2379_v4 = vld [vmem:[%s3005_s0 + $0x20c] ss:$36 sps:$4 sm:$0xff]   ;;  %v2386_v8 = vld [vmem:[%s3005_s0 + $0x20] ss:$36 sps:$4 sm:$0xff]  }
  0x45   :  { %1211 = vmatprep.mubr.bf16.mxu1 %v2302_v9  ;;  %v2387_v9 = vld [vmem:[%s3005_s0 + $0x140] ss:$36 sps:$4 sm:$0xff]  }
  0x4b   :  { %1115 = vmatmul.mubr.bf16.gmra.mrb[20].mxu0 %v2304_v12  ;;  %v2390_v12 = vld [vmem:[%s3005_s0 + $0xb0] ss:$36 sps:$4 sm:$0xff]  }
  0x4c   :  { %1212 = vmatmul.mubr.bf16.gmra.mrb[20].mxu1 %v2305_v15  ;;  %1122 = vmatprep.mubr.bf16.mxu0 %v2310_v16  ;;  %v2393_v15 = vld [vmem:[%s3005_s0 + $0x218] ss:$36 sps:$4 sm:$0xff]  }
  0x4d   :  { %1219 = vmatprep.mubr.bf16.mxu1 %v2312_v17 }
  0x53   :  { %1123 = vmatmul.mubr.bf16.gmra.mrb[24].mxu0 %v2314_v22 }
  0x54   :  { %1220 = vmatmul.mubr.bf16.gmra.mrb[24].mxu1 %v2315_v23  ;;  %1130 = vmatprep.mubr.bf16.mxu0 %v2320_v24 }
  0x55   :  { %1227 = vmatprep.mubr.bf16.mxu1 %v2322_v25 }
  0x5b   :  { %1131 = vmatmul.mubr.bf16.gmra.mrb[28].mxu0 %v2324_v30 }
  0x5c   :  { %1228 = vmatmul.mubr.bf16.gmra.mrb[28].mxu1 %v2325_v31  ;;  %1268 = vmatprep.mubr.bf16.mxu0 %v2332_v33 }
  0x5d   :  { %1365 = vmatprep.mubr.bf16.mxu1 %v2335_v34 }
  0x63   :  { %1269 = vmatmul.mubr.bf16.vlgmr.msra.gmra.mrb[32].mxu0 %v2330_v35 }
  0x64   :  { %1366 = vmatmul.mubr.bf16.vlgmr.msra.gmra.mrb[32].mxu1 %v2333_v36  ;;  %2171 = vmatpush3.bf16.msra.mxu0 %v2336_v32 }
  0x65   :  { %2210 = vmatpush3.bf16.msra.mxu1 %v2336_v32  ;;  %1276 = vmatprep.mubr.bf16.mxu0 %v2337_v37 }
  0x66   :  { %1373 = vmatprep.mubr.bf16.mxu1 %v2339_v38  ;;  %2172 = vmatprep.subr.bf16.mxu0 %v2343_v39 }
  0x67   :  { %2203 = vmatprep.subr.bf16.mxu1 %v2343_v39 }
  0x68   :  { %2173 = vmatpush3.bf16.msra.mxu0 %v2343_v39 }
  0x69   :  { %2211 = vmatpush3.bf16.msra.mxu1 %v2343_v39  ;;  %2174 = vmatprep.subr.bf16.mxu0 %v2350_v40 }
  0x6a   :  { %2204 = vmatprep.subr.bf16.mxu1 %v2350_v40 }
  0x6b   :  { %1277 = vmatmul.mubr.bf16.gmra.mrb[36].mxu0 %v2341_v41 }
  0x6c   :  { %1374 = vmatmul.mubr.bf16.gmra.mrb[36].mxu1 %v2342_v42  ;;  %1284 = vmatprep.mubr.bf16.mxu0 %v2344_v43 }
  0x6d   :  { %1381 = vmatprep.mubr.bf16.mxu1 %v2346_v44  ;;  %2175 = vmatpush3.bf16.msra.mxu0 %v2350_v40 }
  0x6e   :  { %2212 = vmatpush3.bf16.msra.mxu1 %v2350_v40  ;;  %2176 = vmatprep.subr.bf16.mxu0 %v2357_v45 }
  0x6f   :  { %2205 = vmatprep.subr.bf16.mxu1 %v2357_v45 }
  0x71   :  { %2177 = vmatpush3.bf16.msra.mxu0 %v2357_v45 }
  0x72   :  { %2213 = vmatpush3.bf16.msra.mxu1 %v2357_v45  ;;  %2178 = vmatprep.subr.bf16.mxu0 %v2364_v46 }
  0x73   :  { %1285 = vmatmul.mubr.bf16.gmra.mrb[40].mxu0 %v2348_v47  ;;  %2206 = vmatprep.subr.bf16.mxu1 %v2364_v46 }
  0x74   :  { %1382 = vmatmul.mubr.bf16.gmra.mrb[40].mxu1 %v2349_v48  ;;  %1292 = vmatprep.mubr.bf16.mxu0 %v2351_v49 }
  0x75   :  { %1389 = vmatprep.mubr.bf16.mxu1 %v2353_v50  ;;  %2179 = vmatpush3.bf16.msra.mxu0 %v2364_v46 }
  0x76   :  { %2214 = vmatpush3.bf16.msra.mxu1 %v2364_v46  ;;  %2180 = vmatprep.subr.bf16.mxu0 %v2371_v51 }
  0x77   :  { %2207 = vmatprep.subr.bf16.mxu1 %v2371_v51 }
  0x79   :  { %2181 = vmatpush3.bf16.msra.mxu0 %v2371_v51 }
  0x7a   :  { %2215 = vmatpush3.bf16.msra.mxu1 %v2371_v51  ;;  %2182 = vmatprep.subr.bf16.mxu0 %v2378_v53 }
  0x7b   :  { %1293 = vmatmul.mubr.bf16.gmra.mrb[44].mxu0 %v2355_v52  ;;  %2208 = vmatprep.subr.bf16.mxu1 %v2378_v53 }
  0x7c   :  { %1390 = vmatmul.mubr.bf16.gmra.mrb[44].mxu1 %v2356_v54  ;;  %1300 = vmatprep.mubr.bf16.mxu0 %v2358_v55 }
  0x7d   :  { %1397 = vmatprep.mubr.bf16.mxu1 %v2360_v56  ;;  %2183 = vmatpush3.bf16.msra.mxu0 %v2378_v53 }
  0x7e   :  { %2216 = vmatpush3.bf16.msra.mxu1 %v2378_v53  ;;  %2184 = vmatprep.subr.bf16.mxu0 %v2385_v57 }
  0x7f   :  { %2209 = vmatprep.subr.bf16.mxu1 %v2385_v57 }
  0x81   :  { %2185 = vmatpush3.bf16.msra.mxu0 %v2385_v57 }
  0x82   :  { %2217 = vmatpush3.bf16.msra.mxu1 %v2385_v57 }
  0x83   :  { %1301 = vmatmul.mubr.bf16.gmra.mrb[48].mxu0 %v2362_v58 }
  0x84   :  { %1398 = vmatmul.mubr.bf16.gmra.mrb[48].mxu1 %v2363_v59  ;;  %1308 = vmatprep.mubr.bf16.mxu0 %v2365_v60 }
  0x85   :  { %1405 = vmatprep.mubr.bf16.mxu1 %v2367_v61 }
  0x8b   :  { %1309 = vmatmul.mubr.bf16.gmra.mrb[52].mxu0 %v2369_v62 }
  0x8c   :  { %1406 = vmatmul.mubr.bf16.gmra.mrb[52].mxu1 %v2370_v63  ;;  %1316 = vmatprep.mubr.bf16.mxu0 %v2372_v0 }
  0x8d   :  { %1413 = vmatprep.mubr.bf16.mxu1 %v2374_v1 }
  0x93   :  { %1317 = vmatmul.mubr.bf16.gmra.mrb[56].mxu0 %v2376_v2 }
  0x94   :  { %1414 = vmatmul.mubr.bf16.gmra.mrb[56].mxu1 %v2377_v3  ;;  %1324 = vmatprep.mubr.bf16.mxu0 %v2379_v4 }
  0x95   :  { %1421 = vmatprep.mubr.bf16.mxu1 %v2381_v5 }
  0x9b   :  { %1325 = vmatmul.mubr.bf16.gmra.mrb[60].mxu0 %v2383_v6 }
  0x9c   :  { %1422 = vmatmul.mubr.bf16.gmra.mrb[60].mxu1 %v2384_v7  ;;  %2186 = vmatprep.mubr.bf16.mxu0 %v2386_v8 }
  0x9d   :  { %2194 = vmatprep.mubr.bf16.mxu1 %v2387_v9 }
  0xa3   :  { %2187 = vmatmul.mubr.bf16.vlgmr.msra.gmra.mrb[64].mxu0 %v2388_v10 }
  0xa4   :  { %2195 = vmatmul.mubr.bf16.vlgmr.msra.gmra.mrb[64].mxu1 %v2389_v11  ;;  %2190 = vmatprep.mubr.bf16.mxu0 %v2390_v12 }
  0xa5   :  { %2198 = vmatprep.mubr.bf16.mxu1 %v2391_v13 }
  0xab   :  { %2191 = vmatmul.mubr.bf16.gmra.mrb[68].mxu0 %v2392_v14 }
  0xac   :  { %2199 = vmatmul.mubr.bf16.gmra.mrb[68].mxu1 %v2393_v15 }
  0xf6   :  { %v1914_v16 = vpop.f32.mrb[0].mxu0 }
  0xf7   :  { %v1978_v17 = vpop.f32.mrb[0].mxu1  ;;  %v1915_v18 = vpop.f32.mrb[1].mxu0 }
  0xf8   :  { %v1916_v19 = vadd.f32 %v1915_v18, %v1914_v16  ;;  %v1979_v20 = vpop.f32.mrb[1].mxu1  ;;  %v1917_v21 = vpop.f32.mrb[2].mxu0 }
  0xf9   :  { %v1980_v22 = vadd.f32 %v1979_v20, %v1978_v17  ;;  %v1981_v23 = vpop.f32.mrb[2].mxu1  ;;  %v1918_v24 = vpop.f32.mrb[3].mxu0 }
  0xfa   :  { %v1919_v25 = vadd.f32 %v1918_v24, %v1917_v21  ;;  %v1982_v26 = vpop.f32.mrb[3].mxu1 }
  0xfb   :  { %v2851_v27 = vadd.f32 %v1980_v22, %v1916_v19  ;;  %v1983_v28 = vadd.f32 %v1982_v26, %v1981_v23 }
  0xfd   :  { %v2853_v29 = vadd.f32 %v1983_v28, %v1919_v25 }
  0xfe   :  { %v1920_v30 = vpop.f32.mrb[4].mxu0 }
  0xff   :  { %v1984_v31 = vpop.f32.mrb[4].mxu1  ;;  %v1921_v32 = vpop.f32.mrb[5].mxu0 }
 0x100   :  { %v1922_v33 = vadd.f32 %v1921_v32, %v1920_v30  ;;  %v1985_v34 = vpop.f32.mrb[5].mxu1  ;;  %v1923_v35 = vpop.f32.mrb[6].mxu0 }
 0x101   :  { %v1986_v36 = vadd.f32 %v1985_v34, %v1984_v31  ;;  %v1987_v37 = vpop.f32.mrb[6].mxu1  ;;  %v1924_v38 = vpop.f32.mrb[7].mxu0 }
 0x102   :  { %v1925_v39 = vadd.f32 %v1924_v38, %v1923_v35  ;;  %v1988_v40 = vpop.f32.mrb[7].mxu1 }
 0x103   :  { %v2855_v41 = vadd.f32 %v1986_v36, %v1922_v33  ;;  %v1989_v42 = vadd.f32 %v1988_v40, %v1987_v37 }
 0x105   :  { %v2857_v43 = vadd.f32 %v1989_v42, %v1925_v39 }
 0x106   :  { %v1926_v44 = vpop.f32.mrb[8].mxu0 }
 0x107   :  { %v1990_v45 = vpop.f32.mrb[8].mxu1  ;;  %v1927_v46 = vpop.f32.mrb[9].mxu0 }
 0x108   :  { %v1928_v47 = vadd.f32 %v1927_v46, %v1926_v44  ;;  %v1991_v48 = vpop.f32.mrb[9].mxu1  ;;  %v1929_v49 = vpop.f32.mrb[10].mxu0 }
 0x109   :  { %v1992_v50 = vadd.f32 %v1991_v48, %v1990_v45  ;;  %v1993_v51 = vpop.f32.mrb[10].mxu1  ;;  %v1930_v52 = vpop.f32.mrb[11].mxu0 }
 0x10a   :  { %v1931_v53 = vadd.f32 %v1930_v52, %v1929_v49  ;;  %v1994_v54 = vpop.f32.mrb[11].mxu1 }
 0x10b   :  { %v2859_v55 = vadd.f32 %v1992_v50, %v1928_v47  ;;  %v1995_v56 = vadd.f32 %v1994_v54, %v1993_v51 }
 0x10d   :  { %v2861_v57 = vadd.f32 %v1995_v56, %v1931_v53 }
 0x10e   :  { %v1932_v58 = vpop.f32.mrb[12].mxu0 }
 0x10f   :  { %v1996_v59 = vpop.f32.mrb[12].mxu1  ;;  %v1933_v60 = vpop.f32.mrb[13].mxu0 }
 0x110   :  { %v1934_v61 = vadd.f32 %v1933_v60, %v1932_v58  ;;  %v1997_v62 = vpop.f32.mrb[13].mxu1  ;;  %v1935_v63 = vpop.f32.mrb[14].mxu0 }
 0x111   :  { %v1998_v0 = vadd.f32 %v1997_v62, %v1996_v59  ;;  %v1999_v1 = vpop.f32.mrb[14].mxu1  ;;  %v1936_v2 = vpop.f32.mrb[15].mxu0 }
 0x112   :  { %v1937_v3 = vadd.f32 %v1936_v2, %v1935_v63  ;;  %v2000_v4 = vpop.f32.mrb[15].mxu1 }
 0x113   :  { %v2863_v5 = vadd.f32 %v1998_v0, %v1934_v61  ;;  %v2001_v6 = vadd.f32 %v2000_v4, %v1999_v1 }
 0x115   :  { %v2865_v7 = vadd.f32 %v2001_v6, %v1937_v3 }
 0x116   :  { %v1938_v8 = vpop.f32.mrb[16].mxu0 }
 0x117   :  { %v2002_v9 = vpop.f32.mrb[16].mxu1  ;;  %v1939_v10 = vpop.f32.mrb[17].mxu0 }
 0x118   :  { %v1940_v11 = vadd.f32 %v1939_v10, %v1938_v8  ;;  %v2003_v12 = vpop.f32.mrb[17].mxu1  ;;  %v1941_v13 = vpop.f32.mrb[18].mxu0 }
 0x119   :  { %v2004_v14 = vadd.f32 %v2003_v12, %v2002_v9  ;;  %v2005_v15 = vpop.f32.mrb[18].mxu1  ;;  %v1942_v16 = vpop.f32.mrb[19].mxu0 }
 0x11a   :  { %v1943_v17 = vadd.f32 %v1942_v16, %v1941_v13  ;;  %v2006_v18 = vpop.f32.mrb[19].mxu1 }
 0x11b   :  { %v2867_v19 = vadd.f32 %v2004_v14, %v1940_v11  ;;  %v2007_v20 = vadd.f32 %v2006_v18, %v2005_v15 }
 0x11d   :  { %v2869_v21 = vadd.f32 %v2007_v20, %v1943_v17 }
 0x11e   :  { %v1944_v22 = vpop.f32.mrb[20].mxu0 }
 0x11f   :  { %v2008_v23 = vpop.f32.mrb[20].mxu1  ;;  %v1945_v24 = vpop.f32.mrb[21].mxu0 }
 0x120   :  { %v1946_v25 = vadd.f32 %v1945_v24, %v1944_v22  ;;  %v2009_v26 = vpop.f32.mrb[21].mxu1  ;;  %v1947_v28 = vpop.f32.mrb[22].mxu0 }
 0x121   :  { %v2010_v30 = vadd.f32 %v2009_v26, %v2008_v23  ;;  %v2011_v31 = vpop.f32.mrb[22].mxu1  ;;  %v1948_v32 = vpop.f32.mrb[23].mxu0 }
 0x122   :  { %v1949_v33 = vadd.f32 %v1948_v32, %v1947_v28  ;;  %v2012_v34 = vpop.f32.mrb[23].mxu1 }
 0x123   :  { %v2871_v35 = vadd.f32 %v2010_v30, %v1946_v25  ;;  %v2013_v36 = vadd.f32 %v2012_v34, %v2011_v31 }
 0x125   :  { %v2873_v37 = vadd.f32 %v2013_v36, %v1949_v33 }
 0x126   :  { %v1950_v38 = vpop.f32.mrb[24].mxu0 }
 0x127   :  { %v2014_v39 = vpop.f32.mrb[24].mxu1  ;;  %v1951_v40 = vpop.f32.mrb[25].mxu0 }
 0x128   :  { %v1952_v42 = vadd.f32 %v1951_v40, %v1950_v38  ;;  %v2015_v44 = vpop.f32.mrb[25].mxu1  ;;  %v1953_v45 = vpop.f32.mrb[26].mxu0 }
 0x129   :  { %v2016_v46 = vadd.f32 %v2015_v44, %v2014_v39  ;;  %v2017_v47 = vpop.f32.mrb[26].mxu1  ;;  %v1954_v48 = vpop.f32.mrb[27].mxu0 }
 0x12a   :  { %v1955_v49 = vadd.f32 %v1954_v48, %v1953_v45  ;;  %v2018_v50 = vpop.f32.mrb[27].mxu1 }
 0x12b   :  { %v2875_v51 = vadd.f32 %v2016_v46, %v1952_v42  ;;  %v2019_v52 = vadd.f32 %v2018_v50, %v2017_v47 }
 0x12d   :  { %v2877_v53 = vadd.f32 %v2019_v52, %v1955_v49 }
 0x12e   :  { %v1956_v54 = vpop.f32.mrb[28].mxu0 }
 0x12f   :  { %v2020_v56 = vpop.f32.mrb[28].mxu1  ;;  %v1957_v58 = vpop.f32.mrb[29].mxu0 }
 0x130   :  { %v1958_v59 = vadd.f32 %v1957_v58, %v1956_v54  ;;  %v2021_v60 = vpop.f32.mrb[29].mxu1  ;;  %v1959_v61 = vpop.f32.mrb[30].mxu0 }
 0x131   :  { %v2022_v62 = vadd.f32 %v2021_v60, %v2020_v56  ;;  %v2023_v63 = vpop.f32.mrb[30].mxu1  ;;  %v1960_v0 = vpop.f32.mrb[31].mxu0 }
 0x132   :  { %v1961_v1 = vadd.f32 %v1960_v0, %v1959_v61  ;;  %v2024_v2 = vpop.f32.mrb[31].mxu1 }
 0x133   :  { %v2879_v3 = vadd.f32 %v2022_v62, %v1958_v59  ;;  %v2025_v4 = vadd.f32 %v2024_v2, %v2023_v63 }
 0x135   :  { %v2881_v6 = vadd.f32 %v2025_v4, %v1961_v1 }
 0x136   :  { %v2042_v8 = vpop.f32.mrb[32].mxu0 }
 0x137   :  { %v2106_v9 = vpop.f32.mrb[32].mxu1  ;;  %v2043_v10 = vpop.f32.mrb[33].mxu0 }
 0x138   :  { %v2044_v11 = vadd.f32 %v2043_v10, %v2042_v8  ;;  %v2107_v12 = vpop.f32.mrb[33].mxu1  ;;  %v2045_v13 = vpop.f32.mrb[34].mxu0 }
 0x139   :  { %v2108_v14 = vadd.f32 %v2107_v12, %v2106_v9  ;;  %v2109_v15 = vpop.f32.mrb[34].mxu1  ;;  %v2046_v16 = vpop.f32.mrb[35].mxu0 }
 0x13a   :  { %v1271_v17 = vadd.f32 %v2044_v11, %v2851_v27  ;;  %v2047_v18 = vadd.f32 %v2046_v16, %v2045_v13  ;;  %v2110_v20 = vpop.f32.mrb[35].mxu1 }
 0x13b   :  { %v2111_v22 = vadd.f32 %v2110_v20, %v2109_v15 }
 0x13c   :  { %v1274_v23 = vadd.f32 %v2047_v18, %v2853_v29  ;;  %v2885_v24 = vadd.f32 %v2108_v14, %v1271_v17 }
 0x13e   :  { %v2048_v25 = vpop.f32.mrb[36].mxu0  ;;  %v2887_v26 = vadd.f32 %v2111_v22, %v1274_v23 }
 0x13f   :  { %v2112_v28 = vpop.f32.mrb[36].mxu1  ;;  %v2049_v30 = vpop.f32.mrb[37].mxu0 }
 0x140   :  { %v2050_v31 = vadd.f32 %v2049_v30, %v2048_v25  ;;  %v2113_v32 = vpop.f32.mrb[37].mxu1  ;;  %v2051_v33 = vpop.f32.mrb[38].mxu0 }
 0x141   :  { %v2114_v34 = vadd.f32 %v2113_v32, %v2112_v28  ;;  %v2115_v36 = vpop.f32.mrb[38].mxu1  ;;  %v2052_v38 = vpop.f32.mrb[39].mxu0 }
 0x142   :  { %v1279_v27 = vadd.f32 %v2050_v31, %v2855_v41  ;;  %v2053_v39 = vadd.f32 %v2052_v38, %v2051_v33  ;;  %v2116_v40 = vpop.f32.mrb[39].mxu1 }
 0x143   :  { %v2117_v42 = vadd.f32 %v2116_v40, %v2115_v36 }
 0x144   :  { %v1282_v29 = vadd.f32 %v2053_v39, %v2857_v43  ;;  %v2891_v44 = vadd.f32 %v2114_v34, %v1279_v27 }
 0x146   :  { %v2054_v45 = vpop.f32.mrb[40].mxu0  ;;  %v2893_v46 = vadd.f32 %v2117_v42, %v1282_v29 }
 0x147   :  { %v2118_v47 = vpop.f32.mrb[40].mxu1  ;;  %v2055_v48 = vpop.f32.mrb[41].mxu0 }
 0x148   :  { %v2056_v49 = vadd.f32 %v2055_v48, %v2054_v45  ;;  %v2119_v50 = vpop.f32.mrb[41].mxu1  ;;  %v2057_v52 = vpop.f32.mrb[42].mxu0 }
 0x149   :  { %v2120_v54 = vadd.f32 %v2119_v50, %v2118_v47  ;;  %v2121_v56 = vpop.f32.mrb[42].mxu1  ;;  %v2058_v58 = vpop.f32.mrb[43].mxu0 }
 0x14a   :  { %v1287_v41 = vadd.f32 %v2056_v49, %v2859_v55  ;;  %v2059_v59 = vadd.f32 %v2058_v58, %v2057_v52  ;;  %v2122_v60 = vpop.f32.mrb[43].mxu1 }
 0x14b   :  { %v2123_v61 = vadd.f32 %v2122_v60, %v2121_v56 }
 0x14c   :  { %v1290_v43 = vadd.f32 %v2059_v59, %v2861_v57  ;;  %v2897_v62 = vadd.f32 %v2120_v54, %v1287_v41 }
 0x14e   :  { %v2060_v63 = vpop.f32.mrb[44].mxu0  ;;  %v2899_v0 = vadd.f32 %v2123_v61, %v1290_v43 }
 0x14f   :  { %v2124_v1 = vpop.f32.mrb[44].mxu1  ;;  %v2061_v2 = vpop.f32.mrb[45].mxu0 }
 0x150   :  { %v2062_v4 = vadd.f32 %v2061_v2, %v2060_v63  ;;  %v2125_v8 = vpop.f32.mrb[45].mxu1  ;;  %v2063_v9 = vpop.f32.mrb[46].mxu0 }
 0x151   :  { %v2126_v10 = vadd.f32 %v2125_v8, %v2124_v1  ;;  %v2127_v11 = vpop.f32.mrb[46].mxu1  ;;  %v2064_v12 = vpop.f32.mrb[47].mxu0 }
 0x152   :  { %v1295_v55 = vadd.f32 %v2062_v4, %v2863_v5  ;;  %v2065_v13 = vadd.f32 %v2064_v12, %v2063_v9  ;;  %v2128_v14 = vpop.f32.mrb[47].mxu1 }
 0x153   :  { %v2129_v15 = vadd.f32 %v2128_v14, %v2127_v11 }
 0x154   :  { %v1298_v57 = vadd.f32 %v2065_v13, %v2865_v7  ;;  %v2903_v16 = vadd.f32 %v2126_v10, %v1295_v55 }
 0x156   :  { %v2066_v17 = vpop.f32.mrb[48].mxu0  ;;  %v2905_v18 = vadd.f32 %v2129_v15, %v1298_v57 }
 0x157   :  { %v2130_v20 = vpop.f32.mrb[48].mxu1  ;;  %v2067_v22 = vpop.f32.mrb[49].mxu0 }
 0x158   :  { %v2068_v23 = vadd.f32 %v2067_v22, %v2066_v17  ;;  %v2131_v25 = vpop.f32.mrb[49].mxu1  ;;  %v2069_v28 = vpop.f32.mrb[50].mxu0 }
 0x159   :  { %v2132_v30 = vadd.f32 %v2131_v25, %v2130_v20  ;;  %v2133_v31 = vpop.f32.mrb[50].mxu1  ;;  %v2070_v32 = vpop.f32.mrb[51].mxu0 }
 0x15a   :  { %v1303_v5 = vadd.f32 %v2068_v23, %v2867_v19  ;;  %v2071_v33 = vadd.f32 %v2070_v32, %v2069_v28  ;;  %v2134_v34 = vpop.f32.mrb[51].mxu1 }
 0x15b   :  { %v2135_v36 = vadd.f32 %v2134_v34, %v2133_v31 }
 0x15c   :  { %v1306_v7 = vadd.f32 %v2071_v33, %v2869_v21  ;;  %v2909_v38 = vadd.f32 %v2132_v30, %v1303_v5  ;;  %v2926_v33 = vld [vmem:[%s3006_s2] ss:$0 sm:$0xff] }
 0x15e   :  { %v2072_v27 = vpop.f32.mrb[52].mxu0  ;;  %v2911_v39 = vadd.f32 %v2135_v36, %v1306_v7 }
 0x15f   :  { %v2136_v40 = vpop.f32.mrb[52].mxu1  ;;  %v2073_v42 = vpop.f32.mrb[53].mxu0 }
 0x160   :  { %v2074_v29 = vadd.f32 %v2073_v42, %v2072_v27  ;;  %v2137_v45 = vpop.f32.mrb[53].mxu1  ;;  %v2075_v47 = vpop.f32.mrb[54].mxu0 }
 0x161   :  { %v2138_v48 = vadd.f32 %v2137_v45, %v2136_v40  ;;  %v2139_v49 = vpop.f32.mrb[54].mxu1  ;;  %v2076_v50 = vpop.f32.mrb[55].mxu0 }
 0x162   :  { %v1311_v19 = vadd.f32 %v2074_v29, %v2871_v35  ;;  %v2077_v52 = vadd.f32 %v2076_v50, %v2075_v47  ;;  %v2140_v54 = vpop.f32.mrb[55].mxu1 }
 0x163   :  { %v2141_v56 = vadd.f32 %v2140_v54, %v2139_v49 }
 0x164   :  { %v1314_v21 = vadd.f32 %v2077_v52, %v2873_v37  ;;  %v1408_v58 = vadd.f32 %v2138_v48, %v1311_v19 }
 0x166   :  { %v2078_v41 = vpop.f32.mrb[56].mxu0  ;;  %v1411_v59 = vadd.f32 %v2141_v56, %v1314_v21 }
 0x167   :  { %v2142_v60 = vpop.f32.mrb[56].mxu1  ;;  %v2079_v61 = vpop.f32.mrb[57].mxu0 }
 0x168   :  { %v2080_v43 = vadd.f32 %v2079_v61, %v2078_v41  ;;  %v2143_v63 = vpop.f32.mrb[57].mxu1  ;;  %v2081_v1 = vpop.f32.mrb[58].mxu0 }
 0x169   :  { %v2144_v2 = vadd.f32 %v2143_v63, %v2142_v60  ;;  %v2145_v4 = vpop.f32.mrb[58].mxu1  ;;  %v2082_v8 = vpop.f32.mrb[59].mxu0 }
 0x16a   :  { %v1319_v9 = vadd.f32 %v2080_v43, %v2875_v51  ;;  %v2083_v10 = vadd.f32 %v2082_v8, %v2081_v1  ;;  %v2146_v35 = vpop.f32.mrb[59].mxu1 }
 0x16b   :  { %v2147_v11 = vadd.f32 %v2146_v35, %v2145_v4 }
 0x16c   :  { %v1322_v12 = vadd.f32 %v2083_v10, %v2877_v53  ;;  %v2917_v55 = vadd.f32 %v2144_v2, %v1319_v9 }
 0x16e   :  { %v2084_v37 = vpop.f32.mrb[60].mxu0  ;;  %v2919_v13 = vadd.f32 %v2147_v11, %v1322_v12 }
 0x16f   :  { %v2148_v14 = vpop.f32.mrb[60].mxu1  ;;  %v2085_v15 = vpop.f32.mrb[61].mxu0 }
 0x170   :  { %v2086_v57 = vadd.f32 %v2085_v15, %v2084_v37  ;;  %v2149_v17 = vpop.f32.mrb[61].mxu1  ;;  %v2087_v20 = vpop.f32.mrb[62].mxu0 }
 0x171   :  { %v2150_v22 = vadd.f32 %v2149_v17, %v2148_v14  ;;  %v2151_v23 = vpop.f32.mrb[62].mxu1  ;;  %v2088_v25 = vpop.f32.mrb[63].mxu0 }
 0x172   :  { %v1327_v51 = vadd.f32 %v2086_v57, %v2879_v3  ;;  %v2089_v28 = vadd.f32 %v2088_v25, %v2087_v20  ;;  %v2152_v30 = vpop.f32.mrb[63].mxu1  ;;  %v2934_v3 = vld [vmem:[%s3007_s3] ss:$0 sm:$0xff] }
 0x173   :  { %v2153_v31 = vadd.f32 %v2152_v30, %v2151_v23 }
 0x174   :  { %v1330_v53 = vadd.f32 %v2089_v28, %v2881_v6  ;;  %v1424_v32 = vadd.f32 %v2150_v22, %v1327_v51 }
 0x176   :  { %v2188_v5 = vpop.f32.mrb[64].mxu0  ;;  %v2928_v34 = vadd.f32 %v2153_v31, %v1330_v53 }
 0x177   :  { %v1473_v36 = vadd.f32 %v2188_v5, %v2891_v44  ;;  %v2196_v7 = vpop.f32.mrb[64].mxu1  ;;  %v1464_v27 = vpop.f32.mrb[65].mxu0 }
 0x178   :  { %v1505_v40 = vadd.f32 %v2196_v7, %v1408_v58  ;;  %v1465_v6 = vadd.f32 %v1464_v27, %v2885_v24  ;;  %v1496_v42 = vpop.f32.mrb[65].mxu1  ;;  %v2189_v29 = vpop.f32.mrb[66].mxu0 }
 0x179   :  { %v1536_v45 = vmul.f32 %v2926_v33, %v1473_v36  ;;  %v1497_v47 = vadd.f32 %v1496_v42, %v2909_v38  ;;  %v1476_v48 = vadd.f32 %v2189_v29, %v2893_v46  ;;  %v2197_v49 = vpop.f32.mrb[66].mxu1  ;;  %v1467_v44 = vpop.f32.mrb[67].mxu0 }
 0x17a   :  { %v1544_v50 = vmul.f32 %v2926_v33, %v1505_v40  ;;  %v1534_v19 = vmul.f32 %v2926_v33, %v1465_v6  ;;  %v1508_v52 = vadd.f32 %v2197_v49, %v1411_v59  ;;  %v1468_v54 = vadd.f32 %v1467_v44, %v2887_v26  ;;  %v1499_v56 = vpop.f32.mrb[67].mxu1 }
 0x17b   :  { %v1559_v24 = vadd.f32 %v2934_v3, %v1536_v45  ;;  %v1542_v21 = vmul.f32 %v2926_v33, %v1497_v47  ;;  %v1537_v58 = vmul.f32 %v2926_v33, %v1476_v48  ;;  %v1500_v38 = vadd.f32 %v1499_v56, %v2911_v39 }
 0x17c   :  { %v1567_v46 = vadd.f32 %v2934_v3, %v1544_v50  ;;  %v1557_v41 = vadd.f32 %v2934_v3, %v1534_v19  ;;  %v1545_v60 = vmul.f32 %v2926_v33, %v1508_v52  ;;  %v1535_v61 = vmul.f32 %v2926_v33, %v1468_v54 }
 0x17d   :  { %v1575_v59 = vmax.f32 %v1559_v24, 0.0  ;;  %v1565_v26 = vadd.f32 %v2934_v3, %v1542_v21  ;;  %v1560_v43 = vadd.f32 %v2934_v3, %v1537_v58  ;;  %v1543_v63 = vmul.f32 %v2926_v33, %v1500_v38 }
 0x17e   :  { %v1583_v1 = vmax.f32 %v1567_v46, 0.0  ;;  %v1573_v2 = vmax.f32 %v1557_v41, 0.0  ;;  %v1568_v4 = vadd.f32 %v2934_v3, %v1545_v60  ;;  %v1558_v39 = vadd.f32 %v2934_v3, %v1535_v61  ;;  %v2192_v8 = vpop.f32.mrb[68].mxu0 }
 0x17f   :  { %v1581_v9 = vmax.f32 %v1565_v26, 0.0  ;;  %v1576_v10 = vmax.f32 %v1560_v43, 0.0  ;;  %v1566_v35 = vadd.f32 %v2934_v3, %v1543_v63  ;;  %v1489_v11 = vadd.f32 %v2192_v8, %v2903_v16  ;;  %v2200_v12 = vpop.f32.mrb[68].mxu1  ;;  %v1480_v37 = vpop.f32.mrb[69].mxu0 }
 0x180   :  { %v1584_v14 = vmax.f32 %v1568_v4, 0.0  ;;  %v1574_v15 = vmax.f32 %v1558_v39, 0.0  ;;  %v1521_v57 = vadd.f32 %v2200_v12, %v1424_v32  ;;  %v1481_v17 = vadd.f32 %v1480_v37, %v2897_v62  ;;  %v1512_v20 = vpop.f32.mrb[69].mxu1  ;;  %v2193_v22 = vpop.f32.mrb[70].mxu0 }
 0x181   :  { %v1859_v23 = vpack.c.bf16 %v1576_v10, %v1575_v59  ;;  %v1582_v25 = vmax.f32 %v1566_v35, 0.0  ;;  %v1540_v51 = vmul.f32 %v2926_v33, %v1489_v11  ;;  %v1513_v28 = vadd.f32 %v1512_v20, %v2917_v55  ;;  %v2201_v30 = vpop.f32.mrb[70].mxu1  ;;  %v1483_v31 = vpop.f32.mrb[71].mxu0 }
 0x182   :  { %v1879_v53 = vpack.c.bf16 %v1584_v14, %v1583_v1  ;;  %v1854_v5 = vpack.c.bf16 %v1574_v15, %v1573_v2  ;;  %v1548_v16 = vmul.f32 %v2926_v33, %v1521_v57  ;;  %v1538_v36 = vmul.f32 %v2926_v33, %v1481_v17  ;;  %v1515_v7 = vpop.f32.mrb[71].mxu1 }
 0x183   :  { %1891 = vst [vmem:[%s3008_s4 + $0x8] sm:$0xff] %v1859_v23   ;;  %v1874_v62 = vpack.c.bf16 %v1582_v25, %v1581_v9  ;;  %v1546_v32 = vmul.f32 %v2926_v33, %v1513_v28  ;;  %v1492_v27 = vadd.f32 %v2193_v22, %v2905_v18  ;;  %v1524_v55 = vadd.f32 %v2201_v30, %v2928_v34 }
 0x184   :  { %1895 = vst [vmem:[%s3008_s4 + $0x28] sm:$0xff] %v1879_v53   ;;  %1855 = vst [vmem:[%s3008_s4] sm:$0xff] %v1854_v5   ;;  %v1484_v40 = vadd.f32 %v1483_v31, %v2899_v0  ;;  %v1563_v6 = vadd.f32 %v2934_v3, %v1540_v51  ;;  %v1516_v42 = vadd.f32 %v1515_v7, %v2919_v13 }
 0x185   :  { %1894 = vst [vmem:[%s3008_s4 + $0x20] sm:$0xff] %v1874_v62   ;;  %v1541_v18 = vmul.f32 %v2926_v33, %v1492_v27  ;;  %v1571_v29 = vadd.f32 %v2934_v3, %v1548_v16  ;;  %v1561_v45 = vadd.f32 %v2934_v3, %v1538_v36  ;;  %v1549_v47 = vmul.f32 %v2926_v33, %v1524_v55 }
 0x186   :  { %v1539_v34 = vmul.f32 %v2926_v33, %v1484_v40  ;;  %v1569_v0 = vadd.f32 %v2934_v3, %v1546_v32  ;;  %v1547_v49 = vmul.f32 %v2926_v33, %v1516_v42  ;;  %v1579_v19 = vmax.f32 %v1563_v6, 0.0 }
 0x187   :  { %v1564_v48 = vadd.f32 %v2934_v3, %v1541_v18  ;;  %v1572_v44 = vadd.f32 %v2934_v3, %v1549_v47  ;;  %v1587_v54 = vmax.f32 %v1571_v29, 0.0  ;;  %v1577_v56 = vmax.f32 %v1561_v45, 0.0 }
 0x188   :  { %v1562_v50 = vadd.f32 %v2934_v3, %v1539_v34  ;;  %v1570_v52 = vadd.f32 %v2934_v3, %v1547_v49  ;;  %v1585_v58 = vmax.f32 %v1569_v0, 0.0 }
 0x189   :  { %v1580_v13 = vmax.f32 %v1564_v48, 0.0  ;;  %v1588_v24 = vmax.f32 %v1572_v44, 0.0 }
 0x18a   :  { %v1578_v21 = vmax.f32 %v1562_v50, 0.0  ;;  %v1586_v46 = vmax.f32 %v1570_v52, 0.0 }
 0x18b   :  { %v1869_v38 = vpack.c.bf16 %v1580_v13, %v1579_v19  ;;  %v1889_v41 = vpack.c.bf16 %v1588_v24, %v1587_v54 }
 0x18c   :  { %v1864_v60 = vpack.c.bf16 %v1578_v21, %v1577_v56  ;;  %v1884_v33 = vpack.c.bf16 %v1586_v46, %v1585_v58 }
 0x18d   :  { %1893 = vst [vmem:[%s3008_s4 + $0x18] sm:$0xff] %v1869_v38   ;;  %1897 = vst [vmem:[%s3008_s4 + $0x38] sm:$0xff] %v1889_v41  }
 0x18e   :  { %1892 = vst [vmem:[%s3008_s4 + $0x10] sm:$0xff] %v1864_v60   ;;  %1896 = vst [vmem:[%s3008_s4 + $0x30] sm:$0xff] %v1884_v33  }

// kernel: _lambda_.21
= control target key start
LH: loop header
LB: loop body
LE: loop exit
PB: predicated region body
PF: predicated region fallthrough
CT: control target
= control target key end

     0   :  { %v6003_v0 = vmov 0   ;;  %s7845_s1 = inlined_call_operand.vmem [shape: bf16[1152,128], index: 1, kind: input, shape index: {}]   ;;  %s7846_s0 = inlined_call_operand.vmem [shape: bf16[512,1152], index: 0, kind: input, shape index: {}]   ;;  %s7847_s2 = inlined_call_operand.vmem [shape: f32[1,128], index: 2, kind: input, shape index: {}]   ;;  %s7848_s3 = inlined_call_operand.vmem [shape: f32[1,128], index: 3, kind: input, shape index: {}]   ;;  %s7849_s4 = inlined_call_operand.vmem [shape: bf16[512,128], index: 4, kind: output, shape index: {}]  }
   0x1   :  { %2386 = vmatprep.subr.bf16.mxu1 %v6003_v0  ;;  %2675 = vmatprep.subr.bf16.mxu0 %v6003_v0  ;;  %v5515_v1 = vld [vmem:[%s7845_s1] sm:$0xff]   ;;  %v5517_v3 = vld [vmem:[%s7845_s1 + $0x8] sm:$0xff]   ;;  %v5519_v5 = vld [vmem:[%s7845_s1 + $0x10] sm:$0xff]  }
   0x2   :  { %v6037_v2 = vld [vmem:[%s7845_s1 + $0x80] sm:$0xff]   ;;  %2387 = vmatpush1.bf16.msra.mxu1 %v5515_v1  ;;  %v6047_v4 = vld [vmem:[%s7845_s1 + $0x88] sm:$0xff]   ;;  %v6058_v6 = vld [vmem:[%s7845_s1 + $0x90] sm:$0xff]  }
   0x3   :  { %2676 = vmatpush1.bf16.msra.mxu0 %v6037_v2  ;;  %2388 = vmatprep.subr.bf16.mxu1 %v6003_v0  ;;  %v5521_v7 = vld [vmem:[%s7845_s1 + $0x18] sm:$0xff]   ;;  %v5523_v9 = vld [vmem:[%s7845_s1 + $0x20] sm:$0xff]   ;;  %v5525_v11 = vld [vmem:[%s7845_s1 + $0x28] sm:$0xff]  }
   0x4   :  { %2677 = vmatprep.subr.bf16.mxu0 %v6003_v0  ;;  %v6069_v8 = vld [vmem:[%s7845_s1 + $0x98] sm:$0xff]   ;;  %v6080_v10 = vld [vmem:[%s7845_s1 + $0xa0] sm:$0xff]   ;;  %v6091_v12 = vld [vmem:[%s7845_s1 + $0xa8] sm:$0xff]  }
   0x5   :  { %v5527_v13 = vld [vmem:[%s7845_s1 + $0x30] sm:$0xff]   ;;  %v5529_v15 = vld [vmem:[%s7845_s1 + $0x38] sm:$0xff]   ;;  %v5531_v17 = vld [vmem:[%s7845_s1 + $0x40] sm:$0xff]  }
   0x6   :  { %2389 = vmatpush1.bf16.msra.mxu1 %v5517_v3  ;;  %v6102_v14 = vld [vmem:[%s7845_s1 + $0xb0] sm:$0xff]   ;;  %v6113_v16 = vld [vmem:[%s7845_s1 + $0xb8] sm:$0xff]   ;;  %v6124_v18 = vld [vmem:[%s7845_s1 + $0xc0] sm:$0xff]  }
   0x7   :  { %2678 = vmatpush1.bf16.msra.mxu0 %v6047_v4  ;;  %2390 = vmatprep.subr.bf16.mxu1 %v6003_v0  ;;  %v5549_v19 = vld [vmem:[%s7846_s0 + $0x4] ss:$36 sps:$4 sm:$0xff]   ;;  %v5552_v21 = vld [vmem:[%s7846_s0 + $0xc] ss:$36 sps:$4 sm:$0xff]   ;;  %v5537_v25 = vld [vmem:[%s7845_s1 + $0x58] sm:$0xff]  }
   0x8   :  { %2679 = vmatprep.subr.bf16.mxu0 %v6003_v0  ;;  %v5533_v20 = vld [vmem:[%s7845_s1 + $0x48] sm:$0xff]   ;;  %2418 = vmatprep.mubr.bf16.mxu1 %v5549_v19  ;;  %v5535_v23 = vld [vmem:[%s7845_s1 + $0x50] sm:$0xff]   ;;  %v6163_v26 = vld [vmem:[%s7845_s1 + $0xd8] sm:$0xff]  }
   0x9   :  { %v6141_v22 = vld [vmem:[%s7845_s1 + $0xc8] sm:$0xff]   ;;  %2707 = vmatprep.mubr.bf16.mxu0 %v5552_v21  ;;  %v6152_v24 = vld [vmem:[%s7845_s1 + $0xd0] sm:$0xff]   ;;  %v5539_v27 = vld [vmem:[%s7845_s1 + $0x60] sm:$0xff]  }
   0xa   :  { %2391 = vmatpush1.bf16.msra.mxu1 %v5519_v5  ;;  %v6174_v28 = vld [vmem:[%s7845_s1 + $0xe0] sm:$0xff]   ;;  %v5541_v29 = vld [vmem:[%s7845_s1 + $0x68] sm:$0xff]   ;;  %v5543_v31 = vld [vmem:[%s7845_s1 + $0x70] sm:$0xff]  }
   0xb   :  { %2680 = vmatpush1.bf16.msra.mxu0 %v6058_v6  ;;  %2392 = vmatprep.subr.bf16.mxu1 %v6003_v0  ;;  %v6185_v30 = vld [vmem:[%s7845_s1 + $0xe8] sm:$0xff]   ;;  %v6196_v32 = vld [vmem:[%s7845_s1 + $0xf0] sm:$0xff]   ;;  %v5545_v33 = vld [vmem:[%s7845_s1 + $0x78] sm:$0xff]  }
   0xc   :  { %2681 = vmatprep.subr.bf16.mxu0 %v6003_v0  ;;  %v6207_v34 = vld [vmem:[%s7845_s1 + $0xf8] sm:$0xff]   ;;  %v5547_v35 = vld [vmem:[%s7846_s0] ss:$36 sps:$4 sm:$0xff]   ;;  %v5550_v36 = vld [vmem:[%s7846_s0 + $0x8] ss:$36 sps:$4 sm:$0xff]  }
   0xd   :  { %v5553_v37 = vld [vmem:[%s7845_s1 + $0x100] sm:$0xff]   ;;  %v5555_v38 = vld [vmem:[%s7846_s0 + $0x4c] ss:$36 sps:$4 sm:$0xff]   ;;  %v5557_v39 = vld [vmem:[%s7846_s0 + $0x54] ss:$36 sps:$4 sm:$0xff]  }
   0xe   :  { %2393 = vmatpush1.bf16.msra.mxu1 %v5521_v7  ;;  %v5554_v40 = vld [vmem:[%s7845_s1 + $0x108] sm:$0xff]   ;;  %v5560_v42 = vld [vmem:[%s7846_s0 + $0x50] ss:$36 sps:$4 sm:$0xff]   ;;  %v5565_v45 = vld [vmem:[%s7846_s0 + $0x9c] ss:$36 sps:$4 sm:$0xff]  }
   0xf   :  { %2682 = vmatpush1.bf16.msra.mxu0 %v6069_v8  ;;  %2394 = vmatprep.subr.bf16.mxu1 %v6003_v0  ;;  %v5559_v41 = vld [vmem:[%s7846_s0 + $0x48] ss:$36 sps:$4 sm:$0xff]   ;;  %v5563_v43 = vld [vmem:[%s7846_s0 + $0x94] ss:$36 sps:$4 sm:$0xff]   ;;  %v5569_v49 = vld [vmem:[%s7845_s1 + $0x120] sm:$0xff]  }
  0x10   :  { %2683 = vmatprep.subr.bf16.mxu0 %v6003_v0  ;;  %v5561_v44 = vld [vmem:[%s7845_s1 + $0x110] sm:$0xff]   ;;  %v5562_v46 = vld [vmem:[%s7845_s1 + $0x118] sm:$0xff]   ;;  %v5573_v51 = vld [vmem:[%s7846_s0 + $0xe4] ss:$36 sps:$4 sm:$0xff]  }
  0x11   :  { %v5567_v47 = vld [vmem:[%s7846_s0 + $0x90] ss:$36 sps:$4 sm:$0xff]   ;;  %v5568_v48 = vld [vmem:[%s7846_s0 + $0x98] ss:$36 sps:$4 sm:$0xff]   ;;  %v5570_v52 = vld [vmem:[%s7845_s1 + $0x128] sm:$0xff]  }
  0x12   :  { %2395 = vmatpush1.bf16.msra.mxu1 %v5523_v9  ;;  %v5571_v50 = vld [vmem:[%s7846_s0 + $0xdc] ss:$36 sps:$4 sm:$0xff]   ;;  %v5579_v55 = vld [vmem:[%s7846_s0 + $0x124] ss:$36 sps:$4 sm:$0xff]   ;;  %v5577_v56 = vld [vmem:[%s7845_s1 + $0x130] sm:$0xff]  }
  0x13   :  { %2684 = vmatpush1.bf16.msra.mxu0 %v6080_v10  ;;  %2396 = vmatprep.subr.bf16.mxu1 %v6003_v0  ;;  %v5575_v53 = vld [vmem:[%s7846_s0 + $0xd8] ss:$36 sps:$4 sm:$0xff]   ;;  %v5576_v54 = vld [vmem:[%s7846_s0 + $0xe0] ss:$36 sps:$4 sm:$0xff]   ;;  %v5581_v57 = vld [vmem:[%s7846_s0 + $0x12c] ss:$36 sps:$4 sm:$0xff]  }
  0x14   :  { %2685 = vmatprep.subr.bf16.mxu0 %v6003_v0  ;;  %v5578_v58 = vld [vmem:[%s7845_s1 + $0x138] sm:$0xff]   ;;  %v5583_v59 = vld [vmem:[%s7846_s0 + $0x120] ss:$36 sps:$4 sm:$0xff]   ;;  %v5584_v60 = vld [vmem:[%s7846_s0 + $0x128] ss:$36 sps:$4 sm:$0xff]  }
  0x15   :  { %v5585_v61 = vld [vmem:[%s7845_s1 + $0x140] sm:$0xff]   ;;  %v5587_v62 = vld [vmem:[%s7846_s0 + $0x16c] ss:$36 sps:$4 sm:$0xff]   ;;  %v5589_v63 = vld [vmem:[%s7846_s0 + $0x174] ss:$36 sps:$4 sm:$0xff]  }
  0x16   :  { %2397 = vmatpush1.bf16.msra.mxu1 %v5525_v11  ;;  %v5586_v1 = vld [vmem:[%s7845_s1 + $0x148] sm:$0xff]   ;;  %v5592_v3 = vld [vmem:[%s7846_s0 + $0x170] ss:$36 sps:$4 sm:$0xff]   ;;  %v5594_v7 = vld [vmem:[%s7845_s1 + $0x158] sm:$0xff]  }
  0x17   :  { %2686 = vmatpush1.bf16.msra.mxu0 %v6091_v12  ;;  %2398 = vmatprep.subr.bf16.mxu1 %v6003_v0  ;;  %v5593_v5 = vld [vmem:[%s7845_s1 + $0x150] sm:$0xff]   ;;  %v5600_v9 = vld [vmem:[%s7846_s0 + $0x1b8] ss:$36 sps:$4 sm:$0xff]  }
  0x18   :  { %2687 = vmatprep.subr.bf16.mxu0 %v6003_v0  ;;  %v5603_v11 = vld [vmem:[%s7846_s0 + $0x1fc] ss:$36 sps:$4 sm:$0xff]   ;;  %v5613_v21 = vld [vmem:[%s7846_s0 + $0x10] ss:$36 sps:$4 sm:$0xff]  }
  0x19   :  { %v5610_v19 = vld [vmem:[%s7845_s1 + $0x178] sm:$0xff]  }
  0x1a   :  { %2399 = vmatpush1.bf16.msra.mxu1 %v5527_v13  ;;  %v5602_v13 = vld [vmem:[%s7845_s1 + $0x168] sm:$0xff]  }
  0x1b   :  { %2688 = vmatpush1.bf16.msra.mxu0 %v6102_v14  ;;  %2400 = vmatprep.subr.bf16.mxu1 %v6003_v0 }
  0x1c   :  { %2689 = vmatprep.subr.bf16.mxu0 %v6003_v0 }
  0x1e   :  { %2401 = vmatpush1.bf16.msra.mxu1 %v5529_v15  ;;  %v5608_v15 = vld [vmem:[%s7846_s0 + $0x200] ss:$36 sps:$4 sm:$0xff]  }
  0x1f   :  { %2690 = vmatpush1.bf16.msra.mxu0 %v6113_v16  ;;  %2402 = vmatprep.subr.bf16.mxu1 %v6003_v0 }
  0x20   :  { %2691 = vmatprep.subr.bf16.mxu0 %v6003_v0 }
  0x22   :  { %2403 = vmatpush1.bf16.msra.mxu1 %v5531_v17  ;;  %v5609_v17 = vld [vmem:[%s7845_s1 + $0x170] sm:$0xff]  }
  0x23   :  { %2692 = vmatpush1.bf16.msra.mxu0 %v6124_v18  ;;  %2404 = vmatprep.subr.bf16.mxu1 %v6003_v0 }
  0x24   :  { %2693 = vmatprep.subr.bf16.mxu0 %v6003_v0 }
  0x26   :  { %2405 = vmatpush1.bf16.msra.mxu1 %v5533_v20  ;;  %v5616_v20 = vld [vmem:[%s7846_s0 + $0x240] ss:$36 sps:$4 sm:$0xff]  }
  0x27   :  { %2694 = vmatpush1.bf16.msra.mxu0 %v6141_v22  ;;  %2406 = vmatprep.subr.bf16.mxu1 %v6003_v0 }
  0x28   :  { %2695 = vmatprep.subr.bf16.mxu0 %v6003_v0 }
  0x2a   :  { %2407 = vmatpush1.bf16.msra.mxu1 %v5535_v23  ;;  %v5617_v23 = vld [vmem:[%s7845_s1 + $0x180] sm:$0xff]  }
  0x2b   :  { %2696 = vmatpush1.bf16.msra.mxu0 %v6152_v24  ;;  %2408 = vmatprep.subr.bf16.mxu1 %v6003_v0 }
  0x2c   :  { %2697 = vmatprep.subr.bf16.mxu0 %v6003_v0 }
  0x2e   :  { %2409 = vmatpush1.bf16.msra.mxu1 %v5537_v25  ;;  %v5622_v25 = vld [vmem:[%s7846_s0 + $0x288] ss:$36 sps:$4 sm:$0xff]  }
  0x2f   :  { %2698 = vmatpush1.bf16.msra.mxu0 %v6163_v26  ;;  %2410 = vmatprep.subr.bf16.mxu1 %v6003_v0 }
  0x30   :  { %2699 = vmatprep.subr.bf16.mxu0 %v6003_v0 }
  0x32   :  { %2411 = vmatpush1.bf16.msra.mxu1 %v5539_v27  ;;  %v5623_v27 = vld [vmem:[%s7846_s0 + $0x58] ss:$36 sps:$4 sm:$0xff]  }
  0x33   :  { %2700 = vmatpush1.bf16.msra.mxu0 %v6174_v28  ;;  %2412 = vmatprep.subr.bf16.mxu1 %v6003_v0 }
  0x34   :  { %2701 = vmatprep.subr.bf16.mxu0 %v6003_v0 }
  0x36   :  { %2413 = vmatpush1.bf16.msra.mxu1 %v5541_v29  ;;  %v5626_v29 = vld [vmem:[%s7846_s0 + $0xa4] ss:$36 sps:$4 sm:$0xff]  }
  0x37   :  { %2702 = vmatpush1.bf16.msra.mxu0 %v6185_v30  ;;  %2414 = vmatprep.subr.bf16.mxu1 %v6003_v0 }
  0x38   :  { %2703 = vmatprep.subr.bf16.mxu0 %v6003_v0 }
  0x3a   :  { %2415 = vmatpush1.bf16.msra.mxu1 %v5543_v31  ;;  %v5628_v31 = vld [vmem:[%s7846_s0 + $0x2d0] ss:$36 sps:$4 sm:$0xff]  }
  0x3b   :  { %2704 = vmatpush1.bf16.msra.mxu0 %v6196_v32  ;;  %2416 = vmatprep.subr.bf16.mxu1 %v6003_v0 }
  0x3c   :  { %2705 = vmatprep.subr.bf16.mxu0 %v6003_v0 }
  0x3e   :  { %2417 = vmatpush1.bf16.msra.mxu1 %v5545_v33  ;;  %v5629_v33 = vld [vmem:[%s7846_s0 + $0xa0] ss:$36 sps:$4 sm:$0xff]  }
  0x3f   :  { %2706 = vmatpush1.bf16.msra.mxu0 %v6207_v34  ;;  %5162 = vmatprep.subr.bf16.mxu1 %v6003_v0 }
  0x40   :  { %2964 = vmatprep.subr.bf16.mxu0 %v6003_v0 }
  0x41   :  { %2419 = vmatmul.mubr.bf16.vlgmr.msra.gmra.mrb[0].mxu1 %v5547_v35  ;;  %v5633_v35 = vld [vmem:[%s7846_s0 + $0xec] ss:$36 sps:$4 sm:$0xff]  }
  0x42   :  { %2708 = vmatmul.mubr.bf16.vlgmr.msra.gmra.mrb[0].mxu0 %v5550_v36  ;;  %5178 = vmatpush1.bf16.msra.mxu1 %v6037_v2  ;;  %v5591_v2 = vld [vmem:[%s7846_s0 + $0x168] ss:$36 sps:$4 sm:$0xff]   ;;  %v5669_v36 = vld [vmem:[%s7845_s1 + $0x1a0] sm:$0xff]  }
  0x43   :  { %2965 = vmatpush1.bf16.msra.mxu0 %v5553_v37  ;;  %2426 = vmatprep.mubr.bf16.mxu1 %v5555_v38  ;;  %v5682_v37 = vld [vmem:[%s7845_s1 + $0x1a8] sm:$0xff]   ;;  %v5635_v38 = vld [vmem:[%s7846_s0 + $0x318] ss:$36 sps:$4 sm:$0xff]  }
  0x44   :  { %2966 = vmatprep.subr.bf16.mxu0 %v6003_v0  ;;  %2715 = vmatprep.mubr.bf16.mxu0 %v5557_v39  ;;  %v5636_v39 = vld [vmem:[%s7846_s0 + $0xe8] ss:$36 sps:$4 sm:$0xff]  }
  0x45   :  { %5163 = vmatprep.subr.bf16.mxu1 %v6003_v0 }
  0x46   :  { %5179 = vmatpush1.bf16.msra.mxu1 %v6047_v4  ;;  %v5595_v4 = vld [vmem:[%s7846_s0 + $0x1b4] ss:$36 sps:$4 sm:$0xff]  }
  0x47   :  { %2967 = vmatpush1.bf16.msra.mxu0 %v5554_v40  ;;  %5164 = vmatprep.subr.bf16.mxu1 %v6003_v0  ;;  %v5637_v40 = vld [vmem:[%s7846_s0 + $0x364] ss:$36 sps:$4 sm:$0xff]  }
  0x48   :  { %2968 = vmatprep.subr.bf16.mxu0 %v6003_v0 }
  0x49   :  { %2427 = vmatmul.mubr.bf16.gmra.mrb[4].mxu1 %v5559_v41  ;;  %v5639_v41 = vld [vmem:[%s7846_s0 + $0x134] ss:$36 sps:$4 sm:$0xff]  }
  0x4a   :  { %2716 = vmatmul.mubr.bf16.gmra.mrb[4].mxu0 %v5560_v42  ;;  %2434 = vmatprep.mubr.bf16.mxu1 %v5563_v43  ;;  %v5695_v42 = vld [vmem:[%s7845_s1 + $0x1b0] sm:$0xff]   ;;  %v5708_v43 = vld [vmem:[%s7845_s1 + $0x1b8] sm:$0xff]  }
  0x4b   :  { %2969 = vmatpush1.bf16.msra.mxu0 %v5561_v44  ;;  %2723 = vmatprep.mubr.bf16.mxu0 %v5565_v45  ;;  %v5641_v44 = vld [vmem:[%s7846_s0 + $0x360] ss:$36 sps:$4 sm:$0xff]   ;;  %v5642_v45 = vld [vmem:[%s7846_s0 + $0x130] ss:$36 sps:$4 sm:$0xff]  }
  0x4c   :  { %2970 = vmatprep.subr.bf16.mxu0 %v6003_v0  ;;  %5180 = vmatpush1.bf16.msra.mxu1 %v6058_v6  ;;  %v5597_v6 = vld [vmem:[%s7846_s0 + $0x1bc] ss:$36 sps:$4 sm:$0xff]  }
  0x4d   :  { %5165 = vmatprep.subr.bf16.mxu1 %v6003_v0 }
  0x4f   :  { %2971 = vmatpush1.bf16.msra.mxu0 %v5562_v46  ;;  %v5644_v46 = vld [vmem:[%s7846_s0 + $0x3ac] ss:$36 sps:$4 sm:$0xff]  }
  0x50   :  { %2972 = vmatprep.subr.bf16.mxu0 %v6003_v0  ;;  %5181 = vmatpush1.bf16.msra.mxu1 %v6069_v8  ;;  %v5599_v8 = vld [vmem:[%s7846_s0 + $0x1b0] ss:$36 sps:$4 sm:$0xff]  }
  0x51   :  { %2435 = vmatmul.mubr.bf16.gmra.mrb[8].mxu1 %v5567_v47  ;;  %5166 = vmatprep.subr.bf16.mxu1 %v6003_v0  ;;  %v5646_v47 = vld [vmem:[%s7846_s0 + $0x17c] ss:$36 sps:$4 sm:$0xff]  }
  0x52   :  { %2724 = vmatmul.mubr.bf16.gmra.mrb[8].mxu0 %v5568_v48  ;;  %2442 = vmatprep.mubr.bf16.mxu1 %v5571_v50  ;;  %v5721_v48 = vld [vmem:[%s7845_s1 + $0x1c0] sm:$0xff]   ;;  %v5648_v50 = vld [vmem:[%s7846_s0 + $0x3a8] ss:$36 sps:$4 sm:$0xff]  }
  0x53   :  { %2973 = vmatpush1.bf16.msra.mxu0 %v5569_v49  ;;  %2731 = vmatprep.mubr.bf16.mxu0 %v5573_v51  ;;  %v5734_v49 = vld [vmem:[%s7845_s1 + $0x1c8] sm:$0xff]   ;;  %v5649_v51 = vld [vmem:[%s7846_s0 + $0x178] ss:$36 sps:$4 sm:$0xff]  }
  0x54   :  { %2974 = vmatprep.subr.bf16.mxu0 %v6003_v0  ;;  %5182 = vmatpush1.bf16.msra.mxu1 %v6080_v10  ;;  %v5601_v10 = vld [vmem:[%s7845_s1 + $0x160] sm:$0xff]  }
  0x55   :  { %5167 = vmatprep.subr.bf16.mxu1 %v6003_v0 }
  0x57   :  { %2975 = vmatpush1.bf16.msra.mxu0 %v5570_v52  ;;  %v5650_v52 = vld [vmem:[%s7846_s0 + $0x3f4] ss:$36 sps:$4 sm:$0xff]  }
  0x58   :  { %2976 = vmatprep.subr.bf16.mxu0 %v6003_v0  ;;  %5183 = vmatpush1.bf16.msra.mxu1 %v6091_v12  ;;  %v5605_v12 = vld [vmem:[%s7846_s0 + $0x204] ss:$36 sps:$4 sm:$0xff]  }
  0x59   :  { %2443 = vmatmul.mubr.bf16.gmra.mrb[12].mxu1 %v5575_v53  ;;  %5168 = vmatprep.subr.bf16.mxu1 %v6003_v0  ;;  %v5652_v53 = vld [vmem:[%s7846_s0 + $0x1c4] ss:$36 sps:$4 sm:$0xff]  }
  0x5a   :  { %2732 = vmatmul.mubr.bf16.gmra.mrb[12].mxu0 %v5576_v54  ;;  %2450 = vmatprep.mubr.bf16.mxu1 %v5579_v55  ;;  %v5747_v54 = vld [vmem:[%s7845_s1 + $0x1d0] sm:$0xff]  }
  0x5b   :  { %2977 = vmatpush1.bf16.msra.mxu0 %v5577_v56  ;;  %2739 = vmatprep.mubr.bf16.mxu0 %v5581_v57  ;;  %v5654_v55 = vld [vmem:[%s7846_s0 + $0x3f0] ss:$36 sps:$4 sm:$0xff]   ;;  %v5655_v56 = vld [vmem:[%s7846_s0 + $0x1c0] ss:$36 sps:$4 sm:$0xff]  }
  0x5c   :  { %2978 = vmatprep.subr.bf16.mxu0 %v6003_v0  ;;  %5184 = vmatpush1.bf16.msra.mxu1 %v6102_v14  ;;  %v5607_v14 = vld [vmem:[%s7846_s0 + $0x1f8] ss:$36 sps:$4 sm:$0xff]  }
  0x5d   :  { %5169 = vmatprep.subr.bf16.mxu1 %v6003_v0  ;;  %v5657_v57 = vld [vmem:[%s7846_s0 + $0x43c] ss:$36 sps:$4 sm:$0xff]  }
  0x5f   :  { %2979 = vmatpush1.bf16.msra.mxu0 %v5578_v58  ;;  %v5659_v58 = vld [vmem:[%s7846_s0 + $0x20c] ss:$36 sps:$4 sm:$0xff]  }
  0x60   :  { %2980 = vmatprep.subr.bf16.mxu0 %v6003_v0  ;;  %5185 = vmatpush1.bf16.msra.mxu1 %v6113_v16  ;;  %v5611_v16 = vld [vmem:[%s7846_s0 + $0x244] ss:$36 sps:$4 sm:$0xff]  }
  0x61   :  { %2451 = vmatmul.mubr.bf16.gmra.mrb[16].mxu1 %v5583_v59  ;;  %5170 = vmatprep.subr.bf16.mxu1 %v6003_v0  ;;  %v5760_v59 = vld [vmem:[%s7845_s1 + $0x1d8] sm:$0xff]  }
  0x62   :  { %2740 = vmatmul.mubr.bf16.gmra.mrb[16].mxu0 %v5584_v60  ;;  %2458 = vmatprep.mubr.bf16.mxu1 %v5587_v62  ;;  %v5661_v60 = vld [vmem:[%s7846_s0 + $0x438] ss:$36 sps:$4 sm:$0xff]   ;;  %v5663_v62 = vld [vmem:[%s7846_s0 + $0x484] ss:$36 sps:$4 sm:$0xff]  }
  0x63   :  { %2981 = vmatpush1.bf16.msra.mxu0 %v5585_v61  ;;  %2747 = vmatprep.mubr.bf16.mxu0 %v5589_v63  ;;  %v5662_v61 = vld [vmem:[%s7846_s0 + $0x208] ss:$36 sps:$4 sm:$0xff]   ;;  %v5665_v63 = vld [vmem:[%s7846_s0 + $0x254] ss:$36 sps:$4 sm:$0xff]  }
  0x64   :  { %2982 = vmatprep.subr.bf16.mxu0 %v6003_v0  ;;  %5186 = vmatpush1.bf16.msra.mxu1 %v6124_v18  ;;  %v5615_v18 = vld [vmem:[%s7846_s0 + $0x14] ss:$36 sps:$4 sm:$0xff]  }
  0x65   :  { %5171 = vmatprep.subr.bf16.mxu1 %v6003_v0 }
  0x67   :  { %2983 = vmatpush1.bf16.msra.mxu0 %v5586_v1  ;;  %v5667_v1 = vld [vmem:[%s7846_s0 + $0x480] ss:$36 sps:$4 sm:$0xff]  }
  0x68   :  { %2984 = vmatprep.subr.bf16.mxu0 %v6003_v0  ;;  %5187 = vmatpush1.bf16.msra.mxu1 %v6141_v22  ;;  %v5618_v22 = vld [vmem:[%s7846_s0 + $0x28c] ss:$36 sps:$4 sm:$0xff]  }
  0x69   :  { %2459 = vmatmul.mubr.bf16.gmra.mrb[20].mxu1 %v5591_v2  ;;  %5172 = vmatprep.subr.bf16.mxu1 %v6003_v0  ;;  %v5668_v2 = vld [vmem:[%s7846_s0 + $0x250] ss:$36 sps:$4 sm:$0xff]  }
  0x6a   :  { %2748 = vmatmul.mubr.bf16.gmra.mrb[20].mxu0 %v5592_v3  ;;  %2466 = vmatprep.mubr.bf16.mxu1 %v5595_v4  ;;  %v5670_v3 = vld [vmem:[%s7846_s0 + $0x4cc] ss:$36 sps:$4 sm:$0xff]   ;;  %v5672_v4 = vld [vmem:[%s7846_s0 + $0x29c] ss:$36 sps:$4 sm:$0xff]  }
  0x6b   :  { %2985 = vmatpush1.bf16.msra.mxu0 %v5593_v5  ;;  %2755 = vmatprep.mubr.bf16.mxu0 %v5597_v6  ;;  %v5773_v5 = vld [vmem:[%s7845_s1 + $0x1e0] sm:$0xff]  }
  0x6c   :  { %2986 = vmatprep.subr.bf16.mxu0 %v6003_v0  ;;  %5188 = vmatpush1.bf16.msra.mxu1 %v6152_v24  ;;  %v5620_v24 = vld [vmem:[%s7846_s0 + $0x5c] ss:$36 sps:$4 sm:$0xff]  }
  0x6d   :  { %5173 = vmatprep.subr.bf16.mxu1 %v6003_v0  ;;  %v6566_v6 = vld [vmem:[%s7845_s1 + $0x200] sm:$0xff]  }
  0x6f   :  { %2987 = vmatpush1.bf16.msra.mxu0 %v5594_v7  ;;  %v5674_v7 = vld [vmem:[%s7846_s0 + $0x4c8] ss:$36 sps:$4 sm:$0xff]  }
  0x70   :  { %2988 = vmatprep.subr.bf16.mxu0 %v6003_v0  ;;  %5189 = vmatpush1.bf16.msra.mxu1 %v6163_v26  ;;  %v5630_v26 = vld [vmem:[%s7845_s1 + $0x188] sm:$0xff]  }
  0x71   :  { %2467 = vmatmul.mubr.bf16.gmra.mrb[24].mxu1 %v5599_v8  ;;  %5174 = vmatprep.subr.bf16.mxu1 %v6003_v0  ;;  %v5675_v8 = vld [vmem:[%s7846_s0 + $0x298] ss:$36 sps:$4 sm:$0xff]  }
  0x72   :  { %2756 = vmatmul.mubr.bf16.gmra.mrb[24].mxu0 %v5600_v9  ;;  %2474 = vmatprep.mubr.bf16.mxu1 %v5603_v11  ;;  %v5676_v9 = vld [vmem:[%s7846_s0 + $0x514] ss:$36 sps:$4 sm:$0xff]  }
  0x73   :  { %2989 = vmatpush1.bf16.msra.mxu0 %v5601_v10  ;;  %2763 = vmatprep.mubr.bf16.mxu0 %v5605_v12  ;;  %v5678_v10 = vld [vmem:[%s7846_s0 + $0x2e4] ss:$36 sps:$4 sm:$0xff]   ;;  %v5680_v11 = vld [vmem:[%s7846_s0 + $0x510] ss:$36 sps:$4 sm:$0xff]  }
  0x74   :  { %2990 = vmatprep.subr.bf16.mxu0 %v6003_v0  ;;  %5190 = vmatpush1.bf16.msra.mxu1 %v6174_v28  ;;  %v5624_v28 = vld [vmem:[%s7846_s0 + $0x2d4] ss:$36 sps:$4 sm:$0xff]   ;;  %v5681_v12 = vld [vmem:[%s7846_s0 + $0x2e0] ss:$36 sps:$4 sm:$0xff]  }
  0x75   :  { %5175 = vmatprep.subr.bf16.mxu1 %v6003_v0 }
  0x77   :  { %2991 = vmatpush1.bf16.msra.mxu0 %v5602_v13  ;;  %v5683_v13 = vld [vmem:[%s7846_s0 + $0x55c] ss:$36 sps:$4 sm:$0xff]  }
  0x78   :  { %2992 = vmatprep.subr.bf16.mxu0 %v6003_v0  ;;  %5191 = vmatpush1.bf16.msra.mxu1 %v6185_v30  ;;  %v5643_v30 = vld [vmem:[%s7845_s1 + $0x190] sm:$0xff]  }
  0x79   :  { %2475 = vmatmul.mubr.bf16.gmra.mrb[28].mxu1 %v5607_v14  ;;  %5176 = vmatprep.subr.bf16.mxu1 %v6003_v0  ;;  %v5685_v14 = vld [vmem:[%s7846_s0 + $0x32c] ss:$36 sps:$4 sm:$0xff]  }
  0x7a   :  { %2764 = vmatmul.mubr.bf16.gmra.mrb[28].mxu0 %v5608_v15  ;;  %2482 = vmatprep.mubr.bf16.mxu1 %v5611_v16  ;;  %v5787_v15 = vld [vmem:[%s7845_s1 + $0x1e8] sm:$0xff]   ;;  %v5687_v16 = vld [vmem:[%s7846_s0 + $0x558] ss:$36 sps:$4 sm:$0xff]  }
  0x7b   :  { %2993 = vmatpush1.bf16.msra.mxu0 %v5609_v17  ;;  %2996 = vmatprep.mubr.bf16.mxu0 %v5615_v18  ;;  %v5688_v17 = vld [vmem:[%s7846_s0 + $0x328] ss:$36 sps:$4 sm:$0xff]  }
  0x7c   :  { %2994 = vmatprep.subr.bf16.mxu0 %v6003_v0  ;;  %5192 = vmatpush1.bf16.msra.mxu1 %v6196_v32  ;;  %v5656_v32 = vld [vmem:[%s7845_s1 + $0x198] sm:$0xff]   ;;  %v5689_v18 = vld [vmem:[%s7846_s0 + $0x5a4] ss:$36 sps:$4 sm:$0xff]  }
  0x7d   :  { %5177 = vmatprep.subr.bf16.mxu1 %v6003_v0 }
  0x7f   :  { %2995 = vmatpush1.bf16.msra.mxu0 %v5610_v19  ;;  %v5691_v19 = vld [vmem:[%s7846_s0 + $0x374] ss:$36 sps:$4 sm:$0xff]  }
  0x80   :  { %3253 = vmatprep.subr.bf16.mxu0 %v6003_v0  ;;  %5193 = vmatpush1.bf16.msra.mxu1 %v6207_v34  ;;  %v5631_v34 = vld [vmem:[%s7846_s0 + $0x31c] ss:$36 sps:$4 sm:$0xff]  }
  0x81   :  { %2483 = vmatmul.mubr.bf16.gmra.mrb[32].mxu1 %v5616_v20  ;;  %5082 = vmatprep.subr.bf16.mxu1 %v6566_v6  ;;  %v5693_v20 = vld [vmem:[%s7846_s0 + $0x5a0] ss:$36 sps:$4 sm:$0xff]  }
  0x82   :  { %2997 = vmatmul.mubr.bf16.vlgmr.msra.gmra.mrb[0].mxu0 %v5613_v21  ;;  %2490 = vmatprep.mubr.bf16.mxu1 %v5618_v22  ;;  %v5694_v21 = vld [vmem:[%s7846_s0 + $0x370] ss:$36 sps:$4 sm:$0xff]  }
  0x83   :  { %3254 = vmatpush1.bf16.msra.mxu0 %v5617_v23  ;;  %3004 = vmatprep.mubr.bf16.mxu0 %v5620_v24  ;;  %v5696_v22 = vld [vmem:[%s7846_s0 + $0x5ec] ss:$36 sps:$4 sm:$0xff]   ;;  %v5698_v23 = vld [vmem:[%s7846_s0 + $0x3bc] ss:$36 sps:$4 sm:$0xff]  }
  0x84   :  { %3255 = vmatprep.subr.bf16.mxu0 %v6003_v0  ;;  %v5801_v24 = vld [vmem:[%s7845_s1 + $0x1f0] sm:$0xff]  }
  0x87   :  { %3256 = vmatpush1.bf16.msra.mxu0 %v5630_v26  ;;  %v5701_v26 = vld [vmem:[%s7846_s0 + $0x3b8] ss:$36 sps:$4 sm:$0xff]  }
  0x88   :  { %3257 = vmatprep.subr.bf16.mxu0 %v6003_v0 }
  0x89   :  { %2491 = vmatmul.mubr.bf16.gmra.mrb[36].mxu1 %v5622_v25  ;;  %v5700_v25 = vld [vmem:[%s7846_s0 + $0x5e8] ss:$36 sps:$4 sm:$0xff]  }
  0x8a   :  { %3005 = vmatmul.mubr.bf16.gmra.mrb[4].mxu0 %v5623_v27  ;;  %2498 = vmatprep.mubr.bf16.mxu1 %v5624_v28  ;;  %v5702_v27 = vld [vmem:[%s7846_s0 + $0x634] ss:$36 sps:$4 sm:$0xff]   ;;  %v5704_v28 = vld [vmem:[%s7846_s0 + $0x404] ss:$36 sps:$4 sm:$0xff]  }
  0x8b   :  { %3012 = vmatprep.mubr.bf16.mxu0 %v5626_v29  ;;  %3258 = vmatpush1.bf16.msra.mxu0 %v5643_v30  ;;  %v5707_v29 = vld [vmem:[%s7846_s0 + $0x400] ss:$36 sps:$4 sm:$0xff]  }
  0x8c   :  { %3259 = vmatprep.subr.bf16.mxu0 %v6003_v0  ;;  %v5709_v30 = vld [vmem:[%s7846_s0 + $0x67c] ss:$36 sps:$4 sm:$0xff]  }
  0x8f   :  { %3260 = vmatpush1.bf16.msra.mxu0 %v5656_v32  ;;  %v5814_v32 = vld [vmem:[%s7845_s1 + $0x1f8] sm:$0xff]  }
  0x90   :  { %3261 = vmatprep.subr.bf16.mxu0 %v6003_v0 }
  0x91   :  { %2499 = vmatmul.mubr.bf16.gmra.mrb[40].mxu1 %v5628_v31  ;;  %v5711_v31 = vld [vmem:[%s7846_s0 + $0x44c] ss:$36 sps:$4 sm:$0xff]  }
  0x92   :  { %3013 = vmatmul.mubr.bf16.gmra.mrb[8].mxu0 %v5629_v33  ;;  %2506 = vmatprep.mubr.bf16.mxu1 %v5631_v34  ;;  %v5713_v33 = vld [vmem:[%s7846_s0 + $0x678] ss:$36 sps:$4 sm:$0xff]   ;;  %v5714_v34 = vld [vmem:[%s7846_s0 + $0x448] ss:$36 sps:$4 sm:$0xff]  }
  0x93   :  { %3020 = vmatprep.mubr.bf16.mxu0 %v5633_v35  ;;  %3262 = vmatpush1.bf16.msra.mxu0 %v5669_v36  ;;  %v5715_v35 = vld [vmem:[%s7846_s0 + $0x6c4] ss:$36 sps:$4 sm:$0xff]   ;;  %v5717_v36 = vld [vmem:[%s7846_s0 + $0x494] ss:$36 sps:$4 sm:$0xff]  }
  0x94   :  { %3263 = vmatprep.subr.bf16.mxu0 %v6003_v0 }
  0x97   :  { %3264 = vmatpush1.bf16.msra.mxu0 %v5682_v37  ;;  %v5719_v37 = vld [vmem:[%s7846_s0 + $0x6c0] ss:$36 sps:$4 sm:$0xff]  }
  0x98   :  { %3265 = vmatprep.subr.bf16.mxu0 %v6003_v0 }
  0x99   :  { %2507 = vmatmul.mubr.bf16.gmra.mrb[44].mxu1 %v5635_v38  ;;  %v5720_v38 = vld [vmem:[%s7846_s0 + $0x490] ss:$36 sps:$4 sm:$0xff]  }
  0x9a   :  { %3021 = vmatmul.mubr.bf16.gmra.mrb[12].mxu0 %v5636_v39  ;;  %2514 = vmatprep.mubr.bf16.mxu1 %v5637_v40  ;;  %v5722_v39 = vld [vmem:[%s7846_s0 + $0x70c] ss:$36 sps:$4 sm:$0xff]   ;;  %v5724_v40 = vld [vmem:[%s7846_s0 + $0x4dc] ss:$36 sps:$4 sm:$0xff]  }
  0x9b   :  { %3028 = vmatprep.mubr.bf16.mxu0 %v5639_v41  ;;  %3266 = vmatpush1.bf16.msra.mxu0 %v5695_v42  ;;  %v5726_v41 = vld [vmem:[%s7846_s0 + $0x708] ss:$36 sps:$4 sm:$0xff]   ;;  %v5727_v42 = vld [vmem:[%s7846_s0 + $0x4d8] ss:$36 sps:$4 sm:$0xff]  }
  0x9c   :  { %3267 = vmatprep.subr.bf16.mxu0 %v6003_v0 }
  0x9f   :  { %3268 = vmatpush1.bf16.msra.mxu0 %v5708_v43  ;;  %v5728_v43 = vld [vmem:[%s7846_s0 + $0x754] ss:$36 sps:$4 sm:$0xff]  }
  0xa0   :  { %3269 = vmatprep.subr.bf16.mxu0 %v6003_v0 }
  0xa1   :  { %2515 = vmatmul.mubr.bf16.gmra.mrb[48].mxu1 %v5641_v44  ;;  %v5730_v44 = vld [vmem:[%s7846_s0 + $0x524] ss:$36 sps:$4 sm:$0xff]  }
  0xa2   :  { %3029 = vmatmul.mubr.bf16.gmra.mrb[16].mxu0 %v5642_v45  ;;  %2522 = vmatprep.mubr.bf16.mxu1 %v5644_v46  ;;  %v5732_v45 = vld [vmem:[%s7846_s0 + $0x750] ss:$36 sps:$4 sm:$0xff]   ;;  %v5733_v46 = vld [vmem:[%s7846_s0 + $0x520] ss:$36 sps:$4 sm:$0xff]  }
  0xa3   :  { %3036 = vmatprep.mubr.bf16.mxu0 %v5646_v47  ;;  %3270 = vmatpush1.bf16.msra.mxu0 %v5721_v48  ;;  %v5735_v47 = vld [vmem:[%s7846_s0 + $0x79c] ss:$36 sps:$4 sm:$0xff]   ;;  %v5737_v48 = vld [vmem:[%s7846_s0 + $0x56c] ss:$36 sps:$4 sm:$0xff]  }
  0xa4   :  { %3271 = vmatprep.subr.bf16.mxu0 %v6003_v0 }
  0xa7   :  { %3272 = vmatpush1.bf16.msra.mxu0 %v5734_v49 }
  0xa8   :  { %3273 = vmatprep.subr.bf16.mxu0 %v6003_v0 }
  0xa9   :  { %2523 = vmatmul.mubr.bf16.gmra.mrb[52].mxu1 %v5648_v50 }
  0xaa   :  { %3037 = vmatmul.mubr.bf16.gmra.mrb[20].mxu0 %v5649_v51  ;;  %2530 = vmatprep.mubr.bf16.mxu1 %v5650_v52  ;;  %v5739_v51 = vld [vmem:[%s7846_s0 + $0x798] ss:$36 sps:$4 sm:$0xff]  }
  0xab   :  { %3044 = vmatprep.mubr.bf16.mxu0 %v5652_v53  ;;  %3274 = vmatpush1.bf16.msra.mxu0 %v5747_v54  ;;  %v5740_v53 = vld [vmem:[%s7846_s0 + $0x568] ss:$36 sps:$4 sm:$0xff]  }
  0xac   :  { %3275 = vmatprep.subr.bf16.mxu0 %v6003_v0  ;;  %v5741_v54 = vld [vmem:[%s7846_s0 + $0x7e4] ss:$36 sps:$4 sm:$0xff]  }
  0xaf   :  { %3276 = vmatpush1.bf16.msra.mxu0 %v5760_v59  ;;  %v5745_v59 = vld [vmem:[%s7846_s0 + $0x7e0] ss:$36 sps:$4 sm:$0xff]  }
  0xb0   :  { %3277 = vmatprep.subr.bf16.mxu0 %v6003_v0 }
  0xb1   :  { %2531 = vmatmul.mubr.bf16.gmra.mrb[56].mxu1 %v5654_v55 }
  0xb2   :  { %3045 = vmatmul.mubr.bf16.gmra.mrb[24].mxu0 %v5655_v56  ;;  %2538 = vmatprep.mubr.bf16.mxu1 %v5657_v57  ;;  %v5743_v56 = vld [vmem:[%s7846_s0 + $0x5b4] ss:$36 sps:$4 sm:$0xff]  }
  0xb3   :  { %3052 = vmatprep.mubr.bf16.mxu0 %v5659_v58  ;;  %3278 = vmatpush1.bf16.msra.mxu0 %v5773_v5 }
  0xb4   :  { %3279 = vmatprep.subr.bf16.mxu0 %v6003_v0 }
  0xb7   :  { %3280 = vmatpush1.bf16.msra.mxu0 %v5787_v15  ;;  %v5759_v15 = vld [vmem:[%s7846_s0 + $0x640] ss:$36 sps:$4 sm:$0xff]  }
  0xb8   :  { %3281 = vmatprep.subr.bf16.mxu0 %v6003_v0 }
  0xb9   :  { %2539 = vmatmul.mubr.bf16.gmra.mrb[60].mxu1 %v5661_v60 }
  0xba   :  { %3053 = vmatmul.mubr.bf16.gmra.mrb[28].mxu0 %v5662_v61  ;;  %2546 = vmatprep.mubr.bf16.mxu1 %v5663_v62  ;;  %v5746_v61 = vld [vmem:[%s7846_s0 + $0x5b0] ss:$36 sps:$4 sm:$0xff]  }
  0xbb   :  { %3060 = vmatprep.mubr.bf16.mxu0 %v5665_v63  ;;  %3282 = vmatpush1.bf16.msra.mxu0 %v5801_v24  ;;  %v5748_v62 = vld [vmem:[%s7846_s0 + $0x82c] ss:$36 sps:$4 sm:$0xff]  }
  0xbc   :  { %3283 = vmatprep.subr.bf16.mxu0 %v6003_v0  ;;  %v5706_v0 = vld [vmem:[%s7846_s0 + $0x630] ss:$36 sps:$4 sm:$0xff]  }
  0xbd   :  { %v5769_v24 = vld [vmem:[%s7846_s0 + $0x24c] ss:$36 sps:$4 sm:$0xff]  }
  0xbf   :  { %3284 = vmatpush1.bf16.msra.mxu0 %v5814_v32  ;;  %v5775_v32 = vld [vmem:[%s7846_s0 + $0x294] ss:$36 sps:$4 sm:$0xff]  }
  0xc1   :  { %2547 = vmatmul.mubr.bf16.gmra.mrb[64].mxu1 %v5667_v1  ;;  %v5750_v1 = vld [vmem:[%s7846_s0 + $0x5fc] ss:$36 sps:$4 sm:$0xff]  }
  0xc2   :  { %3061 = vmatmul.mubr.bf16.gmra.mrb[32].mxu0 %v5668_v2  ;;  %2554 = vmatprep.mubr.bf16.mxu1 %v5670_v3 }
  0xc3   :  { %3068 = vmatprep.mubr.bf16.mxu0 %v5672_v4  ;;  %v5752_v4 = vld [vmem:[%s7846_s0 + $0x828] ss:$36 sps:$4 sm:$0xff]  }
  0xc9   :  { %2555 = vmatmul.mubr.bf16.gmra.mrb[68].mxu1 %v5674_v7  ;;  %v5753_v7 = vld [vmem:[%s7846_s0 + $0x5f8] ss:$36 sps:$4 sm:$0xff]  }
  0xca   :  { %3069 = vmatmul.mubr.bf16.gmra.mrb[36].mxu0 %v5675_v8  ;;  %2562 = vmatprep.mubr.bf16.mxu1 %v5676_v9  ;;  %v5754_v8 = vld [vmem:[%s7846_s0 + $0x874] ss:$36 sps:$4 sm:$0xff]  }
  0xcb   :  { %3076 = vmatprep.mubr.bf16.mxu0 %v5678_v10  ;;  %v5756_v10 = vld [vmem:[%s7846_s0 + $0x644] ss:$36 sps:$4 sm:$0xff]  }
  0xd1   :  { %2563 = vmatmul.mubr.bf16.gmra.mrb[72].mxu1 %v5680_v11 }
  0xd2   :  { %3077 = vmatmul.mubr.bf16.gmra.mrb[40].mxu0 %v5681_v12  ;;  %2570 = vmatprep.mubr.bf16.mxu1 %v5683_v13  ;;  %v5758_v13 = vld [vmem:[%s7846_s0 + $0x870] ss:$36 sps:$4 sm:$0xff]  }
  0xd3   :  { %3084 = vmatprep.mubr.bf16.mxu0 %v5685_v14 }
  0xd9   :  { %2571 = vmatmul.mubr.bf16.gmra.mrb[76].mxu1 %v5687_v16  ;;  %v5761_v16 = vld [vmem:[%s7846_s0 + $0x8bc] ss:$36 sps:$4 sm:$0xff]  }
  0xda   :  { %3085 = vmatmul.mubr.bf16.gmra.mrb[44].mxu0 %v5688_v17  ;;  %2578 = vmatprep.mubr.bf16.mxu1 %v5689_v18  ;;  %v5763_v18 = vld [vmem:[%s7846_s0 + $0x68c] ss:$36 sps:$4 sm:$0xff]  }
  0xdb   :  { %3092 = vmatprep.mubr.bf16.mxu0 %v5691_v19 }
  0xe1   :  { %2579 = vmatmul.mubr.bf16.gmra.mrb[80].mxu1 %v5693_v20 }
  0xe2   :  { %3093 = vmatmul.mubr.bf16.gmra.mrb[48].mxu0 %v5694_v21  ;;  %2586 = vmatprep.mubr.bf16.mxu1 %v5696_v22  ;;  %v5765_v21 = vld [vmem:[%s7846_s0 + $0x8b8] ss:$36 sps:$4 sm:$0xff]  }
  0xe3   :  { %3100 = vmatprep.mubr.bf16.mxu0 %v5698_v23  ;;  %v5766_v23 = vld [vmem:[%s7846_s0 + $0x688] ss:$36 sps:$4 sm:$0xff]  }
  0xe9   :  { %2587 = vmatmul.mubr.bf16.gmra.mrb[84].mxu1 %v5700_v25 }
  0xea   :  { %3101 = vmatmul.mubr.bf16.gmra.mrb[52].mxu0 %v5701_v26  ;;  %2594 = vmatprep.mubr.bf16.mxu1 %v5702_v27  ;;  %v5770_v26 = vld [vmem:[%s7846_s0 + $0x6d4] ss:$36 sps:$4 sm:$0xff]  }
  0xeb   :  { %3108 = vmatprep.mubr.bf16.mxu0 %v5704_v28 }
  0xf1   :  { %2595 = vmatmul.mubr.bf16.gmra.mrb[88].mxu1 %v5706_v0  ;;  %v5767_v0 = vld [vmem:[%s7846_s0 + $0x248] ss:$36 sps:$4 sm:$0xff]  }
  0xf2   :  { %3109 = vmatmul.mubr.bf16.gmra.mrb[56].mxu0 %v5707_v29  ;;  %2602 = vmatprep.mubr.bf16.mxu1 %v5709_v30  ;;  %v5772_v30 = vld [vmem:[%s7846_s0 + $0x6d0] ss:$36 sps:$4 sm:$0xff]  }
  0xf3   :  { %3116 = vmatprep.mubr.bf16.mxu0 %v5711_v31 }
  0xf9   :  { %2603 = vmatmul.mubr.bf16.gmra.mrb[92].mxu1 %v5713_v33  ;;  %v5777_v33 = vld [vmem:[%s7846_s0 + $0x71c] ss:$36 sps:$4 sm:$0xff]  }
  0xfa   :  { %3117 = vmatmul.mubr.bf16.gmra.mrb[60].mxu0 %v5714_v34  ;;  %2610 = vmatprep.mubr.bf16.mxu1 %v5715_v35  ;;  %v5794_v34 = vld [vmem:[%s7845_s1 + $0x208] sm:$0xff]   ;;  %v5815_v35 = vld [vmem:[%s7845_s1 + $0x210] sm:$0xff]  }
  0xfb   :  { %3124 = vmatprep.mubr.bf16.mxu0 %v5717_v36 }
 0x101   :  { %2611 = vmatmul.mubr.bf16.gmra.mrb[96].mxu1 %v5719_v37 }
 0x102   :  { %3125 = vmatmul.mubr.bf16.gmra.mrb[64].mxu0 %v5720_v38  ;;  %2618 = vmatprep.mubr.bf16.mxu1 %v5722_v39  ;;  %v5779_v38 = vld [vmem:[%s7846_s0 + $0x290] ss:$36 sps:$4 sm:$0xff]  }
 0x103   :  { %3132 = vmatprep.mubr.bf16.mxu0 %v5724_v40  ;;  %v5781_v40 = vld [vmem:[%s7846_s0 + $0x2dc] ss:$36 sps:$4 sm:$0xff]  }
 0x109   :  { %2619 = vmatmul.mubr.bf16.gmra.mrb[100].mxu1 %v5726_v41 }
 0x10a   :  { %3133 = vmatmul.mubr.bf16.gmra.mrb[68].mxu0 %v5727_v42  ;;  %2626 = vmatprep.mubr.bf16.mxu1 %v5728_v43  ;;  %v5783_v42 = vld [vmem:[%s7846_s0 + $0x764] ss:$36 sps:$4 sm:$0xff]   ;;  %v5834_v43 = vld [vmem:[%s7845_s1 + $0x218] sm:$0xff]  }
 0x10b   :  { %3140 = vmatprep.mubr.bf16.mxu0 %v5730_v44 }
 0x111   :  { %2627 = vmatmul.mubr.bf16.gmra.mrb[104].mxu1 %v5732_v45  ;;  %v5853_v45 = vld [vmem:[%s7845_s1 + $0x220] sm:$0xff]  }
 0x112   :  { %3141 = vmatmul.mubr.bf16.gmra.mrb[72].mxu0 %v5733_v46  ;;  %2634 = vmatprep.mubr.bf16.mxu1 %v5735_v47  ;;  %v5785_v47 = vld [vmem:[%s7846_s0 + $0x2d8] ss:$36 sps:$4 sm:$0xff]  }
 0x113   :  { %3148 = vmatprep.mubr.bf16.mxu0 %v5737_v48 }
 0x114   :  { %v6701_v49 = vpop.f32.mrb[0].mxu1 }
 0x115   :  { %v2422_v50 = vpop.f32.mrb[1].mxu1 }
 0x116   :  { %v6706_v52 = vpop.f32.mrb[2].mxu1  ;;  %v5786_v50 = vld [vmem:[%s7846_s0 + $0x760] ss:$36 sps:$4 sm:$0xff]  }
 0x117   :  { %v2425_v55 = vpop.f32.mrb[3].mxu1 }
 0x118   :  { %v5872_v55 = vld [vmem:[%s7845_s1 + $0x228] sm:$0xff]  }
 0x119   :  { %2635 = vmatmul.mubr.bf16.gmra.mrb[108].mxu1 %v5739_v51  ;;  %v5788_v51 = vld [vmem:[%s7846_s0 + $0x324] ss:$36 sps:$4 sm:$0xff]  }
 0x11a   :  { %3149 = vmatmul.mubr.bf16.gmra.mrb[76].mxu0 %v5740_v53  ;;  %2642 = vmatprep.mubr.bf16.mxu1 %v5741_v54  ;;  %v5790_v54 = vld [vmem:[%s7846_s0 + $0x7ac] ss:$36 sps:$4 sm:$0xff]  }
 0x11b   :  { %3156 = vmatprep.mubr.bf16.mxu0 %v5743_v56  ;;  %v5891_v56 = vld [vmem:[%s7845_s1 + $0x230] sm:$0xff]  }
 0x11c   :  { %v6717_v57 = vpop.f32.mrb[4].mxu1 }
 0x11d   :  { %v2430_v58 = vpop.f32.mrb[5].mxu1 }
 0x11e   :  { %v6722_v60 = vpop.f32.mrb[6].mxu1  ;;  %v5792_v58 = vld [vmem:[%s7846_s0 + $0x320] ss:$36 sps:$4 sm:$0xff]  }
 0x11f   :  { %v2433_v63 = vpop.f32.mrb[7].mxu1 }
 0x120   :  { %v5799_v63 = vld [vmem:[%s7846_s0 + $0x368] ss:$36 sps:$4 sm:$0xff]  }
 0x121   :  { %2643 = vmatmul.mubr.bf16.gmra.mrb[112].mxu1 %v5745_v59  ;;  %v5793_v59 = vld [vmem:[%s7846_s0 + $0x7a8] ss:$36 sps:$4 sm:$0xff]  }
 0x122   :  { %3157 = vmatmul.mubr.bf16.gmra.mrb[80].mxu0 %v5746_v61  ;;  %2650 = vmatprep.mubr.bf16.mxu1 %v5748_v62  ;;  %v5795_v61 = vld [vmem:[%s7846_s0 + $0x36c] ss:$36 sps:$4 sm:$0xff]   ;;  %v5797_v62 = vld [vmem:[%s7846_s0 + $0x7f4] ss:$36 sps:$4 sm:$0xff]  }
 0x123   :  { %3164 = vmatprep.mubr.bf16.mxu0 %v5750_v1  ;;  %v5800_v1 = vld [vmem:[%s7846_s0 + $0x7f0] ss:$36 sps:$4 sm:$0xff]  }
 0x124   :  { %v6733_v2 = vpop.f32.mrb[8].mxu1 }
 0x125   :  { %v2438_v3 = vpop.f32.mrb[9].mxu1 }
 0x126   :  { %v6738_v5 = vpop.f32.mrb[10].mxu1  ;;  %v5802_v3 = vld [vmem:[%s7846_s0 + $0x3b4] ss:$36 sps:$4 sm:$0xff]  }
 0x127   :  { %v2441_v9 = vpop.f32.mrb[11].mxu1 }
 0x128   :  { %v5808_v9 = vld [vmem:[%s7846_s0 + $0x3fc] ss:$36 sps:$4 sm:$0xff]  }
 0x129   :  { %2651 = vmatmul.mubr.bf16.gmra.mrb[116].mxu1 %v5752_v4  ;;  %v5804_v4 = vld [vmem:[%s7846_s0 + $0x83c] ss:$36 sps:$4 sm:$0xff]  }
 0x12a   :  { %3165 = vmatmul.mubr.bf16.gmra.mrb[84].mxu0 %v5753_v7  ;;  %2658 = vmatprep.mubr.bf16.mxu1 %v5754_v8  ;;  %v5806_v7 = vld [vmem:[%s7846_s0 + $0x3b0] ss:$36 sps:$4 sm:$0xff]   ;;  %v5807_v8 = vld [vmem:[%s7846_s0 + $0x838] ss:$36 sps:$4 sm:$0xff]  }
 0x12b   :  { %3172 = vmatprep.mubr.bf16.mxu0 %v5756_v10  ;;  %v5810_v10 = vld [vmem:[%s7846_s0 + $0x884] ss:$36 sps:$4 sm:$0xff]  }
 0x12c   :  { %v6749_v11 = vpop.f32.mrb[12].mxu1 }
 0x12d   :  { %v2446_v12 = vpop.f32.mrb[13].mxu1 }
 0x12e   :  { %v6754_v14 = vpop.f32.mrb[14].mxu1  ;;  %v5910_v12 = vld [vmem:[%s7845_s1 + $0x238] sm:$0xff]  }
 0x12f   :  { %v2449_v17 = vpop.f32.mrb[15].mxu1 }
 0x130   :  { %v5818_v17 = vld [vmem:[%s7846_s0 + $0x8cc] ss:$36 sps:$4 sm:$0xff]  }
 0x131   :  { %2659 = vmatmul.mubr.bf16.gmra.mrb[120].mxu1 %v5758_v13  ;;  %v5812_v13 = vld [vmem:[%s7846_s0 + $0x3f8] ss:$36 sps:$4 sm:$0xff]  }
 0x132   :  { %3173 = vmatmul.mubr.bf16.gmra.mrb[88].mxu0 %v5759_v15  ;;  %2666 = vmatprep.mubr.bf16.mxu1 %v5761_v16  ;;  %v5813_v15 = vld [vmem:[%s7846_s0 + $0x880] ss:$36 sps:$4 sm:$0xff]  }
 0x133   :  { %3180 = vmatprep.mubr.bf16.mxu0 %v5763_v18  ;;  %v5816_v16 = vld [vmem:[%s7846_s0 + $0x444] ss:$36 sps:$4 sm:$0xff]  }
 0x134   :  { %v6765_v19 = vpop.f32.mrb[16].mxu1  ;;  %v5820_v18 = vld [vmem:[%s7846_s0 + $0x440] ss:$36 sps:$4 sm:$0xff]  }
 0x135   :  { %v2454_v20 = vpop.f32.mrb[17].mxu1 }
 0x136   :  { %v6770_v22 = vpop.f32.mrb[18].mxu1  ;;  %v5821_v20 = vld [vmem:[%s7846_s0 + $0x8c8] ss:$36 sps:$4 sm:$0xff]  }
 0x137   :  { %v2457_v25 = vpop.f32.mrb[19].mxu1 }
 0x138   :  { %v5824_v25 = vld [vmem:[%s7846_s0 + $0x18] ss:$36 sps:$4 sm:$0xff]  }
 0x139   :  { %2667 = vmatmul.mubr.bf16.gmra.mrb[124].mxu1 %v5765_v21  ;;  %v5822_v21 = vld [vmem:[%s7846_s0 + $0x48c] ss:$36 sps:$4 sm:$0xff]  }
 0x13a   :  { %3181 = vmatmul.mubr.bf16.gmra.mrb[92].mxu0 %v5766_v23  ;;  %2771 = vmatprep.mubr.bf16.mxu1 %v5769_v24  ;;  %v5826_v23 = vld [vmem:[%s7846_s0 + $0x1c] ss:$36 sps:$4 sm:$0xff]   ;;  %v5827_v24 = vld [vmem:[%s7846_s0 + $0x488] ss:$36 sps:$4 sm:$0xff]  }
 0x13b   :  { %3188 = vmatprep.mubr.bf16.mxu0 %v5770_v26  ;;  %v5828_v26 = vld [vmem:[%s7846_s0 + $0x4d4] ss:$36 sps:$4 sm:$0xff]  }
 0x13c   :  { %v6781_v27 = vpop.f32.mrb[20].mxu1 }
 0x13d   :  { %v2462_v28 = vpop.f32.mrb[21].mxu1 }
 0x13e   :  { %v6786_v29 = vpop.f32.mrb[22].mxu1  ;;  %v5830_v28 = vld [vmem:[%s7846_s0 + $0x64] ss:$36 sps:$4 sm:$0xff]  }
 0x13f   :  { %v2465_v31 = vpop.f32.mrb[23].mxu1 }
 0x140   :  { %v5835_v31 = vld [vmem:[%s7846_s0 + $0x51c] ss:$36 sps:$4 sm:$0xff]  }
 0x141   :  { %2772 = vmatmul.mubr.bf16.vlgmr.msra.gmra.mrb[32].mxu1 %v5767_v0  ;;  %v5832_v0 = vld [vmem:[%s7846_s0 + $0x4d0] ss:$36 sps:$4 sm:$0xff]  }
 0x142   :  { %3189 = vmatmul.mubr.bf16.gmra.mrb[96].mxu0 %v5772_v30  ;;  %5083 = vmatpush3.bf16.msra.mxu1 %v6566_v6  ;;  %v5780_v6 = vld [vmem:[%s7846_s0 + $0x718] ss:$36 sps:$4 sm:$0xff]   ;;  %v5833_v30 = vld [vmem:[%s7846_s0 + $0x60] ss:$36 sps:$4 sm:$0xff]  }
 0x143   :  { %2779 = vmatprep.mubr.bf16.mxu1 %v5775_v32  ;;  %3196 = vmatprep.mubr.bf16.mxu0 %v5777_v33  ;;  %v5837_v32 = vld [vmem:[%s7846_s0 + $0xac] ss:$36 sps:$4 sm:$0xff]   ;;  %v5839_v33 = vld [vmem:[%s7846_s0 + $0x518] ss:$36 sps:$4 sm:$0xff]  }
 0x144   :  { %v6804_v36 = vpop.f32.mrb[24].mxu1  ;;  %5084 = vmatprep.subr.bf16.mxu1 %v5794_v34 }
 0x145   :  { %v2470_v37 = vpop.f32.mrb[25].mxu1 }
 0x146   :  { %v6809_v39 = vpop.f32.mrb[26].mxu1  ;;  %5085 = vmatpush3.bf16.msra.mxu1 %v5794_v34  ;;  %v5840_v34 = vld [vmem:[%s7846_s0 + $0xa8] ss:$36 sps:$4 sm:$0xff]   ;;  %v5843_v37 = vld [vmem:[%s7846_s0 + $0xf4] ss:$36 sps:$4 sm:$0xff]  }
 0x147   :  { %v2473_v41 = vpop.f32.mrb[27].mxu1  ;;  %5086 = vmatprep.subr.bf16.mxu1 %v5815_v35 }
 0x148   :  { %v5849_v41 = vld [vmem:[%s7846_s0 + $0x13c] ss:$36 sps:$4 sm:$0xff]  }
 0x149   :  { %2780 = vmatmul.mubr.bf16.gmra.mrb[36].mxu1 %v5779_v38  ;;  %v5845_v38 = vld [vmem:[%s7846_s0 + $0x560] ss:$36 sps:$4 sm:$0xff]  }
 0x14a   :  { %3197 = vmatmul.mubr.bf16.gmra.mrb[100].mxu0 %v5780_v6  ;;  %2787 = vmatprep.mubr.bf16.mxu1 %v5781_v40  ;;  %v5846_v6 = vld [vmem:[%s7846_s0 + $0xf0] ss:$36 sps:$4 sm:$0xff]  }
 0x14b   :  { %3204 = vmatprep.mubr.bf16.mxu0 %v5783_v42  ;;  %5087 = vmatpush3.bf16.msra.mxu1 %v5815_v35  ;;  %v5841_v35 = vld [vmem:[%s7846_s0 + $0x564] ss:$36 sps:$4 sm:$0xff]   ;;  %v5847_v40 = vld [vmem:[%s7846_s0 + $0x5ac] ss:$36 sps:$4 sm:$0xff]  }
 0x14c   :  { %v6823_v44 = vpop.f32.mrb[28].mxu1  ;;  %5088 = vmatprep.subr.bf16.mxu1 %v5834_v43  ;;  %v5851_v42 = vld [vmem:[%s7846_s0 + $0x5a8] ss:$36 sps:$4 sm:$0xff]  }
 0x14d   :  { %v2478_v46 = vpop.f32.mrb[29].mxu1 }
 0x14e   :  { %v6831_v48 = vpop.f32.mrb[30].mxu1  ;;  %v5856_v46 = vld [vmem:[%s7846_s0 + $0x184] ss:$36 sps:$4 sm:$0xff]  }
 0x14f   :  { %v2481_v53 = vpop.f32.mrb[31].mxu1  ;;  %5089 = vmatpush3.bf16.msra.mxu1 %v5834_v43  ;;  %v5852_v43 = vld [vmem:[%s7846_s0 + $0x138] ss:$36 sps:$4 sm:$0xff]  }
 0x150   :  { %5090 = vmatprep.subr.bf16.mxu1 %v5853_v45  ;;  %v5862_v53 = vld [vmem:[%s7846_s0 + $0x1cc] ss:$36 sps:$4 sm:$0xff]  }
 0x151   :  { %2788 = vmatmul.mubr.bf16.gmra.mrb[40].mxu1 %v5785_v47  ;;  %v5858_v47 = vld [vmem:[%s7846_s0 + $0x5f0] ss:$36 sps:$4 sm:$0xff]  }
 0x152   :  { %3205 = vmatmul.mubr.bf16.gmra.mrb[104].mxu0 %v5786_v50  ;;  %2795 = vmatprep.mubr.bf16.mxu1 %v5788_v51  ;;  %v5859_v50 = vld [vmem:[%s7846_s0 + $0x180] ss:$36 sps:$4 sm:$0xff]  }
 0x153   :  { %3212 = vmatprep.mubr.bf16.mxu0 %v5790_v54  ;;  %5091 = vmatpush3.bf16.msra.mxu1 %v5853_v45  ;;  %v5854_v45 = vld [vmem:[%s7846_s0 + $0x5f4] ss:$36 sps:$4 sm:$0xff]   ;;  %v5860_v51 = vld [vmem:[%s7846_s0 + $0x63c] ss:$36 sps:$4 sm:$0xff]  }
 0x154   :  { %5092 = vmatprep.subr.bf16.mxu1 %v5872_v55  ;;  %v5864_v54 = vld [vmem:[%s7846_s0 + $0x638] ss:$36 sps:$4 sm:$0xff]  }
 0x157   :  { %5093 = vmatpush3.bf16.msra.mxu1 %v5872_v55  ;;  %v5865_v55 = vld [vmem:[%s7846_s0 + $0x1c8] ss:$36 sps:$4 sm:$0xff]  }
 0x158   :  { %5094 = vmatprep.subr.bf16.mxu1 %v5891_v56 }
 0x159   :  { %2796 = vmatmul.mubr.bf16.gmra.mrb[44].mxu1 %v5792_v58  ;;  %v5868_v58 = vld [vmem:[%s7846_s0 + $0x214] ss:$36 sps:$4 sm:$0xff]  }
 0x15a   :  { %3213 = vmatmul.mubr.bf16.gmra.mrb[108].mxu0 %v5793_v59  ;;  %2803 = vmatprep.mubr.bf16.mxu1 %v5795_v61  ;;  %v5870_v59 = vld [vmem:[%s7846_s0 + $0x680] ss:$36 sps:$4 sm:$0xff]   ;;  %v5871_v61 = vld [vmem:[%s7846_s0 + $0x210] ss:$36 sps:$4 sm:$0xff]  }
 0x15b   :  { %3220 = vmatprep.mubr.bf16.mxu0 %v5797_v62  ;;  %5095 = vmatpush3.bf16.msra.mxu1 %v5891_v56  ;;  %v5866_v56 = vld [vmem:[%s7846_s0 + $0x684] ss:$36 sps:$4 sm:$0xff]   ;;  %v5873_v62 = vld [vmem:[%s7846_s0 + $0x6cc] ss:$36 sps:$4 sm:$0xff]  }
 0x15c   :  { %5096 = vmatprep.subr.bf16.mxu1 %v5910_v12 }
 0x15f   :  { %5097 = vmatpush3.bf16.msra.mxu1 %v5910_v12  ;;  %v5887_v12 = vld [vmem:[%s7846_s0 + $0x2ec] ss:$36 sps:$4 sm:$0xff]  }
 0x161   :  { %2804 = vmatmul.mubr.bf16.gmra.mrb[48].mxu1 %v5799_v63  ;;  %v5875_v63 = vld [vmem:[%s7846_s0 + $0x25c] ss:$36 sps:$4 sm:$0xff]  }
 0x162   :  { %3221 = vmatmul.mubr.bf16.gmra.mrb[112].mxu0 %v5800_v1  ;;  %2811 = vmatprep.mubr.bf16.mxu1 %v5802_v3  ;;  %v5877_v1 = vld [vmem:[%s7846_s0 + $0x6c8] ss:$36 sps:$4 sm:$0xff]   ;;  %v5878_v3 = vld [vmem:[%s7846_s0 + $0x258] ss:$36 sps:$4 sm:$0xff]  }
 0x163   :  { %3228 = vmatprep.mubr.bf16.mxu0 %v5804_v4  ;;  %v5879_v4 = vld [vmem:[%s7846_s0 + $0x714] ss:$36 sps:$4 sm:$0xff]  }
 0x169   :  { %2812 = vmatmul.mubr.bf16.gmra.mrb[52].mxu1 %v5806_v7  ;;  %v5881_v7 = vld [vmem:[%s7846_s0 + $0x2a4] ss:$36 sps:$4 sm:$0xff]  }
 0x16a   :  { %3229 = vmatmul.mubr.bf16.gmra.mrb[116].mxu0 %v5807_v8  ;;  %2819 = vmatprep.mubr.bf16.mxu1 %v5808_v9  ;;  %v5883_v8 = vld [vmem:[%s7846_s0 + $0x710] ss:$36 sps:$4 sm:$0xff]   ;;  %v5884_v9 = vld [vmem:[%s7846_s0 + $0x2a0] ss:$36 sps:$4 sm:$0xff]  }
 0x16b   :  { %3236 = vmatprep.mubr.bf16.mxu0 %v5810_v10  ;;  %v5885_v10 = vld [vmem:[%s7846_s0 + $0x75c] ss:$36 sps:$4 sm:$0xff]  }
 0x171   :  { %2820 = vmatmul.mubr.bf16.gmra.mrb[56].mxu1 %v5812_v13  ;;  %v5889_v13 = vld [vmem:[%s7846_s0 + $0x758] ss:$36 sps:$4 sm:$0xff]  }
 0x172   :  { %3237 = vmatmul.mubr.bf16.gmra.mrb[120].mxu0 %v5813_v15  ;;  %2827 = vmatprep.mubr.bf16.mxu1 %v5816_v16  ;;  %v5890_v15 = vld [vmem:[%s7846_s0 + $0x2e8] ss:$36 sps:$4 sm:$0xff]  }
 0x173   :  { %3244 = vmatprep.mubr.bf16.mxu0 %v5818_v17  ;;  %v5892_v16 = vld [vmem:[%s7846_s0 + $0x7a4] ss:$36 sps:$4 sm:$0xff]   ;;  %v5894_v17 = vld [vmem:[%s7846_s0 + $0x334] ss:$36 sps:$4 sm:$0xff]  }
 0x179   :  { %2828 = vmatmul.mubr.bf16.gmra.mrb[60].mxu1 %v5820_v18  ;;  %v5896_v18 = vld [vmem:[%s7846_s0 + $0x7a0] ss:$36 sps:$4 sm:$0xff]  }
 0x17a   :  { %3245 = vmatmul.mubr.bf16.gmra.mrb[124].mxu0 %v5821_v20  ;;  %2835 = vmatprep.mubr.bf16.mxu1 %v5822_v21  ;;  %v5897_v20 = vld [vmem:[%s7846_s0 + $0x330] ss:$36 sps:$4 sm:$0xff]  }
 0x17b   :  { %3285 = vmatprep.mubr.bf16.mxu0 %v5826_v23  ;;  %v5898_v21 = vld [vmem:[%s7846_s0 + $0x7ec] ss:$36 sps:$4 sm:$0xff]   ;;  %v5900_v23 = vld [vmem:[%s7846_s0 + $0x37c] ss:$36 sps:$4 sm:$0xff]  }
 0x181   :  { %2836 = vmatmul.mubr.bf16.gmra.mrb[64].mxu1 %v5827_v24  ;;  %v5902_v24 = vld [vmem:[%s7846_s0 + $0x7e8] ss:$36 sps:$4 sm:$0xff]  }
 0x182   :  { %3286 = vmatmul.mubr.bf16.vlgmr.msra.gmra.mrb[0].mxu0 %v5824_v25  ;;  %2843 = vmatprep.mubr.bf16.mxu1 %v5828_v26  ;;  %v5903_v25 = vld [vmem:[%s7846_s0 + $0x378] ss:$36 sps:$4 sm:$0xff]  }
 0x183   :  { %3293 = vmatprep.mubr.bf16.mxu0 %v5830_v28  ;;  %v5904_v26 = vld [vmem:[%s7846_s0 + $0x834] ss:$36 sps:$4 sm:$0xff]   ;;  %v5906_v28 = vld [vmem:[%s7846_s0 + $0x3c4] ss:$36 sps:$4 sm:$0xff]  }
 0x189   :  { %2844 = vmatmul.mubr.bf16.gmra.mrb[68].mxu1 %v5832_v0  ;;  %v5908_v0 = vld [vmem:[%s7846_s0 + $0x830] ss:$36 sps:$4 sm:$0xff]  }
 0x18a   :  { %3294 = vmatmul.mubr.bf16.gmra.mrb[4].mxu0 %v5833_v30  ;;  %2851 = vmatprep.mubr.bf16.mxu1 %v5835_v31  ;;  %v5909_v30 = vld [vmem:[%s7846_s0 + $0x3c0] ss:$36 sps:$4 sm:$0xff]  }
 0x18b   :  { %3301 = vmatprep.mubr.bf16.mxu0 %v5837_v32  ;;  %v5911_v31 = vld [vmem:[%s7846_s0 + $0x87c] ss:$36 sps:$4 sm:$0xff]   ;;  %v5913_v32 = vld [vmem:[%s7846_s0 + $0x40c] ss:$36 sps:$4 sm:$0xff]  }
 0x191   :  { %2852 = vmatmul.mubr.bf16.gmra.mrb[72].mxu1 %v5839_v33  ;;  %v5915_v33 = vld [vmem:[%s7846_s0 + $0x878] ss:$36 sps:$4 sm:$0xff]  }
 0x192   :  { %3302 = vmatmul.mubr.bf16.gmra.mrb[8].mxu0 %v5840_v34  ;;  %2859 = vmatprep.mubr.bf16.mxu1 %v5841_v35  ;;  %v5916_v34 = vld [vmem:[%s7846_s0 + $0x408] ss:$36 sps:$4 sm:$0xff]  }
 0x193   :  { %3309 = vmatprep.mubr.bf16.mxu0 %v5843_v37  ;;  %v5917_v35 = vld [vmem:[%s7846_s0 + $0x8c4] ss:$36 sps:$4 sm:$0xff]   ;;  %v5919_v37 = vld [vmem:[%s7846_s0 + $0x454] ss:$36 sps:$4 sm:$0xff]  }
 0x199   :  { %2860 = vmatmul.mubr.bf16.gmra.mrb[76].mxu1 %v5845_v38  ;;  %v5921_v38 = vld [vmem:[%s7846_s0 + $0x8c0] ss:$36 sps:$4 sm:$0xff]  }
 0x19a   :  { %3310 = vmatmul.mubr.bf16.gmra.mrb[12].mxu0 %v5846_v6  ;;  %2867 = vmatprep.mubr.bf16.mxu1 %v5847_v40  ;;  %v5922_v6 = vld [vmem:[%s7846_s0 + $0x450] ss:$36 sps:$4 sm:$0xff]   ;;  %v5925_v40 = vld [vmem:[%s7846_s0 + $0x20] ss:$36 sps:$4 sm:$0xff]  }
 0x19b   :  { %3317 = vmatprep.mubr.bf16.mxu0 %v5849_v41  ;;  %v5923_v41 = vld [vmem:[%s7846_s0 + $0x49c] ss:$36 sps:$4 sm:$0xff]  }
 0x1a1   :  { %2868 = vmatmul.mubr.bf16.gmra.mrb[80].mxu1 %v5851_v42  ;;  %v5927_v42 = vld [vmem:[%s7846_s0 + $0x68] ss:$36 sps:$4 sm:$0xff]  }
 0x1a2   :  { %3318 = vmatmul.mubr.bf16.gmra.mrb[16].mxu0 %v5852_v43  ;;  %2875 = vmatprep.mubr.bf16.mxu1 %v5854_v45  ;;  %v5926_v43 = vld [vmem:[%s7846_s0 + $0x498] ss:$36 sps:$4 sm:$0xff]   ;;  %v5930_v45 = vld [vmem:[%s7846_s0 + $0xb0] ss:$36 sps:$4 sm:$0xff]  }
 0x1a3   :  { %3325 = vmatprep.mubr.bf16.mxu0 %v5856_v46  ;;  %v5928_v46 = vld [vmem:[%s7846_s0 + $0x4e4] ss:$36 sps:$4 sm:$0xff]  }
 0x1a9   :  { %2876 = vmatmul.mubr.bf16.gmra.mrb[84].mxu1 %v5858_v47  ;;  %v5932_v47 = vld [vmem:[%s7846_s0 + $0xf8] ss:$36 sps:$4 sm:$0xff]  }
 0x1aa   :  { %3326 = vmatmul.mubr.bf16.gmra.mrb[20].mxu0 %v5859_v50  ;;  %2883 = vmatprep.mubr.bf16.mxu1 %v5860_v51  ;;  %v5931_v50 = vld [vmem:[%s7846_s0 + $0x4e0] ss:$36 sps:$4 sm:$0xff]  }
 0x1ab   :  { %3333 = vmatprep.mubr.bf16.mxu0 %v5862_v53  ;;  %v5935_v51 = vld [vmem:[%s7846_s0 + $0x140] ss:$36 sps:$4 sm:$0xff]   ;;  %v5933_v53 = vld [vmem:[%s7846_s0 + $0x52c] ss:$36 sps:$4 sm:$0xff]  }
 0x1b1   :  { %2884 = vmatmul.mubr.bf16.gmra.mrb[88].mxu1 %v5864_v54  ;;  %v5937_v54 = vld [vmem:[%s7846_s0 + $0x188] ss:$36 sps:$4 sm:$0xff]  }
 0x1b2   :  { %3334 = vmatmul.mubr.bf16.gmra.mrb[24].mxu0 %v5865_v55  ;;  %2891 = vmatprep.mubr.bf16.mxu1 %v5866_v56  ;;  %v5936_v55 = vld [vmem:[%s7846_s0 + $0x528] ss:$36 sps:$4 sm:$0xff]   ;;  %v5940_v56 = vld [vmem:[%s7846_s0 + $0x1d0] ss:$36 sps:$4 sm:$0xff]  }
 0x1b3   :  { %3341 = vmatprep.mubr.bf16.mxu0 %v5868_v58  ;;  %v5938_v58 = vld [vmem:[%s7846_s0 + $0x574] ss:$36 sps:$4 sm:$0xff]  }
 0x1b9   :  { %2892 = vmatmul.mubr.bf16.gmra.mrb[92].mxu1 %v5870_v59 }
 0x1ba   :  { %3342 = vmatmul.mubr.bf16.gmra.mrb[28].mxu0 %v5871_v61  ;;  %2899 = vmatprep.mubr.bf16.mxu1 %v5873_v62  ;;  %v5942_v62 = vld [vmem:[%s7846_s0 + $0x218] ss:$36 sps:$4 sm:$0xff]  }
 0x1bb   :  { %3349 = vmatprep.mubr.bf16.mxu0 %v5875_v63 }
 0x1c1   :  { %2900 = vmatmul.mubr.bf16.gmra.mrb[96].mxu1 %v5877_v1  ;;  %v5941_v1 = vld [vmem:[%s7846_s0 + $0x570] ss:$36 sps:$4 sm:$0xff]  }
 0x1c2   :  { %3350 = vmatmul.mubr.bf16.gmra.mrb[32].mxu0 %v5878_v3  ;;  %2907 = vmatprep.mubr.bf16.mxu1 %v5879_v4  ;;  %v5945_v3 = vld [vmem:[%s7846_s0 + $0x260] ss:$36 sps:$4 sm:$0xff]  }
 0x1c3   :  { %3357 = vmatprep.mubr.bf16.mxu0 %v5881_v7  ;;  %v5943_v7 = vld [vmem:[%s7846_s0 + $0x5bc] ss:$36 sps:$4 sm:$0xff]  }
 0x1c9   :  { %2908 = vmatmul.mubr.bf16.gmra.mrb[100].mxu1 %v5883_v8 }
 0x1ca   :  { %3358 = vmatmul.mubr.bf16.gmra.mrb[36].mxu0 %v5884_v9  ;;  %2915 = vmatprep.mubr.bf16.mxu1 %v5885_v10  ;;  %v5947_v10 = vld [vmem:[%s7846_s0 + $0x2a8] ss:$36 sps:$4 sm:$0xff]  }
 0x1cb   :  { %3365 = vmatprep.mubr.bf16.mxu0 %v5887_v12 }
 0x1d1   :  { %2916 = vmatmul.mubr.bf16.gmra.mrb[104].mxu1 %v5889_v13  ;;  %v5946_v13 = vld [vmem:[%s7846_s0 + $0x5b8] ss:$36 sps:$4 sm:$0xff]  }
 0x1d2   :  { %3366 = vmatmul.mubr.bf16.gmra.mrb[40].mxu0 %v5890_v15  ;;  %2923 = vmatprep.mubr.bf16.mxu1 %v5892_v16  ;;  %v5950_v15 = vld [vmem:[%s7846_s0 + $0x2f0] ss:$36 sps:$4 sm:$0xff]  }
 0x1d3   :  { %3373 = vmatprep.mubr.bf16.mxu0 %v5894_v17  ;;  %v5948_v17 = vld [vmem:[%s7846_s0 + $0x604] ss:$36 sps:$4 sm:$0xff]  }
 0x1d9   :  { %2924 = vmatmul.mubr.bf16.gmra.mrb[108].mxu1 %v5896_v18 }
 0x1da   :  { %3374 = vmatmul.mubr.bf16.gmra.mrb[44].mxu0 %v5897_v20  ;;  %2931 = vmatprep.mubr.bf16.mxu1 %v5898_v21  ;;  %v5952_v21 = vld [vmem:[%s7846_s0 + $0x338] ss:$36 sps:$4 sm:$0xff]  }
 0x1db   :  { %3381 = vmatprep.mubr.bf16.mxu0 %v5900_v23 }
 0x1e1   :  { %2932 = vmatmul.mubr.bf16.gmra.mrb[112].mxu1 %v5902_v24  ;;  %v5951_v24 = vld [vmem:[%s7846_s0 + $0x600] ss:$36 sps:$4 sm:$0xff]  }
 0x1e2   :  { %3382 = vmatmul.mubr.bf16.gmra.mrb[48].mxu0 %v5903_v25  ;;  %2939 = vmatprep.mubr.bf16.mxu1 %v5904_v26  ;;  %v5955_v25 = vld [vmem:[%s7846_s0 + $0x380] ss:$36 sps:$4 sm:$0xff]  }
 0x1e3   :  { %3389 = vmatprep.mubr.bf16.mxu0 %v5906_v28  ;;  %v5953_v28 = vld [vmem:[%s7846_s0 + $0x64c] ss:$36 sps:$4 sm:$0xff]  }
 0x1e9   :  { %2940 = vmatmul.mubr.bf16.gmra.mrb[116].mxu1 %v5908_v0 }
 0x1ea   :  { %3390 = vmatmul.mubr.bf16.gmra.mrb[52].mxu0 %v5909_v30  ;;  %2947 = vmatprep.mubr.bf16.mxu1 %v5911_v31  ;;  %v5957_v31 = vld [vmem:[%s7846_s0 + $0x3c8] ss:$36 sps:$4 sm:$0xff]  }
 0x1eb   :  { %3397 = vmatprep.mubr.bf16.mxu0 %v5913_v32 }
 0x1f1   :  { %2948 = vmatmul.mubr.bf16.gmra.mrb[120].mxu1 %v5915_v33  ;;  %v5956_v33 = vld [vmem:[%s7846_s0 + $0x648] ss:$36 sps:$4 sm:$0xff]  }
 0x1f2   :  { %3398 = vmatmul.mubr.bf16.gmra.mrb[56].mxu0 %v5916_v34  ;;  %2955 = vmatprep.mubr.bf16.mxu1 %v5917_v35  ;;  %v5960_v34 = vld [vmem:[%s7846_s0 + $0x410] ss:$36 sps:$4 sm:$0xff]  }
 0x1f3   :  { %3405 = vmatprep.mubr.bf16.mxu0 %v5919_v37  ;;  %v5958_v37 = vld [vmem:[%s7846_s0 + $0x694] ss:$36 sps:$4 sm:$0xff]  }
 0x1f9   :  { %2956 = vmatmul.mubr.bf16.gmra.mrb[124].mxu1 %v5921_v38 }
 0x1fa   :  { %3406 = vmatmul.mubr.bf16.gmra.mrb[60].mxu0 %v5922_v6  ;;  %5098 = vmatprep.mubr.bf16.mxu1 %v5925_v40  ;;  %v5962_v40 = vld [vmem:[%s7846_s0 + $0x458] ss:$36 sps:$4 sm:$0xff]  }
 0x1fb   :  { %3413 = vmatprep.mubr.bf16.mxu0 %v5923_v41 }
 0x201   :  { %5099 = vmatmul.mubr.bf16.vlgmr.msra.gmra.mrb[128].mxu1 %v5927_v42  ;;  %v5961_v42 = vld [vmem:[%s7846_s0 + $0x690] ss:$36 sps:$4 sm:$0xff]  }
 0x202   :  { %3414 = vmatmul.mubr.bf16.gmra.mrb[64].mxu0 %v5926_v43  ;;  %5102 = vmatprep.mubr.bf16.mxu1 %v5930_v45  ;;  %v5965_v43 = vld [vmem:[%s7846_s0 + $0x4a0] ss:$36 sps:$4 sm:$0xff]  }
 0x203   :  { %3421 = vmatprep.mubr.bf16.mxu0 %v5928_v46  ;;  %v5963_v46 = vld [vmem:[%s7846_s0 + $0x6dc] ss:$36 sps:$4 sm:$0xff]  }
 0x209   :  { %5103 = vmatmul.mubr.bf16.gmra.mrb[132].mxu1 %v5932_v47 }
 0x20a   :  { %3422 = vmatmul.mubr.bf16.gmra.mrb[68].mxu0 %v5931_v50  ;;  %5106 = vmatprep.mubr.bf16.mxu1 %v5935_v51  ;;  %v5967_v51 = vld [vmem:[%s7846_s0 + $0x4e8] ss:$36 sps:$4 sm:$0xff]  }
 0x20b   :  { %3429 = vmatprep.mubr.bf16.mxu0 %v5933_v53 }
 0x211   :  { %5107 = vmatmul.mubr.bf16.gmra.mrb[136].mxu1 %v5937_v54  ;;  %v5966_v54 = vld [vmem:[%s7846_s0 + $0x6d8] ss:$36 sps:$4 sm:$0xff]  }
 0x212   :  { %3430 = vmatmul.mubr.bf16.gmra.mrb[72].mxu0 %v5936_v55  ;;  %5110 = vmatprep.mubr.bf16.mxu1 %v5940_v56  ;;  %v5970_v55 = vld [vmem:[%s7846_s0 + $0x530] ss:$36 sps:$4 sm:$0xff]  }
 0x213   :  { %3437 = vmatprep.mubr.bf16.mxu0 %v5938_v58  ;;  %v5968_v58 = vld [vmem:[%s7846_s0 + $0x724] ss:$36 sps:$4 sm:$0xff]  }
 0x214   :  { %v7139_v59 = vpop.f32.mrb[32].mxu1 }
 0x215   :  { %v2775_v61 = vpop.f32.mrb[33].mxu1 }
 0x216   :  { %v7144_v63 = vpop.f32.mrb[34].mxu1 }
 0x217   :  { %v2778_v4 = vpop.f32.mrb[35].mxu1 }
 0x218   :  { %v5971_v4 = vld [vmem:[%s7846_s0 + $0x720] ss:$36 sps:$4 sm:$0xff]  }
 0x219   :  { %5111 = vmatmul.mubr.bf16.gmra.mrb[140].mxu1 %v5942_v62 }
 0x21a   :  { %3438 = vmatmul.mubr.bf16.gmra.mrb[76].mxu0 %v5941_v1  ;;  %5114 = vmatprep.mubr.bf16.mxu1 %v5945_v3  ;;  %v5972_v1 = vld [vmem:[%s7846_s0 + $0x578] ss:$36 sps:$4 sm:$0xff]  }
 0x21b   :  { %3445 = vmatprep.mubr.bf16.mxu0 %v5943_v7  ;;  %v5975_v7 = vld [vmem:[%s7846_s0 + $0x5c0] ss:$36 sps:$4 sm:$0xff]  }
 0x21c   :  { %v7155_v8 = vpop.f32.mrb[36].mxu1 }
 0x21d   :  { %v2783_v9 = vpop.f32.mrb[37].mxu1 }
 0x21e   :  { %v7160_v12 = vpop.f32.mrb[38].mxu1 }
 0x21f   :  { %v2786_v16 = vpop.f32.mrb[39].mxu1 }
 0x220   :  { %v5977_v16 = vld [vmem:[%s7846_s0 + $0x608] ss:$36 sps:$4 sm:$0xff]  }
 0x221   :  { %5115 = vmatmul.mubr.bf16.gmra.mrb[144].mxu1 %v5947_v10  ;;  %v5973_v10 = vld [vmem:[%s7846_s0 + $0x76c] ss:$36 sps:$4 sm:$0xff]  }
 0x222   :  { %3446 = vmatmul.mubr.bf16.gmra.mrb[80].mxu0 %v5946_v13  ;;  %5118 = vmatprep.mubr.bf16.mxu1 %v5950_v15 }
 0x223   :  { %3453 = vmatprep.mubr.bf16.mxu0 %v5948_v17 }
 0x224   :  { %v7171_v18 = vpop.f32.mrb[40].mxu1 }
 0x225   :  { %v2791_v20 = vpop.f32.mrb[41].mxu1 }
 0x226   :  { %v7176_v23 = vpop.f32.mrb[42].mxu1  ;;  %v5976_v20 = vld [vmem:[%s7846_s0 + $0x768] ss:$36 sps:$4 sm:$0xff]  }
 0x227   :  { %v2794_v26 = vpop.f32.mrb[43].mxu1 }
 0x229   :  { %5119 = vmatmul.mubr.bf16.gmra.mrb[148].mxu1 %v5952_v21  ;;  %v5980_v21 = vld [vmem:[%s7846_s0 + $0x650] ss:$36 sps:$4 sm:$0xff]  }
 0x22a   :  { %3454 = vmatmul.mubr.bf16.gmra.mrb[84].mxu0 %v5951_v24  ;;  %5122 = vmatprep.mubr.bf16.mxu1 %v5955_v25  ;;  %v5978_v25 = vld [vmem:[%s7846_s0 + $0x7b4] ss:$36 sps:$4 sm:$0xff]  }
 0x22b   :  { %3461 = vmatprep.mubr.bf16.mxu0 %v5953_v28 }
 0x22c   :  { %v7187_v0 = vpop.f32.mrb[44].mxu1 }
 0x22d   :  { %v2799_v30 = vpop.f32.mrb[45].mxu1 }
 0x22e   :  { %v7192_v32 = vpop.f32.mrb[46].mxu1 }
 0x22f   :  { %v2802_v35 = vpop.f32.mrb[47].mxu1 }
 0x231   :  { %5123 = vmatmul.mubr.bf16.gmra.mrb[152].mxu1 %v5957_v31  ;;  %v5982_v31 = vld [vmem:[%s7846_s0 + $0x698] ss:$36 sps:$4 sm:$0xff]  }
 0x232   :  { %3462 = vmatmul.mubr.bf16.gmra.mrb[88].mxu0 %v5956_v33  ;;  %5126 = vmatprep.mubr.bf16.mxu1 %v5960_v34 }
 0x233   :  { %3469 = vmatprep.mubr.bf16.mxu0 %v5958_v37  ;;  %v5981_v37 = vld [vmem:[%s7846_s0 + $0x7b0] ss:$36 sps:$4 sm:$0xff]  }
 0x234   :  { %v7203_v38 = vpop.f32.mrb[48].mxu1 }
 0x235   :  { %v2807_v6 = vpop.f32.mrb[49].mxu1 }
 0x236   :  { %v7208_v41 = vpop.f32.mrb[50].mxu1  ;;  %v5985_v6 = vld [vmem:[%s7846_s0 + $0x6e0] ss:$36 sps:$4 sm:$0xff]  }
 0x237   :  { %v2810_v45 = vpop.f32.mrb[51].mxu1 }
 0x239   :  { %5127 = vmatmul.mubr.bf16.gmra.mrb[156].mxu1 %v5962_v40 }
 0x23a   :  { %3470 = vmatmul.mubr.bf16.gmra.mrb[92].mxu0 %v5961_v42  ;;  %5130 = vmatprep.mubr.bf16.mxu1 %v5965_v43  ;;  %v5983_v43 = vld [vmem:[%s7846_s0 + $0x7fc] ss:$36 sps:$4 sm:$0xff]  }
 0x23b   :  { %3477 = vmatprep.mubr.bf16.mxu0 %v5963_v46 }
 0x23c   :  { %v7219_v47 = vpop.f32.mrb[52].mxu1 }
 0x23d   :  { %v2815_v50 = vpop.f32.mrb[53].mxu1 }
 0x23e   :  { %v7224_v53 = vpop.f32.mrb[54].mxu1 }
 0x23f   :  { %v2818_v56 = vpop.f32.mrb[55].mxu1 }
 0x241   :  { %5131 = vmatmul.mubr.bf16.gmra.mrb[160].mxu1 %v5967_v51 }
 0x242   :  { %3478 = vmatmul.mubr.bf16.gmra.mrb[96].mxu0 %v5966_v54  ;;  %5134 = vmatprep.mubr.bf16.mxu1 %v5970_v55  ;;  %v5987_v54 = vld [vmem:[%s7846_s0 + $0x728] ss:$36 sps:$4 sm:$0xff]  }
 0x243   :  { %3485 = vmatprep.mubr.bf16.mxu0 %v5968_v58 }
 0x244   :  { %v7235_v61 = vpop.f32.mrb[56].mxu1 }
 0x245   :  { %v2823_v62 = vpop.f32.mrb[57].mxu1 }
 0x246   :  { %v7240_v3 = vpop.f32.mrb[58].mxu1  ;;  %v5990_v62 = vld [vmem:[%s7846_s0 + $0x770] ss:$36 sps:$4 sm:$0xff]  }
 0x247   :  { %v2826_v9 = vpop.f32.mrb[59].mxu1 }
 0x249   :  { %5135 = vmatmul.mubr.bf16.gmra.mrb[164].mxu1 %v5972_v1 }
 0x24a   :  { %3486 = vmatmul.mubr.bf16.gmra.mrb[100].mxu0 %v5971_v4  ;;  %5138 = vmatprep.mubr.bf16.mxu1 %v5975_v7  ;;  %v5988_v7 = vld [vmem:[%s7846_s0 + $0x844] ss:$36 sps:$4 sm:$0xff]  }
 0x24b   :  { %3493 = vmatprep.mubr.bf16.mxu0 %v5973_v10 }
 0x24c   :  { %v7251_v13 = vpop.f32.mrb[60].mxu1 }
 0x24d   :  { %v2831_v15 = vpop.f32.mrb[61].mxu1 }
 0x24e   :  { %v7256_v17 = vpop.f32.mrb[62].mxu1 }
 0x24f   :  { %v2834_v24 = vpop.f32.mrb[63].mxu1 }
 0x251   :  { %5139 = vmatmul.mubr.bf16.gmra.mrb[168].mxu1 %v5977_v16 }
 0x252   :  { %3494 = vmatmul.mubr.bf16.gmra.mrb[104].mxu0 %v5976_v20  ;;  %5142 = vmatprep.mubr.bf16.mxu1 %v5980_v21  ;;  %v5992_v20 = vld [vmem:[%s7846_s0 + $0x7b8] ss:$36 sps:$4 sm:$0xff]  }
 0x253   :  { %3501 = vmatprep.mubr.bf16.mxu0 %v5978_v25 }
 0x254   :  { %v7267_v26 = vpop.f32.mrb[64].mxu1 }
 0x255   :  { %v3287_v28 = vpop.f32.mrb[0].mxu0  ;;  %v2839_v30 = vpop.f32.mrb[65].mxu1 }
 0x256   :  { %v7273_v33 = vadd.f32 %v3287_v28, %v6701_v49  ;;  %v3289_v34 = vpop.f32.mrb[1].mxu0  ;;  %v7275_v35 = vpop.f32.mrb[66].mxu1  ;;  %v5995_v28 = vld [vmem:[%s7846_s0 + $0x800] ss:$36 sps:$4 sm:$0xff]  }
 0x257   :  { %v3290_v40 = vpop.f32.mrb[2].mxu0  ;;  %v2842_v42 = vpop.f32.mrb[67].mxu1  ;;  %v5993_v34 = vld [vmem:[%s7846_s0 + $0x88c] ss:$36 sps:$4 sm:$0xff]  }
 0x258   :  { %v7287_v49 = vadd.f32 %v3290_v40, %v6706_v52  ;;  %v3292_v45 = vpop.f32.mrb[3].mxu0  ;;  %v5986_v52 = vld [vmem:[%s7846_s0 + $0x7f8] ss:$36 sps:$4 sm:$0xff]  }
 0x259   :  { %5143 = vmatmul.mubr.bf16.gmra.mrb[172].mxu1 %v5982_v31 }
 0x25a   :  { %3502 = vmatmul.mubr.bf16.gmra.mrb[108].mxu0 %v5981_v37  ;;  %5146 = vmatprep.mubr.bf16.mxu1 %v5985_v6 }
 0x25b   :  { %3509 = vmatprep.mubr.bf16.mxu0 %v5983_v43  ;;  %v5997_v43 = vld [vmem:[%s7846_s0 + $0x848] ss:$36 sps:$4 sm:$0xff]  }
 0x25c   :  { %v7289_v46 = vpop.f32.mrb[68].mxu1 }
 0x25d   :  { %v3295_v50 = vpop.f32.mrb[4].mxu0  ;;  %v2847_v51 = vpop.f32.mrb[69].mxu1 }
 0x25e   :  { %v7295_v55 = vadd.f32 %v3295_v50, %v6717_v57  ;;  %v3297_v56 = vpop.f32.mrb[5].mxu0  ;;  %v7297_v58 = vpop.f32.mrb[70].mxu1 }
 0x25f   :  { %v3298_v1 = vpop.f32.mrb[6].mxu0  ;;  %v2850_v4 = vpop.f32.mrb[71].mxu1 }
 0x260   :  { %v7309_v57 = vadd.f32 %v3298_v1, %v6722_v60  ;;  %v3300_v9 = vpop.f32.mrb[7].mxu0  ;;  %v5991_v60 = vld [vmem:[%s7846_s0 + $0x840] ss:$36 sps:$4 sm:$0xff]  }
 0x261   :  { %5147 = vmatmul.mubr.bf16.gmra.mrb[176].mxu1 %v5987_v54  ;;  %v6000_v54 = vld [vmem:[%s7846_s0 + $0x890] ss:$36 sps:$4 sm:$0xff]  }
 0x262   :  { %3510 = vmatmul.mubr.bf16.gmra.mrb[112].mxu0 %v5986_v52  ;;  %5150 = vmatprep.mubr.bf16.mxu1 %v5990_v62  ;;  %v5998_v62 = vld [vmem:[%s7846_s0 + $0x8d4] ss:$36 sps:$4 sm:$0xff]  }
 0x263   :  { %3517 = vmatprep.mubr.bf16.mxu0 %v5988_v7 }
 0x264   :  { %v7311_v10 = vpop.f32.mrb[72].mxu1 }
 0x265   :  { %v3303_v15 = vpop.f32.mrb[8].mxu0  ;;  %v2855_v16 = vpop.f32.mrb[73].mxu1 }
 0x266   :  { %v7317_v21 = vadd.f32 %v3303_v15, %v6733_v2  ;;  %v3305_v24 = vpop.f32.mrb[9].mxu0  ;;  %v7319_v25 = vpop.f32.mrb[74].mxu1  ;;  %v6002_v15 = vld [vmem:[%s7846_s0 + $0x8d8] ss:$36 sps:$4 sm:$0xff]  }
 0x267   :  { %v3306_v30 = vpop.f32.mrb[10].mxu0  ;;  %v2858_v31 = vpop.f32.mrb[75].mxu1 }
 0x268   :  { %v7331_v2 = vadd.f32 %v3306_v30, %v6738_v5  ;;  %v3308_v37 = vpop.f32.mrb[11].mxu0  ;;  %v5996_v5 = vld [vmem:[%s7846_s0 + $0x888] ss:$36 sps:$4 sm:$0xff]  }
 0x269   :  { %5151 = vmatmul.mubr.bf16.gmra.mrb[180].mxu1 %v5992_v20 }
 0x26a   :  { %3518 = vmatmul.mubr.bf16.gmra.mrb[116].mxu0 %v5991_v60  ;;  %5154 = vmatprep.mubr.bf16.mxu1 %v5995_v28 }
 0x26b   :  { %3525 = vmatprep.mubr.bf16.mxu0 %v5993_v34 }
 0x26c   :  { %v7333_v6 = vpop.f32.mrb[76].mxu1 }
 0x26d   :  { %v3311_v40 = vpop.f32.mrb[12].mxu0  ;;  %v2863_v42 = vpop.f32.mrb[77].mxu1 }
 0x26e   :  { %v7339_v45 = vadd.f32 %v3311_v40, %v6749_v11  ;;  %v3313_v50 = vpop.f32.mrb[13].mxu0  ;;  %v7341_v51 = vpop.f32.mrb[78].mxu1 }
 0x26f   :  { %v3314_v56 = vpop.f32.mrb[14].mxu0  ;;  %v2866_v52 = vpop.f32.mrb[79].mxu1 }
 0x270   :  { %v7353_v11 = vadd.f32 %v3314_v56, %v6754_v14  ;;  %v3316_v1 = vpop.f32.mrb[15].mxu0  ;;  %v6001_v14 = vld [vmem:[%s7846_s0 + $0x8d0] ss:$36 sps:$4 sm:$0xff]  }
 0x271   :  { %5155 = vmatmul.mubr.bf16.gmra.mrb[184].mxu1 %v5997_v43 }
 0x272   :  { %3526 = vmatmul.mubr.bf16.gmra.mrb[120].mxu0 %v5996_v5  ;;  %5158 = vmatprep.mubr.bf16.mxu1 %v6000_v54 }
 0x273   :  { %3533 = vmatprep.mubr.bf16.mxu0 %v5998_v62 }
 0x274   :  { %v7355_v4 = vpop.f32.mrb[80].mxu1 }
 0x275   :  { %v3319_v7 = vpop.f32.mrb[16].mxu0  ;;  %v2871_v9 = vpop.f32.mrb[81].mxu1 }
 0x276   :  { %v7361_v16 = vadd.f32 %v3319_v7, %v6765_v19  ;;  %v3321_v20 = vpop.f32.mrb[17].mxu0  ;;  %v7363_v24 = vpop.f32.mrb[82].mxu1 }
 0x277   :  { %v3322_v60 = vpop.f32.mrb[18].mxu0  ;;  %v2874_v28 = vpop.f32.mrb[83].mxu1 }
 0x278   :  { %v7369_v30 = vadd.f32 %v3322_v60, %v6770_v22  ;;  %v3324_v31 = vpop.f32.mrb[19].mxu0 }
 0x279   :  { %5159 = vmatmul.mubr.bf16.gmra.mrb[188].mxu1 %v6002_v15 }
 0x27a   :  { %3534 = vmatmul.mubr.bf16.gmra.mrb[124].mxu0 %v6001_v14 }
 0x27c   :  { %v7371_v34 = vpop.f32.mrb[84].mxu1 }
 0x27d   :  { %v3327_v37 = vpop.f32.mrb[20].mxu0  ;;  %v2879_v19 = vpop.f32.mrb[85].mxu1 }
 0x27e   :  { %v7374_v40 = vadd.f32 %v3327_v37, %v6781_v27  ;;  %v3329_v42 = vpop.f32.mrb[21].mxu0  ;;  %v7376_v43 = vpop.f32.mrb[86].mxu1 }
 0x27f   :  { %v3330_v50 = vpop.f32.mrb[22].mxu0  ;;  %v2882_v5 = vpop.f32.mrb[87].mxu1 }
 0x280   :  { %v7379_v54 = vadd.f32 %v3330_v50, %v6786_v29  ;;  %v3332_v22 = vpop.f32.mrb[23].mxu0 }
 0x284   :  { %v7381_v56 = vpop.f32.mrb[88].mxu1 }
 0x285   :  { %v3335_v52 = vpop.f32.mrb[24].mxu0  ;;  %v2887_v62 = vpop.f32.mrb[89].mxu1 }
 0x286   :  { %v7384_v1 = vadd.f32 %v3335_v52, %v6804_v36  ;;  %v3337_v7 = vpop.f32.mrb[25].mxu0  ;;  %v7386_v9 = vpop.f32.mrb[90].mxu1 }
 0x287   :  { %v3338_v27 = vpop.f32.mrb[26].mxu0  ;;  %v2890_v15 = vpop.f32.mrb[91].mxu1 }
 0x288   :  { %v7389_v20 = vadd.f32 %v3338_v27, %v6809_v39  ;;  %v3340_v14 = vpop.f32.mrb[27].mxu0 }
 0x28c   :  { %v7391_v60 = vpop.f32.mrb[92].mxu1 }
 0x28d   :  { %v3343_v29 = vpop.f32.mrb[28].mxu0  ;;  %v2895_v28 = vpop.f32.mrb[93].mxu1 }
 0x28e   :  { %v7394_v31 = vadd.f32 %v3343_v29, %v6823_v44  ;;  %v3345_v37 = vpop.f32.mrb[29].mxu0  ;;  %v7396_v19 = vpop.f32.mrb[94].mxu1 }
 0x28f   :  { %v3346_v36 = vpop.f32.mrb[30].mxu0  ;;  %v2898_v42 = vpop.f32.mrb[95].mxu1 }
 0x290   :  { %v7399_v50 = vadd.f32 %v3346_v36, %v6831_v48  ;;  %v3348_v5 = vpop.f32.mrb[31].mxu0 }
 0x294   :  { %v7401_v22 = vpop.f32.mrb[96].mxu1 }
 0x295   :  { %7850 = vst [vmem:[#allocation2_spill] sm:$0xff] %v7401_v22  ;;  %v3351_v39 = vpop.f32.mrb[32].mxu0  ;;  %v2903_v52 = vpop.f32.mrb[97].mxu1 }
 0x296   :  { %v7404_v62 = vadd.f32 %v3351_v39, %v7139_v59  ;;  %v3353_v7 = vpop.f32.mrb[33].mxu0  ;;  %v7406_v27 = vpop.f32.mrb[98].mxu1 }
 0x297   :  { %7851 = vst [vmem:[#allocation3_spill] sm:$0xff] %v7406_v27  ;;  %v3354_v44 = vpop.f32.mrb[34].mxu0  ;;  %v2906_v15 = vpop.f32.mrb[99].mxu1 }
 0x298   :  { %v7409_v14 = vadd.f32 %v3354_v44, %v7144_v63  ;;  %v3356_v29 = vpop.f32.mrb[35].mxu0 }
 0x29c   :  { %v7411_v28 = vpop.f32.mrb[100].mxu1 }
 0x29d   :  { %7852 = vst [vmem:[#allocation4_spill] sm:$0xff] %v7411_v28  ;;  %v3359_v48 = vpop.f32.mrb[36].mxu0  ;;  %v2911_v37 = vpop.f32.mrb[101].mxu1 }
 0x29e   :  { %v7414_v36 = vadd.f32 %v3359_v48, %v7155_v8  ;;  %v3361_v42 = vpop.f32.mrb[37].mxu0  ;;  %v7416_v5 = vpop.f32.mrb[102].mxu1 }
 0x29f   :  { %7853 = vst [vmem:[#allocation5_spill] sm:$0xff] %v7416_v5  ;;  %v3362_v59 = vpop.f32.mrb[38].mxu0  ;;  %v2914_v39 = vpop.f32.mrb[103].mxu1 }
 0x2a0   :  { %v7419_v52 = vadd.f32 %v3362_v59, %v7160_v12  ;;  %v3364_v7 = vpop.f32.mrb[39].mxu0 }
 0x2a4   :  { %v7421_v15 = vpop.f32.mrb[104].mxu1 }
 0x2a5   :  { %7854 = vst [vmem:[#allocation6_spill] sm:$0xff] %v7421_v15  ;;  %v3367_v63 = vpop.f32.mrb[40].mxu0  ;;  %v2919_v44 = vpop.f32.mrb[105].mxu1 }
 0x2a6   :  { %v7424_v29 = vadd.f32 %v3367_v63, %v7171_v18  ;;  %v3369_v37 = vpop.f32.mrb[41].mxu0  ;;  %v7426_v28 = vpop.f32.mrb[106].mxu1 }
 0x2a7   :  { %7855 = vst [vmem:[#allocation7_spill] sm:$0xff] %v7426_v28  ;;  %v3370_v8 = vpop.f32.mrb[42].mxu0  ;;  %v2922_v48 = vpop.f32.mrb[107].mxu1 }
 0x2a8   :  { %v7429_v42 = vadd.f32 %v3370_v8, %v7176_v23  ;;  %v3372_v39 = vpop.f32.mrb[43].mxu0 }
 0x2ac   :  { %v7431_v5 = vpop.f32.mrb[108].mxu1 }
 0x2ad   :  { %7856 = vst [vmem:[#allocation8_spill] sm:$0xff] %v7431_v5  ;;  %v3375_v12 = vpop.f32.mrb[44].mxu0  ;;  %v2927_v59 = vpop.f32.mrb[109].mxu1 }
 0x2ae   :  { %v7434_v7 = vadd.f32 %v3375_v12, %v7187_v0  ;;  %v3377_v44 = vpop.f32.mrb[45].mxu0  ;;  %v7436_v15 = vpop.f32.mrb[110].mxu1 }
 0x2af   :  { %7857 = vst [vmem:[#allocation9_spill] sm:$0xff] %v7436_v15  ;;  %v3378_v18 = vpop.f32.mrb[46].mxu0  ;;  %v2930_v63 = vpop.f32.mrb[111].mxu1 }
 0x2b0   :  { %v7439_v37 = vadd.f32 %v3378_v18, %v7192_v32  ;;  %v3380_v48 = vpop.f32.mrb[47].mxu0 }
 0x2b4   :  { %v7441_v28 = vpop.f32.mrb[112].mxu1 }
 0x2b5   :  { %7858 = vst [vmem:[#allocation10_spill] sm:$0xff] %v7441_v28  ;;  %v3383_v23 = vpop.f32.mrb[48].mxu0  ;;  %v2935_v8 = vpop.f32.mrb[113].mxu1 }
 0x2b6   :  { %v7444_v39 = vadd.f32 %v3383_v23, %v7203_v38  ;;  %v3385_v59 = vpop.f32.mrb[49].mxu0  ;;  %v7446_v5 = vpop.f32.mrb[114].mxu1 }
 0x2b7   :  { %7859 = vst [vmem:[#allocation11_spill] sm:$0xff] %v7446_v5  ;;  %v3386_v0 = vpop.f32.mrb[50].mxu0  ;;  %v2938_v12 = vpop.f32.mrb[115].mxu1 }
 0x2b8   :  { %v7449_v44 = vadd.f32 %v3386_v0, %v7208_v41  ;;  %v3388_v63 = vpop.f32.mrb[51].mxu0 }
 0x2bc   :  { %v7451_v15 = vpop.f32.mrb[116].mxu1 }
 0x2bd   :  { %7860 = vst [vmem:[#allocation12_spill] sm:$0xff] %v7451_v15  ;;  %v3391_v32 = vpop.f32.mrb[52].mxu0  ;;  %v2943_v18 = vpop.f32.mrb[117].mxu1 }
 0x2be   :  { %v7454_v48 = vadd.f32 %v3391_v32, %v7219_v47  ;;  %v3393_v8 = vpop.f32.mrb[53].mxu0  ;;  %v7456_v28 = vpop.f32.mrb[118].mxu1 }
 0x2bf   :  { %7861 = vst [vmem:[#allocation13_spill] sm:$0xff] %v7456_v28  ;;  %v3394_v38 = vpop.f32.mrb[54].mxu0  ;;  %v2946_v23 = vpop.f32.mrb[119].mxu1 }
 0x2c0   :  { %v7459_v59 = vadd.f32 %v3394_v38, %v7224_v53  ;;  %v3396_v12 = vpop.f32.mrb[55].mxu0 }
 0x2c4   :  { %v7461_v5 = vpop.f32.mrb[120].mxu1 }
 0x2c5   :  { %7862 = vst [vmem:[#allocation14_spill] sm:$0xff] %v7461_v5  ;;  %v3399_v41 = vpop.f32.mrb[56].mxu0  ;;  %v2951_v0 = vpop.f32.mrb[121].mxu1 }
 0x2c6   :  { %v7464_v63 = vadd.f32 %v3399_v41, %v7235_v61  ;;  %v3401_v18 = vpop.f32.mrb[57].mxu0  ;;  %v7466_v15 = vpop.f32.mrb[122].mxu1 }
 0x2c7   :  { %7863 = vst [vmem:[#allocation15_spill] sm:$0xff] %v7466_v15  ;;  %v3402_v47 = vpop.f32.mrb[58].mxu0  ;;  %v2954_v32 = vpop.f32.mrb[123].mxu1 }
 0x2c8   :  { %v7469_v8 = vadd.f32 %v3402_v47, %v7240_v3  ;;  %v3404_v23 = vpop.f32.mrb[59].mxu0  ;;  %v7484_v3 = vld [vmem:[%s7847_s2] ss:$0 sm:$0xff] }
 0x2cc   :  { %v7471_v28 = vpop.f32.mrb[124].mxu1 }
 0x2cd   :  { %7864 = vst [vmem:[#allocation16_spill] sm:$0xff] %v7471_v28  ;;  %v3407_v53 = vpop.f32.mrb[60].mxu0  ;;  %v2959_v38 = vpop.f32.mrb[125].mxu1 }
 0x2ce   :  { %v7474_v12 = vadd.f32 %v3407_v53, %v7251_v13  ;;  %v3409_v0 = vpop.f32.mrb[61].mxu0  ;;  %v7476_v5 = vpop.f32.mrb[126].mxu1  ;;  %v7493_v38 = vld [vmem:[%s7848_s3] ss:$0 sm:$0xff] }
 0x2cf   :  { %7865 = vst [vmem:[#allocation17_spill] sm:$0xff] %v7476_v5  ;;  %v3410_v61 = vpop.f32.mrb[62].mxu0  ;;  %v2962_v41 = vpop.f32.mrb[127].mxu1 }
 0x2d0   :  { %v7479_v18 = vadd.f32 %v3410_v61, %v7256_v17  ;;  %v3412_v32 = vpop.f32.mrb[63].mxu0 }
 0x2d4   :  { %v5100_v15 = vpop.f32.mrb[128].mxu1 }
 0x2d5   :  { %v3415_v47 = vpop.f32.mrb[64].mxu0  ;;  %v3585_v23 = vadd.f32 %v7295_v55, %v5100_v15  ;;  %v3576_v13 = vpop.f32.mrb[129].mxu1 }
 0x2d6   :  { %v7488_v53 = vadd.f32 %v3415_v47, %v7267_v26  ;;  %v3417_v17 = vpop.f32.mrb[65].mxu0  ;;  %v3577_v0 = vadd.f32 %v7273_v33, %v3576_v13  ;;  %v5101_v61 = vpop.f32.mrb[130].mxu1 }
 0x2d7   :  { %v3840_v41 = vmul.f32 %v7484_v3, %v3585_v23  ;;  %v3418_v32 = vpop.f32.mrb[66].mxu0  ;;  %v3588_v5 = vadd.f32 %v7309_v57, %v5101_v61  ;;  %v3579_v28 = vpop.f32.mrb[131].mxu1 }
 0x2d8   :  { %7866 = vst [vmem:[#allocation18_spill] sm:$0xff] %v7488_v53  ;;  %v3838_v55 = vmul.f32 %v7484_v3, %v3577_v0  ;;  %v7500_v26 = vadd.f32 %v3418_v32, %v7275_v35  ;;  %v3420_v15 = vpop.f32.mrb[67].mxu0  ;;  %v3580_v47 = vadd.f32 %v7287_v49, %v3579_v28 }
 0x2d9   :  { %v3911_v27 = vadd.f32 %v7493_v38, %v3840_v41  ;;  %v3841_v17 = vmul.f32 %v7484_v3, %v3588_v5 }
 0x2da   :  { %7867 = vst [vmem:[#allocation19_spill] sm:$0xff] %v7500_v26  ;;  %v3909_v33 = vadd.f32 %v7493_v38, %v3838_v55  ;;  %v3839_v23 = vmul.f32 %v7484_v3, %v3580_v47 }
 0x2db   :  { %v3912_v13 = vadd.f32 %v7493_v38, %v3841_v17  ;;  %v3975_v0 = vmax.f32 %v3911_v27, 0.0 }
 0x2dc   :  { %v3910_v57 = vadd.f32 %v7493_v38, %v3839_v23  ;;  %v5104_v61 = vpop.f32.mrb[132].mxu1  ;;  %v3973_v49 = vmax.f32 %v3909_v33, 0.0 }
 0x2dd   :  { %v3976_v53 = vmax.f32 %v3912_v13, 0.0  ;;  %v3423_v35 = vpop.f32.mrb[68].mxu0  ;;  %v3601_v32 = vadd.f32 %v7339_v45, %v5104_v61  ;;  %v3592_v15 = vpop.f32.mrb[133].mxu1 }
 0x2de   :  { %v3974_v28 = vmax.f32 %v3910_v57, 0.0  ;;  %v7511_v41 = vadd.f32 %v3423_v35, %v7289_v46  ;;  %v3425_v5 = vpop.f32.mrb[69].mxu0  ;;  %v3593_v55 = vadd.f32 %v7317_v21, %v3592_v15  ;;  %v5105_v47 = vpop.f32.mrb[134].mxu1 }
 0x2df   :  { %v4859_v26 = vpack.c.bf16 %v3976_v53, %v3975_v0  ;;  %v3844_v17 = vmul.f32 %v7484_v3, %v3601_v32  ;;  %v3426_v23 = vpop.f32.mrb[70].mxu0  ;;  %v3604_v27 = vadd.f32 %v7353_v11, %v5105_v47  ;;  %v3595_v13 = vpop.f32.mrb[135].mxu1 }
 0x2e0   :  { %v4854_v22 = vpack.c.bf16 %v3974_v28, %v3973_v49  ;;  %v3842_v45 = vmul.f32 %v7484_v3, %v3593_v55  ;;  %v7518_v33 = vadd.f32 %v3426_v23, %v7297_v58  ;;  %v3428_v57 = vpop.f32.mrb[71].mxu0  ;;  %v3596_v46 = vadd.f32 %v7331_v2, %v3595_v13 }
 0x2e1   :  { %5011 = vst [vmem:[%s7849_s4 + $0x8] sm:$0xff] %v4859_v26   ;;  %v3915_v21 = vadd.f32 %v7493_v38, %v3844_v17  ;;  %v3845_v53 = vmul.f32 %v7484_v3, %v3604_v27 }
 0x2e2   :  { %4855 = vst [vmem:[%s7849_s4] sm:$0xff] %v4854_v22   ;;  %v3913_v11 = vadd.f32 %v7493_v38, %v3842_v45  ;;  %v3843_v58 = vmul.f32 %v7484_v3, %v3596_v46 }
 0x2e3   :  { %v3916_v61 = vadd.f32 %v7493_v38, %v3845_v53  ;;  %v3979_v35 = vmax.f32 %v3915_v21, 0.0 }
 0x2e4   :  { %v3914_v2 = vadd.f32 %v7493_v38, %v3843_v58  ;;  %v5108_v0 = vpop.f32.mrb[136].mxu1  ;;  %v3977_v28 = vmax.f32 %v3913_v11, 0.0 }
 0x2e5   :  { %v3980_v32 = vmax.f32 %v3916_v61, 0.0  ;;  %v3431_v26 = vpop.f32.mrb[72].mxu0  ;;  %v3617_v15 = vadd.f32 %v7374_v40, %v5108_v0  ;;  %v3608_v49 = vpop.f32.mrb[137].mxu1 }
 0x2e6   :  { %v3978_v5 = vmax.f32 %v3914_v2, 0.0  ;;  %v7535_v55 = vadd.f32 %v3431_v26, %v7311_v10  ;;  %v3433_v22 = vpop.f32.mrb[73].mxu0  ;;  %v3609_v47 = vadd.f32 %v7361_v16, %v3608_v49  ;;  %v5109_v17 = vpop.f32.mrb[138].mxu1 }
 0x2e7   :  { %v4869_v23 = vpack.c.bf16 %v3980_v32, %v3979_v35  ;;  %v3848_v27 = vmul.f32 %v7484_v3, %v3617_v15  ;;  %v3434_v13 = vpop.f32.mrb[74].mxu0  ;;  %v3620_v45 = vadd.f32 %v7379_v54, %v5109_v17  ;;  %v3611_v57 = vpop.f32.mrb[139].mxu1 }
 0x2e8   :  { %v4864_v46 = vpack.c.bf16 %v3978_v5, %v3977_v28  ;;  %v3846_v40 = vmul.f32 %v7484_v3, %v3609_v47  ;;  %v7542_v21 = vadd.f32 %v3434_v13, %v7319_v25  ;;  %v3436_v53 = vpop.f32.mrb[75].mxu0  ;;  %v3612_v10 = vadd.f32 %v7369_v30, %v3611_v57 }
 0x2e9   :  { %5013 = vst [vmem:[%s7849_s4 + $0x18] sm:$0xff] %v4869_v23   ;;  %v3919_v16 = vadd.f32 %v7493_v38, %v3848_v27  ;;  %v3849_v11 = vmul.f32 %v7484_v3, %v3620_v45 }
 0x2ea   :  { %5012 = vst [vmem:[%s7849_s4 + $0x10] sm:$0xff] %v4864_v46   ;;  %v3917_v54 = vadd.f32 %v7493_v38, %v3846_v40  ;;  %v3847_v25 = vmul.f32 %v7484_v3, %v3612_v10 }
 0x2eb   :  { %v3920_v58 = vadd.f32 %v7493_v38, %v3849_v11  ;;  %v3983_v2 = vmax.f32 %v3919_v16, 0.0 }
 0x2ec   :  { %v3918_v30 = vadd.f32 %v7493_v38, %v3847_v25  ;;  %v5112_v61 = vpop.f32.mrb[140].mxu1  ;;  %v3981_v15 = vmax.f32 %v3917_v54, 0.0 }
 0x2ed   :  { %v3984_v0 = vmax.f32 %v3920_v58, 0.0  ;;  %v3439_v35 = vpop.f32.mrb[76].mxu0  ;;  %v3633_v32 = vadd.f32 %v7394_v31, %v5112_v61  ;;  %v3624_v26 = vpop.f32.mrb[141].mxu1 }
 0x2ee   :  { %v3982_v49 = vmax.f32 %v3918_v30, 0.0  ;;  %v7559_v28 = vadd.f32 %v3439_v35, %v7333_v6  ;;  %v3441_v5 = vpop.f32.mrb[77].mxu0  ;;  %v3625_v22 = vadd.f32 %v7384_v1, %v3624_v26  ;;  %v5113_v47 = vpop.f32.mrb[142].mxu1 }
 0x2ef   :  { %v4879_v17 = vpack.c.bf16 %v3984_v0, %v3983_v2  ;;  %v3852_v23 = vmul.f32 %v7484_v3, %v3633_v32  ;;  %v3442_v27 = vpop.f32.mrb[78].mxu0  ;;  %v3636_v13 = vadd.f32 %v7399_v50, %v5113_v47  ;;  %v3627_v45 = vpop.f32.mrb[143].mxu1 }
 0x2f0   :  { %v4874_v57 = vpack.c.bf16 %v3982_v49, %v3981_v15  ;;  %v3850_v31 = vmul.f32 %v7484_v3, %v3625_v22  ;;  %v7566_v46 = vadd.f32 %v3442_v27, %v7341_v51  ;;  %v3444_v40 = vpop.f32.mrb[79].mxu0  ;;  %v3628_v6 = vadd.f32 %v7389_v20, %v3627_v45 }
 0x2f1   :  { %5015 = vst [vmem:[%s7849_s4 + $0x28] sm:$0xff] %v4879_v17   ;;  %v3923_v1 = vadd.f32 %v7493_v38, %v3852_v23  ;;  %v3853_v53 = vmul.f32 %v7484_v3, %v3636_v13 }
 0x2f2   :  { %5014 = vst [vmem:[%s7849_s4 + $0x20] sm:$0xff] %v4874_v57   ;;  %v3921_v50 = vadd.f32 %v7493_v38, %v3850_v31  ;;  %v3851_v51 = vmul.f32 %v7484_v3, %v3628_v6 }
 0x2f3   :  { %v3924_v10 = vadd.f32 %v7493_v38, %v3853_v53  ;;  %v3987_v11 = vmax.f32 %v3923_v1, 0.0 }
 0x2f4   :  { %v3922_v20 = vadd.f32 %v7493_v38, %v3851_v51  ;;  %v5116_v16 = vpop.f32.mrb[144].mxu1  ;;  %v3985_v61 = vmax.f32 %v3921_v50, 0.0 }
 0x2f5   :  { %v3988_v54 = vmax.f32 %v3924_v10, 0.0  ;;  %v3447_v25 = vpop.f32.mrb[80].mxu0  ;;  %v3649_v58 = vadd.f32 %v7414_v36, %v5116_v16  ;;  %v3640_v30 = vpop.f32.mrb[145].mxu1 }
 0x2f6   :  { %v3986_v2 = vmax.f32 %v3922_v20, 0.0  ;;  %v7583_v0 = vadd.f32 %v3447_v25, %v7355_v4  ;;  %v3449_v35 = vpop.f32.mrb[81].mxu0  ;;  %v3641_v32 = vadd.f32 %v7404_v62, %v3640_v30  ;;  %v5117_v26 = vpop.f32.mrb[146].mxu1 }
 0x2f7   :  { %v4889_v15 = vpack.c.bf16 %v3988_v54, %v3987_v11  ;;  %v3856_v49 = vmul.f32 %v7484_v3, %v3649_v58  ;;  %v3450_v5 = vpop.f32.mrb[82].mxu0  ;;  %v3652_v22 = vadd.f32 %v7419_v52, %v5117_v26  ;;  %v3643_v47 = vpop.f32.mrb[147].mxu1 }
 0x2f8   :  { %v4884_v17 = vpack.c.bf16 %v3986_v2, %v3985_v61  ;;  %v3854_v36 = vmul.f32 %v7484_v3, %v3641_v32  ;;  %v7590_v23 = vadd.f32 %v3450_v5, %v7363_v24  ;;  %v3452_v27 = vpop.f32.mrb[83].mxu0  ;;  %v3644_v4 = vadd.f32 %v7409_v14, %v3643_v47 }
 0x2f9   :  { %5017 = vst [vmem:[%s7849_s4 + $0x38] sm:$0xff] %v4889_v15   ;;  %v3927_v62 = vadd.f32 %v7493_v38, %v3856_v49  ;;  %v3857_v13 = vmul.f32 %v7484_v3, %v3652_v22 }
 0x2fa   :  { %5016 = vst [vmem:[%s7849_s4 + $0x30] sm:$0xff] %v4884_v17   ;;  %v3925_v52 = vadd.f32 %v7493_v38, %v3854_v36  ;;  %v3855_v24 = vmul.f32 %v7484_v3, %v3644_v4 }
 0x2fb   :  { %v3928_v45 = vadd.f32 %v7493_v38, %v3857_v13  ;;  %v3991_v31 = vmax.f32 %v3927_v62, 0.0 }
 0x2fc   :  { %v3926_v14 = vadd.f32 %v7493_v38, %v3855_v24  ;;  %v5120_v57 = vpop.f32.mrb[148].mxu1  ;;  %v3989_v50 = vmax.f32 %v3925_v52, 0.0 }
 0x2fd   :  { %v3992_v40 = vmax.f32 %v3928_v45, 0.0  ;;  %v3455_v6 = vpop.f32.mrb[84].mxu0  ;;  %v3665_v1 = vadd.f32 %v7434_v7, %v5120_v57  ;;  %v3656_v53 = vpop.f32.mrb[149].mxu1 }
 0x2fe   :  { %v3990_v51 = vmax.f32 %v3926_v14, 0.0  ;;  %v7607_v10 = vadd.f32 %v3455_v6, %v7371_v34  ;;  %v3457_v20 = vpop.f32.mrb[85].mxu0  ;;  %v3657_v16 = vadd.f32 %v7424_v29, %v3656_v53  ;;  %v5121_v11 = vpop.f32.mrb[150].mxu1 }
 0x2ff   :  { %v4899_v54 = vpack.c.bf16 %v3992_v40, %v3991_v31  ;;  %v3860_v25 = vmul.f32 %v7484_v3, %v3665_v1  ;;  %v3458_v58 = vpop.f32.mrb[86].mxu0  ;;  %v3668_v30 = vadd.f32 %v7439_v37, %v5121_v11  ;;  %v3659_v61 = vpop.f32.mrb[151].mxu1 }
 0x300   :  { %v4894_v2 = vpack.c.bf16 %v3990_v51, %v3989_v50  ;;  %v3858_v7 = vmul.f32 %v7484_v3, %v3657_v16  ;;  %v7614_v35 = vadd.f32 %v3458_v58, %v7376_v43  ;;  %v3460_v32 = vpop.f32.mrb[87].mxu0  ;;  %v3660_v34 = vadd.f32 %v7429_v42, %v3659_v61 }
 0x301   :  { %5019 = vst [vmem:[%s7849_s4 + $0x48] sm:$0xff] %v4899_v54   ;;  %v3931_v29 = vadd.f32 %v7493_v38, %v3860_v25  ;;  %v3861_v26 = vmul.f32 %v7484_v3, %v3668_v30 }
 0x302   :  { %5018 = vst [vmem:[%s7849_s4 + $0x40] sm:$0xff] %v4894_v2   ;;  %v3929_v37 = vadd.f32 %v7493_v38, %v3858_v7  ;;  %v3859_v43 = vmul.f32 %v7484_v3, %v3660_v34 }
 0x303   :  { %v3932_v15 = vadd.f32 %v7493_v38, %v3861_v26  ;;  %v3995_v5 = vmax.f32 %v3931_v29, 0.0 }
 0x304   :  { %v3930_v42 = vadd.f32 %v7493_v38, %v3859_v43  ;;  %v5124_v49 = vpop.f32.mrb[152].mxu1  ;;  %v3993_v27 = vmax.f32 %v3929_v37, 0.0 }
 0x305   :  { %v3996_v22 = vmax.f32 %v3932_v15, 0.0  ;;  %v3463_v47 = vpop.f32.mrb[88].mxu0  ;;  %v3681_v17 = vadd.f32 %v7454_v48, %v5124_v49  ;;  %v3672_v36 = vpop.f32.mrb[153].mxu1 }
 0x306   :  { %v3994_v4 = vmax.f32 %v3930_v42, 0.0  ;;  %v7631_v62 = vadd.f32 %v3463_v47, %v7381_v56  ;;  %v3465_v13 = vpop.f32.mrb[89].mxu0  ;;  %v3673_v52 = vadd.f32 %v7444_v39, %v3672_v36  ;;  %v5125_v24 = vpop.f32.mrb[154].mxu1 }
 0x307   :  { %v4909_v45 = vpack.c.bf16 %v3996_v22, %v3995_v5  ;;  %v3864_v14 = vmul.f32 %v7484_v3, %v3681_v17  ;;  %v3466_v57 = vpop.f32.mrb[90].mxu0  ;;  %v3684_v31 = vadd.f32 %v7459_v59, %v5125_v24  ;;  %v3675_v40 = vpop.f32.mrb[155].mxu1 }
 0x308   :  { %v4904_v6 = vpack.c.bf16 %v3994_v4, %v3993_v27  ;;  %v3862_v48 = vmul.f32 %v7484_v3, %v3673_v52  ;;  %v7638_v1 = vadd.f32 %v3466_v57, %v7386_v9  ;;  %v3468_v53 = vpop.f32.mrb[91].mxu0  ;;  %v3676_v56 = vadd.f32 %v7449_v44, %v3675_v40  ;;  %v7869_v40 = vld [vmem:[#allocation18_spill] sm:$0xff] }
 0x309   :  { %5021 = vst [vmem:[%s7849_s4 + $0x58] sm:$0xff] %v4909_v45   ;;  %v3935_v39 = vadd.f32 %v7493_v38, %v3864_v14  ;;  %v3865_v50 = vmul.f32 %v7484_v3, %v3684_v31  ;;  %v7868_v14 = vld [vmem:[#allocation2_spill] sm:$0xff] }
 0x30a   :  { %5020 = vst [vmem:[%s7849_s4 + $0x50] sm:$0xff] %v4904_v6   ;;  %v3933_v59 = vadd.f32 %v7493_v38, %v3862_v48  ;;  %v3863_v9 = vmul.f32 %v7484_v3, %v3676_v56 }
 0x30b   :  { %v3936_v51 = vadd.f32 %v7493_v38, %v3865_v50  ;;  %v3999_v16 = vmax.f32 %v3935_v39, 0.0 }
 0x30c   :  { %v3934_v44 = vadd.f32 %v7493_v38, %v3863_v9  ;;  %v5128_v20 = vpop.f32.mrb[156].mxu1  ;;  %v3997_v30 = vmax.f32 %v3933_v59, 0.0 }
 0x30d   :  { %v4000_v11 = vmax.f32 %v3936_v51, 0.0  ;;  %v3471_v54 = vpop.f32.mrb[92].mxu0  ;;  %v3697_v25 = vadd.f32 %v7474_v12, %v5128_v20  ;;  %v3688_v58 = vpop.f32.mrb[157].mxu1  ;;  %v7870_v51 = vld [vmem:[#allocation3_spill] sm:$0xff] }
 0x30e   :  { %v3998_v61 = vmax.f32 %v3934_v44, 0.0  ;;  %v7655_v2 = vadd.f32 %v3471_v54, %v7391_v60  ;;  %v3473_v7 = vpop.f32.mrb[93].mxu0  ;;  %v3689_v32 = vadd.f32 %v7464_v63, %v3688_v58  ;;  %v5129_v34 = vpop.f32.mrb[158].mxu1 }
 0x30f   :  { %v4919_v29 = vpack.c.bf16 %v4000_v11, %v3999_v16  ;;  %v3868_v26 = vmul.f32 %v7484_v3, %v3697_v25  ;;  %v3474_v37 = vpop.f32.mrb[94].mxu0  ;;  %v3700_v43 = vadd.f32 %v7479_v18, %v5129_v34  ;;  %v3691_v15 = vpop.f32.mrb[159].mxu1  ;;  %v7871_v16 = vld [vmem:[#allocation19_spill] sm:$0xff] }
 0x310   :  { %v4914_v42 = vpack.c.bf16 %v3998_v61, %v3997_v30  ;;  %v3866_v12 = vmul.f32 %v7484_v3, %v3689_v32  ;;  %v7662_v49 = vadd.f32 %v3474_v37, %v7396_v19  ;;  %v3476_v5 = vpop.f32.mrb[95].mxu0  ;;  %v3692_v60 = vadd.f32 %v7469_v8, %v3691_v15 }
 0x311   :  { %5023 = vst [vmem:[%s7849_s4 + $0x68] sm:$0xff] %v4919_v29   ;;  %v3939_v63 = vadd.f32 %v7493_v38, %v3868_v26  ;;  %v3869_v22 = vmul.f32 %v7484_v3, %v3700_v43 }
 0x312   :  { %5022 = vst [vmem:[%s7849_s4 + $0x60] sm:$0xff] %v4914_v42   ;;  %v3937_v18 = vadd.f32 %v7493_v38, %v3866_v12  ;;  %v3867_v19 = vmul.f32 %v7484_v3, %v3692_v60  ;;  %v7872_v42 = vld [vmem:[#allocation4_spill] sm:$0xff] }
 0x313   :  { %v3940_v47 = vadd.f32 %v7493_v38, %v3869_v22  ;;  %v4003_v36 = vmax.f32 %v3939_v63, 0.0 }
 0x314   :  { %v3938_v8 = vadd.f32 %v7493_v38, %v3867_v19  ;;  %v5132_v17 = vpop.f32.mrb[160].mxu1  ;;  %v4001_v24 = vmax.f32 %v3937_v18, 0.0 }
 0x315   :  { %v4004_v27 = vmax.f32 %v3940_v47, 0.0  ;;  %v3479_v4 = vpop.f32.mrb[96].mxu0  ;;  %v3713_v13 = vadd.f32 %v7511_v41, %v5132_v17  ;;  %v3704_v52 = vpop.f32.mrb[161].mxu1 }
 0x316   :  { %v4002_v45 = vmax.f32 %v3938_v8, 0.0  ;;  %v7679_v57 = vadd.f32 %v3479_v4, %v7868_v14  ;;  %v3481_v31 = vpop.f32.mrb[97].mxu0  ;;  %v3705_v6 = vadd.f32 %v7869_v40, %v3704_v52  ;;  %v5133_v48 = vpop.f32.mrb[162].mxu1 }
 0x317   :  { %v4929_v53 = vpack.c.bf16 %v4004_v27, %v4003_v36  ;;  %v3872_v56 = vmul.f32 %v7484_v3, %v3713_v13  ;;  %v3482_v39 = vpop.f32.mrb[98].mxu0  ;;  %v3716_v50 = vadd.f32 %v7518_v33, %v5133_v48  ;;  %v3707_v59 = vpop.f32.mrb[163].mxu1  ;;  %v7873_v36 = vld [vmem:[#allocation5_spill] sm:$0xff] }
 0x318   :  { %v4924_v9 = vpack.c.bf16 %v4002_v45, %v4001_v24  ;;  %v3870_v41 = vmul.f32 %v7484_v3, %v3705_v6  ;;  %v7686_v44 = vadd.f32 %v3482_v39, %v7870_v51  ;;  %v3484_v20 = vpop.f32.mrb[99].mxu0  ;;  %v3708_v11 = vadd.f32 %v7871_v16, %v3707_v59 }
 0x319   :  { %5025 = vst [vmem:[%s7849_s4 + $0x78] sm:$0xff] %v4929_v53   ;;  %v3943_v54 = vadd.f32 %v7493_v38, %v3872_v56  ;;  %v3873_v25 = vmul.f32 %v7484_v3, %v3716_v50  ;;  %v7874_v50 = vld [vmem:[#allocation6_spill] sm:$0xff] }
 0x31a   :  { %5024 = vst [vmem:[%s7849_s4 + $0x70] sm:$0xff] %v4924_v9   ;;  %v3941_v33 = vadd.f32 %v7493_v38, %v3870_v41  ;;  %v3871_v58 = vmul.f32 %v7484_v3, %v3708_v11 }
 0x31b   :  { %v3944_v30 = vadd.f32 %v7493_v38, %v3873_v25  ;;  %v4007_v32 = vmax.f32 %v3943_v54, 0.0 }
 0x31c   :  { %v3942_v61 = vadd.f32 %v7493_v38, %v3871_v58  ;;  %v5136_v7 = vpop.f32.mrb[164].mxu1  ;;  %v4005_v43 = vmax.f32 %v3941_v33, 0.0  ;;  %v7875_v58 = vld [vmem:[#allocation7_spill] sm:$0xff] }
 0x31d   :  { %v4008_v34 = vmax.f32 %v3944_v30, 0.0  ;;  %v3487_v29 = vpop.f32.mrb[100].mxu0  ;;  %v3729_v26 = vadd.f32 %v7559_v28, %v5136_v7  ;;  %v3720_v37 = vpop.f32.mrb[165].mxu1 }
 0x31e   :  { %v4006_v15 = vmax.f32 %v3942_v61, 0.0  ;;  %v7703_v12 = vadd.f32 %v3487_v29, %v7872_v42  ;;  %v3489_v5 = vpop.f32.mrb[101].mxu0  ;;  %v3721_v60 = vadd.f32 %v7535_v55, %v3720_v37  ;;  %v5137_v63 = vpop.f32.mrb[166].mxu1 }
 0x31f   :  { %v4939_v22 = vpack.c.bf16 %v4008_v34, %v4007_v32  ;;  %v3876_v18 = vmul.f32 %v7484_v3, %v3729_v26  ;;  %v3490_v19 = vpop.f32.mrb[102].mxu0  ;;  %v3732_v47 = vadd.f32 %v7566_v46, %v5137_v63  ;;  %v3723_v8 = vpop.f32.mrb[167].mxu1 }
 0x320   :  { %v4934_v17 = vpack.c.bf16 %v4006_v15, %v4005_v43  ;;  %v3874_v28 = vmul.f32 %v7484_v3, %v3721_v60  ;;  %v7710_v27 = vadd.f32 %v3490_v19, %v7873_v36  ;;  %v3492_v4 = vpop.f32.mrb[103].mxu0  ;;  %v3724_v13 = vadd.f32 %v7542_v21, %v3723_v8 }
 0x321   :  { %5027 = vst [vmem:[%s7849_s4 + $0x88] sm:$0xff] %v4939_v22   ;;  %v3947_v55 = vadd.f32 %v7493_v38, %v3876_v18  ;;  %v3877_v52 = vmul.f32 %v7484_v3, %v3732_v47  ;;  %v7876_v22 = vld [vmem:[#allocation8_spill] sm:$0xff] }
 0x322   :  { %5026 = vst [vmem:[%s7849_s4 + $0x80] sm:$0xff] %v4934_v17   ;;  %v3945_v46 = vadd.f32 %v7493_v38, %v3874_v28  ;;  %v3875_v24 = vmul.f32 %v7484_v3, %v3724_v13 }
 0x323   :  { %v3948_v45 = vadd.f32 %v7493_v38, %v3877_v52  ;;  %v4011_v31 = vmax.f32 %v3947_v55, 0.0 }
 0x324   :  { %v3946_v21 = vadd.f32 %v7493_v38, %v3875_v24  ;;  %v5140_v14 = vpop.f32.mrb[168].mxu1  ;;  %v4009_v56 = vmax.f32 %v3945_v46, 0.0 }
 0x325   :  { %v4012_v40 = vmax.f32 %v3948_v45, 0.0  ;;  %v3495_v6 = vpop.f32.mrb[104].mxu0  ;;  %v3745_v48 = vadd.f32 %v7607_v10, %v5140_v14  ;;  %v3736_v53 = vpop.f32.mrb[169].mxu1 }
 0x326   :  { %v4010_v39 = vmax.f32 %v3946_v21, 0.0  ;;  %v7727_v59 = vadd.f32 %v3495_v6, %v7874_v50  ;;  %v3497_v9 = vpop.f32.mrb[105].mxu0  ;;  %v3737_v41 = vadd.f32 %v7583_v0, %v3736_v53  ;;  %v5141_v51 = vpop.f32.mrb[170].mxu1 }
 0x327   :  { %v4949_v20 = vpack.c.bf16 %v4012_v40, %v4011_v31  ;;  %v3880_v16 = vmul.f32 %v7484_v3, %v3745_v48  ;;  %v3498_v11 = vpop.f32.mrb[106].mxu0  ;;  %v3748_v54 = vadd.f32 %v7614_v35, %v5141_v51  ;;  %v3739_v25 = vpop.f32.mrb[171].mxu1 }
 0x328   :  { %v4944_v33 = vpack.c.bf16 %v4010_v39, %v4009_v56  ;;  %v3878_v10 = vmul.f32 %v7484_v3, %v3737_v41  ;;  %v7734_v30 = vadd.f32 %v3498_v11, %v7875_v58  ;;  %v3500_v61 = vpop.f32.mrb[107].mxu0  ;;  %v3740_v7 = vadd.f32 %v7590_v23, %v3739_v25  ;;  %v7878_v41 = vld [vmem:[#allocation10_spill] sm:$0xff] }
 0x329   :  { %5029 = vst [vmem:[%s7849_s4 + $0x98] sm:$0xff] %v4949_v20   ;;  %v3951_v0 = vadd.f32 %v7493_v38, %v3880_v16  ;;  %v3881_v32 = vmul.f32 %v7484_v3, %v3748_v54 }
 0x32a   :  { %5028 = vst [vmem:[%s7849_s4 + $0x90] sm:$0xff] %v4944_v33   ;;  %v3949_v35 = vadd.f32 %v7493_v38, %v3878_v10  ;;  %v3879_v34 = vmul.f32 %v7484_v3, %v3740_v7 }
 0x32b   :  { %v3952_v29 = vadd.f32 %v7493_v38, %v3881_v32  ;;  %v4015_v37 = vmax.f32 %v3951_v0, 0.0 }
 0x32c   :  { %v3950_v23 = vadd.f32 %v7493_v38, %v3879_v34  ;;  %v5144_v26 = vpop.f32.mrb[172].mxu1  ;;  %v4013_v60 = vmax.f32 %v3949_v35, 0.0 }
 0x32d   :  { %v4016_v43 = vmax.f32 %v3952_v29, 0.0  ;;  %v3503_v15 = vpop.f32.mrb[108].mxu0  ;;  %v3761_v42 = vadd.f32 %v7655_v2, %v5144_v26  ;;  %v3752_v5 = vpop.f32.mrb[173].mxu1  ;;  %v7877_v2 = vld [vmem:[#allocation9_spill] sm:$0xff] }
 0x32e   :  { %v4014_v63 = vmax.f32 %v3950_v23, 0.0  ;;  %v5248_v18 = vadd.f32 %v3503_v15, %v7876_v22  ;;  %v3505_v19 = vpop.f32.mrb[109].mxu0  ;;  %v3753_v47 = vadd.f32 %v7631_v62, %v3752_v5  ;;  %v5145_v8 = vpop.f32.mrb[174].mxu1  ;;  %v7880_v22 = vld [vmem:[#allocation12_spill] sm:$0xff] }
 0x32f   :  { %v4959_v17 = vpack.c.bf16 %v4016_v43, %v4015_v37  ;;  %v3884_v28 = vmul.f32 %v7484_v3, %v3761_v42  ;;  %v3506_v36 = vpop.f32.mrb[110].mxu0  ;;  %v3764_v4 = vadd.f32 %v7662_v49, %v5145_v8  ;;  %v3755_v13 = vpop.f32.mrb[175].mxu1 }
 0x330   :  { %v4954_v55 = vpack.c.bf16 %v4014_v63, %v4013_v60  ;;  %v3882_v52 = vmul.f32 %v7484_v3, %v3753_v47  ;;  %v5249_v46 = vadd.f32 %v3506_v36, %v7877_v2  ;;  %v3508_v24 = vpop.f32.mrb[111].mxu0  ;;  %v3756_v45 = vadd.f32 %v7638_v1, %v3755_v13 }
 0x331   :  { %5031 = vst [vmem:[%s7849_s4 + $0xa8] sm:$0xff] %v4959_v17   ;;  %v3955_v62 = vadd.f32 %v7493_v38, %v3884_v28  ;;  %v3885_v21 = vmul.f32 %v7484_v3, %v3764_v4  ;;  %v7881_v24 = vld [vmem:[#allocation13_spill] sm:$0xff] }
 0x332   :  { %5030 = vst [vmem:[%s7849_s4 + $0xa0] sm:$0xff] %v4954_v55   ;;  %v3953_v49 = vadd.f32 %v7493_v38, %v3882_v52  ;;  %v3883_v14 = vmul.f32 %v7484_v3, %v3756_v45 }
 0x333   :  { %v3956_v31 = vadd.f32 %v7493_v38, %v3885_v21  ;;  %v4019_v6 = vmax.f32 %v3955_v62, 0.0 }
 0x334   :  { %v3954_v1 = vadd.f32 %v7493_v38, %v3883_v14  ;;  %v5148_v40 = vpop.f32.mrb[176].mxu1  ;;  %v4017_v50 = vmax.f32 %v3953_v49, 0.0 }
 0x335   :  { %v4020_v48 = vmax.f32 %v3956_v31, 0.0  ;;  %v3511_v53 = vpop.f32.mrb[112].mxu0  ;;  %v3777_v56 = vadd.f32 %v7703_v12, %v5148_v40  ;;  %v3768_v39 = vpop.f32.mrb[177].mxu1  ;;  %v7879_v12 = vld [vmem:[#allocation11_spill] sm:$0xff] }
 0x336   :  { %v4018_v9 = vmax.f32 %v3954_v1, 0.0  ;;  %v5250_v51 = vadd.f32 %v3511_v53, %v7878_v41  ;;  %v3513_v20 = vpop.f32.mrb[113].mxu0  ;;  %v3769_v16 = vadd.f32 %v7679_v57, %v3768_v39  ;;  %v5149_v11 = vpop.f32.mrb[178].mxu1 }
 0x337   :  { %v4969_v54 = vpack.c.bf16 %v4020_v48, %v4019_v6  ;;  %v3888_v25 = vmul.f32 %v7484_v3, %v3777_v56  ;;  %v3514_v33 = vpop.f32.mrb[114].mxu0  ;;  %v3780_v10 = vadd.f32 %v7710_v27, %v5149_v11  ;;  %v3771_v58 = vpop.f32.mrb[179].mxu1 }
 0x338   :  { %v4964_v61 = vpack.c.bf16 %v4018_v9, %v4017_v50  ;;  %v3886_v7 = vmul.f32 %v7484_v3, %v3769_v16  ;;  %v5251_v0 = vadd.f32 %v3514_v33, %v7879_v12  ;;  %v3516_v32 = vpop.f32.mrb[115].mxu0  ;;  %v3772_v35 = vadd.f32 %v7686_v44, %v3771_v58  ;;  %v7882_v50 = vld [vmem:[#allocation14_spill] sm:$0xff] }
 0x339   :  { %5033 = vst [vmem:[%s7849_s4 + $0xb8] sm:$0xff] %v4969_v54   ;;  %v3959_v57 = vadd.f32 %v7493_v38, %v3888_v25  ;;  %v3889_v34 = vmul.f32 %v7484_v3, %v3780_v10 }
 0x33a   :  { %5032 = vst [vmem:[%s7849_s4 + $0xb0] sm:$0xff] %v4964_v61   ;;  %v3957_v27 = vadd.f32 %v7493_v38, %v3886_v7  ;;  %v3887_v29 = vmul.f32 %v7484_v3, %v3772_v35  ;;  %v7883_v7 = vld [vmem:[#allocation15_spill] sm:$0xff] }
 0x33b   :  { %v3960_v23 = vadd.f32 %v7493_v38, %v3889_v34  ;;  %v4023_v37 = vmax.f32 %v3959_v57, 0.0 }
 0x33c   :  { %v3958_v44 = vadd.f32 %v7493_v38, %v3887_v29  ;;  %v5152_v26 = vpop.f32.mrb[180].mxu1  ;;  %v4021_v60 = vmax.f32 %v3957_v27, 0.0 }
 0x33d   :  { %v4024_v43 = vmax.f32 %v3960_v23, 0.0  ;;  %v3519_v15 = vpop.f32.mrb[116].mxu0  ;;  %v3793_v42 = vadd.f32 %v5248_v18, %v5152_v26  ;;  %v3784_v5 = vpop.f32.mrb[181].mxu1 }
 0x33e   :  { %v4022_v63 = vmax.f32 %v3958_v44, 0.0  ;;  %v5252_v19 = vadd.f32 %v3519_v15, %v7880_v22  ;;  %v3521_v47 = vpop.f32.mrb[117].mxu0  ;;  %v3785_v8 = vadd.f32 %v7727_v59, %v3784_v5  ;;  %v5153_v17 = vpop.f32.mrb[182].mxu1  ;;  %v7884_v5 = vld [vmem:[#allocation16_spill] sm:$0xff] }
 0x33f   :  { %v4979_v28 = vpack.c.bf16 %v4024_v43, %v4023_v37  ;;  %v3892_v36 = vmul.f32 %v7484_v3, %v3793_v42  ;;  %v3522_v4 = vpop.f32.mrb[118].mxu0  ;;  %v3796_v13 = vadd.f32 %v5249_v46, %v5153_v17  ;;  %v3787_v55 = vpop.f32.mrb[183].mxu1 }
 0x340   :  { %v4974_v52 = vpack.c.bf16 %v4022_v63, %v4021_v60  ;;  %v3890_v2 = vmul.f32 %v7484_v3, %v3785_v8  ;;  %v5253_v18 = vadd.f32 %v3522_v4, %v7881_v24  ;;  %v3524_v45 = vpop.f32.mrb[119].mxu0  ;;  %v3788_v62 = vadd.f32 %v7734_v30, %v3787_v55 }
 0x341   :  { %5035 = vst [vmem:[%s7849_s4 + $0xc8] sm:$0xff] %v4979_v28   ;;  %v3963_v59 = vadd.f32 %v7493_v38, %v3892_v36  ;;  %v3893_v21 = vmul.f32 %v7484_v3, %v3796_v13  ;;  %v7885_v13 = vld [vmem:[#allocation17_spill] sm:$0xff] }
 0x342   :  { %5034 = vst [vmem:[%s7849_s4 + $0xc0] sm:$0xff] %v4974_v52   ;;  %v3961_v46 = vadd.f32 %v7493_v38, %v3890_v2  ;;  %v3891_v49 = vmul.f32 %v7484_v3, %v3788_v62 }
 0x343   :  { %v3964_v14 = vadd.f32 %v7493_v38, %v3893_v21  ;;  %v4027_v1 = vmax.f32 %v3963_v59, 0.0 }
 0x344   :  { %v3962_v30 = vadd.f32 %v7493_v38, %v3891_v49  ;;  %v5156_v31 = vpop.f32.mrb[184].mxu1  ;;  %v4025_v56 = vmax.f32 %v3961_v46, 0.0 }
 0x345   :  { %v4028_v40 = vmax.f32 %v3964_v14, 0.0  ;;  %v3527_v6 = vpop.f32.mrb[120].mxu0  ;;  %v3809_v48 = vadd.f32 %v5252_v19, %v5156_v31  ;;  %v3800_v53 = vpop.f32.mrb[185].mxu1 }
 0x346   :  { %v4026_v39 = vmax.f32 %v3962_v30, 0.0  ;;  %v5254_v9 = vadd.f32 %v3527_v6, %v7882_v50  ;;  %v3529_v41 = vpop.f32.mrb[121].mxu0  ;;  %v3801_v20 = vadd.f32 %v5250_v51, %v3800_v53  ;;  %v5157_v16 = vpop.f32.mrb[186].mxu1 }
 0x347   :  { %v4989_v11 = vpack.c.bf16 %v4028_v40, %v4027_v1  ;;  %v3896_v54 = vmul.f32 %v7484_v3, %v3809_v48  ;;  %v3530_v25 = vpop.f32.mrb[122].mxu0  ;;  %v3812_v33 = vadd.f32 %v5253_v18, %v5157_v16  ;;  %v3803_v10 = vpop.f32.mrb[187].mxu1 }
 0x348   :  { %v4984_v58 = vpack.c.bf16 %v4026_v39, %v4025_v56  ;;  %v3894_v61 = vmul.f32 %v7484_v3, %v3801_v20  ;;  %v5255_v12 = vadd.f32 %v3530_v25, %v7883_v7  ;;  %v3532_v32 = vpop.f32.mrb[123].mxu0  ;;  %v3804_v35 = vadd.f32 %v5251_v0, %v3803_v10 }
 0x349   :  { %5037 = vst [vmem:[%s7849_s4 + $0xd8] sm:$0xff] %v4989_v11   ;;  %v3967_v51 = vadd.f32 %v7493_v38, %v3896_v54  ;;  %v3897_v57 = vmul.f32 %v7484_v3, %v3812_v33 }
 0x34a   :  { %5036 = vst [vmem:[%s7849_s4 + $0xd0] sm:$0xff] %v4984_v58   ;;  %v3965_v34 = vadd.f32 %v7493_v38, %v3894_v61  ;;  %v3895_v27 = vmul.f32 %v7484_v3, %v3804_v35 }
 0x34b   :  { %v3968_v29 = vadd.f32 %v7493_v38, %v3897_v57  ;;  %v4031_v44 = vmax.f32 %v3967_v51, 0.0 }
 0x34c   :  { %v3966_v0 = vadd.f32 %v7493_v38, %v3895_v27  ;;  %v5160_v23 = vpop.f32.mrb[188].mxu1  ;;  %v4029_v15 = vmax.f32 %v3965_v34, 0.0 }
 0x34d   :  { %v4032_v26 = vmax.f32 %v3968_v29, 0.0  ;;  %v3535_v37 = vpop.f32.mrb[124].mxu0  ;;  %v3816_v43 = vpop.f32.mrb[189].mxu1 }
 0x34e   :  { %v4030_v42 = vmax.f32 %v3966_v0, 0.0  ;;  %v5256_v60 = vadd.f32 %v3535_v37, %v7884_v5  ;;  %v3537_v63 = vpop.f32.mrb[125].mxu0  ;;  %v3817_v22 = vadd.f32 %v5254_v9, %v3816_v43  ;;  %v5161_v19 = vpop.f32.mrb[190].mxu1 }
 0x34f   :  { %v4999_v47 = vpack.c.bf16 %v4032_v26, %v4031_v44  ;;  %v3538_v8 = vpop.f32.mrb[126].mxu0  ;;  %v3819_v17 = vpop.f32.mrb[191].mxu1 }
 0x350   :  { %v4994_v28 = vpack.c.bf16 %v4030_v42, %v4029_v15  ;;  %v3825_v36 = vadd.f32 %v5256_v60, %v5160_v23  ;;  %v3898_v4 = vmul.f32 %v7484_v3, %v3817_v22  ;;  %v5257_v55 = vadd.f32 %v3538_v8, %v7885_v13  ;;  %v3540_v52 = vpop.f32.mrb[127].mxu0 }
 0x351   :  { %5039 = vst [vmem:[%s7849_s4 + $0xe8] sm:$0xff] %v4999_v47   ;;  %v3820_v2 = vadd.f32 %v5255_v12, %v3819_v17 }
 0x352   :  { %5038 = vst [vmem:[%s7849_s4 + $0xe0] sm:$0xff] %v4994_v28   ;;  %v3900_v24 = vmul.f32 %v7484_v3, %v3825_v36  ;;  %v3828_v18 = vadd.f32 %v5257_v55, %v5161_v19  ;;  %v3969_v45 = vadd.f32 %v7493_v38, %v3898_v4 }
 0x353   :  { %v3899_v62 = vmul.f32 %v7484_v3, %v3820_v2 }
 0x354   :  { %v3971_v59 = vadd.f32 %v7493_v38, %v3900_v24  ;;  %v3901_v21 = vmul.f32 %v7484_v3, %v3828_v18  ;;  %v4033_v14 = vmax.f32 %v3969_v45, 0.0 }
 0x355   :  { %v3970_v46 = vadd.f32 %v7493_v38, %v3899_v62 }
 0x356   :  { %v3972_v49 = vadd.f32 %v7493_v38, %v3901_v21  ;;  %v4035_v31 = vmax.f32 %v3971_v59, 0.0 }
 0x357   :  { %v4034_v30 = vmax.f32 %v3970_v46, 0.0 }
 0x358   :  { %v4036_v1 = vmax.f32 %v3972_v49, 0.0 }
 0x359   :  { %v5004_v40 = vpack.c.bf16 %v4034_v30, %v4033_v14 }
 0x35a   :  { %v5009_v6 = vpack.c.bf16 %v4036_v1, %v4035_v31 }
 0x35b   :  { %5040 = vst [vmem:[%s7849_s4 + $0xf0] sm:$0xff] %v5004_v40  }
 0x35c   :  { %5041 = vst [vmem:[%s7849_s4 + $0xf8] sm:$0xff] %v5009_v6  }

// kernel: _lambda_.22
= control target key start
LH: loop header
LB: loop body
LE: loop exit
PB: predicated region body
PF: predicated region fallthrough
CT: control target
= control target key end

     0   :  { %v7036_v0 = vmov 0   ;;  %s9324_s1 = inlined_call_operand.vmem [shape: bf16[1152,128], index: 1, kind: input, shape index: {}]   ;;  %s9325_s0 = inlined_call_operand.vmem [shape: bf16[512,1152], index: 0, kind: input, shape index: {}]   ;;  %s9326_s5 = inlined_call_operand.vmem [shape: bf16[128,128], index: 5, kind: input, shape index: {}]   ;;  %s9327_s4 = inlined_call_operand.vmem [shape: bf16[512,128], index: 4, kind: input, shape index: {}]   ;;  %s9328_s2 = inlined_call_operand.vmem [shape: f32[1,128], index: 2, kind: input, shape index: {}]   ;;  %s9329_s3 = inlined_call_operand.vmem [shape: f32[1,128], index: 3, kind: input, shape index: {}]   ;;  %s9330_s6 = inlined_call_operand.vmem [shape: f32[1,128], index: 6, kind: input, shape index: {}]   ;;  %s9331_s7 = inlined_call_operand.vmem [shape: f32[1,128], index: 7, kind: input, shape index: {}]   ;;  %s9332_s8 = inlined_call_operand.vmem [shape: bf16[512,128], index: 8, kind: output, shape index: {}]  }
   0x1   :  { %2398 = vmatprep.subr.bf16.mxu1 %v7036_v0  ;;  %2687 = vmatprep.subr.bf16.mxu0 %v7036_v0  ;;  %v6504_v1 = vld [vmem:[%s9324_s1] sm:$0xff]   ;;  %v6506_v3 = vld [vmem:[%s9324_s1 + $0x8] sm:$0xff]   ;;  %v6508_v5 = vld [vmem:[%s9324_s1 + $0x10] sm:$0xff]  }
   0x2   :  { %v7090_v2 = vld [vmem:[%s9324_s1 + $0x80] sm:$0xff]   ;;  %2399 = vmatpush1.bf16.msra.mxu1 %v6504_v1  ;;  %v7100_v4 = vld [vmem:[%s9324_s1 + $0x88] sm:$0xff]   ;;  %v7111_v6 = vld [vmem:[%s9324_s1 + $0x90] sm:$0xff]  }
   0x3   :  { %2688 = vmatpush1.bf16.msra.mxu0 %v7090_v2  ;;  %2400 = vmatprep.subr.bf16.mxu1 %v7036_v0  ;;  %v6510_v7 = vld [vmem:[%s9324_s1 + $0x18] sm:$0xff]   ;;  %v6512_v9 = vld [vmem:[%s9324_s1 + $0x20] sm:$0xff]   ;;  %v6514_v11 = vld [vmem:[%s9324_s1 + $0x28] sm:$0xff]  }
   0x4   :  { %2689 = vmatprep.subr.bf16.mxu0 %v7036_v0  ;;  %v7122_v8 = vld [vmem:[%s9324_s1 + $0x98] sm:$0xff]   ;;  %v7133_v10 = vld [vmem:[%s9324_s1 + $0xa0] sm:$0xff]   ;;  %v7144_v12 = vld [vmem:[%s9324_s1 + $0xa8] sm:$0xff]  }
   0x5   :  { %v6516_v13 = vld [vmem:[%s9324_s1 + $0x30] sm:$0xff]   ;;  %v6518_v15 = vld [vmem:[%s9324_s1 + $0x38] sm:$0xff]   ;;  %v6520_v17 = vld [vmem:[%s9324_s1 + $0x40] sm:$0xff]  }
   0x6   :  { %2401 = vmatpush1.bf16.msra.mxu1 %v6506_v3  ;;  %v7155_v14 = vld [vmem:[%s9324_s1 + $0xb0] sm:$0xff]   ;;  %v7166_v16 = vld [vmem:[%s9324_s1 + $0xb8] sm:$0xff]   ;;  %v7177_v18 = vld [vmem:[%s9324_s1 + $0xc0] sm:$0xff]  }
   0x7   :  { %2690 = vmatpush1.bf16.msra.mxu0 %v7100_v4  ;;  %2402 = vmatprep.subr.bf16.mxu1 %v7036_v0  ;;  %v6538_v19 = vld [vmem:[%s9325_s0 + $0x4] ss:$36 sps:$4 sm:$0xff]   ;;  %v6541_v21 = vld [vmem:[%s9325_s0 + $0xc] ss:$36 sps:$4 sm:$0xff]   ;;  %v6526_v25 = vld [vmem:[%s9324_s1 + $0x58] sm:$0xff]  }
   0x8   :  { %2691 = vmatprep.subr.bf16.mxu0 %v7036_v0  ;;  %v6522_v20 = vld [vmem:[%s9324_s1 + $0x48] sm:$0xff]   ;;  %2430 = vmatprep.mubr.bf16.mxu1 %v6538_v19  ;;  %v6524_v23 = vld [vmem:[%s9324_s1 + $0x50] sm:$0xff]   ;;  %v7216_v26 = vld [vmem:[%s9324_s1 + $0xd8] sm:$0xff]  }
   0x9   :  { %v7194_v22 = vld [vmem:[%s9324_s1 + $0xc8] sm:$0xff]   ;;  %2719 = vmatprep.mubr.bf16.mxu0 %v6541_v21  ;;  %v7205_v24 = vld [vmem:[%s9324_s1 + $0xd0] sm:$0xff]   ;;  %v6528_v27 = vld [vmem:[%s9324_s1 + $0x60] sm:$0xff]  }
   0xa   :  { %2403 = vmatpush1.bf16.msra.mxu1 %v6508_v5  ;;  %v7227_v28 = vld [vmem:[%s9324_s1 + $0xe0] sm:$0xff]   ;;  %v6530_v29 = vld [vmem:[%s9324_s1 + $0x68] sm:$0xff]   ;;  %v6532_v31 = vld [vmem:[%s9324_s1 + $0x70] sm:$0xff]  }
   0xb   :  { %2692 = vmatpush1.bf16.msra.mxu0 %v7111_v6  ;;  %2404 = vmatprep.subr.bf16.mxu1 %v7036_v0  ;;  %v7238_v30 = vld [vmem:[%s9324_s1 + $0xe8] sm:$0xff]   ;;  %v7249_v32 = vld [vmem:[%s9324_s1 + $0xf0] sm:$0xff]   ;;  %v6534_v33 = vld [vmem:[%s9324_s1 + $0x78] sm:$0xff]  }
   0xc   :  { %2693 = vmatprep.subr.bf16.mxu0 %v7036_v0  ;;  %v7260_v34 = vld [vmem:[%s9324_s1 + $0xf8] sm:$0xff]   ;;  %v6536_v35 = vld [vmem:[%s9325_s0] ss:$36 sps:$4 sm:$0xff]   ;;  %v6539_v36 = vld [vmem:[%s9325_s0 + $0x8] ss:$36 sps:$4 sm:$0xff]  }
   0xd   :  { %v6542_v37 = vld [vmem:[%s9324_s1 + $0x100] sm:$0xff]   ;;  %v6543_v38 = vld [vmem:[%s9325_s0 + $0x4c] ss:$36 sps:$4 sm:$0xff]   ;;  %v6545_v39 = vld [vmem:[%s9325_s0 + $0x54] ss:$36 sps:$4 sm:$0xff]  }
   0xe   :  { %2405 = vmatpush1.bf16.msra.mxu1 %v6510_v7  ;;  %v6549_v40 = vld [vmem:[%s9324_s1 + $0x108] sm:$0xff]   ;;  %v6548_v42 = vld [vmem:[%s9325_s0 + $0x50] ss:$36 sps:$4 sm:$0xff]   ;;  %v6552_v44 = vld [vmem:[%s9325_s0 + $0x9c] ss:$36 sps:$4 sm:$0xff]  }
   0xf   :  { %2694 = vmatpush1.bf16.msra.mxu0 %v7122_v8  ;;  %2406 = vmatprep.subr.bf16.mxu1 %v7036_v0  ;;  %v6547_v41 = vld [vmem:[%s9325_s0 + $0x48] ss:$36 sps:$4 sm:$0xff]   ;;  %v6550_v43 = vld [vmem:[%s9325_s0 + $0x94] ss:$36 sps:$4 sm:$0xff]   ;;  %v6557_v49 = vld [vmem:[%s9325_s0 + $0xdc] ss:$36 sps:$4 sm:$0xff]  }
  0x10   :  { %2695 = vmatprep.subr.bf16.mxu0 %v7036_v0  ;;  %v6556_v45 = vld [vmem:[%s9324_s1 + $0x110] sm:$0xff]   ;;  %v6563_v46 = vld [vmem:[%s9324_s1 + $0x118] sm:$0xff]   ;;  %v6559_v50 = vld [vmem:[%s9325_s0 + $0xe4] ss:$36 sps:$4 sm:$0xff]  }
  0x11   :  { %v6554_v47 = vld [vmem:[%s9325_s0 + $0x90] ss:$36 sps:$4 sm:$0xff]   ;;  %v6555_v48 = vld [vmem:[%s9325_s0 + $0x98] ss:$36 sps:$4 sm:$0xff]   ;;  %v6570_v51 = vld [vmem:[%s9324_s1 + $0x120] sm:$0xff]  }
  0x12   :  { %2407 = vmatpush1.bf16.msra.mxu1 %v6512_v9  ;;  %v6577_v52 = vld [vmem:[%s9324_s1 + $0x128] sm:$0xff]   ;;  %v6561_v53 = vld [vmem:[%s9325_s0 + $0xd8] ss:$36 sps:$4 sm:$0xff]   ;;  %v6562_v54 = vld [vmem:[%s9325_s0 + $0xe0] ss:$36 sps:$4 sm:$0xff]  }
  0x13   :  { %2696 = vmatpush1.bf16.msra.mxu0 %v7133_v10  ;;  %2408 = vmatprep.subr.bf16.mxu1 %v7036_v0  ;;  %v6564_v55 = vld [vmem:[%s9325_s0 + $0x124] ss:$36 sps:$4 sm:$0xff]   ;;  %v6566_v56 = vld [vmem:[%s9325_s0 + $0x12c] ss:$36 sps:$4 sm:$0xff]   ;;  %v6591_v58 = vld [vmem:[%s9324_s1 + $0x138] sm:$0xff]  }
  0x14   :  { %2697 = vmatprep.subr.bf16.mxu0 %v7036_v0  ;;  %v6584_v57 = vld [vmem:[%s9324_s1 + $0x130] sm:$0xff]   ;;  %v6568_v59 = vld [vmem:[%s9325_s0 + $0x120] ss:$36 sps:$4 sm:$0xff]   ;;  %v6569_v60 = vld [vmem:[%s9325_s0 + $0x128] ss:$36 sps:$4 sm:$0xff]  }
  0x15   :  { %v6571_v61 = vld [vmem:[%s9325_s0 + $0x16c] ss:$36 sps:$4 sm:$0xff]   ;;  %v6573_v62 = vld [vmem:[%s9325_s0 + $0x174] ss:$36 sps:$4 sm:$0xff]   ;;  %v6598_v63 = vld [vmem:[%s9324_s1 + $0x140] sm:$0xff]  }
  0x16   :  { %2409 = vmatpush1.bf16.msra.mxu1 %v6514_v11  ;;  %v6605_v1 = vld [vmem:[%s9324_s1 + $0x148] sm:$0xff]   ;;  %v6576_v3 = vld [vmem:[%s9325_s0 + $0x170] ss:$36 sps:$4 sm:$0xff]   ;;  %v6580_v5 = vld [vmem:[%s9325_s0 + $0x1bc] ss:$36 sps:$4 sm:$0xff]  }
  0x17   :  { %2698 = vmatpush1.bf16.msra.mxu0 %v7144_v12  ;;  %2410 = vmatprep.subr.bf16.mxu1 %v7036_v0  ;;  %v6619_v7 = vld [vmem:[%s9324_s1 + $0x158] sm:$0xff]   ;;  %v6587_v11 = vld [vmem:[%s9325_s0 + $0x204] ss:$36 sps:$4 sm:$0xff]  }
  0x18   :  { %2699 = vmatprep.subr.bf16.mxu0 %v7036_v0  ;;  %v6583_v9 = vld [vmem:[%s9325_s0 + $0x1b8] ss:$36 sps:$4 sm:$0xff]   ;;  %v6596_v19 = vld [vmem:[%s9325_s0 + $0x240] ss:$36 sps:$4 sm:$0xff]   ;;  %v6597_v21 = vld [vmem:[%s9325_s0 + $0x248] ss:$36 sps:$4 sm:$0xff]  }
  0x1a   :  { %2411 = vmatpush1.bf16.msra.mxu1 %v6516_v13  ;;  %v6589_v13 = vld [vmem:[%s9325_s0 + $0x1f8] ss:$36 sps:$4 sm:$0xff]  }
  0x1b   :  { %2700 = vmatpush1.bf16.msra.mxu0 %v7155_v14  ;;  %2412 = vmatprep.subr.bf16.mxu1 %v7036_v0 }
  0x1c   :  { %2701 = vmatprep.subr.bf16.mxu0 %v7036_v0 }
  0x1e   :  { %2413 = vmatpush1.bf16.msra.mxu1 %v6518_v15  ;;  %v6590_v15 = vld [vmem:[%s9325_s0 + $0x200] ss:$36 sps:$4 sm:$0xff]  }
  0x1f   :  { %2702 = vmatpush1.bf16.msra.mxu0 %v7166_v16  ;;  %2414 = vmatprep.subr.bf16.mxu1 %v7036_v0 }
  0x20   :  { %2703 = vmatprep.subr.bf16.mxu0 %v7036_v0 }
  0x22   :  { %2415 = vmatpush1.bf16.msra.mxu1 %v6520_v17  ;;  %v6594_v17 = vld [vmem:[%s9325_s0 + $0x24c] ss:$36 sps:$4 sm:$0xff]  }
  0x23   :  { %2704 = vmatpush1.bf16.msra.mxu0 %v7177_v18  ;;  %2416 = vmatprep.subr.bf16.mxu1 %v7036_v0 }
  0x24   :  { %2705 = vmatprep.subr.bf16.mxu0 %v7036_v0 }
  0x26   :  { %2417 = vmatpush1.bf16.msra.mxu1 %v6522_v20  ;;  %v6647_v20 = vld [vmem:[%s9324_s1 + $0x178] sm:$0xff]  }
  0x27   :  { %2706 = vmatpush1.bf16.msra.mxu0 %v7194_v22  ;;  %2418 = vmatprep.subr.bf16.mxu1 %v7036_v0 }
  0x28   :  { %2707 = vmatprep.subr.bf16.mxu0 %v7036_v0 }
  0x2a   :  { %2419 = vmatpush1.bf16.msra.mxu1 %v6524_v23  ;;  %v6601_v23 = vld [vmem:[%s9325_s0 + $0x294] ss:$36 sps:$4 sm:$0xff]  }
  0x2b   :  { %2708 = vmatpush1.bf16.msra.mxu0 %v7205_v24  ;;  %2420 = vmatprep.subr.bf16.mxu1 %v7036_v0 }
  0x2c   :  { %2709 = vmatprep.subr.bf16.mxu0 %v7036_v0 }
  0x2e   :  { %2421 = vmatpush1.bf16.msra.mxu1 %v6526_v25  ;;  %v6604_v25 = vld [vmem:[%s9325_s0 + $0x290] ss:$36 sps:$4 sm:$0xff]  }
  0x2f   :  { %2710 = vmatpush1.bf16.msra.mxu0 %v7216_v26  ;;  %2422 = vmatprep.subr.bf16.mxu1 %v7036_v0 }
  0x30   :  { %2711 = vmatprep.subr.bf16.mxu0 %v7036_v0 }
  0x32   :  { %2423 = vmatpush1.bf16.msra.mxu1 %v6528_v27  ;;  %v6608_v27 = vld [vmem:[%s9325_s0 + $0x2dc] ss:$36 sps:$4 sm:$0xff]  }
  0x33   :  { %2712 = vmatpush1.bf16.msra.mxu0 %v7227_v28  ;;  %2424 = vmatprep.subr.bf16.mxu1 %v7036_v0 }
  0x34   :  { %2713 = vmatprep.subr.bf16.mxu0 %v7036_v0 }
  0x36   :  { %2425 = vmatpush1.bf16.msra.mxu1 %v6530_v29  ;;  %v6611_v29 = vld [vmem:[%s9325_s0 + $0x2d8] ss:$36 sps:$4 sm:$0xff]  }
  0x37   :  { %2714 = vmatpush1.bf16.msra.mxu0 %v7238_v30  ;;  %2426 = vmatprep.subr.bf16.mxu1 %v7036_v0 }
  0x38   :  { %2715 = vmatprep.subr.bf16.mxu0 %v7036_v0 }
  0x3a   :  { %2427 = vmatpush1.bf16.msra.mxu1 %v6532_v31  ;;  %v6615_v31 = vld [vmem:[%s9325_s0 + $0x324] ss:$36 sps:$4 sm:$0xff]  }
  0x3b   :  { %2716 = vmatpush1.bf16.msra.mxu0 %v7249_v32  ;;  %2428 = vmatprep.subr.bf16.mxu1 %v7036_v0 }
  0x3c   :  { %2717 = vmatprep.subr.bf16.mxu0 %v7036_v0 }
  0x3e   :  { %2429 = vmatpush1.bf16.msra.mxu1 %v6534_v33  ;;  %v6618_v33 = vld [vmem:[%s9325_s0 + $0x320] ss:$36 sps:$4 sm:$0xff]  }
  0x3f   :  { %2718 = vmatpush1.bf16.msra.mxu0 %v7260_v34  ;;  %6151 = vmatprep.subr.bf16.mxu1 %v7036_v0 }
  0x40   :  { %2976 = vmatprep.subr.bf16.mxu0 %v7036_v0 }
  0x41   :  { %2431 = vmatmul.mubr.bf16.vlgmr.msra.gmra.mrb[0].mxu1 %v6536_v35  ;;  %v6622_v35 = vld [vmem:[%s9325_s0 + $0x36c] ss:$36 sps:$4 sm:$0xff]  }
  0x42   :  { %2720 = vmatmul.mubr.bf16.vlgmr.msra.gmra.mrb[0].mxu0 %v6539_v36  ;;  %6167 = vmatpush1.bf16.msra.mxu1 %v7090_v2  ;;  %v6575_v2 = vld [vmem:[%s9325_s0 + $0x168] ss:$36 sps:$4 sm:$0xff]   ;;  %v6624_v36 = vld [vmem:[%s9325_s0 + $0x360] ss:$36 sps:$4 sm:$0xff]  }
  0x43   :  { %2977 = vmatpush1.bf16.msra.mxu0 %v6542_v37  ;;  %2438 = vmatprep.mubr.bf16.mxu1 %v6543_v38  ;;  %v6625_v37 = vld [vmem:[%s9325_s0 + $0x368] ss:$36 sps:$4 sm:$0xff]  }
  0x44   :  { %2727 = vmatprep.mubr.bf16.mxu0 %v6545_v39  ;;  %2978 = vmatprep.subr.bf16.mxu0 %v7036_v0  ;;  %v6627_v38 = vld [vmem:[%s9325_s0 + $0x3ac] ss:$36 sps:$4 sm:$0xff]   ;;  %v6629_v39 = vld [vmem:[%s9325_s0 + $0x3b4] ss:$36 sps:$4 sm:$0xff]  }
  0x45   :  { %6152 = vmatprep.subr.bf16.mxu1 %v7036_v0 }
  0x46   :  { %6168 = vmatpush1.bf16.msra.mxu1 %v7100_v4  ;;  %v6578_v4 = vld [vmem:[%s9325_s0 + $0x1b4] ss:$36 sps:$4 sm:$0xff]  }
  0x47   :  { %2979 = vmatpush1.bf16.msra.mxu0 %v6549_v40  ;;  %6153 = vmatprep.subr.bf16.mxu1 %v7036_v0  ;;  %v6631_v40 = vld [vmem:[%s9325_s0 + $0x3a8] ss:$36 sps:$4 sm:$0xff]  }
  0x48   :  { %2980 = vmatprep.subr.bf16.mxu0 %v7036_v0 }
  0x49   :  { %2439 = vmatmul.mubr.bf16.gmra.mrb[4].mxu1 %v6547_v41  ;;  %v6632_v41 = vld [vmem:[%s9325_s0 + $0x3b0] ss:$36 sps:$4 sm:$0xff]  }
  0x4a   :  { %2728 = vmatmul.mubr.bf16.gmra.mrb[4].mxu0 %v6548_v42  ;;  %2446 = vmatprep.mubr.bf16.mxu1 %v6550_v43  ;;  %v6634_v42 = vld [vmem:[%s9325_s0 + $0x3f4] ss:$36 sps:$4 sm:$0xff]   ;;  %v6636_v43 = vld [vmem:[%s9325_s0 + $0x3fc] ss:$36 sps:$4 sm:$0xff]  }
  0x4b   :  { %2735 = vmatprep.mubr.bf16.mxu0 %v6552_v44  ;;  %2981 = vmatpush1.bf16.msra.mxu0 %v6556_v45  ;;  %v6638_v44 = vld [vmem:[%s9325_s0 + $0x3f0] ss:$36 sps:$4 sm:$0xff]   ;;  %v6639_v45 = vld [vmem:[%s9325_s0 + $0x3f8] ss:$36 sps:$4 sm:$0xff]  }
  0x4c   :  { %2982 = vmatprep.subr.bf16.mxu0 %v7036_v0  ;;  %6169 = vmatpush1.bf16.msra.mxu1 %v7111_v6  ;;  %v6612_v6 = vld [vmem:[%s9324_s1 + $0x150] sm:$0xff]  }
  0x4d   :  { %6154 = vmatprep.subr.bf16.mxu1 %v7036_v0 }
  0x4f   :  { %2983 = vmatpush1.bf16.msra.mxu0 %v6563_v46  ;;  %v6641_v46 = vld [vmem:[%s9325_s0 + $0x43c] ss:$36 sps:$4 sm:$0xff]  }
  0x50   :  { %2984 = vmatprep.subr.bf16.mxu0 %v7036_v0  ;;  %6170 = vmatpush1.bf16.msra.mxu1 %v7122_v8  ;;  %v6582_v8 = vld [vmem:[%s9325_s0 + $0x1b0] ss:$36 sps:$4 sm:$0xff]  }
  0x51   :  { %2447 = vmatmul.mubr.bf16.gmra.mrb[8].mxu1 %v6554_v47  ;;  %6155 = vmatprep.subr.bf16.mxu1 %v7036_v0  ;;  %v6643_v47 = vld [vmem:[%s9325_s0 + $0x444] ss:$36 sps:$4 sm:$0xff]  }
  0x52   :  { %2736 = vmatmul.mubr.bf16.gmra.mrb[8].mxu0 %v6555_v48  ;;  %2454 = vmatprep.mubr.bf16.mxu1 %v6557_v49  ;;  %v6645_v48 = vld [vmem:[%s9325_s0 + $0x438] ss:$36 sps:$4 sm:$0xff]   ;;  %v6646_v49 = vld [vmem:[%s9325_s0 + $0x440] ss:$36 sps:$4 sm:$0xff]  }
  0x53   :  { %2743 = vmatprep.mubr.bf16.mxu0 %v6559_v50  ;;  %2985 = vmatpush1.bf16.msra.mxu0 %v6570_v51  ;;  %v6648_v50 = vld [vmem:[%s9325_s0 + $0x484] ss:$36 sps:$4 sm:$0xff]   ;;  %v6652_v51 = vld [vmem:[%s9325_s0 + $0x14] ss:$36 sps:$4 sm:$0xff]  }
  0x54   :  { %2986 = vmatprep.subr.bf16.mxu0 %v7036_v0  ;;  %6171 = vmatpush1.bf16.msra.mxu1 %v7133_v10  ;;  %v6585_v10 = vld [vmem:[%s9325_s0 + $0x1fc] ss:$36 sps:$4 sm:$0xff]  }
  0x55   :  { %6156 = vmatprep.subr.bf16.mxu1 %v7036_v0 }
  0x57   :  { %2987 = vmatpush1.bf16.msra.mxu0 %v6577_v52  ;;  %v6653_v52 = vld [vmem:[%s9325_s0 + $0x480] ss:$36 sps:$4 sm:$0xff]  }
  0x58   :  { %2988 = vmatprep.subr.bf16.mxu0 %v7036_v0  ;;  %6172 = vmatpush1.bf16.msra.mxu1 %v7144_v12  ;;  %v6626_v12 = vld [vmem:[%s9324_s1 + $0x160] sm:$0xff]  }
  0x59   :  { %2455 = vmatmul.mubr.bf16.gmra.mrb[12].mxu1 %v6561_v53  ;;  %6157 = vmatprep.subr.bf16.mxu1 %v7036_v0  ;;  %v6650_v53 = vld [vmem:[%s9325_s0 + $0x10] ss:$36 sps:$4 sm:$0xff]  }
  0x5a   :  { %2744 = vmatmul.mubr.bf16.gmra.mrb[12].mxu0 %v6562_v54  ;;  %2462 = vmatprep.mubr.bf16.mxu1 %v6564_v55  ;;  %v6655_v54 = vld [vmem:[%s9325_s0 + $0x4cc] ss:$36 sps:$4 sm:$0xff]   ;;  %v6654_v55 = vld [vmem:[%s9324_s1 + $0x180] sm:$0xff]  }
  0x5b   :  { %2751 = vmatprep.mubr.bf16.mxu0 %v6566_v56  ;;  %2989 = vmatpush1.bf16.msra.mxu0 %v6584_v57  ;;  %v6657_v56 = vld [vmem:[%s9325_s0 + $0x5c] ss:$36 sps:$4 sm:$0xff]   ;;  %v6667_v57 = vld [vmem:[%s9324_s1 + $0x188] sm:$0xff]  }
  0x5c   :  { %2990 = vmatprep.subr.bf16.mxu0 %v7036_v0  ;;  %6173 = vmatpush1.bf16.msra.mxu1 %v7155_v14  ;;  %v6633_v14 = vld [vmem:[%s9324_s1 + $0x168] sm:$0xff]  }
  0x5d   :  { %6158 = vmatprep.subr.bf16.mxu1 %v7036_v0 }
  0x5f   :  { %2991 = vmatpush1.bf16.msra.mxu0 %v6591_v58  ;;  %v7574_v58 = vld [vmem:[%s9324_s1 + $0x200] sm:$0xff]  }
  0x60   :  { %2992 = vmatprep.subr.bf16.mxu0 %v7036_v0  ;;  %6174 = vmatpush1.bf16.msra.mxu1 %v7166_v16  ;;  %v6592_v16 = vld [vmem:[%s9325_s0 + $0x244] ss:$36 sps:$4 sm:$0xff]  }
  0x61   :  { %2463 = vmatmul.mubr.bf16.gmra.mrb[16].mxu1 %v6568_v59  ;;  %6159 = vmatprep.subr.bf16.mxu1 %v7036_v0  ;;  %v6659_v59 = vld [vmem:[%s9325_s0 + $0x4c8] ss:$36 sps:$4 sm:$0xff]  }
  0x62   :  { %2752 = vmatmul.mubr.bf16.gmra.mrb[16].mxu0 %v6569_v60  ;;  %2470 = vmatprep.mubr.bf16.mxu1 %v6571_v61  ;;  %v6660_v60 = vld [vmem:[%s9325_s0 + $0x58] ss:$36 sps:$4 sm:$0xff]  }
  0x63   :  { %2759 = vmatprep.mubr.bf16.mxu0 %v6573_v62  ;;  %2993 = vmatpush1.bf16.msra.mxu0 %v6598_v63  ;;  %v6661_v61 = vld [vmem:[%s9325_s0 + $0x514] ss:$36 sps:$4 sm:$0xff]   ;;  %v6663_v62 = vld [vmem:[%s9325_s0 + $0xa4] ss:$36 sps:$4 sm:$0xff]  }
  0x64   :  { %2994 = vmatprep.subr.bf16.mxu0 %v7036_v0  ;;  %6175 = vmatpush1.bf16.msra.mxu1 %v7177_v18  ;;  %v6640_v18 = vld [vmem:[%s9324_s1 + $0x170] sm:$0xff]  }
  0x65   :  { %6160 = vmatprep.subr.bf16.mxu1 %v7036_v0  ;;  %v6680_v63 = vld [vmem:[%s9324_s1 + $0x190] sm:$0xff]  }
  0x67   :  { %2995 = vmatpush1.bf16.msra.mxu0 %v6605_v1  ;;  %v6693_v1 = vld [vmem:[%s9324_s1 + $0x198] sm:$0xff]  }
  0x68   :  { %2996 = vmatprep.subr.bf16.mxu0 %v7036_v0  ;;  %6176 = vmatpush1.bf16.msra.mxu1 %v7194_v22  ;;  %v6599_v22 = vld [vmem:[%s9325_s0 + $0x28c] ss:$36 sps:$4 sm:$0xff]  }
  0x69   :  { %2471 = vmatmul.mubr.bf16.gmra.mrb[20].mxu1 %v6575_v2  ;;  %6161 = vmatprep.subr.bf16.mxu1 %v7036_v0  ;;  %v6665_v2 = vld [vmem:[%s9325_s0 + $0x510] ss:$36 sps:$4 sm:$0xff]  }
  0x6a   :  { %2760 = vmatmul.mubr.bf16.gmra.mrb[20].mxu0 %v6576_v3  ;;  %2478 = vmatprep.mubr.bf16.mxu1 %v6578_v4  ;;  %v6666_v3 = vld [vmem:[%s9325_s0 + $0xa0] ss:$36 sps:$4 sm:$0xff]  }
  0x6b   :  { %2767 = vmatprep.mubr.bf16.mxu0 %v6580_v5  ;;  %2997 = vmatpush1.bf16.msra.mxu0 %v6612_v6  ;;  %v6668_v4 = vld [vmem:[%s9325_s0 + $0x55c] ss:$36 sps:$4 sm:$0xff]   ;;  %v6670_v5 = vld [vmem:[%s9325_s0 + $0xec] ss:$36 sps:$4 sm:$0xff]  }
  0x6c   :  { %2998 = vmatprep.subr.bf16.mxu0 %v7036_v0  ;;  %6177 = vmatpush1.bf16.msra.mxu1 %v7205_v24  ;;  %v6603_v24 = vld [vmem:[%s9325_s0 + $0x288] ss:$36 sps:$4 sm:$0xff]   ;;  %v6706_v6 = vld [vmem:[%s9324_s1 + $0x1a0] sm:$0xff]  }
  0x6d   :  { %6162 = vmatprep.subr.bf16.mxu1 %v7036_v0 }
  0x6f   :  { %2999 = vmatpush1.bf16.msra.mxu0 %v6619_v7  ;;  %v6719_v7 = vld [vmem:[%s9324_s1 + $0x1a8] sm:$0xff]  }
  0x70   :  { %3000 = vmatprep.subr.bf16.mxu0 %v7036_v0  ;;  %6178 = vmatpush1.bf16.msra.mxu1 %v7216_v26  ;;  %v6606_v26 = vld [vmem:[%s9325_s0 + $0x2d4] ss:$36 sps:$4 sm:$0xff]  }
  0x71   :  { %2479 = vmatmul.mubr.bf16.gmra.mrb[24].mxu1 %v6582_v8  ;;  %6163 = vmatprep.subr.bf16.mxu1 %v7036_v0  ;;  %v6672_v8 = vld [vmem:[%s9325_s0 + $0x558] ss:$36 sps:$4 sm:$0xff]  }
  0x72   :  { %2768 = vmatmul.mubr.bf16.gmra.mrb[24].mxu0 %v6583_v9  ;;  %2486 = vmatprep.mubr.bf16.mxu1 %v6585_v10  ;;  %v6673_v9 = vld [vmem:[%s9325_s0 + $0xe8] ss:$36 sps:$4 sm:$0xff]  }
  0x73   :  { %2775 = vmatprep.mubr.bf16.mxu0 %v6587_v11  ;;  %3001 = vmatpush1.bf16.msra.mxu0 %v6626_v12  ;;  %v6674_v10 = vld [vmem:[%s9325_s0 + $0x5a4] ss:$36 sps:$4 sm:$0xff]   ;;  %v6676_v11 = vld [vmem:[%s9325_s0 + $0x134] ss:$36 sps:$4 sm:$0xff]  }
  0x74   :  { %3002 = vmatprep.subr.bf16.mxu0 %v7036_v0  ;;  %6179 = vmatpush1.bf16.msra.mxu1 %v7227_v28  ;;  %v6610_v28 = vld [vmem:[%s9325_s0 + $0x2d0] ss:$36 sps:$4 sm:$0xff]  }
  0x75   :  { %6164 = vmatprep.subr.bf16.mxu1 %v7036_v0  ;;  %v6732_v12 = vld [vmem:[%s9324_s1 + $0x1b0] sm:$0xff]  }
  0x77   :  { %3003 = vmatpush1.bf16.msra.mxu0 %v6633_v14  ;;  %v6678_v14 = vld [vmem:[%s9325_s0 + $0x5a0] ss:$36 sps:$4 sm:$0xff]  }
  0x78   :  { %3004 = vmatprep.subr.bf16.mxu0 %v7036_v0  ;;  %6180 = vmatpush1.bf16.msra.mxu1 %v7238_v30  ;;  %v6613_v30 = vld [vmem:[%s9325_s0 + $0x31c] ss:$36 sps:$4 sm:$0xff]  }
  0x79   :  { %2487 = vmatmul.mubr.bf16.gmra.mrb[28].mxu1 %v6589_v13  ;;  %6165 = vmatprep.subr.bf16.mxu1 %v7036_v0  ;;  %v6745_v13 = vld [vmem:[%s9324_s1 + $0x1b8] sm:$0xff]  }
  0x7a   :  { %2776 = vmatmul.mubr.bf16.gmra.mrb[28].mxu0 %v6590_v15  ;;  %2494 = vmatprep.mubr.bf16.mxu1 %v6592_v16  ;;  %v6679_v15 = vld [vmem:[%s9325_s0 + $0x130] ss:$36 sps:$4 sm:$0xff]  }
  0x7b   :  { %2783 = vmatprep.mubr.bf16.mxu0 %v6594_v17  ;;  %3005 = vmatpush1.bf16.msra.mxu0 %v6640_v18  ;;  %v6681_v16 = vld [vmem:[%s9325_s0 + $0x5ec] ss:$36 sps:$4 sm:$0xff]   ;;  %v6683_v17 = vld [vmem:[%s9325_s0 + $0x17c] ss:$36 sps:$4 sm:$0xff]  }
  0x7c   :  { %3006 = vmatprep.subr.bf16.mxu0 %v7036_v0  ;;  %6181 = vmatpush1.bf16.msra.mxu1 %v7249_v32  ;;  %v6617_v32 = vld [vmem:[%s9325_s0 + $0x318] ss:$36 sps:$4 sm:$0xff]   ;;  %v6758_v18 = vld [vmem:[%s9324_s1 + $0x1c0] sm:$0xff]  }
  0x7d   :  { %6166 = vmatprep.subr.bf16.mxu1 %v7036_v0 }
  0x7f   :  { %3007 = vmatpush1.bf16.msra.mxu0 %v6647_v20  ;;  %v6685_v20 = vld [vmem:[%s9325_s0 + $0x5e8] ss:$36 sps:$4 sm:$0xff]  }
  0x80   :  { %3265 = vmatprep.subr.bf16.mxu0 %v7036_v0  ;;  %6182 = vmatpush1.bf16.msra.mxu1 %v7260_v34  ;;  %v6620_v34 = vld [vmem:[%s9325_s0 + $0x364] ss:$36 sps:$4 sm:$0xff]  }
  0x81   :  { %2495 = vmatmul.mubr.bf16.gmra.mrb[32].mxu1 %v6596_v19  ;;  %5991 = vmatprep.subr.bf16.mxu1 %v7574_v58  ;;  %v6772_v19 = vld [vmem:[%s9324_s1 + $0x1c8] sm:$0xff]  }
  0x82   :  { %2784 = vmatmul.mubr.bf16.gmra.mrb[32].mxu0 %v6597_v21  ;;  %2502 = vmatprep.mubr.bf16.mxu1 %v6599_v22  ;;  %v6686_v21 = vld [vmem:[%s9325_s0 + $0x178] ss:$36 sps:$4 sm:$0xff]  }
  0x83   :  { %2791 = vmatprep.mubr.bf16.mxu0 %v6601_v23  ;;  %v6687_v22 = vld [vmem:[%s9325_s0 + $0x634] ss:$36 sps:$4 sm:$0xff]   ;;  %v6689_v23 = vld [vmem:[%s9325_s0 + $0x1c4] ss:$36 sps:$4 sm:$0xff]  }
  0x89   :  { %2503 = vmatmul.mubr.bf16.gmra.mrb[36].mxu1 %v6603_v24  ;;  %v6786_v24 = vld [vmem:[%s9324_s1 + $0x1d0] sm:$0xff]  }
  0x8a   :  { %2792 = vmatmul.mubr.bf16.gmra.mrb[36].mxu0 %v6604_v25  ;;  %2510 = vmatprep.mubr.bf16.mxu1 %v6606_v26  ;;  %v6691_v25 = vld [vmem:[%s9325_s0 + $0x630] ss:$36 sps:$4 sm:$0xff]   ;;  %v6692_v26 = vld [vmem:[%s9325_s0 + $0x1c0] ss:$36 sps:$4 sm:$0xff]  }
  0x8b   :  { %2799 = vmatprep.mubr.bf16.mxu0 %v6608_v27  ;;  %v6694_v27 = vld [vmem:[%s9325_s0 + $0x67c] ss:$36 sps:$4 sm:$0xff]  }
  0x91   :  { %2511 = vmatmul.mubr.bf16.gmra.mrb[40].mxu1 %v6610_v28  ;;  %v6696_v28 = vld [vmem:[%s9325_s0 + $0x20c] ss:$36 sps:$4 sm:$0xff]  }
  0x92   :  { %2800 = vmatmul.mubr.bf16.gmra.mrb[40].mxu0 %v6611_v29  ;;  %2518 = vmatprep.mubr.bf16.mxu1 %v6613_v30  ;;  %v6800_v29 = vld [vmem:[%s9324_s1 + $0x1d8] sm:$0xff]  }
  0x93   :  { %2807 = vmatprep.mubr.bf16.mxu0 %v6615_v31  ;;  %v6698_v30 = vld [vmem:[%s9325_s0 + $0x678] ss:$36 sps:$4 sm:$0xff]   ;;  %v6699_v31 = vld [vmem:[%s9325_s0 + $0x208] ss:$36 sps:$4 sm:$0xff]  }
  0x99   :  { %2519 = vmatmul.mubr.bf16.gmra.mrb[44].mxu1 %v6617_v32  ;;  %v6700_v32 = vld [vmem:[%s9325_s0 + $0x6c4] ss:$36 sps:$4 sm:$0xff]  }
  0x9a   :  { %2808 = vmatmul.mubr.bf16.gmra.mrb[44].mxu0 %v6618_v33  ;;  %2526 = vmatprep.mubr.bf16.mxu1 %v6620_v34  ;;  %v6702_v33 = vld [vmem:[%s9325_s0 + $0x254] ss:$36 sps:$4 sm:$0xff]   ;;  %v6704_v34 = vld [vmem:[%s9325_s0 + $0x6c0] ss:$36 sps:$4 sm:$0xff]  }
  0x9b   :  { %2815 = vmatprep.mubr.bf16.mxu0 %v6622_v35  ;;  %v6705_v35 = vld [vmem:[%s9325_s0 + $0x250] ss:$36 sps:$4 sm:$0xff]  }
  0xa1   :  { %2527 = vmatmul.mubr.bf16.gmra.mrb[48].mxu1 %v6624_v36  ;;  %v6707_v36 = vld [vmem:[%s9325_s0 + $0x70c] ss:$36 sps:$4 sm:$0xff]  }
  0xa2   :  { %2816 = vmatmul.mubr.bf16.gmra.mrb[48].mxu0 %v6625_v37  ;;  %2534 = vmatprep.mubr.bf16.mxu1 %v6627_v38  ;;  %v6709_v37 = vld [vmem:[%s9325_s0 + $0x29c] ss:$36 sps:$4 sm:$0xff]  }
  0xa3   :  { %2823 = vmatprep.mubr.bf16.mxu0 %v6629_v39  ;;  %v6814_v38 = vld [vmem:[%s9324_s1 + $0x1e0] sm:$0xff]   ;;  %v6711_v39 = vld [vmem:[%s9325_s0 + $0x708] ss:$36 sps:$4 sm:$0xff]  }
  0xa9   :  { %2535 = vmatmul.mubr.bf16.gmra.mrb[52].mxu1 %v6631_v40  ;;  %v6712_v40 = vld [vmem:[%s9325_s0 + $0x298] ss:$36 sps:$4 sm:$0xff]  }
  0xaa   :  { %2824 = vmatmul.mubr.bf16.gmra.mrb[52].mxu0 %v6632_v41  ;;  %2542 = vmatprep.mubr.bf16.mxu1 %v6634_v42  ;;  %v6713_v41 = vld [vmem:[%s9325_s0 + $0x754] ss:$36 sps:$4 sm:$0xff]   ;;  %v6715_v42 = vld [vmem:[%s9325_s0 + $0x2e4] ss:$36 sps:$4 sm:$0xff]  }
  0xab   :  { %2831 = vmatprep.mubr.bf16.mxu0 %v6636_v43  ;;  %v6717_v43 = vld [vmem:[%s9325_s0 + $0x750] ss:$36 sps:$4 sm:$0xff]  }
  0xb1   :  { %2543 = vmatmul.mubr.bf16.gmra.mrb[56].mxu1 %v6638_v44  ;;  %v6718_v44 = vld [vmem:[%s9325_s0 + $0x2e0] ss:$36 sps:$4 sm:$0xff]  }
  0xb2   :  { %2832 = vmatmul.mubr.bf16.gmra.mrb[56].mxu0 %v6639_v45  ;;  %2550 = vmatprep.mubr.bf16.mxu1 %v6641_v46  ;;  %v6720_v45 = vld [vmem:[%s9325_s0 + $0x79c] ss:$36 sps:$4 sm:$0xff]   ;;  %v6722_v46 = vld [vmem:[%s9325_s0 + $0x32c] ss:$36 sps:$4 sm:$0xff]  }
  0xb3   :  { %2839 = vmatprep.mubr.bf16.mxu0 %v6643_v47  ;;  %v6828_v47 = vld [vmem:[%s9324_s1 + $0x1e8] sm:$0xff]  }
  0xb9   :  { %2551 = vmatmul.mubr.bf16.gmra.mrb[60].mxu1 %v6645_v48 }
  0xba   :  { %2840 = vmatmul.mubr.bf16.gmra.mrb[60].mxu0 %v6646_v49  ;;  %2558 = vmatprep.mubr.bf16.mxu1 %v6648_v50  ;;  %v6724_v50 = vld [vmem:[%s9325_s0 + $0x798] ss:$36 sps:$4 sm:$0xff]  }
  0xbb   :  { %3008 = vmatprep.mubr.bf16.mxu0 %v6652_v51 }
  0xc1   :  { %2559 = vmatmul.mubr.bf16.gmra.mrb[64].mxu1 %v6653_v52  ;;  %v6725_v52 = vld [vmem:[%s9325_s0 + $0x328] ss:$36 sps:$4 sm:$0xff]  }
  0xc2   :  { %3009 = vmatmul.mubr.bf16.vlgmr.msra.gmra.mrb[0].mxu0 %v6650_v53  ;;  %2566 = vmatprep.mubr.bf16.mxu1 %v6655_v54  ;;  %v6726_v53 = vld [vmem:[%s9325_s0 + $0x7e4] ss:$36 sps:$4 sm:$0xff]  }
  0xc3   :  { %3266 = vmatpush1.bf16.msra.mxu0 %v6654_v55  ;;  %3016 = vmatprep.mubr.bf16.mxu0 %v6657_v56  ;;  %v6728_v55 = vld [vmem:[%s9325_s0 + $0x374] ss:$36 sps:$4 sm:$0xff]  }
  0xc4   :  { %3267 = vmatprep.subr.bf16.mxu0 %v7036_v0 }
  0xc7   :  { %3268 = vmatpush1.bf16.msra.mxu0 %v6667_v57 }
  0xc8   :  { %3269 = vmatprep.subr.bf16.mxu0 %v7036_v0 }
  0xc9   :  { %2567 = vmatmul.mubr.bf16.gmra.mrb[68].mxu1 %v6659_v59  ;;  %v6730_v59 = vld [vmem:[%s9325_s0 + $0x7e0] ss:$36 sps:$4 sm:$0xff]  }
  0xca   :  { %3017 = vmatmul.mubr.bf16.gmra.mrb[4].mxu0 %v6660_v60  ;;  %2574 = vmatprep.mubr.bf16.mxu1 %v6661_v61  ;;  %v6731_v61 = vld [vmem:[%s9325_s0 + $0x370] ss:$36 sps:$4 sm:$0xff]  }
  0xcb   :  { %3024 = vmatprep.mubr.bf16.mxu0 %v6663_v62  ;;  %3270 = vmatpush1.bf16.msra.mxu0 %v6680_v63  ;;  %v6733_v62 = vld [vmem:[%s9325_s0 + $0x82c] ss:$36 sps:$4 sm:$0xff]  }
  0xcc   :  { %3271 = vmatprep.subr.bf16.mxu0 %v7036_v0 }
  0xcf   :  { %3272 = vmatpush1.bf16.msra.mxu0 %v6693_v1  ;;  %v6735_v1 = vld [vmem:[%s9325_s0 + $0x3bc] ss:$36 sps:$4 sm:$0xff]  }
  0xd0   :  { %3273 = vmatprep.subr.bf16.mxu0 %v7036_v0 }
  0xd1   :  { %2575 = vmatmul.mubr.bf16.gmra.mrb[72].mxu1 %v6665_v2  ;;  %v6842_v2 = vld [vmem:[%s9324_s1 + $0x1f0] sm:$0xff]  }
  0xd2   :  { %3025 = vmatmul.mubr.bf16.gmra.mrb[8].mxu0 %v6666_v3  ;;  %2582 = vmatprep.mubr.bf16.mxu1 %v6668_v4 }
  0xd3   :  { %3032 = vmatprep.mubr.bf16.mxu0 %v6670_v5  ;;  %3274 = vmatpush1.bf16.msra.mxu0 %v6706_v6  ;;  %v6737_v5 = vld [vmem:[%s9325_s0 + $0x828] ss:$36 sps:$4 sm:$0xff]  }
  0xd4   :  { %3275 = vmatprep.subr.bf16.mxu0 %v7036_v0 }
  0xd7   :  { %3276 = vmatpush1.bf16.msra.mxu0 %v6719_v7  ;;  %v6738_v7 = vld [vmem:[%s9325_s0 + $0x3b8] ss:$36 sps:$4 sm:$0xff]  }
  0xd8   :  { %3277 = vmatprep.subr.bf16.mxu0 %v7036_v0 }
  0xd9   :  { %2583 = vmatmul.mubr.bf16.gmra.mrb[76].mxu1 %v6672_v8  ;;  %v6739_v8 = vld [vmem:[%s9325_s0 + $0x874] ss:$36 sps:$4 sm:$0xff]  }
  0xda   :  { %3033 = vmatmul.mubr.bf16.gmra.mrb[12].mxu0 %v6673_v9  ;;  %2590 = vmatprep.mubr.bf16.mxu1 %v6674_v10  ;;  %v6741_v10 = vld [vmem:[%s9325_s0 + $0x404] ss:$36 sps:$4 sm:$0xff]  }
  0xdb   :  { %3040 = vmatprep.mubr.bf16.mxu0 %v6676_v11  ;;  %3278 = vmatpush1.bf16.msra.mxu0 %v6732_v12  ;;  %v6743_v12 = vld [vmem:[%s9325_s0 + $0x870] ss:$36 sps:$4 sm:$0xff]  }
  0xdc   :  { %3279 = vmatprep.subr.bf16.mxu0 %v7036_v0 }
  0xdf   :  { %3280 = vmatpush1.bf16.msra.mxu0 %v6745_v13 }
  0xe0   :  { %3281 = vmatprep.subr.bf16.mxu0 %v7036_v0 }
  0xe1   :  { %2591 = vmatmul.mubr.bf16.gmra.mrb[80].mxu1 %v6678_v14  ;;  %v6744_v14 = vld [vmem:[%s9325_s0 + $0x400] ss:$36 sps:$4 sm:$0xff]  }
  0xe2   :  { %3041 = vmatmul.mubr.bf16.gmra.mrb[16].mxu0 %v6679_v15  ;;  %2598 = vmatprep.mubr.bf16.mxu1 %v6681_v16  ;;  %v6746_v15 = vld [vmem:[%s9325_s0 + $0x8bc] ss:$36 sps:$4 sm:$0xff]  }
  0xe3   :  { %3048 = vmatprep.mubr.bf16.mxu0 %v6683_v17  ;;  %3282 = vmatpush1.bf16.msra.mxu0 %v6758_v18  ;;  %v6748_v17 = vld [vmem:[%s9325_s0 + $0x44c] ss:$36 sps:$4 sm:$0xff]   ;;  %v6856_v18 = vld [vmem:[%s9324_s1 + $0x1f8] sm:$0xff]  }
  0xe4   :  { %3283 = vmatprep.subr.bf16.mxu0 %v7036_v0 }
  0xe7   :  { %3284 = vmatpush1.bf16.msra.mxu0 %v6772_v19 }
  0xe8   :  { %3285 = vmatprep.subr.bf16.mxu0 %v7036_v0 }
  0xe9   :  { %2599 = vmatmul.mubr.bf16.gmra.mrb[84].mxu1 %v6685_v20 }
  0xea   :  { %3049 = vmatmul.mubr.bf16.gmra.mrb[20].mxu0 %v6686_v21  ;;  %2606 = vmatprep.mubr.bf16.mxu1 %v6687_v22  ;;  %v6750_v21 = vld [vmem:[%s9325_s0 + $0x8b8] ss:$36 sps:$4 sm:$0xff]  }
  0xeb   :  { %3056 = vmatprep.mubr.bf16.mxu0 %v6689_v23  ;;  %3286 = vmatpush1.bf16.msra.mxu0 %v6786_v24  ;;  %v6751_v23 = vld [vmem:[%s9325_s0 + $0x448] ss:$36 sps:$4 sm:$0xff]  }
  0xec   :  { %3287 = vmatprep.subr.bf16.mxu0 %v7036_v0  ;;  %v6754_v24 = vld [vmem:[%s9325_s0 + $0x48c] ss:$36 sps:$4 sm:$0xff]  }
  0xef   :  { %3288 = vmatpush1.bf16.msra.mxu0 %v6800_v29  ;;  %v6752_v29 = vld [vmem:[%s9325_s0 + $0x488] ss:$36 sps:$4 sm:$0xff]  }
  0xf0   :  { %3289 = vmatprep.subr.bf16.mxu0 %v7036_v0 }
  0xf1   :  { %2607 = vmatmul.mubr.bf16.gmra.mrb[88].mxu1 %v6691_v25 }
  0xf2   :  { %3057 = vmatmul.mubr.bf16.gmra.mrb[24].mxu0 %v6692_v26  ;;  %2614 = vmatprep.mubr.bf16.mxu1 %v6694_v27  ;;  %v6755_v26 = vld [vmem:[%s9325_s0 + $0x494] ss:$36 sps:$4 sm:$0xff]  }
  0xf3   :  { %3064 = vmatprep.mubr.bf16.mxu0 %v6696_v28  ;;  %3290 = vmatpush1.bf16.msra.mxu0 %v6814_v38 }
  0xf4   :  { %3291 = vmatprep.subr.bf16.mxu0 %v7036_v0 }
  0xf7   :  { %3292 = vmatpush1.bf16.msra.mxu0 %v6828_v47 }
  0xf8   :  { %3293 = vmatprep.subr.bf16.mxu0 %v7036_v0 }
  0xf9   :  { %2615 = vmatmul.mubr.bf16.gmra.mrb[92].mxu1 %v6698_v30 }
  0xfa   :  { %3065 = vmatmul.mubr.bf16.gmra.mrb[28].mxu0 %v6699_v31  ;;  %2622 = vmatprep.mubr.bf16.mxu1 %v6700_v32  ;;  %v6757_v31 = vld [vmem:[%s9325_s0 + $0x490] ss:$36 sps:$4 sm:$0xff]  }
  0xfb   :  { %3072 = vmatprep.mubr.bf16.mxu0 %v6702_v33  ;;  %3294 = vmatpush1.bf16.msra.mxu0 %v6842_v2  ;;  %v6760_v33 = vld [vmem:[%s9325_s0 + $0x4d4] ss:$36 sps:$4 sm:$0xff]   ;;  %v6779_v2 = vld [vmem:[%s9325_s0 + $0x568] ss:$36 sps:$4 sm:$0xff]  }
  0xfc   :  { %3295 = vmatprep.subr.bf16.mxu0 %v7036_v0 }
  0xff   :  { %3296 = vmatpush1.bf16.msra.mxu0 %v6856_v18  ;;  %v6790_v18 = vld [vmem:[%s9325_s0 + $0x5fc] ss:$36 sps:$4 sm:$0xff]  }
 0x101   :  { %2623 = vmatmul.mubr.bf16.gmra.mrb[96].mxu1 %v6704_v34  ;;  %v6762_v34 = vld [vmem:[%s9325_s0 + $0x4dc] ss:$36 sps:$4 sm:$0xff]  }
 0x102   :  { %3073 = vmatmul.mubr.bf16.gmra.mrb[32].mxu0 %v6705_v35  ;;  %2630 = vmatprep.mubr.bf16.mxu1 %v6707_v36  ;;  %v6773_v35 = vld [vmem:[%s9324_s1 + $0x208] sm:$0xff]   ;;  %v6764_v36 = vld [vmem:[%s9325_s0 + $0x4d0] ss:$36 sps:$4 sm:$0xff]  }
 0x103   :  { %3080 = vmatprep.mubr.bf16.mxu0 %v6709_v37  ;;  %v6787_v37 = vld [vmem:[%s9324_s1 + $0x210] sm:$0xff]  }
 0x109   :  { %2631 = vmatmul.mubr.bf16.gmra.mrb[100].mxu1 %v6711_v39  ;;  %v6765_v39 = vld [vmem:[%s9325_s0 + $0x4d8] ss:$36 sps:$4 sm:$0xff]  }
 0x10a   :  { %3081 = vmatmul.mubr.bf16.gmra.mrb[36].mxu0 %v6712_v40  ;;  %2638 = vmatprep.mubr.bf16.mxu1 %v6713_v41  ;;  %v6768_v41 = vld [vmem:[%s9325_s0 + $0x524] ss:$36 sps:$4 sm:$0xff]  }
 0x10b   :  { %3088 = vmatprep.mubr.bf16.mxu0 %v6715_v42 }
 0x111   :  { %2639 = vmatmul.mubr.bf16.gmra.mrb[104].mxu1 %v6717_v43 }
 0x112   :  { %3089 = vmatmul.mubr.bf16.gmra.mrb[40].mxu0 %v6718_v44  ;;  %2646 = vmatprep.mubr.bf16.mxu1 %v6720_v45  ;;  %v6801_v44 = vld [vmem:[%s9324_s1 + $0x218] sm:$0xff]  }
 0x113   :  { %3096 = vmatprep.mubr.bf16.mxu0 %v6722_v46  ;;  %v6815_v46 = vld [vmem:[%s9324_s1 + $0x220] sm:$0xff]  }
 0x114   :  { %v7746_v48 = vpop.f32.mrb[0].mxu1 }
 0x115   :  { %v2434_v49 = vpop.f32.mrb[1].mxu1 }
 0x116   :  { %v7752_v51 = vpop.f32.mrb[2].mxu1  ;;  %v6770_v49 = vld [vmem:[%s9325_s0 + $0x518] ss:$36 sps:$4 sm:$0xff]  }
 0x117   :  { %v2437_v54 = vpop.f32.mrb[3].mxu1 }
 0x119   :  { %2647 = vmatmul.mubr.bf16.gmra.mrb[108].mxu1 %v6724_v50 }
 0x11a   :  { %3097 = vmatmul.mubr.bf16.gmra.mrb[44].mxu0 %v6725_v52  ;;  %2654 = vmatprep.mubr.bf16.mxu1 %v6726_v53  ;;  %v6771_v52 = vld [vmem:[%s9325_s0 + $0x520] ss:$36 sps:$4 sm:$0xff]  }
 0x11b   :  { %3104 = vmatprep.mubr.bf16.mxu0 %v6728_v55  ;;  %v6774_v53 = vld [vmem:[%s9325_s0 + $0x564] ss:$36 sps:$4 sm:$0xff]   ;;  %v6776_v55 = vld [vmem:[%s9325_s0 + $0x56c] ss:$36 sps:$4 sm:$0xff]  }
 0x11c   :  { %v7763_v56 = vpop.f32.mrb[4].mxu1 }
 0x11d   :  { %v2442_v57 = vpop.f32.mrb[5].mxu1 }
 0x11e   :  { %v7768_v60 = vpop.f32.mrb[6].mxu1  ;;  %v6829_v57 = vld [vmem:[%s9324_s1 + $0x228] sm:$0xff]  }
 0x11f   :  { %v2445_v63 = vpop.f32.mrb[7].mxu1 }
 0x120   :  { %v6778_v63 = vld [vmem:[%s9325_s0 + $0x560] ss:$36 sps:$4 sm:$0xff]  }
 0x121   :  { %2655 = vmatmul.mubr.bf16.gmra.mrb[112].mxu1 %v6730_v59 }
 0x122   :  { %3105 = vmatmul.mubr.bf16.gmra.mrb[48].mxu0 %v6731_v61  ;;  %2662 = vmatprep.mubr.bf16.mxu1 %v6733_v62  ;;  %v6843_v61 = vld [vmem:[%s9324_s1 + $0x230] sm:$0xff]  }
 0x123   :  { %3112 = vmatprep.mubr.bf16.mxu0 %v6735_v1 }
 0x124   :  { %v7782_v3 = vpop.f32.mrb[8].mxu1 }
 0x125   :  { %v2450_v4 = vpop.f32.mrb[9].mxu1 }
 0x126   :  { %v7788_v6 = vpop.f32.mrb[10].mxu1  ;;  %v6780_v4 = vld [vmem:[%s9325_s0 + $0x5ac] ss:$36 sps:$4 sm:$0xff]  }
 0x127   :  { %v2453_v9 = vpop.f32.mrb[11].mxu1 }
 0x129   :  { %2663 = vmatmul.mubr.bf16.gmra.mrb[116].mxu1 %v6737_v5 }
 0x12a   :  { %3113 = vmatmul.mubr.bf16.gmra.mrb[52].mxu0 %v6738_v7  ;;  %2670 = vmatprep.mubr.bf16.mxu1 %v6739_v8  ;;  %v6782_v7 = vld [vmem:[%s9325_s0 + $0x5b4] ss:$36 sps:$4 sm:$0xff]  }
 0x12b   :  { %3120 = vmatprep.mubr.bf16.mxu0 %v6741_v10  ;;  %v6857_v8 = vld [vmem:[%s9324_s1 + $0x238] sm:$0xff]   ;;  %v7925_v10 = vld [vmem:[%s9326_s5] sm:$0xff]  }
 0x12c   :  { %v7799_v0 = vpop.f32.mrb[12].mxu1 }
 0x12d   :  { %v2458_v11 = vpop.f32.mrb[13].mxu1 }
 0x12e   :  { %v7804_v13 = vpop.f32.mrb[14].mxu1 }
 0x12f   :  { %v2461_v16 = vpop.f32.mrb[15].mxu1 }
 0x130   :  { %v6788_v16 = vld [vmem:[%s9325_s0 + $0x5f4] ss:$36 sps:$4 sm:$0xff]  }
 0x131   :  { %2671 = vmatmul.mubr.bf16.gmra.mrb[120].mxu1 %v6743_v12  ;;  %v6784_v12 = vld [vmem:[%s9325_s0 + $0x5a8] ss:$36 sps:$4 sm:$0xff]  }
 0x132   :  { %3121 = vmatmul.mubr.bf16.gmra.mrb[56].mxu0 %v6744_v14  ;;  %2678 = vmatprep.mubr.bf16.mxu1 %v6746_v15  ;;  %v6785_v15 = vld [vmem:[%s9325_s0 + $0x5b0] ss:$36 sps:$4 sm:$0xff]  }
 0x133   :  { %3128 = vmatprep.mubr.bf16.mxu0 %v6748_v17 }
 0x134   :  { %v7818_v19 = vpop.f32.mrb[16].mxu1 }
 0x135   :  { %v2466_v20 = vpop.f32.mrb[17].mxu1 }
 0x136   :  { %v7823_v22 = vpop.f32.mrb[18].mxu1 }
 0x137   :  { %v2469_v25 = vpop.f32.mrb[19].mxu1 }
 0x138   :  { %v6793_v25 = vld [vmem:[%s9325_s0 + $0x5f8] ss:$36 sps:$4 sm:$0xff]  }
 0x139   :  { %2679 = vmatmul.mubr.bf16.gmra.mrb[124].mxu1 %v6750_v21 }
 0x13a   :  { %3129 = vmatmul.mubr.bf16.gmra.mrb[60].mxu0 %v6751_v23  ;;  %2847 = vmatprep.mubr.bf16.mxu1 %v6754_v24  ;;  %v6792_v23 = vld [vmem:[%s9325_s0 + $0x5f0] ss:$36 sps:$4 sm:$0xff]  }
 0x13b   :  { %3136 = vmatprep.mubr.bf16.mxu0 %v6755_v26  ;;  %v6794_v26 = vld [vmem:[%s9325_s0 + $0x63c] ss:$36 sps:$4 sm:$0xff]  }
 0x13c   :  { %v7834_v27 = vpop.f32.mrb[20].mxu1 }
 0x13d   :  { %v2474_v28 = vpop.f32.mrb[21].mxu1 }
 0x13e   :  { %v7839_v30 = vpop.f32.mrb[22].mxu1 }
 0x13f   :  { %v2477_v32 = vpop.f32.mrb[23].mxu1 }
 0x141   :  { %2848 = vmatmul.mubr.bf16.vlgmr.msra.gmra.mrb[64].mxu1 %v6752_v29  ;;  %v6796_v29 = vld [vmem:[%s9325_s0 + $0x644] ss:$36 sps:$4 sm:$0xff]  }
 0x142   :  { %3137 = vmatmul.mubr.bf16.gmra.mrb[64].mxu0 %v6757_v31  ;;  %5992 = vmatpush3.bf16.msra.mxu1 %v7574_v58  ;;  %v6766_v58 = vld [vmem:[%s9325_s0 + $0x51c] ss:$36 sps:$4 sm:$0xff]  }
 0x143   :  { %2855 = vmatprep.mubr.bf16.mxu1 %v6760_v33  ;;  %3144 = vmatprep.mubr.bf16.mxu0 %v6762_v34  ;;  %v6798_v33 = vld [vmem:[%s9325_s0 + $0x638] ss:$36 sps:$4 sm:$0xff]  }
 0x144   :  { %v7860_v38 = vpop.f32.mrb[24].mxu1  ;;  %5993 = vmatprep.subr.bf16.mxu1 %v6773_v35 }
 0x145   :  { %v2482_v40 = vpop.f32.mrb[25].mxu1 }
 0x146   :  { %v7871_v42 = vpop.f32.mrb[26].mxu1  ;;  %5994 = vmatpush3.bf16.msra.mxu1 %v6773_v35  ;;  %v6799_v35 = vld [vmem:[%s9325_s0 + $0x640] ss:$36 sps:$4 sm:$0xff]  }
 0x147   :  { %v2485_v43 = vpop.f32.mrb[27].mxu1  ;;  %5995 = vmatprep.subr.bf16.mxu1 %v6787_v37 }
 0x149   :  { %2856 = vmatmul.mubr.bf16.gmra.mrb[68].mxu1 %v6764_v36  ;;  %v6802_v36 = vld [vmem:[%s9325_s0 + $0x684] ss:$36 sps:$4 sm:$0xff]  }
 0x14a   :  { %3145 = vmatmul.mubr.bf16.gmra.mrb[68].mxu0 %v6765_v39  ;;  %2863 = vmatprep.mubr.bf16.mxu1 %v6766_v58  ;;  %v6804_v39 = vld [vmem:[%s9325_s0 + $0x68c] ss:$36 sps:$4 sm:$0xff]  }
 0x14b   :  { %3152 = vmatprep.mubr.bf16.mxu0 %v6768_v41  ;;  %5996 = vmatpush3.bf16.msra.mxu1 %v6787_v37  ;;  %v6806_v41 = vld [vmem:[%s9325_s0 + $0x680] ss:$36 sps:$4 sm:$0xff]  }
 0x14c   :  { %v7876_v45 = vpop.f32.mrb[28].mxu1  ;;  %5997 = vmatprep.subr.bf16.mxu1 %v6801_v44 }
 0x14d   :  { %v2490_v47 = vpop.f32.mrb[29].mxu1 }
 0x14e   :  { %v7884_v50 = vpop.f32.mrb[30].mxu1 }
 0x14f   :  { %v2493_v54 = vpop.f32.mrb[31].mxu1  ;;  %5998 = vmatpush3.bf16.msra.mxu1 %v6801_v44  ;;  %v6807_v44 = vld [vmem:[%s9325_s0 + $0x688] ss:$36 sps:$4 sm:$0xff]  }
 0x150   :  { %5999 = vmatprep.subr.bf16.mxu1 %v6815_v46  ;;  %v6812_v54 = vld [vmem:[%s9325_s0 + $0x6c8] ss:$36 sps:$4 sm:$0xff]  }
 0x151   :  { %2864 = vmatmul.mubr.bf16.gmra.mrb[72].mxu1 %v6770_v49  ;;  %v6810_v49 = vld [vmem:[%s9325_s0 + $0x6d4] ss:$36 sps:$4 sm:$0xff]  }
 0x152   :  { %3153 = vmatmul.mubr.bf16.gmra.mrb[72].mxu0 %v6771_v52  ;;  %2871 = vmatprep.mubr.bf16.mxu1 %v6774_v53 }
 0x153   :  { %3160 = vmatprep.mubr.bf16.mxu0 %v6776_v55  ;;  %6000 = vmatpush3.bf16.msra.mxu1 %v6815_v46  ;;  %v6808_v46 = vld [vmem:[%s9325_s0 + $0x6cc] ss:$36 sps:$4 sm:$0xff]  }
 0x154   :  { %v7898_v59 = vpop.f32.mrb[32].mxu1  ;;  %6001 = vmatprep.subr.bf16.mxu1 %v6829_v57 }
 0x155   :  { %v2498_v62 = vpop.f32.mrb[33].mxu1 }
 0x156   :  { %v7906_v1 = vpop.f32.mrb[34].mxu1 }
 0x157   :  { %v2501_v5 = vpop.f32.mrb[35].mxu1  ;;  %6002 = vmatpush3.bf16.msra.mxu1 %v6829_v57  ;;  %v6813_v57 = vld [vmem:[%s9325_s0 + $0x6d0] ss:$36 sps:$4 sm:$0xff]  }
 0x158   :  { %6003 = vmatprep.subr.bf16.mxu1 %v6843_v61  ;;  %v6820_v5 = vld [vmem:[%s9325_s0 + $0x710] ss:$36 sps:$4 sm:$0xff]  }
 0x159   :  { %2872 = vmatmul.mubr.bf16.gmra.mrb[76].mxu1 %v6778_v63  ;;  %v6818_v63 = vld [vmem:[%s9325_s0 + $0x71c] ss:$36 sps:$4 sm:$0xff]  }
 0x15a   :  { %3161 = vmatmul.mubr.bf16.gmra.mrb[76].mxu0 %v6779_v2  ;;  %2879 = vmatprep.mubr.bf16.mxu1 %v6780_v4 }
 0x15b   :  { %3168 = vmatprep.mubr.bf16.mxu0 %v6782_v7  ;;  %6004 = vmatpush3.bf16.msra.mxu1 %v6843_v61  ;;  %v6816_v61 = vld [vmem:[%s9325_s0 + $0x714] ss:$36 sps:$4 sm:$0xff]  }
 0x15c   :  { %v7920_v9 = vpop.f32.mrb[36].mxu1  ;;  %6005 = vmatprep.subr.bf16.mxu1 %v6857_v8 }
 0x15d   :  { %v2506_v11 = vpop.f32.mrb[37].mxu1 }
 0x15e   :  { %v7930_v14 = vpop.f32.mrb[38].mxu1  ;;  %v6822_v11 = vld [vmem:[%s9325_s0 + $0x75c] ss:$36 sps:$4 sm:$0xff]  }
 0x15f   :  { %v2509_v17 = vpop.f32.mrb[39].mxu1  ;;  %6006 = vmatpush3.bf16.msra.mxu1 %v6857_v8  ;;  %v6821_v8 = vld [vmem:[%s9325_s0 + $0x718] ss:$36 sps:$4 sm:$0xff]  }
 0x160   :  { %6071 = vmatprep.subr.bf16.mxu1 %v7925_v10 }
 0x161   :  { %2880 = vmatmul.mubr.bf16.gmra.mrb[80].mxu1 %v6784_v12 }
 0x162   :  { %3169 = vmatmul.mubr.bf16.gmra.mrb[80].mxu0 %v6785_v15  ;;  %2887 = vmatprep.mubr.bf16.mxu1 %v6788_v16  ;;  %v6824_v15 = vld [vmem:[%s9325_s0 + $0x764] ss:$36 sps:$4 sm:$0xff]  }
 0x163   :  { %3176 = vmatprep.mubr.bf16.mxu0 %v6790_v18  ;;  %v6826_v18 = vld [vmem:[%s9325_s0 + $0x758] ss:$36 sps:$4 sm:$0xff]  }
 0x164   :  { %v7942_v20 = vpop.f32.mrb[40].mxu1 }
 0x165   :  { %v2514_v21 = vpop.f32.mrb[41].mxu1 }
 0x166   :  { %v7947_v24 = vpop.f32.mrb[42].mxu1 }
 0x167   :  { %v2517_v28 = vpop.f32.mrb[43].mxu1 }
 0x168   :  { %v6832_v28 = vld [vmem:[%s9325_s0 + $0x7ac] ss:$36 sps:$4 sm:$0xff]  }
 0x169   :  { %2888 = vmatmul.mubr.bf16.gmra.mrb[84].mxu1 %v6792_v23  ;;  %v6827_v23 = vld [vmem:[%s9325_s0 + $0x760] ss:$36 sps:$4 sm:$0xff]  }
 0x16a   :  { %3177 = vmatmul.mubr.bf16.gmra.mrb[84].mxu0 %v6793_v25  ;;  %2895 = vmatprep.mubr.bf16.mxu1 %v6794_v26  ;;  %v6830_v25 = vld [vmem:[%s9325_s0 + $0x7a4] ss:$36 sps:$4 sm:$0xff]  }
 0x16b   :  { %3184 = vmatprep.mubr.bf16.mxu0 %v6796_v29  ;;  %v6834_v29 = vld [vmem:[%s9325_s0 + $0x7a0] ss:$36 sps:$4 sm:$0xff]  }
 0x16c   :  { %v7958_v31 = vpop.f32.mrb[44].mxu1 }
 0x16d   :  { %v2522_v32 = vpop.f32.mrb[45].mxu1 }
 0x16e   :  { %v7963_v34 = vpop.f32.mrb[46].mxu1  ;;  %v6835_v32 = vld [vmem:[%s9325_s0 + $0x7a8] ss:$36 sps:$4 sm:$0xff]  }
 0x16f   :  { %v2525_v37 = vpop.f32.mrb[47].mxu1 }
 0x170   :  { %v6841_v37 = vld [vmem:[%s9325_s0 + $0x7f0] ss:$36 sps:$4 sm:$0xff]  }
 0x171   :  { %2896 = vmatmul.mubr.bf16.gmra.mrb[88].mxu1 %v6798_v33  ;;  %v6836_v33 = vld [vmem:[%s9325_s0 + $0x7ec] ss:$36 sps:$4 sm:$0xff]  }
 0x172   :  { %3185 = vmatmul.mubr.bf16.gmra.mrb[88].mxu0 %v6799_v35  ;;  %2903 = vmatprep.mubr.bf16.mxu1 %v6802_v36  ;;  %v6838_v35 = vld [vmem:[%s9325_s0 + $0x7f4] ss:$36 sps:$4 sm:$0xff]   ;;  %v6840_v36 = vld [vmem:[%s9325_s0 + $0x7e8] ss:$36 sps:$4 sm:$0xff]  }
 0x173   :  { %3192 = vmatprep.mubr.bf16.mxu0 %v6804_v39  ;;  %v6844_v39 = vld [vmem:[%s9325_s0 + $0x834] ss:$36 sps:$4 sm:$0xff]  }
 0x174   :  { %v7974_v58 = vpop.f32.mrb[48].mxu1 }
 0x175   :  { %v2530_v40 = vpop.f32.mrb[49].mxu1 }
 0x176   :  { %v7979_v43 = vpop.f32.mrb[50].mxu1  ;;  %v6846_v40 = vld [vmem:[%s9325_s0 + $0x83c] ss:$36 sps:$4 sm:$0xff]  }
 0x177   :  { %v2533_v47 = vpop.f32.mrb[51].mxu1 }
 0x178   :  { %v6852_v47 = vld [vmem:[%s9325_s0 + $0x884] ss:$36 sps:$4 sm:$0xff]  }
 0x179   :  { %2904 = vmatmul.mubr.bf16.gmra.mrb[92].mxu1 %v6806_v41  ;;  %v6848_v41 = vld [vmem:[%s9325_s0 + $0x830] ss:$36 sps:$4 sm:$0xff]  }
 0x17a   :  { %3193 = vmatmul.mubr.bf16.gmra.mrb[92].mxu0 %v6807_v44  ;;  %2911 = vmatprep.mubr.bf16.mxu1 %v6808_v46  ;;  %v6849_v44 = vld [vmem:[%s9325_s0 + $0x838] ss:$36 sps:$4 sm:$0xff]  }
 0x17b   :  { %3200 = vmatprep.mubr.bf16.mxu0 %v6810_v49  ;;  %v6850_v46 = vld [vmem:[%s9325_s0 + $0x87c] ss:$36 sps:$4 sm:$0xff]  }
 0x17c   :  { %v7990_v52 = vpop.f32.mrb[52].mxu1  ;;  %v6854_v49 = vld [vmem:[%s9325_s0 + $0x878] ss:$36 sps:$4 sm:$0xff]  }
 0x17d   :  { %v2538_v53 = vpop.f32.mrb[53].mxu1 }
 0x17e   :  { %v7995_v55 = vpop.f32.mrb[54].mxu1  ;;  %v6855_v53 = vld [vmem:[%s9325_s0 + $0x880] ss:$36 sps:$4 sm:$0xff]  }
 0x17f   :  { %v2541_v62 = vpop.f32.mrb[55].mxu1 }
 0x180   :  { %v6863_v62 = vld [vmem:[%s9325_s0 + $0x8c8] ss:$36 sps:$4 sm:$0xff]  }
 0x181   :  { %2912 = vmatmul.mubr.bf16.gmra.mrb[96].mxu1 %v6812_v54  ;;  %v6858_v54 = vld [vmem:[%s9325_s0 + $0x8c4] ss:$36 sps:$4 sm:$0xff]  }
 0x182   :  { %3201 = vmatmul.mubr.bf16.gmra.mrb[96].mxu0 %v6813_v57  ;;  %2919 = vmatprep.mubr.bf16.mxu1 %v6816_v61  ;;  %v6860_v57 = vld [vmem:[%s9325_s0 + $0x8cc] ss:$36 sps:$4 sm:$0xff]   ;;  %v6862_v61 = vld [vmem:[%s9325_s0 + $0x8c0] ss:$36 sps:$4 sm:$0xff]  }
 0x183   :  { %3208 = vmatprep.mubr.bf16.mxu0 %v6818_v63  ;;  %v6867_v63 = vld [vmem:[%s9325_s0 + $0x20] ss:$36 sps:$4 sm:$0xff]  }
 0x184   :  { %v8006_v2 = vpop.f32.mrb[56].mxu1 }
 0x185   :  { %v2546_v4 = vpop.f32.mrb[57].mxu1 }
 0x186   :  { %v8011_v7 = vpop.f32.mrb[58].mxu1  ;;  %v6866_v4 = vld [vmem:[%s9325_s0 + $0x1c] ss:$36 sps:$4 sm:$0xff]  }
 0x187   :  { %v2549_v12 = vpop.f32.mrb[59].mxu1 }
 0x188   :  { %v6872_v12 = vld [vmem:[%s9325_s0 + $0xb0] ss:$36 sps:$4 sm:$0xff]  }
 0x189   :  { %2920 = vmatmul.mubr.bf16.gmra.mrb[100].mxu1 %v6820_v5  ;;  %v6868_v5 = vld [vmem:[%s9325_s0 + $0x68] ss:$36 sps:$4 sm:$0xff]  }
 0x18a   :  { %3209 = vmatmul.mubr.bf16.gmra.mrb[100].mxu0 %v6821_v8  ;;  %2927 = vmatprep.mubr.bf16.mxu1 %v6822_v11  ;;  %v6864_v8 = vld [vmem:[%s9325_s0 + $0x18] ss:$36 sps:$4 sm:$0xff]   ;;  %v6870_v11 = vld [vmem:[%s9325_s0 + $0x64] ss:$36 sps:$4 sm:$0xff]  }
 0x18b   :  { %3216 = vmatprep.mubr.bf16.mxu0 %v6824_v15  ;;  %v6880_v15 = vld [vmem:[%s9326_s5 + $0x8] sm:$0xff]  }
 0x18c   :  { %v8022_v16 = vpop.f32.mrb[60].mxu1 }
 0x18d   :  { %v2554_v17 = vpop.f32.mrb[61].mxu1 }
 0x18e   :  { %v8027_v21 = vpop.f32.mrb[62].mxu1  ;;  %v6891_v17 = vld [vmem:[%s9326_s5 + $0x10] sm:$0xff]  }
 0x18f   :  { %v2557_v26 = vpop.f32.mrb[63].mxu1 }
 0x190   :  { %v6902_v26 = vld [vmem:[%s9326_s5 + $0x18] sm:$0xff]  }
 0x191   :  { %2928 = vmatmul.mubr.bf16.gmra.mrb[104].mxu1 %v6826_v18  ;;  %v6874_v18 = vld [vmem:[%s9325_s0 + $0xf8] ss:$36 sps:$4 sm:$0xff]  }
 0x192   :  { %3217 = vmatmul.mubr.bf16.gmra.mrb[104].mxu0 %v6827_v23  ;;  %2935 = vmatprep.mubr.bf16.mxu1 %v6830_v25  ;;  %v6873_v23 = vld [vmem:[%s9325_s0 + $0x60] ss:$36 sps:$4 sm:$0xff]  }
 0x193   :  { %3224 = vmatprep.mubr.bf16.mxu0 %v6832_v28  ;;  %v6877_v25 = vld [vmem:[%s9325_s0 + $0x140] ss:$36 sps:$4 sm:$0xff]  }
 0x194   :  { %v6913_v28 = vld [vmem:[%s9326_s5 + $0x20] sm:$0xff]  }
 0x199   :  { %2936 = vmatmul.mubr.bf16.gmra.mrb[108].mxu1 %v6834_v29  ;;  %v6879_v29 = vld [vmem:[%s9325_s0 + $0x188] ss:$36 sps:$4 sm:$0xff]  }
 0x19a   :  { %3225 = vmatmul.mubr.bf16.gmra.mrb[108].mxu0 %v6835_v32  ;;  %2943 = vmatprep.mubr.bf16.mxu1 %v6836_v33  ;;  %v6878_v32 = vld [vmem:[%s9325_s0 + $0xa8] ss:$36 sps:$4 sm:$0xff]   ;;  %v6883_v33 = vld [vmem:[%s9325_s0 + $0x1d0] ss:$36 sps:$4 sm:$0xff]  }
 0x19b   :  { %3232 = vmatprep.mubr.bf16.mxu0 %v6838_v35  ;;  %v6881_v35 = vld [vmem:[%s9325_s0 + $0xf4] ss:$36 sps:$4 sm:$0xff]  }
 0x1a1   :  { %2944 = vmatmul.mubr.bf16.gmra.mrb[112].mxu1 %v6840_v36  ;;  %v6924_v36 = vld [vmem:[%s9326_s5 + $0x28] sm:$0xff]  }
 0x1a2   :  { %3233 = vmatmul.mubr.bf16.gmra.mrb[112].mxu0 %v6841_v37  ;;  %2951 = vmatprep.mubr.bf16.mxu1 %v6844_v39  ;;  %v6935_v37 = vld [vmem:[%s9326_s5 + $0x30] sm:$0xff]   ;;  %v6885_v39 = vld [vmem:[%s9325_s0 + $0x218] ss:$36 sps:$4 sm:$0xff]  }
 0x1a3   :  { %3240 = vmatprep.mubr.bf16.mxu0 %v6846_v40  ;;  %v6884_v40 = vld [vmem:[%s9325_s0 + $0xf0] ss:$36 sps:$4 sm:$0xff]  }
 0x1a9   :  { %2952 = vmatmul.mubr.bf16.gmra.mrb[116].mxu1 %v6848_v41  ;;  %v6888_v41 = vld [vmem:[%s9325_s0 + $0x260] ss:$36 sps:$4 sm:$0xff]  }
 0x1aa   :  { %3241 = vmatmul.mubr.bf16.gmra.mrb[116].mxu0 %v6849_v44  ;;  %2959 = vmatprep.mubr.bf16.mxu1 %v6850_v46  ;;  %v6886_v44 = vld [vmem:[%s9325_s0 + $0x13c] ss:$36 sps:$4 sm:$0xff]  }
 0x1ab   :  { %3248 = vmatprep.mubr.bf16.mxu0 %v6852_v47  ;;  %v6946_v46 = vld [vmem:[%s9326_s5 + $0x38] sm:$0xff]   ;;  %v6890_v47 = vld [vmem:[%s9325_s0 + $0x2a8] ss:$36 sps:$4 sm:$0xff]  }
 0x1b1   :  { %2960 = vmatmul.mubr.bf16.gmra.mrb[120].mxu1 %v6854_v49  ;;  %v6889_v49 = vld [vmem:[%s9325_s0 + $0x138] ss:$36 sps:$4 sm:$0xff]  }
 0x1b2   :  { %3249 = vmatmul.mubr.bf16.gmra.mrb[120].mxu0 %v6855_v53  ;;  %2967 = vmatprep.mubr.bf16.mxu1 %v6858_v54  ;;  %v6894_v53 = vld [vmem:[%s9325_s0 + $0x2f0] ss:$36 sps:$4 sm:$0xff]   ;;  %v6892_v54 = vld [vmem:[%s9325_s0 + $0x184] ss:$36 sps:$4 sm:$0xff]  }
 0x1b3   :  { %3256 = vmatprep.mubr.bf16.mxu0 %v6860_v57  ;;  %v6896_v57 = vld [vmem:[%s9325_s0 + $0x338] ss:$36 sps:$4 sm:$0xff]  }
 0x1b9   :  { %2968 = vmatmul.mubr.bf16.gmra.mrb[124].mxu1 %v6862_v61  ;;  %v6895_v61 = vld [vmem:[%s9325_s0 + $0x180] ss:$36 sps:$4 sm:$0xff]  }
 0x1ba   :  { %3257 = vmatmul.mubr.bf16.gmra.mrb[124].mxu0 %v6863_v62  ;;  %6007 = vmatprep.mubr.bf16.mxu1 %v6867_v63  ;;  %v6899_v62 = vld [vmem:[%s9325_s0 + $0x380] ss:$36 sps:$4 sm:$0xff]   ;;  %v6897_v63 = vld [vmem:[%s9325_s0 + $0x1cc] ss:$36 sps:$4 sm:$0xff]  }
 0x1bb   :  { %3297 = vmatprep.mubr.bf16.mxu0 %v6866_v4  ;;  %v6901_v4 = vld [vmem:[%s9325_s0 + $0x3c8] ss:$36 sps:$4 sm:$0xff]  }
 0x1c1   :  { %6008 = vmatmul.mubr.bf16.vlgmr.msra.gmra.mrb[128].mxu1 %v6868_v5  ;;  %v6900_v5 = vld [vmem:[%s9325_s0 + $0x1c8] ss:$36 sps:$4 sm:$0xff]  }
 0x1c2   :  { %3298 = vmatmul.mubr.bf16.vlgmr.msra.gmra.mrb[0].mxu0 %v6864_v8  ;;  %6072 = vmatpush3.bf16.msra.mxu1 %v7925_v10  ;;  %v6875_v10 = vld [vmem:[%s9325_s0 + $0xac] ss:$36 sps:$4 sm:$0xff]  }
 0x1c3   :  { %3305 = vmatprep.mubr.bf16.mxu0 %v6870_v11  ;;  %6011 = vmatprep.mubr.bf16.mxu1 %v6872_v12  ;;  %v6905_v8 = vld [vmem:[%s9325_s0 + $0x410] ss:$36 sps:$4 sm:$0xff]   ;;  %v6907_v12 = vld [vmem:[%s9325_s0 + $0x458] ss:$36 sps:$4 sm:$0xff]  }
 0x1c4   :  { %6073 = vmatprep.subr.bf16.mxu1 %v6880_v15  ;;  %v6903_v11 = vld [vmem:[%s9325_s0 + $0x214] ss:$36 sps:$4 sm:$0xff]  }
 0x1c6   :  { %6074 = vmatpush3.bf16.msra.mxu1 %v6880_v15  ;;  %v6906_v15 = vld [vmem:[%s9325_s0 + $0x210] ss:$36 sps:$4 sm:$0xff]  }
 0x1c7   :  { %6075 = vmatprep.subr.bf16.mxu1 %v6891_v17 }
 0x1c9   :  { %6012 = vmatmul.mubr.bf16.gmra.mrb[132].mxu1 %v6874_v18  ;;  %v6908_v18 = vld [vmem:[%s9325_s0 + $0x25c] ss:$36 sps:$4 sm:$0xff]  }
 0x1ca   :  { %3306 = vmatmul.mubr.bf16.gmra.mrb[4].mxu0 %v6873_v23  ;;  %6015 = vmatprep.mubr.bf16.mxu1 %v6877_v25  ;;  %v6912_v23 = vld [vmem:[%s9325_s0 + $0x4e8] ss:$36 sps:$4 sm:$0xff]   ;;  %v6911_v25 = vld [vmem:[%s9325_s0 + $0x258] ss:$36 sps:$4 sm:$0xff]  }
 0x1cb   :  { %3313 = vmatprep.mubr.bf16.mxu0 %v6875_v10  ;;  %6076 = vmatpush3.bf16.msra.mxu1 %v6891_v17  ;;  %v6910_v17 = vld [vmem:[%s9325_s0 + $0x4a0] ss:$36 sps:$4 sm:$0xff]   ;;  %v6916_v10 = vld [vmem:[%s9325_s0 + $0x530] ss:$36 sps:$4 sm:$0xff]  }
 0x1cc   :  { %6077 = vmatprep.subr.bf16.mxu1 %v6902_v26 }
 0x1cf   :  { %6078 = vmatpush3.bf16.msra.mxu1 %v6902_v26  ;;  %v6914_v26 = vld [vmem:[%s9325_s0 + $0x2a4] ss:$36 sps:$4 sm:$0xff]  }
 0x1d0   :  { %6079 = vmatprep.subr.bf16.mxu1 %v6913_v28 }
 0x1d1   :  { %6016 = vmatmul.mubr.bf16.gmra.mrb[136].mxu1 %v6879_v29  ;;  %v6917_v29 = vld [vmem:[%s9325_s0 + $0x2a0] ss:$36 sps:$4 sm:$0xff]  }
 0x1d2   :  { %3314 = vmatmul.mubr.bf16.gmra.mrb[8].mxu0 %v6878_v32  ;;  %6019 = vmatprep.mubr.bf16.mxu1 %v6883_v33  ;;  %v6921_v32 = vld [vmem:[%s9325_s0 + $0x5c0] ss:$36 sps:$4 sm:$0xff]   ;;  %v6919_v33 = vld [vmem:[%s9325_s0 + $0x2ec] ss:$36 sps:$4 sm:$0xff]  }
 0x1d3   :  { %3321 = vmatprep.mubr.bf16.mxu0 %v6881_v35  ;;  %6080 = vmatpush3.bf16.msra.mxu1 %v6913_v28  ;;  %v6918_v28 = vld [vmem:[%s9325_s0 + $0x578] ss:$36 sps:$4 sm:$0xff]   ;;  %v6923_v35 = vld [vmem:[%s9325_s0 + $0x608] ss:$36 sps:$4 sm:$0xff]  }
 0x1d4   :  { %6081 = vmatprep.subr.bf16.mxu1 %v6924_v36 }
 0x1d7   :  { %6082 = vmatpush3.bf16.msra.mxu1 %v6924_v36  ;;  %v6922_v36 = vld [vmem:[%s9325_s0 + $0x2e8] ss:$36 sps:$4 sm:$0xff]  }
 0x1d8   :  { %6083 = vmatprep.subr.bf16.mxu1 %v6935_v37 }
 0x1d9   :  { %6020 = vmatmul.mubr.bf16.gmra.mrb[140].mxu1 %v6885_v39  ;;  %v6925_v39 = vld [vmem:[%s9325_s0 + $0x334] ss:$36 sps:$4 sm:$0xff]  }
 0x1da   :  { %3322 = vmatmul.mubr.bf16.gmra.mrb[12].mxu0 %v6884_v40  ;;  %6023 = vmatprep.mubr.bf16.mxu1 %v6888_v41 }
 0x1db   :  { %3329 = vmatprep.mubr.bf16.mxu0 %v6886_v44  ;;  %6084 = vmatpush3.bf16.msra.mxu1 %v6935_v37  ;;  %v6927_v37 = vld [vmem:[%s9325_s0 + $0x650] ss:$36 sps:$4 sm:$0xff]   ;;  %v6929_v44 = vld [vmem:[%s9325_s0 + $0x698] ss:$36 sps:$4 sm:$0xff]  }
 0x1dc   :  { %6085 = vmatprep.subr.bf16.mxu1 %v6946_v46 }
 0x1df   :  { %6086 = vmatpush3.bf16.msra.mxu1 %v6946_v46 }
 0x1e1   :  { %6024 = vmatmul.mubr.bf16.gmra.mrb[144].mxu1 %v6890_v47  ;;  %v6928_v47 = vld [vmem:[%s9325_s0 + $0x330] ss:$36 sps:$4 sm:$0xff]  }
 0x1e2   :  { %3330 = vmatmul.mubr.bf16.gmra.mrb[16].mxu0 %v6889_v49  ;;  %6027 = vmatprep.mubr.bf16.mxu1 %v6894_v53  ;;  %v6932_v49 = vld [vmem:[%s9325_s0 + $0x6e0] ss:$36 sps:$4 sm:$0xff]  }
 0x1e3   :  { %3337 = vmatprep.mubr.bf16.mxu0 %v6892_v54  ;;  %v6930_v54 = vld [vmem:[%s9325_s0 + $0x37c] ss:$36 sps:$4 sm:$0xff]  }
 0x1e9   :  { %6028 = vmatmul.mubr.bf16.gmra.mrb[148].mxu1 %v6896_v57 }
 0x1ea   :  { %3338 = vmatmul.mubr.bf16.gmra.mrb[20].mxu0 %v6895_v61  ;;  %6031 = vmatprep.mubr.bf16.mxu1 %v6899_v62  ;;  %v6934_v62 = vld [vmem:[%s9325_s0 + $0x728] ss:$36 sps:$4 sm:$0xff]  }
 0x1eb   :  { %3345 = vmatprep.mubr.bf16.mxu0 %v6897_v63 }
 0x1f1   :  { %6032 = vmatmul.mubr.bf16.gmra.mrb[152].mxu1 %v6901_v4  ;;  %v6933_v4 = vld [vmem:[%s9325_s0 + $0x378] ss:$36 sps:$4 sm:$0xff]  }
 0x1f2   :  { %3346 = vmatmul.mubr.bf16.gmra.mrb[24].mxu0 %v6900_v5  ;;  %6035 = vmatprep.mubr.bf16.mxu1 %v6905_v8  ;;  %v6938_v5 = vld [vmem:[%s9325_s0 + $0x770] ss:$36 sps:$4 sm:$0xff]  }
 0x1f3   :  { %3353 = vmatprep.mubr.bf16.mxu0 %v6903_v11  ;;  %v6936_v11 = vld [vmem:[%s9325_s0 + $0x3c4] ss:$36 sps:$4 sm:$0xff]  }
 0x1f9   :  { %6036 = vmatmul.mubr.bf16.gmra.mrb[156].mxu1 %v6907_v12 }
 0x1fa   :  { %3354 = vmatmul.mubr.bf16.gmra.mrb[28].mxu0 %v6906_v15  ;;  %6039 = vmatprep.mubr.bf16.mxu1 %v6910_v17  ;;  %v6940_v17 = vld [vmem:[%s9325_s0 + $0x7b8] ss:$36 sps:$4 sm:$0xff]  }
 0x1fb   :  { %3361 = vmatprep.mubr.bf16.mxu0 %v6908_v18 }
 0x201   :  { %6040 = vmatmul.mubr.bf16.gmra.mrb[160].mxu1 %v6912_v23  ;;  %v6939_v23 = vld [vmem:[%s9325_s0 + $0x3c0] ss:$36 sps:$4 sm:$0xff]  }
 0x202   :  { %3362 = vmatmul.mubr.bf16.gmra.mrb[32].mxu0 %v6911_v25  ;;  %6043 = vmatprep.mubr.bf16.mxu1 %v6916_v10  ;;  %v6943_v25 = vld [vmem:[%s9325_s0 + $0x800] ss:$36 sps:$4 sm:$0xff]  }
 0x203   :  { %3369 = vmatprep.mubr.bf16.mxu0 %v6914_v26  ;;  %v6941_v26 = vld [vmem:[%s9325_s0 + $0x40c] ss:$36 sps:$4 sm:$0xff]  }
 0x209   :  { %6044 = vmatmul.mubr.bf16.gmra.mrb[164].mxu1 %v6918_v28 }
 0x20a   :  { %3370 = vmatmul.mubr.bf16.gmra.mrb[36].mxu0 %v6917_v29  ;;  %6047 = vmatprep.mubr.bf16.mxu1 %v6921_v32  ;;  %v6945_v32 = vld [vmem:[%s9325_s0 + $0x848] ss:$36 sps:$4 sm:$0xff]  }
 0x20b   :  { %3377 = vmatprep.mubr.bf16.mxu0 %v6919_v33 }
 0x211   :  { %6048 = vmatmul.mubr.bf16.gmra.mrb[168].mxu1 %v6923_v35  ;;  %v6944_v35 = vld [vmem:[%s9325_s0 + $0x408] ss:$36 sps:$4 sm:$0xff]  }
 0x212   :  { %3378 = vmatmul.mubr.bf16.gmra.mrb[40].mxu0 %v6922_v36  ;;  %6051 = vmatprep.mubr.bf16.mxu1 %v6927_v37  ;;  %v6949_v36 = vld [vmem:[%s9325_s0 + $0x890] ss:$36 sps:$4 sm:$0xff]  }
 0x213   :  { %3385 = vmatprep.mubr.bf16.mxu0 %v6925_v39  ;;  %v6947_v39 = vld [vmem:[%s9325_s0 + $0x454] ss:$36 sps:$4 sm:$0xff]  }
 0x214   :  { %v8252_v40 = vpop.f32.mrb[64].mxu1 }
 0x215   :  { %v2851_v41 = vpop.f32.mrb[65].mxu1 }
 0x216   :  { %v8257_v46 = vpop.f32.mrb[66].mxu1 }
 0x217   :  { %v2854_v53 = vpop.f32.mrb[67].mxu1 }
 0x218   :  { %v6950_v53 = vld [vmem:[%s9325_s0 + $0x450] ss:$36 sps:$4 sm:$0xff]  }
 0x219   :  { %6052 = vmatmul.mubr.bf16.gmra.mrb[172].mxu1 %v6929_v44 }
 0x21a   :  { %3386 = vmatmul.mubr.bf16.gmra.mrb[44].mxu0 %v6928_v47  ;;  %6055 = vmatprep.mubr.bf16.mxu1 %v6932_v49  ;;  %v6951_v47 = vld [vmem:[%s9325_s0 + $0x8d8] ss:$36 sps:$4 sm:$0xff]  }
 0x21b   :  { %3393 = vmatprep.mubr.bf16.mxu0 %v6930_v54  ;;  %v6954_v54 = vld [vmem:[%s9327_s4] sm:$0xff]  }
 0x21c   :  { %v8268_v57 = vpop.f32.mrb[68].mxu1 }
 0x21d   :  { %v2859_v61 = vpop.f32.mrb[69].mxu1 }
 0x21e   :  { %v8273_v63 = vpop.f32.mrb[70].mxu1 }
 0x21f   :  { %v2862_v8 = vpop.f32.mrb[71].mxu1 }
 0x220   :  { %v6956_v8 = vld [vmem:[%s9327_s4 + $0x8] sm:$0xff]  }
 0x221   :  { %6056 = vmatmul.mubr.bf16.gmra.mrb[176].mxu1 %v6934_v62  ;;  %v6952_v62 = vld [vmem:[%s9325_s0 + $0x49c] ss:$36 sps:$4 sm:$0xff]  }
 0x222   :  { %3394 = vmatmul.mubr.bf16.gmra.mrb[48].mxu0 %v6933_v4  ;;  %6059 = vmatprep.mubr.bf16.mxu1 %v6938_v5 }
 0x223   :  { %3401 = vmatprep.mubr.bf16.mxu0 %v6936_v11 }
 0x224   :  { %v8284_v12 = vpop.f32.mrb[72].mxu1 }
 0x225   :  { %9333 = vst [vmem:[#allocation2_spill] sm:$0xff] %v8284_v12  ;;  %v2867_v15 = vpop.f32.mrb[73].mxu1 }
 0x226   :  { %v8289_v18 = vpop.f32.mrb[74].mxu1  ;;  %v6955_v15 = vld [vmem:[%s9325_s0 + $0x498] ss:$36 sps:$4 sm:$0xff]  }
 0x227   :  { %9334 = vst [vmem:[#allocation3_spill] sm:$0xff] %v8289_v18  ;;  %v2870_v10 = vpop.f32.mrb[75].mxu1 }
 0x229   :  { %6060 = vmatmul.mubr.bf16.gmra.mrb[180].mxu1 %v6940_v17  ;;  %v6959_v17 = vld [vmem:[%s9327_s4 + $0x10] sm:$0xff]  }
 0x22a   :  { %3402 = vmatmul.mubr.bf16.gmra.mrb[52].mxu0 %v6939_v23  ;;  %6063 = vmatprep.mubr.bf16.mxu1 %v6943_v25  ;;  %v6957_v25 = vld [vmem:[%s9325_s0 + $0x4e4] ss:$36 sps:$4 sm:$0xff]  }
 0x22b   :  { %3409 = vmatprep.mubr.bf16.mxu0 %v6941_v26 }
 0x22c   :  { %v8300_v28 = vpop.f32.mrb[76].mxu1 }
 0x22d   :  { %9335 = vst [vmem:[#allocation4_spill] sm:$0xff] %v8300_v28  ;;  %v2875_v29 = vpop.f32.mrb[77].mxu1 }
 0x22e   :  { %v8305_v33 = vpop.f32.mrb[78].mxu1  ;;  %v6961_v29 = vld [vmem:[%s9327_s4 + $0x18] sm:$0xff]  }
 0x22f   :  { %9336 = vst [vmem:[#allocation5_spill] sm:$0xff] %v8305_v33  ;;  %v2878_v37 = vpop.f32.mrb[79].mxu1 }
 0x231   :  { %6064 = vmatmul.mubr.bf16.gmra.mrb[184].mxu1 %v6945_v32 }
 0x232   :  { %3410 = vmatmul.mubr.bf16.gmra.mrb[56].mxu0 %v6944_v35  ;;  %6067 = vmatprep.mubr.bf16.mxu1 %v6949_v36  ;;  %v6960_v35 = vld [vmem:[%s9325_s0 + $0x4e0] ss:$36 sps:$4 sm:$0xff]  }
 0x233   :  { %3417 = vmatprep.mubr.bf16.mxu0 %v6947_v39  ;;  %v6964_v36 = vld [vmem:[%s9327_s4 + $0x20] sm:$0xff]   ;;  %v6962_v39 = vld [vmem:[%s9325_s0 + $0x52c] ss:$36 sps:$4 sm:$0xff]  }
 0x234   :  { %v8316_v41 = vpop.f32.mrb[80].mxu1 }
 0x235   :  { %9337 = vst [vmem:[#allocation6_spill] sm:$0xff] %v8316_v41  ;;  %v2883_v44 = vpop.f32.mrb[81].mxu1 }
 0x236   :  { %v8321_v49 = vpop.f32.mrb[82].mxu1 }
 0x237   :  { %9338 = vst [vmem:[#allocation7_spill] sm:$0xff] %v8321_v49  ;;  %v2886_v61 = vpop.f32.mrb[83].mxu1  ;;  %v7031_v49 = vld [vmem:[%s9327_s4 + $0xf8] sm:$0xff]  }
 0x238   :  { %v6965_v61 = vld [vmem:[%s9325_s0 + $0x528] ss:$36 sps:$4 sm:$0xff]  }
 0x239   :  { %6068 = vmatmul.mubr.bf16.gmra.mrb[188].mxu1 %v6951_v47 }
 0x23a   :  { %3418 = vmatmul.mubr.bf16.gmra.mrb[60].mxu0 %v6950_v53  ;;  %6087 = vmatprep.mubr.bf16.mxu1 %v6954_v54  ;;  %v6966_v53 = vld [vmem:[%s9327_s4 + $0x28] sm:$0xff]  }
 0x23b   :  { %3425 = vmatprep.mubr.bf16.mxu0 %v6952_v62  ;;  %v6969_v62 = vld [vmem:[%s9327_s4 + $0x30] sm:$0xff]  }
 0x23c   :  { %v8332_v4 = vpop.f32.mrb[84].mxu1 }
 0x23d   :  { %9339 = vst [vmem:[#allocation8_spill] sm:$0xff] %v8332_v4  ;;  %v2891_v5 = vpop.f32.mrb[85].mxu1 }
 0x23e   :  { %v8337_v11 = vpop.f32.mrb[86].mxu1 }
 0x23f   :  { %9340 = vst [vmem:[#allocation9_spill] sm:$0xff] %v8337_v11  ;;  %v2894_v23 = vpop.f32.mrb[87].mxu1  ;;  %v7026_v11 = vld [vmem:[%s9327_s4 + $0xe8] sm:$0xff]  }
 0x240   :  { %v6971_v23 = vld [vmem:[%s9327_s4 + $0x38] sm:$0xff]  }
 0x241   :  { %6088 = vmatmul.mubr.bf16.vlgmr.msra.gmra.mrb[192].mxu1 %v6956_v8  ;;  %v6967_v8 = vld [vmem:[%s9325_s0 + $0x574] ss:$36 sps:$4 sm:$0xff]  }
 0x242   :  { %3426 = vmatmul.mubr.bf16.gmra.mrb[64].mxu0 %v6955_v15  ;;  %6091 = vmatprep.mubr.bf16.mxu1 %v6959_v17 }
 0x243   :  { %3433 = vmatprep.mubr.bf16.mxu0 %v6957_v25 }
 0x244   :  { %v8348_v10 = vpop.f32.mrb[88].mxu1 }
 0x245   :  { %9341 = vst [vmem:[#allocation10_spill] sm:$0xff] %v8348_v10  ;;  %v2899_v26 = vpop.f32.mrb[89].mxu1 }
 0x246   :  { %v8353_v32 = vpop.f32.mrb[90].mxu1  ;;  %v6970_v26 = vld [vmem:[%s9325_s0 + $0x570] ss:$36 sps:$4 sm:$0xff]  }
 0x247   :  { %9342 = vst [vmem:[#allocation11_spill] sm:$0xff] %v8353_v32  ;;  %v2902_v37 = vpop.f32.mrb[91].mxu1 }
 0x249   :  { %6092 = vmatmul.mubr.bf16.gmra.mrb[196].mxu1 %v6961_v29  ;;  %v6974_v29 = vld [vmem:[%s9327_s4 + $0x40] sm:$0xff]  }
 0x24a   :  { %3434 = vmatmul.mubr.bf16.gmra.mrb[68].mxu0 %v6960_v35  ;;  %6095 = vmatprep.mubr.bf16.mxu1 %v6964_v36  ;;  %v6972_v36 = vld [vmem:[%s9325_s0 + $0x5bc] ss:$36 sps:$4 sm:$0xff]  }
 0x24b   :  { %3441 = vmatprep.mubr.bf16.mxu0 %v6962_v39 }
 0x24c   :  { %v8364_v44 = vpop.f32.mrb[92].mxu1 }
 0x24d   :  { %9343 = vst [vmem:[#allocation12_spill] sm:$0xff] %v8364_v44  ;;  %v2907_v47 = vpop.f32.mrb[93].mxu1 }
 0x24e   :  { %v8369_v54 = vpop.f32.mrb[94].mxu1  ;;  %v6976_v47 = vld [vmem:[%s9327_s4 + $0x48] sm:$0xff]  }
 0x24f   :  { %9344 = vst [vmem:[#allocation13_spill] sm:$0xff] %v8369_v54  ;;  %v2910_v5 = vpop.f32.mrb[95].mxu1  ;;  %v7016_v54 = vld [vmem:[%s9327_s4 + $0xc8] sm:$0xff]  }
 0x251   :  { %6096 = vmatmul.mubr.bf16.gmra.mrb[200].mxu1 %v6966_v53 }
 0x252   :  { %3442 = vmatmul.mubr.bf16.gmra.mrb[72].mxu0 %v6965_v61  ;;  %6099 = vmatprep.mubr.bf16.mxu1 %v6969_v62  ;;  %v6975_v61 = vld [vmem:[%s9325_s0 + $0x5b8] ss:$36 sps:$4 sm:$0xff]   ;;  %v6979_v62 = vld [vmem:[%s9327_s4 + $0x50] sm:$0xff]  }
 0x253   :  { %3449 = vmatprep.mubr.bf16.mxu0 %v6967_v8  ;;  %v6977_v8 = vld [vmem:[%s9325_s0 + $0x604] ss:$36 sps:$4 sm:$0xff]  }
 0x254   :  { %v8380_v15 = vpop.f32.mrb[96].mxu1 }
 0x255   :  { %9345 = vst [vmem:[#allocation14_spill] sm:$0xff] %v8380_v15  ;;  %v2915_v17 = vpop.f32.mrb[97].mxu1 }
 0x256   :  { %v8385_v25 = vpop.f32.mrb[98].mxu1 }
 0x257   :  { %9346 = vst [vmem:[#allocation15_spill] sm:$0xff] %v8385_v25  ;;  %v2918_v35 = vpop.f32.mrb[99].mxu1 }
 0x258   :  { %v6980_v35 = vld [vmem:[%s9325_s0 + $0x600] ss:$36 sps:$4 sm:$0xff]  }
 0x259   :  { %6100 = vmatmul.mubr.bf16.gmra.mrb[204].mxu1 %v6971_v23 }
 0x25a   :  { %3450 = vmatmul.mubr.bf16.gmra.mrb[76].mxu0 %v6970_v26  ;;  %6103 = vmatprep.mubr.bf16.mxu1 %v6974_v29  ;;  %v6981_v26 = vld [vmem:[%s9327_s4 + $0x58] sm:$0xff]  }
 0x25b   :  { %3457 = vmatprep.mubr.bf16.mxu0 %v6972_v36  ;;  %v6984_v36 = vld [vmem:[%s9327_s4 + $0x60] sm:$0xff]  }
 0x25c   :  { %v8396_v37 = vpop.f32.mrb[100].mxu1 }
 0x25d   :  { %9347 = vst [vmem:[#allocation16_spill] sm:$0xff] %v8396_v37  ;;  %v2923_v39 = vpop.f32.mrb[101].mxu1 }
 0x25e   :  { %v8401_v53 = vpop.f32.mrb[102].mxu1 }
 0x25f   :  { %9348 = vst [vmem:[#allocation17_spill] sm:$0xff] %v8401_v53  ;;  %v2926_v5 = vpop.f32.mrb[103].mxu1 }
 0x260   :  { %v6986_v5 = vld [vmem:[%s9327_s4 + $0x68] sm:$0xff]  }
 0x261   :  { %6104 = vmatmul.mubr.bf16.gmra.mrb[208].mxu1 %v6976_v47  ;;  %v6982_v47 = vld [vmem:[%s9325_s0 + $0x64c] ss:$36 sps:$4 sm:$0xff]  }
 0x262   :  { %3458 = vmatmul.mubr.bf16.gmra.mrb[80].mxu0 %v6975_v61  ;;  %6107 = vmatprep.mubr.bf16.mxu1 %v6979_v62 }
 0x263   :  { %3465 = vmatprep.mubr.bf16.mxu0 %v6977_v8 }
 0x264   :  { %v8412_v17 = vpop.f32.mrb[104].mxu1 }
 0x265   :  { %9349 = vst [vmem:[#allocation18_spill] sm:$0xff] %v8412_v17  ;;  %v2931_v23 = vpop.f32.mrb[105].mxu1 }
 0x266   :  { %v8417_v29 = vpop.f32.mrb[106].mxu1  ;;  %v6985_v23 = vld [vmem:[%s9325_s0 + $0x648] ss:$36 sps:$4 sm:$0xff]  }
 0x267   :  { %9350 = vst [vmem:[#allocation19_spill] sm:$0xff] %v8417_v29  ;;  %v2934_v39 = vpop.f32.mrb[107].mxu1 }
 0x269   :  { %6108 = vmatmul.mubr.bf16.gmra.mrb[212].mxu1 %v6981_v26  ;;  %v6989_v26 = vld [vmem:[%s9327_s4 + $0x70] sm:$0xff]  }
 0x26a   :  { %3466 = vmatmul.mubr.bf16.gmra.mrb[84].mxu0 %v6980_v35  ;;  %6111 = vmatprep.mubr.bf16.mxu1 %v6984_v36  ;;  %v6987_v36 = vld [vmem:[%s9325_s0 + $0x694] ss:$36 sps:$4 sm:$0xff]  }
 0x26b   :  { %3473 = vmatprep.mubr.bf16.mxu0 %v6982_v47 }
 0x26c   :  { %v8428_v61 = vpop.f32.mrb[108].mxu1 }
 0x26d   :  { %9351 = vst [vmem:[#allocation20_spill] sm:$0xff] %v8428_v61  ;;  %v2939_v62 = vpop.f32.mrb[109].mxu1 }
 0x26e   :  { %v8433_v8 = vpop.f32.mrb[110].mxu1  ;;  %v6991_v62 = vld [vmem:[%s9327_s4 + $0x78] sm:$0xff]  }
 0x26f   :  { %9352 = vst [vmem:[#allocation21_spill] sm:$0xff] %v8433_v8  ;;  %v2942_v35 = vpop.f32.mrb[111].mxu1 }
 0x270   :  { %v6990_v35 = vld [vmem:[%s9325_s0 + $0x690] ss:$36 sps:$4 sm:$0xff]  }
 0x271   :  { %6112 = vmatmul.mubr.bf16.gmra.mrb[216].mxu1 %v6986_v5  ;;  %v6994_v5 = vld [vmem:[%s9327_s4 + $0x80] sm:$0xff]  }
 0x272   :  { %3474 = vmatmul.mubr.bf16.gmra.mrb[88].mxu0 %v6985_v23  ;;  %6115 = vmatprep.mubr.bf16.mxu1 %v6989_v26  ;;  %v6992_v26 = vld [vmem:[%s9325_s0 + $0x6dc] ss:$36 sps:$4 sm:$0xff]  }
 0x273   :  { %3481 = vmatprep.mubr.bf16.mxu0 %v6987_v36 }
 0x274   :  { %v8444_v39 = vpop.f32.mrb[112].mxu1 }
 0x275   :  { %9353 = vst [vmem:[#allocation22_spill] sm:$0xff] %v8444_v39  ;;  %v2947_v47 = vpop.f32.mrb[113].mxu1 }
 0x276   :  { %v8449_v8 = vpop.f32.mrb[114].mxu1 }
 0x277   :  { %9354 = vst [vmem:[#allocation23_spill] sm:$0xff] %v8449_v8  ;;  %v2950_v23 = vpop.f32.mrb[115].mxu1  ;;  %v6996_v8 = vld [vmem:[%s9327_s4 + $0x88] sm:$0xff]  }
 0x278   :  { %v6995_v23 = vld [vmem:[%s9325_s0 + $0x6d8] ss:$36 sps:$4 sm:$0xff]  }
 0x279   :  { %6116 = vmatmul.mubr.bf16.gmra.mrb[220].mxu1 %v6991_v62  ;;  %v6999_v62 = vld [vmem:[%s9327_s4 + $0x90] sm:$0xff]  }
 0x27a   :  { %3482 = vmatmul.mubr.bf16.gmra.mrb[92].mxu0 %v6990_v35  ;;  %6119 = vmatprep.mubr.bf16.mxu1 %v6994_v5  ;;  %v6997_v5 = vld [vmem:[%s9325_s0 + $0x724] ss:$36 sps:$4 sm:$0xff]  }
 0x27b   :  { %3489 = vmatprep.mubr.bf16.mxu0 %v6992_v26 }
 0x27c   :  { %v8460_v36 = vpop.f32.mrb[116].mxu1 }
 0x27d   :  { %9355 = vst [vmem:[#allocation24_spill] sm:$0xff] %v8460_v36  ;;  %v2955_v47 = vpop.f32.mrb[117].mxu1 }
 0x27e   :  { %v8465_v39 = vpop.f32.mrb[118].mxu1 }
 0x27f   :  { %9356 = vst [vmem:[#allocation25_spill] sm:$0xff] %v8465_v39  ;;  %v2958_v35 = vpop.f32.mrb[119].mxu1  ;;  %v7001_v39 = vld [vmem:[%s9327_s4 + $0x98] sm:$0xff]  }
 0x280   :  { %v7000_v35 = vld [vmem:[%s9325_s0 + $0x720] ss:$36 sps:$4 sm:$0xff]  }
 0x281   :  { %6120 = vmatmul.mubr.bf16.gmra.mrb[224].mxu1 %v6996_v8  ;;  %v7004_v8 = vld [vmem:[%s9327_s4 + $0xa0] sm:$0xff]  }
 0x282   :  { %3490 = vmatmul.mubr.bf16.gmra.mrb[96].mxu0 %v6995_v23  ;;  %6123 = vmatprep.mubr.bf16.mxu1 %v6999_v62  ;;  %v7002_v62 = vld [vmem:[%s9325_s0 + $0x76c] ss:$36 sps:$4 sm:$0xff]  }
 0x283   :  { %3497 = vmatprep.mubr.bf16.mxu0 %v6997_v5 }
 0x284   :  { %v8476_v26 = vpop.f32.mrb[120].mxu1 }
 0x285   :  { %9357 = vst [vmem:[#allocation26_spill] sm:$0xff] %v8476_v26  ;;  %v2963_v47 = vpop.f32.mrb[121].mxu1 }
 0x286   :  { %v8481_v36 = vpop.f32.mrb[122].mxu1 }
 0x287   :  { %9358 = vst [vmem:[#allocation27_spill] sm:$0xff] %v8481_v36  ;;  %v2966_v23 = vpop.f32.mrb[123].mxu1  ;;  %v7006_v36 = vld [vmem:[%s9327_s4 + $0xa8] sm:$0xff]  }
 0x288   :  { %v7005_v23 = vld [vmem:[%s9325_s0 + $0x768] ss:$36 sps:$4 sm:$0xff]  }
 0x289   :  { %6124 = vmatmul.mubr.bf16.gmra.mrb[228].mxu1 %v7001_v39  ;;  %v7009_v39 = vld [vmem:[%s9327_s4 + $0xb0] sm:$0xff]  }
 0x28a   :  { %3498 = vmatmul.mubr.bf16.gmra.mrb[100].mxu0 %v7000_v35  ;;  %6127 = vmatprep.mubr.bf16.mxu1 %v7004_v8  ;;  %v7007_v8 = vld [vmem:[%s9325_s0 + $0x7b4] ss:$36 sps:$4 sm:$0xff]  }
 0x28b   :  { %3505 = vmatprep.mubr.bf16.mxu0 %v7002_v62 }
 0x28c   :  { %v8492_v5 = vpop.f32.mrb[124].mxu1 }
 0x28d   :  { %9359 = vst [vmem:[#allocation28_spill] sm:$0xff] %v8492_v5  ;;  %v2971_v47 = vpop.f32.mrb[125].mxu1  ;;  %v7011_v5 = vld [vmem:[%s9327_s4 + $0xb8] sm:$0xff]  }
 0x28e   :  { %v8497_v26 = vpop.f32.mrb[126].mxu1 }
 0x28f   :  { %9360 = vst [vmem:[#allocation29_spill] sm:$0xff] %v8497_v26  ;;  %v2974_v35 = vpop.f32.mrb[127].mxu1 }
 0x290   :  { %v7010_v35 = vld [vmem:[%s9325_s0 + $0x7b0] ss:$36 sps:$4 sm:$0xff]  }
 0x291   :  { %6128 = vmatmul.mubr.bf16.gmra.mrb[232].mxu1 %v7006_v36  ;;  %v7014_v36 = vld [vmem:[%s9327_s4 + $0xc0] sm:$0xff]  }
 0x292   :  { %3506 = vmatmul.mubr.bf16.gmra.mrb[104].mxu0 %v7005_v23  ;;  %6131 = vmatprep.mubr.bf16.mxu1 %v7009_v39 }
 0x293   :  { %3513 = vmatprep.mubr.bf16.mxu0 %v7007_v8  ;;  %v7012_v8 = vld [vmem:[%s9325_s0 + $0x7fc] ss:$36 sps:$4 sm:$0xff]  }
 0x294   :  { %v6009_v62 = vpop.f32.mrb[128].mxu1 }
 0x295   :  { %v3299_v47 = vpop.f32.mrb[0].mxu0  ;;  %v3588_v26 = vpop.f32.mrb[129].mxu1 }
 0x296   :  { %v6183_v61 = vadd.f32 %v3299_v47, %v7746_v48  ;;  %v3301_v29 = vpop.f32.mrb[1].mxu0  ;;  %v6010_v17 = vpop.f32.mrb[130].mxu1 }
 0x297   :  { %v3302_v23 = vpop.f32.mrb[2].mxu0  ;;  %v3591_v39 = vpop.f32.mrb[131].mxu1 }
 0x298   :  { %v6184_v53 = vadd.f32 %v3302_v23, %v7752_v51  ;;  %v8522_v37 = vadd.f32 %v6183_v61, %v3588_v26  ;;  %v3304_v48 = vpop.f32.mrb[3].mxu0  ;;  %v7015_v61 = vld [vmem:[%s9325_s0 + $0x7f8] ss:$36 sps:$4 sm:$0xff]  }
 0x299   :  { %6132 = vmatmul.mubr.bf16.gmra.mrb[236].mxu1 %v7011_v5  ;;  %v7021_v48 = vld [vmem:[%s9327_s4 + $0xd8] sm:$0xff]  }
 0x29a   :  { %v8524_v29 = vadd.f32 %v6184_v53, %v3591_v39  ;;  %3514 = vmatmul.mubr.bf16.gmra.mrb[108].mxu0 %v7010_v35  ;;  %6135 = vmatprep.mubr.bf16.mxu1 %v7014_v36  ;;  %v7019_v53 = vld [vmem:[%s9327_s4 + $0xd0] sm:$0xff]   ;;  %v7017_v35 = vld [vmem:[%s9325_s0 + $0x844] ss:$36 sps:$4 sm:$0xff]  }
 0x29b   :  { %3521 = vmatprep.mubr.bf16.mxu0 %v7012_v8 }
 0x29c   :  { %v6013_v47 = vpop.f32.mrb[132].mxu1 }
 0x29d   :  { %v3307_v25 = vpop.f32.mrb[4].mxu0  ;;  %v3604_v15 = vpop.f32.mrb[133].mxu1 }
 0x29e   :  { %v6185_v44 = vadd.f32 %v3307_v25, %v7763_v56  ;;  %v3309_v32 = vpop.f32.mrb[5].mxu0  ;;  %v6014_v51 = vpop.f32.mrb[134].mxu1 }
 0x29f   :  { %v3310_v26 = vpop.f32.mrb[6].mxu0  ;;  %v3607_v5 = vpop.f32.mrb[135].mxu1 }
 0x2a0   :  { %v8539_v36 = vadd.f32 %v6185_v44, %v6009_v62  ;;  %v6186_v56 = vadd.f32 %v3310_v26, %v7768_v60  ;;  %v3312_v32 = vpop.f32.mrb[7].mxu0  ;;  %v7020_v60 = vld [vmem:[%s9325_s0 + $0x840] ss:$36 sps:$4 sm:$0xff]  }
 0x2a1   :  { %6136 = vmatmul.mubr.bf16.gmra.mrb[240].mxu1 %v7016_v54  ;;  %v7024_v54 = vld [vmem:[%s9327_s4 + $0xe0] sm:$0xff]  }
 0x2a2   :  { %v8542_v25 = vadd.f32 %v6186_v56, %v6010_v17  ;;  %3522 = vmatmul.mubr.bf16.gmra.mrb[112].mxu0 %v7015_v61  ;;  %6139 = vmatprep.mubr.bf16.mxu1 %v7019_v53  ;;  %v7022_v53 = vld [vmem:[%s9325_s0 + $0x88c] ss:$36 sps:$4 sm:$0xff]  }
 0x2a3   :  { %3529 = vmatprep.mubr.bf16.mxu0 %v7017_v35 }
 0x2a4   :  { %v8544_v23 = vpop.f32.mrb[136].mxu1 }
 0x2a5   :  { %v3315_v39 = vpop.f32.mrb[8].mxu0  ;;  %v3620_v8 = vpop.f32.mrb[137].mxu1 }
 0x2a6   :  { %v6187_v44 = vadd.f32 %v3315_v39, %v7782_v3  ;;  %v3317_v62 = vpop.f32.mrb[9].mxu0  ;;  %v6018_v10 = vpop.f32.mrb[138].mxu1 }
 0x2a7   :  { %v3318_v17 = vpop.f32.mrb[10].mxu0  ;;  %v3623_v61 = vpop.f32.mrb[139].mxu1 }
 0x2a8   :  { %v8559_v26 = vadd.f32 %v6187_v44, %v3604_v15  ;;  %v6188_v3 = vadd.f32 %v3318_v17, %v7788_v6  ;;  %v3320_v35 = vpop.f32.mrb[11].mxu0  ;;  %v7025_v6 = vld [vmem:[%s9325_s0 + $0x888] ss:$36 sps:$4 sm:$0xff]  }
 0x2a9   :  { %6140 = vmatmul.mubr.bf16.gmra.mrb[244].mxu1 %v7021_v48 }
 0x2aa   :  { %v8562_v56 = vadd.f32 %v6188_v3, %v3607_v5  ;;  %3530 = vmatmul.mubr.bf16.gmra.mrb[116].mxu0 %v7020_v60  ;;  %6143 = vmatprep.mubr.bf16.mxu1 %v7024_v54  ;;  %v7029_v5 = vld [vmem:[%s9327_s4 + $0xf0] sm:$0xff]  }
 0x2ab   :  { %3537 = vmatprep.mubr.bf16.mxu0 %v7022_v53  ;;  %v7027_v54 = vld [vmem:[%s9325_s0 + $0x8d4] ss:$36 sps:$4 sm:$0xff]  }
 0x2ac   :  { %v8564_v32 = vpop.f32.mrb[140].mxu1 }
 0x2ad   :  { %v3323_v39 = vpop.f32.mrb[12].mxu0  ;;  %v3636_v62 = vpop.f32.mrb[141].mxu1 }
 0x2ae   :  { %v6189_v15 = vadd.f32 %v3323_v39, %v7799_v0  ;;  %v3325_v44 = vpop.f32.mrb[13].mxu0  ;;  %v8570_v4 = vpop.f32.mrb[142].mxu1 }
 0x2af   :  { %v3326_v48 = vpop.f32.mrb[14].mxu0  ;;  %v3639_v60 = vpop.f32.mrb[143].mxu1 }
 0x2b0   :  { %v8581_v17 = vadd.f32 %v6189_v15, %v6013_v47  ;;  %v6190_v0 = vadd.f32 %v3326_v48, %v7804_v13  ;;  %v3328_v53 = vpop.f32.mrb[15].mxu0  ;;  %v7030_v13 = vld [vmem:[%s9325_s0 + $0x8d0] ss:$36 sps:$4 sm:$0xff]  }
 0x2b1   :  { %6144 = vmatmul.mubr.bf16.gmra.mrb[248].mxu1 %v7026_v11 }
 0x2b2   :  { %v8584_v3 = vadd.f32 %v6190_v0, %v6014_v51  ;;  %3538 = vmatmul.mubr.bf16.gmra.mrb[120].mxu0 %v7025_v6  ;;  %6147 = vmatprep.mubr.bf16.mxu1 %v7029_v5 }
 0x2b3   :  { %3545 = vmatprep.mubr.bf16.mxu0 %v7027_v54 }
 0x2b4   :  { %v8586_v35 = vpop.f32.mrb[144].mxu1 }
 0x2b5   :  { %v3331_v39 = vpop.f32.mrb[16].mxu0  ;;  %v3652_v44 = vpop.f32.mrb[145].mxu1 }
 0x2b6   :  { %v6191_v47 = vadd.f32 %v3331_v39, %v7818_v19  ;;  %v3333_v15 = vpop.f32.mrb[17].mxu0  ;;  %v8592_v41 = vpop.f32.mrb[146].mxu1 }
 0x2b7   :  { %v3334_v11 = vpop.f32.mrb[18].mxu0  ;;  %v3655_v51 = vpop.f32.mrb[147].mxu1 }
 0x2b8   :  { %v8597_v6 = vadd.f32 %v6191_v47, %v3620_v8  ;;  %v6192_v5 = vadd.f32 %v3334_v11, %v7823_v22  ;;  %v3336_v48 = vpop.f32.mrb[19].mxu0 }
 0x2b9   :  { %6148 = vmatmul.mubr.bf16.gmra.mrb[252].mxu1 %v7031_v49 }
 0x2ba   :  { %v8600_v54 = vadd.f32 %v6192_v5, %v3623_v61  ;;  %3546 = vmatmul.mubr.bf16.gmra.mrb[124].mxu0 %v7030_v13 }
 0x2bc   :  { %v8602_v0 = vpop.f32.mrb[148].mxu1 }
 0x2bd   :  { %v3339_v19 = vpop.f32.mrb[20].mxu0  ;;  %v8604_v53 = vpop.f32.mrb[149].mxu1 }
 0x2be   :  { %v6193_v39 = vadd.f32 %v3339_v19, %v7834_v27  ;;  %v3341_v15 = vpop.f32.mrb[21].mxu0  ;;  %v8607_v33 = vpop.f32.mrb[150].mxu1 }
 0x2bf   :  { %v3342_v28 = vpop.f32.mrb[22].mxu0  ;;  %v8609_v8 = vpop.f32.mrb[151].mxu1 }
 0x2c0   :  { %v8612_v22 = vadd.f32 %v6193_v39, %v8544_v23  ;;  %v6194_v49 = vadd.f32 %v3342_v28, %v7839_v30  ;;  %v3344_v61 = vpop.f32.mrb[23].mxu0 }
 0x2c2   :  { %v8615_v47 = vadd.f32 %v6194_v49, %v6018_v10 }
 0x2c4   :  { %9361 = vst [vmem:[#allocation30_spill] sm:$0xff] %v8615_v47  ;;  %v8617_v13 = vpop.f32.mrb[152].mxu1 }
 0x2c5   :  { %v3347_v11 = vpop.f32.mrb[24].mxu0  ;;  %v8619_v5 = vpop.f32.mrb[153].mxu1 }
 0x2c6   :  { %v6195_v27 = vadd.f32 %v3347_v11, %v7860_v38  ;;  %v3349_v48 = vpop.f32.mrb[25].mxu0  ;;  %v8622_v19 = vpop.f32.mrb[154].mxu1 }
 0x2c7   :  { %v3350_v15 = vpop.f32.mrb[26].mxu0  ;;  %v8624_v18 = vpop.f32.mrb[155].mxu1 }
 0x2c8   :  { %v8626_v23 = vadd.f32 %v6195_v27, %v3636_v62  ;;  %v6196_v30 = vadd.f32 %v3350_v15, %v7871_v42  ;;  %v3352_v28 = vpop.f32.mrb[27].mxu0 }
 0x2ca   :  { %9362 = vst [vmem:[#allocation31_spill] sm:$0xff] %v8626_v23  ;;  %v8629_v10 = vadd.f32 %v6196_v30, %v3639_v60 }
 0x2cc   :  { %9363 = vst [vmem:[#allocation32_spill] sm:$0xff] %v8629_v10  ;;  %v8631_v39 = vpop.f32.mrb[156].mxu1 }
 0x2cd   :  { %v3355_v49 = vpop.f32.mrb[28].mxu0  ;;  %v8633_v61 = vpop.f32.mrb[157].mxu1 }
 0x2ce   :  { %v6197_v38 = vadd.f32 %v3355_v49, %v7876_v45  ;;  %v3357_v11 = vpop.f32.mrb[29].mxu0  ;;  %v8636_v48 = vpop.f32.mrb[158].mxu1 }
 0x2cf   :  { %v3358_v12 = vpop.f32.mrb[30].mxu0  ;;  %v8638_v47 = vpop.f32.mrb[159].mxu1 }
 0x2d0   :  { %v8641_v62 = vadd.f32 %v6197_v38, %v8564_v32  ;;  %v6198_v42 = vadd.f32 %v3358_v12, %v7884_v50  ;;  %v3360_v60 = vpop.f32.mrb[31].mxu0 }
 0x2d2   :  { %9364 = vst [vmem:[#allocation33_spill] sm:$0xff] %v8641_v62  ;;  %v8645_v27 = vadd.f32 %v6198_v42, %v8570_v4 }
 0x2d4   :  { %9365 = vst [vmem:[#allocation34_spill] sm:$0xff] %v8645_v27  ;;  %v8647_v15 = vpop.f32.mrb[160].mxu1 }
 0x2d5   :  { %v3363_v30 = vpop.f32.mrb[32].mxu0  ;;  %v8649_v28 = vpop.f32.mrb[161].mxu1 }
 0x2d6   :  { %v6199_v45 = vadd.f32 %v3363_v30, %v7898_v59  ;;  %v3365_v49 = vpop.f32.mrb[33].mxu0  ;;  %v8652_v11 = vpop.f32.mrb[162].mxu1 }
 0x2d7   :  { %v3366_v10 = vpop.f32.mrb[34].mxu0  ;;  %v8654_v23 = vpop.f32.mrb[163].mxu1 }
 0x2d8   :  { %v8656_v32 = vadd.f32 %v6199_v45, %v3652_v44  ;;  %v6200_v50 = vadd.f32 %v3366_v10, %v7906_v1  ;;  %v3368_v12 = vpop.f32.mrb[35].mxu0 }
 0x2da   :  { %v8659_v4 = vadd.f32 %v6200_v50, %v3655_v51 }
 0x2dc   :  { %9366 = vst [vmem:[#allocation35_spill] sm:$0xff] %v8659_v4  ;;  %v8661_v38 = vpop.f32.mrb[164].mxu1 }
 0x2dd   :  { %v3371_v42 = vpop.f32.mrb[36].mxu0  ;;  %v8663_v60 = vpop.f32.mrb[165].mxu1 }
 0x2de   :  { %v6201_v59 = vadd.f32 %v3371_v42, %v7920_v9  ;;  %v3373_v30 = vpop.f32.mrb[37].mxu0  ;;  %v8666_v49 = vpop.f32.mrb[166].mxu1 }
 0x2df   :  { %9367 = vst [vmem:[#allocation36_spill] sm:$0xff] %v8666_v49  ;;  %v3374_v27 = vpop.f32.mrb[38].mxu0  ;;  %v8668_v62 = vpop.f32.mrb[167].mxu1 }
 0x2e0   :  { %v8671_v44 = vadd.f32 %v6201_v59, %v8586_v35  ;;  %v6202_v1 = vadd.f32 %v3374_v27, %v7930_v14  ;;  %v3376_v51 = vpop.f32.mrb[39].mxu0 }
 0x2e2   :  { %v8675_v10 = vadd.f32 %v6202_v1, %v8592_v41 }
 0x2e4   :  { %v8677_v45 = vpop.f32.mrb[168].mxu1 }
 0x2e5   :  { %9368 = vst [vmem:[#allocation37_spill] sm:$0xff] %v8677_v45  ;;  %v3379_v50 = vpop.f32.mrb[40].mxu0  ;;  %v8679_v12 = vpop.f32.mrb[169].mxu1 }
 0x2e6   :  { %v6203_v9 = vadd.f32 %v3379_v50, %v7942_v20  ;;  %v3381_v42 = vpop.f32.mrb[41].mxu0  ;;  %v8682_v30 = vpop.f32.mrb[170].mxu1 }
 0x2e7   :  { %9369 = vst [vmem:[#allocation38_spill] sm:$0xff] %v8682_v30  ;;  %v3382_v4 = vpop.f32.mrb[42].mxu0  ;;  %v8684_v49 = vpop.f32.mrb[171].mxu1 }
 0x2e8   :  { %v8687_v35 = vadd.f32 %v6203_v9, %v8604_v53  ;;  %v6204_v14 = vadd.f32 %v3382_v4, %v7947_v24  ;;  %v3384_v41 = vpop.f32.mrb[43].mxu0 }
 0x2ea   :  { %v8691_v27 = vadd.f32 %v6204_v14, %v8609_v8 }
 0x2ec   :  { %v8693_v59 = vpop.f32.mrb[172].mxu1 }
 0x2ed   :  { %9370 = vst [vmem:[#allocation39_spill] sm:$0xff] %v8693_v59  ;;  %v3387_v1 = vpop.f32.mrb[44].mxu0  ;;  %v8695_v51 = vpop.f32.mrb[173].mxu1 }
 0x2ee   :  { %v6205_v20 = vadd.f32 %v3387_v1, %v7958_v31  ;;  %v3389_v50 = vpop.f32.mrb[45].mxu0  ;;  %v8698_v42 = vpop.f32.mrb[174].mxu1 }
 0x2ef   :  { %9371 = vst [vmem:[#allocation40_spill] sm:$0xff] %v8698_v42  ;;  %v3390_v30 = vpop.f32.mrb[46].mxu0  ;;  %v8700_v45 = vpop.f32.mrb[175].mxu1 }
 0x2f0   :  { %v8703_v53 = vadd.f32 %v6205_v20, %v8602_v0  ;;  %v6206_v24 = vadd.f32 %v3390_v30, %v7963_v34  ;;  %v3392_v8 = vpop.f32.mrb[47].mxu0 }
 0x2f2   :  { %v8707_v4 = vadd.f32 %v6206_v24, %v8607_v33 }
 0x2f4   :  { %v8709_v9 = vpop.f32.mrb[176].mxu1 }
 0x2f5   :  { %9372 = vst [vmem:[#allocation41_spill] sm:$0xff] %v8709_v9  ;;  %v3395_v14 = vpop.f32.mrb[48].mxu0  ;;  %v8711_v41 = vpop.f32.mrb[177].mxu1 }
 0x2f6   :  { %v6207_v31 = vadd.f32 %v3395_v14, %v7974_v58  ;;  %v3397_v1 = vpop.f32.mrb[49].mxu0  ;;  %v8714_v50 = vpop.f32.mrb[178].mxu1 }
 0x2f7   :  { %9373 = vst [vmem:[#allocation42_spill] sm:$0xff] %v8714_v50  ;;  %v3398_v42 = vpop.f32.mrb[50].mxu0  ;;  %v8716_v59 = vpop.f32.mrb[179].mxu1 }
 0x2f8   :  { %v8719_v0 = vadd.f32 %v6207_v31, %v8619_v5  ;;  %v6208_v34 = vadd.f32 %v3398_v42, %v7979_v43  ;;  %v3400_v33 = vpop.f32.mrb[51].mxu0 }
 0x2fa   :  { %v8723_v30 = vadd.f32 %v6208_v34, %v8624_v18 }
 0x2fc   :  { %v8725_v20 = vpop.f32.mrb[180].mxu1 }
 0x2fd   :  { %9374 = vst [vmem:[#allocation43_spill] sm:$0xff] %v8725_v20  ;;  %v3403_v24 = vpop.f32.mrb[52].mxu0  ;;  %v8727_v8 = vpop.f32.mrb[181].mxu1 }
 0x2fe   :  { %v6209_v58 = vadd.f32 %v3403_v24, %v7990_v52  ;;  %v3405_v14 = vpop.f32.mrb[53].mxu0  ;;  %v8730_v1 = vpop.f32.mrb[182].mxu1 }
 0x2ff   :  { %9375 = vst [vmem:[#allocation44_spill] sm:$0xff] %v8730_v1  ;;  %v3406_v50 = vpop.f32.mrb[54].mxu0  ;;  %v8732_v9 = vpop.f32.mrb[183].mxu1 }
 0x300   :  { %9376 = vst [vmem:[#allocation45_spill] sm:$0xff] %v8732_v9  ;;  %v8735_v5 = vadd.f32 %v6209_v58, %v8617_v13  ;;  %v6210_v43 = vadd.f32 %v3406_v50, %v7995_v55  ;;  %v3408_v18 = vpop.f32.mrb[55].mxu0 }
 0x302   :  { %v8739_v42 = vadd.f32 %v6210_v43, %v8622_v19 }
 0x304   :  { %v8741_v31 = vpop.f32.mrb[184].mxu1 }
 0x305   :  { %9377 = vst [vmem:[#allocation46_spill] sm:$0xff] %v8741_v31  ;;  %v3411_v34 = vpop.f32.mrb[56].mxu0  ;;  %v8743_v33 = vpop.f32.mrb[185].mxu1 }
 0x306   :  { %9378 = vst [vmem:[#allocation47_spill] sm:$0xff] %v8743_v33  ;;  %v6211_v52 = vadd.f32 %v3411_v34, %v8006_v2  ;;  %v3413_v24 = vpop.f32.mrb[57].mxu0  ;;  %v8746_v14 = vpop.f32.mrb[186].mxu1  ;;  %v8764_v2 = vld [vmem:[%s9328_s2] ss:$0 sm:$0xff] }
 0x307   :  { %9379 = vst [vmem:[#allocation48_spill] sm:$0xff] %v8746_v14  ;;  %v3414_v1 = vpop.f32.mrb[58].mxu0  ;;  %v8748_v20 = vpop.f32.mrb[187].mxu1 }
 0x308   :  { %9380 = vst [vmem:[#allocation49_spill] sm:$0xff] %v8748_v20  ;;  %v8751_v13 = vadd.f32 %v6211_v52, %v8633_v61  ;;  %v6212_v55 = vadd.f32 %v3414_v1, %v8011_v7  ;;  %v3416_v19 = vpop.f32.mrb[59].mxu0 }
 0x309   :  { %v3850_v19 = vmul.f32 %v8764_v2, %v8522_v37  ;;  %v8795_v37 = vld [vmem:[%s9331_s7] ss:$0 sm:$0xff] }
 0x30a   :  { %v8755_v50 = vadd.f32 %v6212_v55, %v8638_v47 }
 0x30c   :  { %v8757_v58 = vpop.f32.mrb[188].mxu1 }
 0x30d   :  { %9381 = vst [vmem:[#allocation50_spill] sm:$0xff] %v8757_v58  ;;  %v3419_v43 = vpop.f32.mrb[60].mxu0  ;;  %v8759_v18 = vpop.f32.mrb[189].mxu1  ;;  %v8780_v58 = vld [vmem:[%s9329_s3] ss:$0 sm:$0xff] }
 0x30e   :  { %9382 = vst [vmem:[#allocation51_spill] sm:$0xff] %v8759_v18  ;;  %v6213_v34 = vadd.f32 %v3419_v43, %v8022_v16  ;;  %v3421_v61 = vpop.f32.mrb[61].mxu0  ;;  %v8767_v52 = vpop.f32.mrb[190].mxu1  ;;  %v3852_v16 = vmul.f32 %v8764_v2, %v8539_v36 }
 0x30f   :  { %9383 = vst [vmem:[#allocation52_spill] sm:$0xff] %v8767_v52  ;;  %v3422_v7 = vpop.f32.mrb[62].mxu0  ;;  %v8769_v1 = vpop.f32.mrb[191].mxu1  ;;  %v3853_v61 = vmul.f32 %v8764_v2, %v8542_v25  ;;  %v3856_v25 = vmul.f32 %v8764_v2, %v8581_v17 }
 0x310   :  { %9384 = vst [vmem:[#allocation53_spill] sm:$0xff] %v8769_v1  ;;  %v8772_v47 = vadd.f32 %v6213_v34, %v8631_v39  ;;  %v6214_v24 = vadd.f32 %v3422_v7, %v8027_v21  ;;  %v3424_v55 = vpop.f32.mrb[63].mxu0  ;;  %v8790_v39 = vld [vmem:[%s9330_s6] ss:$0 sm:$0xff]  ;;  %v3921_v34 = vadd.f32 %v8780_v58, %v3850_v19  ;;  %v3923_v52 = vadd.f32 %v8780_v58, %v3852_v16 }
 0x311   :  { %v3854_v19 = vmul.f32 %v8764_v2, %v8559_v26  ;;  %v3924_v33 = vadd.f32 %v8780_v58, %v3853_v61  ;;  %v3927_v61 = vadd.f32 %v8780_v58, %v3856_v25 }
 0x312   :  { %v8785_v43 = vadd.f32 %v6214_v24, %v8636_v48  ;;  %v3851_v24 = vmul.f32 %v8764_v2, %v8524_v29 }
 0x314   :  { %v6089_v21 = vpop.f32.mrb[192].mxu1 }
 0x315   :  { %v3427_v36 = vpop.f32.mrb[64].mxu0  ;;  %v4603_v48 = vmul.f32 %v6089_v21, %v8790_v39  ;;  %v4339_v7 = vpop.f32.mrb[193].mxu1 }
 0x316   :  { %v6215_v55 = vadd.f32 %v3427_v36, %v8252_v40  ;;  %v3429_v1 = vpop.f32.mrb[65].mxu0  ;;  %v4601_v18 = vmul.f32 %v8790_v39, %v4339_v7  ;;  %v6090_v14 = vpop.f32.mrb[194].mxu1 }
 0x317   :  { %v4674_v21 = vadd.f32 %v8795_v37, %v4603_v48  ;;  %v3430_v31 = vpop.f32.mrb[66].mxu0  ;;  %v4604_v20 = vmul.f32 %v6090_v14, %v8790_v39  ;;  %v4342_v29 = vpop.f32.mrb[195].mxu1  ;;  %v3922_v48 = vadd.f32 %v8780_v58, %v3851_v24 }
 0x318   :  { %v8813_v40 = vadd.f32 %v6215_v55, %v8649_v28  ;;  %v4672_v1 = vadd.f32 %v8795_v37, %v4601_v18  ;;  %v6216_v16 = vadd.f32 %v3430_v31, %v8257_v46  ;;  %v3432_v36 = vpop.f32.mrb[67].mxu0  ;;  %v4602_v7 = vmul.f32 %v8790_v39, %v4342_v29 }
 0x319   :  { %v4738_v26 = vadd.f32 %v4674_v21, %v3923_v52  ;;  %v4675_v17 = vadd.f32 %v8795_v37, %v4604_v20  ;;  %v3855_v18 = vmul.f32 %v8764_v2, %v8562_v56  ;;  %v3857_v31 = vmul.f32 %v8764_v2, %v8584_v3 }
 0x31a   :  { %v4736_v9 = vadd.f32 %v4672_v1, %v3921_v34  ;;  %v8822_v14 = vadd.f32 %v6216_v16, %v8654_v23  ;;  %v4673_v28 = vadd.f32 %v8795_v37, %v4602_v7  ;;  %v3925_v20 = vadd.f32 %v8780_v58, %v3854_v19 }
 0x31b   :  { %v4739_v46 = vadd.f32 %v4675_v17, %v3924_v33  ;;  %v3858_v34 = vmul.f32 %v8764_v2, %v8597_v6  ;;  %v4802_v23 = vmax.f32 %v4738_v26, 0.0  ;;  %v3860_v19 = vmul.f32 %v8764_v2, %v8612_v22 }
 0x31c   :  { %v4737_v52 = vadd.f32 %v4673_v28, %v3922_v48  ;;  %v6093_v55 = vpop.f32.mrb[196].mxu1  ;;  %v4800_v56 = vmax.f32 %v4736_v9, 0.0 }
 0x31d   :  { %v4803_v24 = vmax.f32 %v4739_v46, 0.0  ;;  %v3435_v21 = vpop.f32.mrb[68].mxu0  ;;  %v4607_v29 = vmul.f32 %v6093_v55, %v8790_v39  ;;  %v4355_v1 = vpop.f32.mrb[197].mxu1  ;;  %v3928_v55 = vadd.f32 %v8780_v58, %v3857_v31 }
 0x31e   :  { %v4801_v33 = vmax.f32 %v4737_v52, 0.0  ;;  %v6217_v16 = vadd.f32 %v3435_v21, %v8268_v57  ;;  %v3437_v3 = vpop.f32.mrb[69].mxu0  ;;  %v4605_v36 = vmul.f32 %v8790_v39, %v4355_v1  ;;  %v6094_v25 = vpop.f32.mrb[198].mxu1  ;;  %v9385_v1 = vld [vmem:[#allocation30_spill] sm:$0xff] }
 0x31f   :  { %v5728_v7 = vpack.c.bf16 %v4803_v24, %v4802_v23  ;;  %v4678_v6 = vadd.f32 %v8795_v37, %v4607_v29  ;;  %v3438_v26 = vpop.f32.mrb[70].mxu0  ;;  %v4608_v17 = vmul.f32 %v6094_v25, %v8790_v39  ;;  %v4358_v48 = vpop.f32.mrb[199].mxu1  ;;  %v3931_v3 = vadd.f32 %v8780_v58, %v3860_v19 }
 0x320   :  { %v5723_v28 = vpack.c.bf16 %v4801_v33, %v4800_v56  ;;  %v8841_v9 = vadd.f32 %v6217_v16, %v8647_v15  ;;  %v4676_v57 = vadd.f32 %v8795_v37, %v4605_v36  ;;  %v6218_v46 = vadd.f32 %v3438_v26, %v8273_v63  ;;  %v3440_v52 = vpop.f32.mrb[71].mxu0  ;;  %v9386_v33 = vld [vmem:[#allocation31_spill] sm:$0xff]  ;;  %v9387_v26 = vld [vmem:[#allocation33_spill] sm:$0xff] }
 0x321   :  { %5880 = vst [vmem:[%s9332_s8 + $0x8] sm:$0xff] %v5728_v7   ;;  %v4742_v22 = vadd.f32 %v4678_v6, %v3927_v61  ;;  %v4679_v23 = vadd.f32 %v8795_v37, %v4608_v17  ;;  %v4606_v24 = vmul.f32 %v8790_v39, %v4358_v48  ;;  %v3859_v63 = vmul.f32 %v8764_v2, %v8600_v54 }
 0x322   :  { %5724 = vst [vmem:[%s9332_s8] sm:$0xff] %v5723_v28   ;;  %v4740_v15 = vadd.f32 %v4676_v57, %v3925_v20  ;;  %v8855_v21 = vadd.f32 %v6218_v46, %v8652_v11  ;;  %v3926_v61 = vadd.f32 %v8780_v58, %v3855_v18  ;;  %v3861_v56 = vmul.f32 %v8764_v2, %v9385_v1  ;;  %v9388_v28 = vld [vmem:[#allocation2_spill] sm:$0xff] }
 0x323   :  { %v4743_v29 = vadd.f32 %v4679_v23, %v3928_v55  ;;  %v4677_v31 = vadd.f32 %v8795_v37, %v4606_v24  ;;  %v3862_v16 = vmul.f32 %v8764_v2, %v9386_v33  ;;  %v3929_v11 = vadd.f32 %v8780_v58, %v3858_v34 }
 0x324   :  { %v6097_v20 = vpop.f32.mrb[200].mxu1  ;;  %v4806_v36 = vmax.f32 %v4742_v22, 0.0  ;;  %v3864_v17 = vmul.f32 %v8764_v2, %v9387_v26  ;;  %v4804_v48 = vmax.f32 %v4740_v15, 0.0  ;;  %v9389_v15 = vld [vmem:[#allocation3_spill] sm:$0xff] }
 0x325   :  { %v4807_v25 = vmax.f32 %v4743_v29, 0.0  ;;  %v4741_v7 = vadd.f32 %v4677_v31, %v3926_v61  ;;  %v3443_v54 = vpop.f32.mrb[72].mxu0  ;;  %v4611_v6 = vmul.f32 %v6097_v20, %v8790_v39  ;;  %v4371_v18 = vpop.f32.mrb[201].mxu1 }
 0x326   :  { %v6219_v57 = vadd.f32 %v3443_v54, %v9388_v28  ;;  %v3445_v46 = vpop.f32.mrb[73].mxu0  ;;  %v4609_v52 = vmul.f32 %v8790_v39, %v4371_v18  ;;  %v6098_v19 = vpop.f32.mrb[202].mxu1  ;;  %v3930_v18 = vadd.f32 %v8780_v58, %v3859_v63  ;;  %v9390_v28 = vld [vmem:[#allocation32_spill] sm:$0xff]  ;;  %v3866_v63 = vmul.f32 %v8764_v2, %v8656_v32 }
 0x327   :  { %v5738_v55 = vpack.c.bf16 %v4807_v25, %v4806_v36  ;;  %v4805_v23 = vmax.f32 %v4741_v7, 0.0  ;;  %v4682_v34 = vadd.f32 %v8795_v37, %v4611_v6  ;;  %v3446_v22 = vpop.f32.mrb[74].mxu0  ;;  %v4612_v24 = vmul.f32 %v6098_v19, %v8790_v39  ;;  %v4374_v29 = vpop.f32.mrb[203].mxu1 }
 0x328   :  { %v8875_v61 = vadd.f32 %v6219_v57, %v8663_v60  ;;  %v4680_v31 = vadd.f32 %v8795_v37, %v4609_v52  ;;  %v6220_v1 = vadd.f32 %v3446_v22, %v9389_v15  ;;  %v3448_v33 = vpop.f32.mrb[75].mxu0  ;;  %v4610_v20 = vmul.f32 %v8790_v39, %v4374_v29 }
 0x329   :  { %5882 = vst [vmem:[%s9332_s8 + $0x18] sm:$0xff] %v5738_v55   ;;  %v5733_v36 = vpack.c.bf16 %v4805_v23, %v4804_v48  ;;  %v4746_v25 = vadd.f32 %v4682_v34, %v3931_v3  ;;  %v3932_v7 = vadd.f32 %v8780_v58, %v3861_v56  ;;  %v4683_v54 = vadd.f32 %v8795_v37, %v4612_v24  ;;  %v9391_v48 = vld [vmem:[#allocation34_spill] sm:$0xff] }
 0x32a   :  { %v4744_v6 = vadd.f32 %v4680_v31, %v3929_v11  ;;  %v8886_v60 = vadd.f32 %v6220_v1, %v8668_v62  ;;  %v4681_v26 = vadd.f32 %v8795_v37, %v4610_v20  ;;  %v3863_v57 = vmul.f32 %v8764_v2, %v9390_v28  ;;  %v9392_v31 = vld [vmem:[#allocation4_spill] sm:$0xff] }
 0x32b   :  { %5881 = vst [vmem:[%s9332_s8 + $0x10] sm:$0xff] %v5733_v36   ;;  %v4747_v3 = vadd.f32 %v4683_v54, %v3932_v7  ;;  %v3865_v56 = vmul.f32 %v8764_v2, %v9391_v48  ;;  %v3935_v11 = vadd.f32 %v8780_v58, %v3864_v17  ;;  %v3933_v52 = vadd.f32 %v8780_v58, %v3862_v16 }
 0x32c   :  { %v4745_v46 = vadd.f32 %v4681_v26, %v3930_v18  ;;  %v6101_v62 = vpop.f32.mrb[204].mxu1  ;;  %v4810_v19 = vmax.f32 %v4746_v25, 0.0  ;;  %v4808_v24 = vmax.f32 %v4744_v6, 0.0  ;;  %v3868_v16 = vmul.f32 %v8764_v2, %v8671_v44  ;;  %v9393_v26 = vld [vmem:[#allocation5_spill] sm:$0xff] }
 0x32d   :  { %v4811_v55 = vmax.f32 %v4747_v3, 0.0  ;;  %v3451_v23 = vpop.f32.mrb[76].mxu0  ;;  %v4615_v34 = vmul.f32 %v6101_v62, %v8790_v39  ;;  %v4387_v22 = vpop.f32.mrb[205].mxu1  ;;  %v3936_v48 = vadd.f32 %v8780_v58, %v3865_v56 }
 0x32e   :  { %v4809_v29 = vmax.f32 %v4745_v46, 0.0  ;;  %v6221_v15 = vadd.f32 %v3451_v23, %v9392_v31  ;;  %v3453_v1 = vpop.f32.mrb[77].mxu0  ;;  %v4613_v33 = vmul.f32 %v8790_v39, %v4387_v22  ;;  %v6102_v17 = vpop.f32.mrb[206].mxu1  ;;  %v9395_v23 = vld [vmem:[#allocation35_spill] sm:$0xff]  ;;  %v3939_v31 = vadd.f32 %v8780_v58, %v3868_v16 }
 0x32f   :  { %v5748_v20 = vpack.c.bf16 %v4811_v55, %v4810_v19  ;;  %v4686_v32 = vadd.f32 %v8795_v37, %v4615_v34  ;;  %v3454_v36 = vpop.f32.mrb[78].mxu0  ;;  %v4616_v25 = vmul.f32 %v6102_v17, %v8790_v39  ;;  %v4390_v7 = vpop.f32.mrb[207].mxu1  ;;  %v9394_v19 = vld [vmem:[#allocation36_spill] sm:$0xff]  ;;  %v3867_v34 = vmul.f32 %v8764_v2, %v9395_v23 }
 0x330   :  { %v5743_v54 = vpack.c.bf16 %v4809_v29, %v4808_v24  ;;  %v8909_v6 = vadd.f32 %v6221_v15, %v8661_v38  ;;  %v4684_v18 = vadd.f32 %v8795_v37, %v4613_v33  ;;  %v6222_v28 = vadd.f32 %v3454_v36, %v9393_v26  ;;  %v3456_v3 = vpop.f32.mrb[79].mxu0 }
 0x331   :  { %5884 = vst [vmem:[%s9332_s8 + $0x28] sm:$0xff] %v5748_v20   ;;  %v4750_v44 = vadd.f32 %v4686_v32, %v3935_v11  ;;  %v4687_v46 = vadd.f32 %v8795_v37, %v4616_v25  ;;  %v4614_v62 = vmul.f32 %v8790_v39, %v4390_v7  ;;  %v3934_v11 = vadd.f32 %v8780_v58, %v3863_v57 }
 0x332   :  { %5883 = vst [vmem:[%s9332_s8 + $0x20] sm:$0xff] %v5743_v54   ;;  %v4748_v38 = vadd.f32 %v4684_v18, %v3933_v52  ;;  %v8923_v55 = vadd.f32 %v6222_v28, %v9394_v19  ;;  %v3869_v24 = vmul.f32 %v8764_v2, %v8675_v10  ;;  %v3870_v29 = vmul.f32 %v8764_v2, %v8687_v35  ;;  %v9396_v10 = vld [vmem:[#allocation6_spill] sm:$0xff] }
 0x333   :  { %v4751_v22 = vadd.f32 %v4687_v46, %v3936_v48  ;;  %v4685_v56 = vadd.f32 %v8795_v37, %v4614_v62  ;;  %v3937_v15 = vadd.f32 %v8780_v58, %v3866_v63  ;;  %v4814_v1 = vmax.f32 %v4750_v44, 0.0  ;;  %v9397_v46 = vld [vmem:[#allocation7_spill] sm:$0xff] }
 0x334   :  { %v6105_v52 = vpop.f32.mrb[208].mxu1  ;;  %v3872_v36 = vmul.f32 %v8764_v2, %v8703_v53  ;;  %v4812_v25 = vmax.f32 %v4748_v38, 0.0 }
 0x335   :  { %v4815_v33 = vmax.f32 %v4751_v22, 0.0  ;;  %v4749_v17 = vadd.f32 %v4685_v56, %v3934_v11  ;;  %v3459_v20 = vpop.f32.mrb[80].mxu0  ;;  %v4619_v32 = vmul.f32 %v6105_v52, %v8790_v39  ;;  %v4403_v57 = vpop.f32.mrb[209].mxu1  ;;  %v3940_v11 = vadd.f32 %v8780_v58, %v3869_v24 }
 0x336   :  { %v6223_v7 = vadd.f32 %v3459_v20, %v9396_v10  ;;  %v3461_v54 = vpop.f32.mrb[81].mxu0  ;;  %v4617_v35 = vmul.f32 %v8790_v39, %v4403_v57  ;;  %v6106_v16 = vpop.f32.mrb[210].mxu1  ;;  %v3873_v24 = vmul.f32 %v8764_v2, %v8707_v4 }
 0x337   :  { %v5758_v18 = vpack.c.bf16 %v4815_v33, %v4814_v1  ;;  %v4813_v26 = vmax.f32 %v4749_v17, 0.0  ;;  %v4690_v63 = vadd.f32 %v8795_v37, %v4619_v32  ;;  %v3462_v28 = vpop.f32.mrb[82].mxu0  ;;  %v4620_v3 = vmul.f32 %v6106_v16, %v8790_v39  ;;  %v4406_v44 = vpop.f32.mrb[211].mxu1  ;;  %v9398_v16 = vld [vmem:[#allocation8_spill] sm:$0xff] }
 0x338   :  { %v8943_v48 = vadd.f32 %v6223_v7, %v8679_v12  ;;  %v4688_v53 = vadd.f32 %v8795_v37, %v4617_v35  ;;  %v6224_v62 = vadd.f32 %v3462_v28, %v9397_v46  ;;  %v3464_v38 = vpop.f32.mrb[83].mxu0  ;;  %v4618_v19 = vmul.f32 %v8790_v39, %v4406_v44  ;;  %v9399_v46 = vld [vmem:[#allocation37_spill] sm:$0xff] }
 0x339   :  { %5886 = vst [vmem:[%s9332_s8 + $0x38] sm:$0xff] %v5758_v18   ;;  %v5753_v23 = vpack.c.bf16 %v4813_v26, %v4812_v25  ;;  %v4754_v22 = vadd.f32 %v4690_v63, %v3939_v31  ;;  %v4691_v56 = vadd.f32 %v8795_v37, %v4620_v3  ;;  %v3938_v1 = vadd.f32 %v8780_v58, %v3867_v34 }
 0x33a   :  { %v4752_v52 = vadd.f32 %v4688_v53, %v3937_v15  ;;  %v8954_v12 = vadd.f32 %v6224_v62, %v8684_v49  ;;  %v4689_v33 = vadd.f32 %v8795_v37, %v4618_v19  ;;  %v3871_v17 = vmul.f32 %v8764_v2, %v8691_v27  ;;  %v9400_v19 = vld [vmem:[#allocation9_spill] sm:$0xff] }
 0x33b   :  { %5885 = vst [vmem:[%s9332_s8 + $0x30] sm:$0xff] %v5753_v23   ;;  %v4755_v31 = vadd.f32 %v4691_v56, %v3940_v11  ;;  %v3943_v15 = vadd.f32 %v8780_v58, %v3872_v36  ;;  %v3941_v32 = vadd.f32 %v8780_v58, %v3870_v29  ;;  %v3874_v34 = vmul.f32 %v8764_v2, %v8719_v0 }
 0x33c   :  { %v4753_v20 = vadd.f32 %v4689_v33, %v3938_v1  ;;  %v6109_v49 = vpop.f32.mrb[212].mxu1  ;;  %v4818_v57 = vmax.f32 %v4754_v22, 0.0  ;;  %v4816_v54 = vmax.f32 %v4752_v52, 0.0  ;;  %v3876_v29 = vmul.f32 %v8764_v2, %v8735_v5  ;;  %v9401_v33 = vld [vmem:[#allocation38_spill] sm:$0xff] }
 0x33d   :  { %v4819_v25 = vmax.f32 %v4755_v31, 0.0  ;;  %v3467_v27 = vpop.f32.mrb[84].mxu0  ;;  %v4623_v10 = vmul.f32 %v6109_v49, %v8790_v39  ;;  %v4419_v7 = vpop.f32.mrb[213].mxu1  ;;  %v3944_v11 = vadd.f32 %v8780_v58, %v3873_v24 }
 0x33e   :  { %v4817_v35 = vmax.f32 %v4753_v20, 0.0  ;;  %v6225_v18 = vadd.f32 %v3467_v27, %v9398_v16  ;;  %v3469_v4 = vpop.f32.mrb[85].mxu0  ;;  %v4621_v26 = vmul.f32 %v8790_v39, %v4419_v7  ;;  %v6110_v36 = vpop.f32.mrb[214].mxu1  ;;  %v3875_v20 = vmul.f32 %v8764_v2, %v8723_v30 }
 0x33f   :  { %v5768_v63 = vpack.c.bf16 %v4819_v25, %v4818_v57  ;;  %v4694_v0 = vadd.f32 %v8795_v37, %v4623_v10  ;;  %v3470_v28 = vpop.f32.mrb[86].mxu0  ;;  %v4624_v3 = vmul.f32 %v6110_v36, %v8790_v39  ;;  %v4422_v44 = vpop.f32.mrb[215].mxu1  ;;  %v3877_v57 = vmul.f32 %v8764_v2, %v8739_v42  ;;  %v9402_v42 = vld [vmem:[#allocation10_spill] sm:$0xff] }
 0x340   :  { %v5763_v53 = vpack.c.bf16 %v4817_v35, %v4816_v54  ;;  %v8977_v62 = vadd.f32 %v6225_v18, %v9399_v46  ;;  %v4692_v38 = vadd.f32 %v8795_v37, %v4621_v26  ;;  %v6226_v23 = vadd.f32 %v3470_v28, %v9400_v19  ;;  %v3472_v22 = vpop.f32.mrb[87].mxu0  ;;  %v9403_v46 = vld [vmem:[#allocation11_spill] sm:$0xff] }
 0x341   :  { %5888 = vst [vmem:[%s9332_s8 + $0x48] sm:$0xff] %v5768_v63   ;;  %v4758_v5 = vadd.f32 %v4694_v0, %v3943_v15  ;;  %v4695_v56 = vadd.f32 %v8795_v37, %v4624_v3  ;;  %v4622_v52 = vmul.f32 %v8790_v39, %v4422_v44  ;;  %v3942_v15 = vadd.f32 %v8780_v58, %v3871_v17 }
 0x342   :  { %5887 = vst [vmem:[%s9332_s8 + $0x40] sm:$0xff] %v5763_v53   ;;  %v4756_v1 = vadd.f32 %v4692_v38, %v3941_v32  ;;  %v8991_v31 = vadd.f32 %v6226_v23, %v9401_v33  ;;  %v3878_v25 = vmul.f32 %v8764_v2, %v8751_v13  ;;  %v3947_v27 = vadd.f32 %v8780_v58, %v3876_v29 }
 0x343   :  { %v4759_v49 = vadd.f32 %v4695_v56, %v3944_v11  ;;  %v4693_v24 = vadd.f32 %v8795_v37, %v4622_v52  ;;  %v3945_v10 = vadd.f32 %v8780_v58, %v3874_v34  ;;  %v4822_v7 = vmax.f32 %v4758_v5, 0.0 }
 0x344   :  { %v6113_v32 = vpop.f32.mrb[216].mxu1  ;;  %v3880_v18 = vmul.f32 %v8764_v2, %v8772_v47  ;;  %v4820_v4 = vmax.f32 %v4756_v1, 0.0  ;;  %v3948_v11 = vadd.f32 %v8780_v58, %v3877_v57  ;;  %v3946_v1 = vadd.f32 %v8780_v58, %v3875_v20 }
 0x345   :  { %v4823_v54 = vmax.f32 %v4759_v49, 0.0  ;;  %v4757_v35 = vadd.f32 %v4693_v24, %v3942_v15  ;;  %v3475_v30 = vpop.f32.mrb[88].mxu0  ;;  %v4627_v16 = vmul.f32 %v6113_v32, %v8790_v39  ;;  %v4435_v17 = vpop.f32.mrb[217].mxu1  ;;  %v3879_v49 = vmul.f32 %v8764_v2, %v8755_v50 }
 0x346   :  { %v6227_v26 = vadd.f32 %v3475_v30, %v9402_v42  ;;  %v3477_v36 = vpop.f32.mrb[89].mxu0  ;;  %v4625_v13 = vmul.f32 %v8790_v39, %v4435_v17  ;;  %v6114_v29 = vpop.f32.mrb[218].mxu1  ;;  %v3881_v24 = vmul.f32 %v8764_v2, %v8785_v43  ;;  %v3949_v32 = vadd.f32 %v8780_v58, %v3878_v25  ;;  %v9404_v17 = vld [vmem:[#allocation12_spill] sm:$0xff] }
 0x347   :  { %v5778_v63 = vpack.c.bf16 %v4823_v54, %v4822_v7  ;;  %v4821_v0 = vmax.f32 %v4757_v35, 0.0  ;;  %v4698_v34 = vadd.f32 %v8795_v37, %v4627_v16  ;;  %v3478_v28 = vpop.f32.mrb[90].mxu0  ;;  %v4628_v3 = vmul.f32 %v6114_v29, %v8790_v39  ;;  %v4438_v44 = vpop.f32.mrb[219].mxu1 }
 0x348   :  { %v9011_v53 = vadd.f32 %v6227_v26, %v8695_v51  ;;  %v4696_v47 = vadd.f32 %v8795_v37, %v4625_v13  ;;  %v6228_v38 = vadd.f32 %v3478_v28, %v9403_v46  ;;  %v3480_v19 = vpop.f32.mrb[91].mxu0  ;;  %v4626_v23 = vmul.f32 %v8790_v39, %v4438_v44 }
 0x349   :  { %5890 = vst [vmem:[%s9332_s8 + $0x58] sm:$0xff] %v5778_v63   ;;  %v5773_v22 = vpack.c.bf16 %v4821_v0, %v4820_v4  ;;  %v4762_v5 = vadd.f32 %v4698_v34, %v3947_v27  ;;  %v4699_v56 = vadd.f32 %v8795_v37, %v4628_v3  ;;  %v3951_v27 = vadd.f32 %v8780_v58, %v3880_v18  ;;  %v9405_v0 = vld [vmem:[#allocation39_spill] sm:$0xff]  ;;  %v9406_v3 = vld [vmem:[#allocation13_spill] sm:$0xff] }
 0x34a   :  { %v4760_v52 = vadd.f32 %v4696_v47, %v3945_v10  ;;  %v9022_v51 = vadd.f32 %v6228_v38, %v8700_v45  ;;  %v4697_v33 = vadd.f32 %v8795_v37, %v4626_v23  ;;  %v3882_v20 = vmul.f32 %v8764_v2, %v8813_v40 }
 0x34b   :  { %5889 = vst [vmem:[%s9332_s8 + $0x50] sm:$0xff] %v5773_v22   ;;  %v4763_v15 = vadd.f32 %v4699_v56, %v3948_v11  ;;  %v4826_v10 = vmax.f32 %v4762_v5, 0.0  ;;  %v3884_v25 = vmul.f32 %v8764_v2, %v8841_v9  ;;  %v3952_v46 = vadd.f32 %v8780_v58, %v3881_v24  ;;  %v9407_v22 = vld [vmem:[#allocation40_spill] sm:$0xff] }
 0x34c   :  { %v4761_v57 = vadd.f32 %v4697_v33, %v3946_v1  ;;  %v6117_v45 = vpop.f32.mrb[220].mxu1  ;;  %v4824_v30 = vmax.f32 %v4760_v52, 0.0  ;;  %v3883_v11 = vmul.f32 %v8764_v2, %v8822_v14  ;;  %v3950_v52 = vadd.f32 %v8780_v58, %v3879_v49 }
 0x34d   :  { %v4827_v7 = vmax.f32 %v4763_v15, 0.0  ;;  %v3483_v50 = vpop.f32.mrb[92].mxu0  ;;  %v4631_v54 = vmul.f32 %v6117_v45, %v8790_v39  ;;  %v4451_v35 = vpop.f32.mrb[221].mxu1  ;;  %v3885_v33 = vmul.f32 %v8764_v2, %v8855_v21  ;;  %v3886_v15 = vmul.f32 %v8764_v2, %v8875_v61  ;;  %v9408_v21 = vld [vmem:[#allocation14_spill] sm:$0xff] }
 0x34e   :  { %v4825_v16 = vmax.f32 %v4761_v57, 0.0  ;;  %v6229_v4 = vadd.f32 %v3483_v50, %v9404_v17  ;;  %v3485_v43 = vpop.f32.mrb[93].mxu0  ;;  %v4629_v42 = vmul.f32 %v8790_v39, %v4451_v35  ;;  %v6118_v18 = vpop.f32.mrb[222].mxu1  ;;  %v3955_v24 = vadd.f32 %v8780_v58, %v3884_v25 }
 0x34f   :  { %v5788_v26 = vpack.c.bf16 %v4827_v7, %v4826_v10  ;;  %v4702_v40 = vadd.f32 %v8795_v37, %v4631_v54  ;;  %v3486_v36 = vpop.f32.mrb[94].mxu0  ;;  %v4632_v13 = vmul.f32 %v6118_v18, %v8790_v39  ;;  %v4454_v29 = vpop.f32.mrb[223].mxu1  ;;  %v3888_v50 = vmul.f32 %v8764_v2, %v8909_v6 }
 0x350   :  { %v5783_v63 = vpack.c.bf16 %v4825_v16, %v4824_v30  ;;  %v9045_v34 = vadd.f32 %v6229_v4, %v9405_v0  ;;  %v4700_v28 = vadd.f32 %v8795_v37, %v4629_v42  ;;  %v6230_v44 = vadd.f32 %v3486_v36, %v9406_v3  ;;  %v3488_v47 = vpop.f32.mrb[95].mxu0 }
 0x351   :  { %5892 = vst [vmem:[%s9332_s8 + $0x68] sm:$0xff] %v5788_v26   ;;  %v4766_v9 = vadd.f32 %v4702_v40, %v3951_v27  ;;  %v4703_v38 = vadd.f32 %v8795_v37, %v4632_v13  ;;  %v4630_v19 = vmul.f32 %v8790_v39, %v4454_v29  ;;  %v3953_v27 = vadd.f32 %v8780_v58, %v3882_v20  ;;  %v9409_v26 = vld [vmem:[#allocation15_spill] sm:$0xff] }
 0x352   :  { %5891 = vst [vmem:[%s9332_s8 + $0x60] sm:$0xff] %v5783_v63   ;;  %v4764_v23 = vadd.f32 %v4700_v28, %v3949_v32  ;;  %v9059_v5 = vadd.f32 %v6230_v44, %v9407_v22  ;;  %v3956_v0 = vadd.f32 %v8780_v58, %v3885_v33  ;;  %v3954_v44 = vadd.f32 %v8780_v58, %v3883_v11 }
 0x353   :  { %v4767_v56 = vadd.f32 %v4703_v38, %v3952_v46  ;;  %v4701_v1 = vadd.f32 %v8795_v37, %v4630_v19  ;;  %v4830_v45 = vmax.f32 %v4766_v9, 0.0  ;;  %v3887_v9 = vmul.f32 %v8764_v2, %v8886_v60 }
 0x354   :  { %v6121_v57 = vpop.f32.mrb[224].mxu1  ;;  %v4828_v54 = vmax.f32 %v4764_v23, 0.0  ;;  %v3889_v38 = vmul.f32 %v8764_v2, %v8923_v55  ;;  %v3959_v23 = vadd.f32 %v8780_v58, %v3888_v50  ;;  %v3957_v22 = vadd.f32 %v8780_v58, %v3886_v15 }
 0x355   :  { %v4831_v32 = vmax.f32 %v4767_v56, 0.0  ;;  %v4765_v10 = vadd.f32 %v4701_v1, %v3950_v52  ;;  %v3491_v14 = vpop.f32.mrb[96].mxu0  ;;  %v4635_v7 = vmul.f32 %v6121_v57, %v8790_v39  ;;  %v4467_v49 = vpop.f32.mrb[225].mxu1  ;;  %v3890_v11 = vmul.f32 %v8764_v2, %v8943_v48 }
 0x356   :  { %v6231_v35 = vadd.f32 %v3491_v14, %v9408_v21  ;;  %v3493_v30 = vpop.f32.mrb[97].mxu0  ;;  %v4633_v61 = vmul.f32 %v8790_v39, %v4467_v49  ;;  %v6122_v16 = vpop.f32.mrb[226].mxu1  ;;  %v3892_v15 = vmul.f32 %v8764_v2, %v8977_v62  ;;  %v9411_v21 = vld [vmem:[#allocation41_spill] sm:$0xff] }
 0x357   :  { %v5798_v17 = vpack.c.bf16 %v4831_v32, %v4830_v45  ;;  %v4829_v4 = vmax.f32 %v4765_v10, 0.0  ;;  %v4706_v20 = vadd.f32 %v8795_v37, %v4635_v7  ;;  %v3494_v43 = vpop.f32.mrb[98].mxu0  ;;  %v4636_v42 = vmul.f32 %v6122_v16, %v8790_v39  ;;  %v4470_v18 = vpop.f32.mrb[227].mxu1 }
 0x358   :  { %v9079_v25 = vadd.f32 %v6231_v35, %v8711_v41  ;;  %v4704_v6 = vadd.f32 %v8795_v37, %v4633_v61  ;;  %v6232_v40 = vadd.f32 %v3494_v43, %v9409_v26  ;;  %v3496_v36 = vpop.f32.mrb[99].mxu0  ;;  %v4634_v13 = vmul.f32 %v8790_v39, %v4470_v18  ;;  %v9412_v61 = vld [vmem:[#allocation17_spill] sm:$0xff]  ;;  %v9413_v18 = vld [vmem:[#allocation42_spill] sm:$0xff] }
 0x359   :  { %5894 = vst [vmem:[%s9332_s8 + $0x78] sm:$0xff] %v5798_v17   ;;  %v5793_v29 = vpack.c.bf16 %v4829_v4, %v4828_v54  ;;  %v4770_v63 = vadd.f32 %v4706_v20, %v3955_v24  ;;  %v4707_v28 = vadd.f32 %v8795_v37, %v4636_v42  ;;  %v3960_v4 = vadd.f32 %v8780_v58, %v3889_v38 }
 0x35a   :  { %v4768_v3 = vadd.f32 %v4704_v6, %v3953_v27  ;;  %v9090_v41 = vadd.f32 %v6232_v40, %v8716_v59  ;;  %v4705_v47 = vadd.f32 %v8795_v37, %v4634_v13  ;;  %v9410_v27 = vld [vmem:[#allocation16_spill] sm:$0xff]  ;;  %v3891_v26 = vmul.f32 %v8764_v2, %v8954_v12 }
 0x35b   :  { %5893 = vst [vmem:[%s9332_s8 + $0x70] sm:$0xff] %v5793_v29   ;;  %v4771_v46 = vadd.f32 %v4707_v28, %v3956_v0  ;;  %v4834_v56 = vmax.f32 %v4770_v63, 0.0  ;;  %v3958_v36 = vadd.f32 %v8780_v58, %v3887_v9  ;;  %v3893_v29 = vmul.f32 %v8764_v2, %v8991_v31  ;;  %v9414_v31 = vld [vmem:[#allocation18_spill] sm:$0xff] }
 0x35c   :  { %v4769_v19 = vadd.f32 %v4705_v47, %v3954_v44  ;;  %v6125_v59 = vpop.f32.mrb[228].mxu1  ;;  %v4832_v24 = vmax.f32 %v4768_v3, 0.0  ;;  %v3894_v63 = vmul.f32 %v8764_v2, %v9011_v53  ;;  %v3963_v0 = vadd.f32 %v8780_v58, %v3892_v15 }
 0x35d   :  { %v4835_v52 = vmax.f32 %v4771_v46, 0.0  ;;  %v3499_v60 = vpop.f32.mrb[100].mxu0  ;;  %v4639_v1 = vmul.f32 %v6125_v59, %v8790_v39  ;;  %v4483_v33 = vpop.f32.mrb[229].mxu1  ;;  %v3961_v3 = vadd.f32 %v8780_v58, %v3890_v11 }
 0x35e   :  { %v4833_v57 = vmax.f32 %v4769_v19, 0.0  ;;  %v6233_v45 = vadd.f32 %v3499_v60, %v9410_v27  ;;  %v3501_v55 = vpop.f32.mrb[101].mxu0  ;;  %v4637_v32 = vmul.f32 %v8790_v39, %v4483_v33  ;;  %v6126_v10 = vpop.f32.mrb[230].mxu1  ;;  %v3896_v19 = vmul.f32 %v8764_v2, %v9045_v34  ;;  %v9415_v27 = vld [vmem:[#allocation19_spill] sm:$0xff] }
 0x35f   :  { %v5808_v14 = vpack.c.bf16 %v4835_v52, %v4834_v56  ;;  %v4710_v48 = vadd.f32 %v8795_v37, %v4639_v1  ;;  %v3502_v7 = vpop.f32.mrb[102].mxu0  ;;  %v4640_v49 = vmul.f32 %v6126_v10, %v8790_v39  ;;  %v4486_v50 = vpop.f32.mrb[231].mxu1 }
 0x360   :  { %v5803_v54 = vpack.c.bf16 %v4833_v57, %v4832_v24  ;;  %v3789_v35 = vadd.f32 %v6233_v45, %v9411_v21  ;;  %v4708_v30 = vadd.f32 %v8795_v37, %v4637_v32  ;;  %v6234_v16 = vadd.f32 %v3502_v7, %v9412_v61  ;;  %v3504_v17 = vpop.f32.mrb[103].mxu0 }
 0x361   :  { %5896 = vst [vmem:[%s9332_s8 + $0x88] sm:$0xff] %v5808_v14   ;;  %v4774_v62 = vadd.f32 %v4710_v48, %v3959_v23  ;;  %v4711_v20 = vadd.f32 %v8795_v37, %v4640_v49  ;;  %v4638_v43 = vmul.f32 %v8790_v39, %v4486_v50  ;;  %v3964_v14 = vadd.f32 %v8780_v58, %v3893_v29  ;;  %v9417_v29 = vld [vmem:[#allocation20_spill] sm:$0xff] }
 0x362   :  { %5895 = vst [vmem:[%s9332_s8 + $0x80] sm:$0xff] %v5803_v54   ;;  %v4772_v42 = vadd.f32 %v4708_v30, %v3957_v22  ;;  %v9125_v6 = vadd.f32 %v6234_v16, %v9413_v18  ;;  %v3962_v50 = vadd.f32 %v8780_v58, %v3891_v26  ;;  %v3895_v21 = vmul.f32 %v8764_v2, %v9022_v51 }
 0x363   :  { %v4775_v40 = vadd.f32 %v4711_v20, %v3960_v4  ;;  %v4709_v13 = vadd.f32 %v8795_v37, %v4638_v43  ;;  %v4838_v44 = vmax.f32 %v4774_v62, 0.0  ;;  %v3965_v61 = vadd.f32 %v8780_v58, %v3894_v63 }
 0x364   :  { %v6129_v28 = vpop.f32.mrb[232].mxu1  ;;  %v4836_v23 = vmax.f32 %v4772_v42, 0.0  ;;  %v3897_v16 = vmul.f32 %v8764_v2, %v9059_v5  ;;  %v3898_v17 = vmul.f32 %v8764_v2, %v9079_v25  ;;  %v3967_v4 = vadd.f32 %v8780_v58, %v3896_v19 }
 0x365   :  { %v4839_v47 = vmax.f32 %v4775_v40, 0.0  ;;  %v4773_v46 = vadd.f32 %v4709_v13, %v3958_v36  ;;  %v3507_v12 = vpop.f32.mrb[104].mxu0  ;;  %v4643_v38 = vmul.f32 %v6129_v28, %v8790_v39  ;;  %v4499_v9 = vpop.f32.mrb[233].mxu1  ;;  %v3900_v43 = vmul.f32 %v8764_v2, %v3789_v35 }
 0x366   :  { %v6235_v59 = vadd.f32 %v3507_v12, %v9414_v31  ;;  %v3509_v22 = vpop.f32.mrb[105].mxu0  ;;  %v4641_v53 = vmul.f32 %v8790_v39, %v4499_v9  ;;  %v6130_v56 = vpop.f32.mrb[234].mxu1  ;;  %v3901_v28 = vmul.f32 %v8764_v2, %v9125_v6 }
 0x367   :  { %v5818_v52 = vpack.c.bf16 %v4839_v47, %v4838_v44  ;;  %v4837_v60 = vmax.f32 %v4773_v46, 0.0  ;;  %v4714_v11 = vadd.f32 %v8795_v37, %v4643_v38  ;;  %v3510_v1 = vpop.f32.mrb[106].mxu0  ;;  %v4644_v33 = vmul.f32 %v6130_v56, %v8790_v39  ;;  %v4502_v24 = vpop.f32.mrb[235].mxu1  ;;  %v9418_v38 = vld [vmem:[#allocation43_spill] sm:$0xff] }
 0x368   :  { %v9145_v57 = vadd.f32 %v6235_v59, %v8727_v8  ;;  %v4712_v34 = vadd.f32 %v8795_v37, %v4641_v53  ;;  %v6236_v45 = vadd.f32 %v3510_v1, %v9415_v27  ;;  %v3512_v55 = vpop.f32.mrb[107].mxu0  ;;  %v4642_v32 = vmul.f32 %v8790_v39, %v4502_v24  ;;  %v9416_v8 = vld [vmem:[#allocation45_spill] sm:$0xff] }
 0x369   :  { %5898 = vst [vmem:[%s9332_s8 + $0x98] sm:$0xff] %v5818_v52   ;;  %v5813_v10 = vpack.c.bf16 %v4837_v60, %v4836_v23  ;;  %v4778_v15 = vadd.f32 %v4714_v11, %v3963_v0  ;;  %v4715_v48 = vadd.f32 %v8795_v37, %v4644_v33  ;;  %v9419_v23 = vld [vmem:[#allocation21_spill] sm:$0xff]  ;;  %v3968_v22 = vadd.f32 %v8780_v58, %v3897_v16  ;;  %v9420_v60 = vld [vmem:[#allocation44_spill] sm:$0xff] }
 0x36a   :  { %v4776_v7 = vadd.f32 %v4712_v34, %v3961_v3  ;;  %v9156_v49 = vadd.f32 %v6236_v45, %v9416_v8  ;;  %v4713_v54 = vadd.f32 %v8795_v37, %v4642_v32  ;;  %v3966_v33 = vadd.f32 %v8780_v58, %v3895_v21  ;;  %v9421_v21 = vld [vmem:[#allocation22_spill] sm:$0xff] }
 0x36b   :  { %5897 = vst [vmem:[%s9332_s8 + $0x90] sm:$0xff] %v5813_v10   ;;  %v4779_v30 = vadd.f32 %v4715_v48, %v3964_v14  ;;  %v4842_v51 = vmax.f32 %v4778_v15, 0.0  ;;  %v3899_v34 = vmul.f32 %v8764_v2, %v9090_v41  ;;  %v3971_v27 = vadd.f32 %v8780_v58, %v3900_v43 }
 0x36c   :  { %v4777_v62 = vadd.f32 %v4713_v54, %v3962_v50  ;;  %v6133_v20 = vpop.f32.mrb[236].mxu1  ;;  %v4840_v36 = vmax.f32 %v4776_v7, 0.0  ;;  %v3969_v55 = vadd.f32 %v8780_v58, %v3898_v17  ;;  %v3972_v32 = vadd.f32 %v8780_v58, %v3901_v28 }
 0x36d   :  { %v4843_v42 = vmax.f32 %v4779_v30, 0.0  ;;  %v3515_v18 = vpop.f32.mrb[108].mxu0  ;;  %v4647_v26 = vmul.f32 %v6133_v20, %v8790_v39  ;;  %v4515_v40 = vpop.f32.mrb[237].mxu1  ;;  %v3902_v50 = vmul.f32 %v8764_v2, %v9145_v57  ;;  %v9423_v2 = vld [vmem:[#allocation23_spill] sm:$0xff] }
 0x36e   :  { %v4841_v13 = vmax.f32 %v4777_v62, 0.0  ;;  %v6237_v63 = vadd.f32 %v3515_v18, %v9417_v29  ;;  %v3517_v5 = vpop.f32.mrb[109].mxu0  ;;  %v4645_v0 = vmul.f32 %v8790_v39, %v4515_v40  ;;  %v6134_v25 = vpop.f32.mrb[238].mxu1 }
 0x36f   :  { %v5828_v3 = vpack.c.bf16 %v4843_v42, %v4842_v51  ;;  %v4718_v35 = vadd.f32 %v8795_v37, %v4647_v26  ;;  %v3518_v44 = vpop.f32.mrb[110].mxu0  ;;  %v4648_v47 = vmul.f32 %v6134_v25, %v8790_v39  ;;  %v4518_v46 = vpop.f32.mrb[239].mxu1  ;;  %v9422_v51 = vld [vmem:[#allocation47_spill] sm:$0xff]  ;;  %v9424_v25 = vld [vmem:[#allocation49_spill] sm:$0xff] }
 0x370   :  { %v5823_v12 = vpack.c.bf16 %v4841_v13, %v4840_v36  ;;  %v3805_v9 = vadd.f32 %v6237_v63, %v9418_v38  ;;  %v4716_v19 = vadd.f32 %v8795_v37, %v4645_v0  ;;  %v6238_v31 = vadd.f32 %v3518_v44, %v9419_v23  ;;  %v3520_v59 = vpop.f32.mrb[111].mxu0  ;;  %v9213_v36 = vld [vmem:[%s9328_s2] ss:$0 sm:$0xff] }
 0x371   :  { %5900 = vst [vmem:[%s9332_s8 + $0xa8] sm:$0xff] %v5828_v3   ;;  %v4782_v6 = vadd.f32 %v4718_v35, %v3967_v4  ;;  %v4719_v53 = vadd.f32 %v8795_v37, %v4648_v47  ;;  %v4646_v56 = vmul.f32 %v8790_v39, %v4518_v46  ;;  %v3903_v47 = vmul.f32 %v9213_v36, %v9156_v49 }
 0x372   :  { %5899 = vst [vmem:[%s9332_s8 + $0xa0] sm:$0xff] %v5823_v12   ;;  %v4780_v52 = vadd.f32 %v4716_v19, %v3965_v61  ;;  %v3808_v11 = vadd.f32 %v6238_v31, %v9420_v60  ;;  %v3904_v13 = vmul.f32 %v9213_v36, %v3805_v9 }
 0x373   :  { %v4783_v1 = vadd.f32 %v4719_v53, %v3968_v22  ;;  %v4717_v24 = vadd.f32 %v8795_v37, %v4646_v56  ;;  %v4846_v10 = vmax.f32 %v4782_v6, 0.0  ;;  %v9425_v56 = vld [vmem:[#allocation24_spill] sm:$0xff] }
 0x374   :  { %v6137_v45 = vpop.f32.mrb[240].mxu1  ;;  %v4844_v54 = vmax.f32 %v4780_v52, 0.0  ;;  %v3905_v46 = vmul.f32 %v9213_v36, %v3808_v11 }
 0x375   :  { %v4847_v15 = vmax.f32 %v4783_v1, 0.0  ;;  %v4781_v14 = vadd.f32 %v4717_v24, %v3966_v33  ;;  %v3523_v48 = vpop.f32.mrb[112].mxu0  ;;  %v4651_v7 = vmul.f32 %v6137_v45, %v8790_v39  ;;  %v4531_v8 = vpop.f32.mrb[241].mxu1 }
 0x376   :  { %v6239_v41 = vadd.f32 %v3523_v48, %v9421_v21  ;;  %v3525_v30 = vpop.f32.mrb[113].mxu0  ;;  %v4649_v61 = vmul.f32 %v8790_v39, %v4531_v8  ;;  %v6138_v16 = vpop.f32.mrb[242].mxu1 }
 0x377   :  { %v5838_v17 = vpack.c.bf16 %v4847_v15, %v4846_v10  ;;  %v4845_v62 = vmax.f32 %v4781_v14, 0.0  ;;  %v4722_v58 = vadd.f32 %v8795_v37, %v4651_v7  ;;  %v3526_v4 = vpop.f32.mrb[114].mxu0  ;;  %v4652_v20 = vmul.f32 %v6138_v16, %v8790_v39  ;;  %v4534_v43 = vpop.f32.mrb[243].mxu1  ;;  %v9426_v15 = vld [vmem:[#allocation46_spill] sm:$0xff]  ;;  %v9427_v7 = vld [vmem:[#allocation25_spill] sm:$0xff] }
 0x378   :  { %v3813_v42 = vadd.f32 %v6239_v41, %v9422_v51  ;;  %v4720_v18 = vadd.f32 %v8795_v37, %v4649_v61  ;;  %v6240_v57 = vadd.f32 %v3526_v4, %v9423_v2  ;;  %v3528_v26 = vpop.f32.mrb[115].mxu0  ;;  %v4650_v40 = vmul.f32 %v8790_v39, %v4534_v43  ;;  %v9224_v39 = vld [vmem:[%s9329_s3] ss:$0 sm:$0xff] }
 0x379   :  { %5902 = vst [vmem:[%s9332_s8 + $0xb8] sm:$0xff] %v5838_v17   ;;  %v5833_v29 = vpack.c.bf16 %v4845_v62, %v4844_v54  ;;  %v4786_v63 = vadd.f32 %v4722_v58, %v3971_v27  ;;  %v4723_v5 = vadd.f32 %v8795_v37, %v4652_v20  ;;  %v3970_v3 = vadd.f32 %v9224_v39, %v3899_v34  ;;  %v9248_v34 = vld [vmem:[%s9331_s7] ss:$0 sm:$0xff]  ;;  %v9428_v17 = vld [vmem:[#allocation48_spill] sm:$0xff] }
 0x37a   :  { %v4784_v0 = vadd.f32 %v4720_v18, %v3969_v55  ;;  %v3816_v28 = vadd.f32 %v6240_v57, %v9424_v25  ;;  %v4721_v35 = vadd.f32 %v8795_v37, %v4650_v40  ;;  %v3973_v9 = vadd.f32 %v9224_v39, %v3902_v50  ;;  %v9239_v37 = vld [vmem:[%s9330_s6] ss:$0 sm:$0xff] }
 0x37b   :  { %5901 = vst [vmem:[%s9332_s8 + $0xb0] sm:$0xff] %v5833_v29   ;;  %v4787_v44 = vadd.f32 %v4723_v5, %v3972_v32  ;;  %v4850_v19 = vmax.f32 %v4786_v63, 0.0  ;;  %v3975_v59 = vadd.f32 %v9224_v39, %v3904_v13  ;;  %v3906_v33 = vmul.f32 %v9213_v36, %v3813_v42  ;;  %v9429_v5 = vld [vmem:[#allocation26_spill] sm:$0xff] }
 0x37c   :  { %v4785_v12 = vadd.f32 %v4721_v35, %v3970_v3  ;;  %v6141_v38 = vpop.f32.mrb[244].mxu1  ;;  %v4848_v49 = vmax.f32 %v4784_v0, 0.0  ;;  %v3976_v21 = vadd.f32 %v9224_v39, %v3905_v46  ;;  %v3974_v4 = vadd.f32 %v9224_v39, %v3903_v47 }
 0x37d   :  { %v4851_v23 = vmax.f32 %v4787_v44, 0.0  ;;  %v3531_v31 = vpop.f32.mrb[116].mxu0  ;;  %v4655_v6 = vmul.f32 %v9239_v37, %v6141_v38  ;;  %v4547_v22 = vpop.f32.mrb[245].mxu1  ;;  %v3907_v43 = vmul.f32 %v9213_v36, %v3816_v28  ;;  %v3977_v18 = vadd.f32 %v9224_v39, %v3906_v33 }
 0x37e   :  { %v4849_v53 = vmax.f32 %v4785_v12, 0.0  ;;  %v6241_v52 = vadd.f32 %v3531_v31, %v9425_v56  ;;  %v3533_v60 = vpop.f32.mrb[117].mxu0  ;;  %v4653_v11 = vmul.f32 %v9239_v37, %v4547_v22  ;;  %v6142_v1 = vpop.f32.mrb[246].mxu1 }
 0x37f   :  { %v5848_v24 = vpack.c.bf16 %v4851_v23, %v4850_v19  ;;  %v4726_v27 = vadd.f32 %v9248_v34, %v4655_v6  ;;  %v3534_v45 = vpop.f32.mrb[118].mxu0  ;;  %v4656_v55 = vmul.f32 %v9239_v37, %v6142_v1  ;;  %v4550_v32 = vpop.f32.mrb[247].mxu1  ;;  %v9430_v19 = vld [vmem:[#allocation51_spill] sm:$0xff]  ;;  %v9432_v1 = vld [vmem:[#allocation53_spill] sm:$0xff] }
 0x380   :  { %v5843_v10 = vpack.c.bf16 %v4849_v53, %v4848_v49  ;;  %v3821_v14 = vadd.f32 %v6241_v52, %v9426_v15  ;;  %v4724_v48 = vadd.f32 %v9248_v34, %v4653_v11  ;;  %v6242_v8 = vadd.f32 %v3534_v45, %v9427_v7  ;;  %v3536_v50 = vpop.f32.mrb[119].mxu0 }
 0x381   :  { %5904 = vst [vmem:[%s9332_s8 + $0xc8] sm:$0xff] %v5848_v24   ;;  %v4790_v54 = vadd.f32 %v4726_v27, %v3975_v59  ;;  %v4727_v41 = vadd.f32 %v9248_v34, %v4656_v55  ;;  %v4654_v30 = vmul.f32 %v9239_v37, %v4550_v32  ;;  %v9431_v59 = vld [vmem:[#allocation27_spill] sm:$0xff]  ;;  %v3978_v24 = vadd.f32 %v9224_v39, %v3907_v43 }
 0x382   :  { %5903 = vst [vmem:[%s9332_s8 + $0xc0] sm:$0xff] %v5843_v10   ;;  %v3908_v61 = vmul.f32 %v9213_v36, %v3821_v14  ;;  %v4788_v16 = vadd.f32 %v4724_v48, %v3973_v9  ;;  %v3824_v62 = vadd.f32 %v6242_v8, %v9428_v17 }
 0x383   :  { %v4791_v58 = vadd.f32 %v4727_v41, %v3976_v21  ;;  %v4725_v20 = vadd.f32 %v9248_v34, %v4654_v30  ;;  %v4854_v51 = vmax.f32 %v4790_v54, 0.0  ;;  %v9433_v21 = vld [vmem:[#allocation28_spill] sm:$0xff] }
 0x384   :  { %v6145_v42 = vpop.f32.mrb[248].mxu1  ;;  %v3909_v2 = vmul.f32 %v9213_v36, %v3824_v62  ;;  %v4852_v63 = vmax.f32 %v4788_v16, 0.0  ;;  %v3979_v25 = vadd.f32 %v9224_v39, %v3908_v61 }
 0x385   :  { %v4855_v57 = vmax.f32 %v4791_v58, 0.0  ;;  %v4789_v26 = vadd.f32 %v4725_v20, %v3974_v4  ;;  %v3539_v40 = vpop.f32.mrb[120].mxu0  ;;  %v4659_v13 = vmul.f32 %v9239_v37, %v6145_v42  ;;  %v4563_v29 = vpop.f32.mrb[249].mxu1 }
 0x386   :  { %v6243_v0 = vadd.f32 %v3539_v40, %v9429_v5  ;;  %v3541_v3 = vpop.f32.mrb[121].mxu0  ;;  %v4657_v28 = vmul.f32 %v9239_v37, %v4563_v29  ;;  %v6146_v35 = vpop.f32.mrb[250].mxu1  ;;  %v3980_v52 = vadd.f32 %v9224_v39, %v3909_v2  ;;  %v9435_v2 = vld [vmem:[#allocation29_spill] sm:$0xff]  ;;  %v9436_v5 = vld [vmem:[#allocation52_spill] sm:$0xff] }
 0x387   :  { %v5858_v44 = vpack.c.bf16 %v4855_v57, %v4854_v51  ;;  %v4853_v47 = vmax.f32 %v4789_v26, 0.0  ;;  %v4730_v46 = vadd.f32 %v9248_v34, %v4659_v13  ;;  %v3542_v12 = vpop.f32.mrb[122].mxu0  ;;  %v4660_v38 = vmul.f32 %v9239_v37, %v6146_v35  ;;  %v4566_v9 = vpop.f32.mrb[251].mxu1  ;;  %v9434_v51 = vld [vmem:[#allocation50_spill] sm:$0xff] }
 0x388   :  { %v3829_v23 = vadd.f32 %v6243_v0, %v9430_v19  ;;  %v4728_v31 = vadd.f32 %v9248_v34, %v4657_v28  ;;  %v6244_v6 = vadd.f32 %v3542_v12, %v9431_v59  ;;  %v3544_v22 = vpop.f32.mrb[123].mxu0  ;;  %v4658_v49 = vmul.f32 %v9239_v37, %v4566_v9 }
 0x389   :  { %5906 = vst [vmem:[%s9332_s8 + $0xd8] sm:$0xff] %v5858_v44   ;;  %v5853_v53 = vpack.c.bf16 %v4853_v47, %v4852_v63  ;;  %v4794_v56 = vadd.f32 %v4730_v46, %v3979_v25  ;;  %v4731_v60 = vadd.f32 %v9248_v34, %v4660_v38 }
 0x38a   :  { %v4792_v11 = vadd.f32 %v4728_v31, %v3977_v18  ;;  %v3832_v33 = vadd.f32 %v6244_v6, %v9432_v1  ;;  %v4729_v27 = vadd.f32 %v9248_v34, %v4658_v49  ;;  %v3910_v45 = vmul.f32 %v9213_v36, %v3829_v23 }
 0x38b   :  { %5905 = vst [vmem:[%s9332_s8 + $0xd0] sm:$0xff] %v5853_v53   ;;  %v4795_v55 = vadd.f32 %v4731_v60, %v3980_v52  ;;  %v4858_v15 = vmax.f32 %v4794_v56, 0.0 }
 0x38c   :  { %v4793_v32 = vadd.f32 %v4729_v27, %v3978_v24  ;;  %v6149_v10 = vpop.f32.mrb[252].mxu1  ;;  %v4856_v50 = vmax.f32 %v4792_v11, 0.0  ;;  %v3911_v17 = vmul.f32 %v9213_v36, %v3832_v33  ;;  %v3981_v58 = vadd.f32 %v9224_v39, %v3910_v45 }
 0x38d   :  { %v4859_v14 = vmax.f32 %v4795_v55, 0.0  ;;  %v3547_v48 = vpop.f32.mrb[124].mxu0  ;;  %v4663_v7 = vmul.f32 %v9239_v37, %v6149_v10  ;;  %v4579_v8 = vpop.f32.mrb[253].mxu1 }
 0x38e   :  { %v4857_v54 = vmax.f32 %v4793_v32, 0.0  ;;  %v6245_v41 = vadd.f32 %v3547_v48, %v9433_v21  ;;  %v3549_v30 = vpop.f32.mrb[125].mxu0  ;;  %v4661_v61 = vmul.f32 %v9239_v37, %v4579_v8  ;;  %v6150_v16 = vpop.f32.mrb[254].mxu1  ;;  %v3982_v3 = vadd.f32 %v9224_v39, %v3911_v17 }
 0x38f   :  { %v5868_v62 = vpack.c.bf16 %v4859_v14, %v4858_v15  ;;  %v3550_v4 = vpop.f32.mrb[126].mxu0  ;;  %v4582_v20 = vpop.f32.mrb[255].mxu1  ;;  %v4734_v40 = vadd.f32 %v9248_v34, %v4663_v7  ;;  %v4664_v25 = vmul.f32 %v9239_v37, %v6150_v16 }
 0x390   :  { %v5863_v43 = vpack.c.bf16 %v4857_v54, %v4856_v50  ;;  %v3837_v42 = vadd.f32 %v6245_v41, %v9434_v51  ;;  %v4732_v18 = vadd.f32 %v9248_v34, %v4661_v61  ;;  %v6246_v57 = vadd.f32 %v3550_v4, %v9435_v2  ;;  %v3552_v26 = vpop.f32.mrb[127].mxu0 }
 0x391   :  { %5908 = vst [vmem:[%s9332_s8 + $0xe8] sm:$0xff] %v5868_v62   ;;  %v4662_v13 = vmul.f32 %v9239_v37, %v4582_v20  ;;  %v4735_v38 = vadd.f32 %v9248_v34, %v4664_v25 }
 0x392   :  { %5907 = vst [vmem:[%s9332_s8 + $0xe0] sm:$0xff] %v5863_v43   ;;  %v3912_v29 = vmul.f32 %v9213_v36, %v3837_v42  ;;  %v4796_v63 = vadd.f32 %v4732_v18, %v3981_v58  ;;  %v3840_v0 = vadd.f32 %v6246_v57, %v9436_v5 }
 0x393   :  { %v4733_v28 = vadd.f32 %v9248_v34, %v4662_v13 }
 0x394   :  { %v3983_v35 = vadd.f32 %v9224_v39, %v3912_v29  ;;  %v3913_v44 = vmul.f32 %v9213_v36, %v3840_v0  ;;  %v4860_v9 = vmax.f32 %v4796_v63, 0.0 }
 0x395   :  { %v4797_v47 = vadd.f32 %v4733_v28, %v3982_v3 }
 0x396   :  { %v4798_v46 = vadd.f32 %v4734_v40, %v3983_v35  ;;  %v3984_v12 = vadd.f32 %v9224_v39, %v3913_v44 }
 0x397   :  { %v4861_v19 = vmax.f32 %v4797_v47, 0.0 }
 0x398   :  { %v4799_v23 = vadd.f32 %v4735_v38, %v3984_v12  ;;  %v4862_v59 = vmax.f32 %v4798_v46, 0.0 }
 0x399   :  { %v5873_v31 = vpack.c.bf16 %v4861_v19, %v4860_v9 }
 0x39a   :  { %v4863_v37 = vmax.f32 %v4799_v23, 0.0 }
 0x39b   :  { %5909 = vst [vmem:[%s9332_s8 + $0xf0] sm:$0xff] %v5873_v31  }
 0x39c   :  { %v5878_v6 = vpack.c.bf16 %v4863_v37, %v4862_v59 }
 0x39e   :  { %5910 = vst [vmem:[%s9332_s8 + $0xf8] sm:$0xff] %v5878_v6  }

// kernel: _lambda_.28
= control target key start
LH: loop header
LB: loop body
LE: loop exit
PB: predicated region body
PF: predicated region fallthrough
CT: control target
= control target key end

     0   :  { %s3488_s1 = inlined_call_operand.vmem [shape: bf16[1152,128], index: 1, kind: input, shape index: {}]   ;;  %s3489_s0 = inlined_call_operand.vmem [shape: bf16[128,1152], index: 0, kind: input, shape index: {}]   ;;  %s3490_s5 = inlined_call_operand.vmem [shape: bf16[128,128], index: 5, kind: input, shape index: {}]   ;;  %s3491_s4 = inlined_call_operand.vmem [shape: bf16[128,128], index: 4, kind: input, shape index: {}]   ;;  %s3492_s6 = inlined_call_operand.vmem [shape: f32[1,128], index: 6, kind: input, shape index: {}]   ;;  %s3493_s2 = inlined_call_operand.vmem [shape: f32[1,128], index: 2, kind: input, shape index: {}]   ;;  %s3494_s7 = inlined_call_operand.vmem [shape: f32[1,128], index: 7, kind: input, shape index: {}]   ;;  %s3495_s3 = inlined_call_operand.vmem [shape: f32[1,128], index: 3, kind: input, shape index: {}]   ;;  %s3496_s8 = inlined_call_operand.vmem [shape: bf16[128,128], index: 8, kind: output, shape index: {}]  }
   0x1   :  { %v2567_v0 = vld [vmem:[%s3488_s1 + $0x40] sm:$0xff]   ;;  %v2571_v4 = vld [vmem:[%s3488_s1 + $0x48] sm:$0xff]   ;;  %v2575_v8 = vld [vmem:[%s3488_s1 + $0x50] sm:$0xff]  }
   0x2   :  { %v2568_v1 = vld [vmem:[%s3488_s1 + $0xc0] sm:$0xff]   ;;  %2215 = vmatprep.subr.bf16.mxu0 %v2567_v0  ;;  %v2572_v5 = vld [vmem:[%s3488_s1 + $0xc8] sm:$0xff]   ;;  %v2576_v9 = vld [vmem:[%s3488_s1 + $0xd0] sm:$0xff]  }
   0x3   :  { %v2569_v2 = vld [vmem:[%s3488_s1] sm:$0xff]   ;;  %2279 = vmatprep.subr.bf16.mxu1 %v2568_v1  ;;  %v2573_v6 = vld [vmem:[%s3488_s1 + $0x8] sm:$0xff]   ;;  %v2577_v10 = vld [vmem:[%s3488_s1 + $0x10] sm:$0xff]  }
   0x4   :  { %v2570_v3 = vld [vmem:[%s3488_s1 + $0x80] sm:$0xff]   ;;  %2216 = vmatpush3.bf16.msra.mxu0 %v2569_v2  ;;  %v2574_v7 = vld [vmem:[%s3488_s1 + $0x88] sm:$0xff]   ;;  %v2578_v11 = vld [vmem:[%s3488_s1 + $0x90] sm:$0xff]  }
   0x5   :  { %2280 = vmatpush3.bf16.msra.mxu1 %v2570_v3  ;;  %2217 = vmatprep.subr.bf16.mxu0 %v2571_v4  ;;  %v2579_v12 = vld [vmem:[%s3488_s1 + $0x58] sm:$0xff]   ;;  %v2583_v16 = vld [vmem:[%s3488_s1 + $0x60] sm:$0xff]   ;;  %v2587_v20 = vld [vmem:[%s3488_s1 + $0x68] sm:$0xff]  }
   0x6   :  { %2281 = vmatprep.subr.bf16.mxu1 %v2572_v5  ;;  %v2580_v13 = vld [vmem:[%s3488_s1 + $0xd8] sm:$0xff]   ;;  %v2584_v17 = vld [vmem:[%s3488_s1 + $0xe0] sm:$0xff]   ;;  %v2588_v21 = vld [vmem:[%s3488_s1 + $0xe8] sm:$0xff]  }
   0x7   :  { %v2581_v14 = vld [vmem:[%s3488_s1 + $0x18] sm:$0xff]   ;;  %v2585_v18 = vld [vmem:[%s3488_s1 + $0x20] sm:$0xff]   ;;  %v2589_v22 = vld [vmem:[%s3488_s1 + $0x28] sm:$0xff]  }
   0x8   :  { %2218 = vmatpush3.bf16.msra.mxu0 %v2573_v6  ;;  %v2582_v15 = vld [vmem:[%s3488_s1 + $0x98] sm:$0xff]   ;;  %v2586_v19 = vld [vmem:[%s3488_s1 + $0xa0] sm:$0xff]   ;;  %v2590_v23 = vld [vmem:[%s3488_s1 + $0xa8] sm:$0xff]  }
   0x9   :  { %2282 = vmatpush3.bf16.msra.mxu1 %v2574_v7  ;;  %2219 = vmatprep.subr.bf16.mxu0 %v2575_v8  ;;  %v2591_v24 = vld [vmem:[%s3488_s1 + $0x70] sm:$0xff]   ;;  %v2595_v28 = vld [vmem:[%s3488_s1 + $0x78] sm:$0xff]   ;;  %v2599_v32 = vld [vmem:[%s3489_s0] ss:$36 sps:$4 sm:$0xff]  }
   0xa   :  { %2283 = vmatprep.subr.bf16.mxu1 %v2576_v9  ;;  %v2592_v25 = vld [vmem:[%s3488_s1 + $0xf0] sm:$0xff]   ;;  %v2596_v29 = vld [vmem:[%s3488_s1 + $0xf8] sm:$0xff]   ;;  %v2601_v33 = vld [vmem:[%s3489_s0 + $0x4] ss:$36 sps:$4 sm:$0xff]  }
   0xb   :  { %v2593_v26 = vld [vmem:[%s3488_s1 + $0x30] sm:$0xff]   ;;  %v2597_v30 = vld [vmem:[%s3488_s1 + $0x38] sm:$0xff]   ;;  %v2602_v34 = vld [vmem:[%s3489_s0 + $0x8] ss:$36 sps:$4 sm:$0xff]   ;;  %1086 = vmatprep.mubr.bf16.mxu0 %v2601_v33 }
   0xc   :  { %2220 = vmatpush3.bf16.msra.mxu0 %v2577_v10  ;;  %v2594_v27 = vld [vmem:[%s3488_s1 + $0xb0] sm:$0xff]   ;;  %v2598_v31 = vld [vmem:[%s3488_s1 + $0xb8] sm:$0xff]   ;;  %v2605_v36 = vld [vmem:[%s3488_s1 + $0x140] sm:$0xff]  }
   0xd   :  { %2284 = vmatpush3.bf16.msra.mxu1 %v2578_v11  ;;  %2221 = vmatprep.subr.bf16.mxu0 %v2579_v12  ;;  %v2604_v35 = vld [vmem:[%s3489_s0 + $0xc] ss:$36 sps:$4 sm:$0xff]   ;;  %v2606_v37 = vld [vmem:[%s3488_s1 + $0x100] sm:$0xff]   ;;  %v2611_v41 = vld [vmem:[%s3489_s0 + $0x54] ss:$36 sps:$4 sm:$0xff]  }
   0xe   :  { %2285 = vmatprep.subr.bf16.mxu1 %v2580_v13  ;;  %1183 = vmatprep.mubr.bf16.mxu1 %v2604_v35  ;;  %v2607_v38 = vld [vmem:[%s3488_s1 + $0x1c0] sm:$0xff]   ;;  %v2609_v40 = vld [vmem:[%s3489_s0 + $0x4c] ss:$36 sps:$4 sm:$0xff]   ;;  %v2619_v48 = vld [vmem:[%s3489_s0 + $0x94] ss:$36 sps:$4 sm:$0xff]  }
   0xf   :  { %v2608_v39 = vld [vmem:[%s3488_s1 + $0x180] sm:$0xff]   ;;  %v2613_v42 = vld [vmem:[%s3489_s0 + $0x48] ss:$36 sps:$4 sm:$0xff]   ;;  %v2614_v43 = vld [vmem:[%s3489_s0 + $0x50] ss:$36 sps:$4 sm:$0xff]  }
  0x10   :  { %2222 = vmatpush3.bf16.msra.mxu0 %v2581_v14  ;;  %v2615_v44 = vld [vmem:[%s3488_s1 + $0x148] sm:$0xff]   ;;  %v2621_v49 = vld [vmem:[%s3489_s0 + $0x9c] ss:$36 sps:$4 sm:$0xff]   ;;  %v2623_v50 = vld [vmem:[%s3489_s0 + $0x90] ss:$36 sps:$4 sm:$0xff]  }
  0x11   :  { %2286 = vmatpush3.bf16.msra.mxu1 %v2582_v15  ;;  %2223 = vmatprep.subr.bf16.mxu0 %v2583_v16  ;;  %v2616_v45 = vld [vmem:[%s3488_s1 + $0x108] sm:$0xff]   ;;  %v2624_v51 = vld [vmem:[%s3489_s0 + $0x98] ss:$36 sps:$4 sm:$0xff]   ;;  %v2625_v52 = vld [vmem:[%s3488_s1 + $0x150] sm:$0xff]  }
  0x12   :  { %2287 = vmatprep.subr.bf16.mxu1 %v2584_v17  ;;  %v2617_v46 = vld [vmem:[%s3488_s1 + $0x1c8] sm:$0xff]   ;;  %v2626_v53 = vld [vmem:[%s3488_s1 + $0x110] sm:$0xff]   ;;  %v2629_v56 = vld [vmem:[%s3489_s0 + $0xdc] ss:$36 sps:$4 sm:$0xff]  }
  0x13   :  { %v2618_v47 = vld [vmem:[%s3488_s1 + $0x188] sm:$0xff]   ;;  %v2627_v54 = vld [vmem:[%s3488_s1 + $0x1d0] sm:$0xff]   ;;  %v2633_v58 = vld [vmem:[%s3489_s0 + $0xd8] ss:$36 sps:$4 sm:$0xff]  }
  0x14   :  { %2224 = vmatpush3.bf16.msra.mxu0 %v2585_v18  ;;  %v2628_v55 = vld [vmem:[%s3488_s1 + $0x190] sm:$0xff]   ;;  %v2631_v57 = vld [vmem:[%s3489_s0 + $0xe4] ss:$36 sps:$4 sm:$0xff]   ;;  %v2635_v60 = vld [vmem:[%s3488_s1 + $0x158] sm:$0xff]  }
  0x15   :  { %2288 = vmatpush3.bf16.msra.mxu1 %v2586_v19  ;;  %2225 = vmatprep.subr.bf16.mxu0 %v2587_v20  ;;  %v2634_v59 = vld [vmem:[%s3489_s0 + $0xe0] ss:$36 sps:$4 sm:$0xff]   ;;  %v2636_v61 = vld [vmem:[%s3488_s1 + $0x118] sm:$0xff]   ;;  %v2641_v1 = vld [vmem:[%s3489_s0 + $0x12c] ss:$36 sps:$4 sm:$0xff]  }
  0x16   :  { %2289 = vmatprep.subr.bf16.mxu1 %v2588_v21  ;;  %v2637_v62 = vld [vmem:[%s3488_s1 + $0x1d8] sm:$0xff]   ;;  %v2639_v0 = vld [vmem:[%s3489_s0 + $0x124] ss:$36 sps:$4 sm:$0xff]   ;;  %v2649_v8 = vld [vmem:[%s3489_s0 + $0x16c] ss:$36 sps:$4 sm:$0xff]  }
  0x17   :  { %v2638_v63 = vld [vmem:[%s3488_s1 + $0x198] sm:$0xff]   ;;  %v2643_v2 = vld [vmem:[%s3489_s0 + $0x120] ss:$36 sps:$4 sm:$0xff]   ;;  %v2644_v4 = vld [vmem:[%s3489_s0 + $0x128] ss:$36 sps:$4 sm:$0xff]  }
  0x18   :  { %2226 = vmatpush3.bf16.msra.mxu0 %v2589_v22  ;;  %v2645_v3 = vld [vmem:[%s3488_s1 + $0x160] sm:$0xff]   ;;  %v2651_v9 = vld [vmem:[%s3489_s0 + $0x174] ss:$36 sps:$4 sm:$0xff]   ;;  %v2655_v10 = vld [vmem:[%s3488_s1 + $0x168] sm:$0xff]  }
  0x19   :  { %2290 = vmatpush3.bf16.msra.mxu1 %v2590_v23  ;;  %2227 = vmatprep.subr.bf16.mxu0 %v2591_v24  ;;  %v2646_v5 = vld [vmem:[%s3488_s1 + $0x120] sm:$0xff]   ;;  %v2656_v11 = vld [vmem:[%s3488_s1 + $0x128] sm:$0xff]   ;;  %v2654_v15 = vld [vmem:[%s3489_s0 + $0x170] ss:$36 sps:$4 sm:$0xff]  }
  0x1a   :  { %2291 = vmatprep.subr.bf16.mxu1 %v2592_v25  ;;  %v2647_v6 = vld [vmem:[%s3488_s1 + $0x1e0] sm:$0xff]   ;;  %v2653_v12 = vld [vmem:[%s3489_s0 + $0x168] ss:$36 sps:$4 sm:$0xff]   ;;  %v2659_v16 = vld [vmem:[%s3489_s0 + $0x1b4] ss:$36 sps:$4 sm:$0xff]  }
  0x1b   :  { %v2648_v7 = vld [vmem:[%s3488_s1 + $0x1a0] sm:$0xff]   ;;  %v2657_v13 = vld [vmem:[%s3488_s1 + $0x1e8] sm:$0xff]   ;;  %v2665_v18 = vld [vmem:[%s3488_s1 + $0x170] sm:$0xff]  }
  0x1c   :  { %2228 = vmatpush3.bf16.msra.mxu0 %v2593_v26  ;;  %v2658_v14 = vld [vmem:[%s3488_s1 + $0x1a8] sm:$0xff]   ;;  %v2661_v17 = vld [vmem:[%s3489_s0 + $0x1bc] ss:$36 sps:$4 sm:$0xff]   ;;  %v2666_v19 = vld [vmem:[%s3488_s1 + $0x130] sm:$0xff]  }
  0x1d   :  { %2292 = vmatpush3.bf16.msra.mxu1 %v2594_v27  ;;  %2229 = vmatprep.subr.bf16.mxu0 %v2595_v28  ;;  %v2667_v20 = vld [vmem:[%s3488_s1 + $0x1f0] sm:$0xff]   ;;  %v2664_v23 = vld [vmem:[%s3489_s0 + $0x1b8] ss:$36 sps:$4 sm:$0xff]   ;;  %v2671_v25 = vld [vmem:[%s3489_s0 + $0x204] ss:$36 sps:$4 sm:$0xff]  }
  0x1e   :  { %2293 = vmatprep.subr.bf16.mxu1 %v2596_v29  ;;  %v2668_v21 = vld [vmem:[%s3488_s1 + $0x1b0] sm:$0xff]   ;;  %v2669_v24 = vld [vmem:[%s3489_s0 + $0x1fc] ss:$36 sps:$4 sm:$0xff]  }
  0x1f   :  { %v2663_v22 = vld [vmem:[%s3489_s0 + $0x1b0] ss:$36 sps:$4 sm:$0xff]   ;;  %v2675_v26 = vld [vmem:[%s3488_s1 + $0x178] sm:$0xff]   ;;  %v2685_v33 = vld [vmem:[%s3488_s1 + $0x200] sm:$0xff]  }
  0x20   :  { %2230 = vmatpush3.bf16.msra.mxu0 %v2597_v30  ;;  %v2676_v27 = vld [vmem:[%s3488_s1 + $0x138] sm:$0xff]  }
  0x21   :  { %2294 = vmatpush3.bf16.msra.mxu1 %v2598_v31  ;;  %2343 = vmatprep.subr.bf16.mxu0 %v2605_v36  ;;  %v2677_v28 = vld [vmem:[%s3488_s1 + $0x1f8] sm:$0xff]   ;;  %v2674_v31 = vld [vmem:[%s3489_s0 + $0x200] ss:$36 sps:$4 sm:$0xff]   ;;  %v2679_v36 = vld [vmem:[%s3489_s0 + $0x10] ss:$36 sps:$4 sm:$0xff]  }
  0x22   :  { %2407 = vmatprep.subr.bf16.mxu1 %v2607_v38  ;;  %v2678_v29 = vld [vmem:[%s3488_s1 + $0x1b8] sm:$0xff]  }
  0x23   :  { %1087 = vmatmul.mubr.bf16.vlgmr.msra.gmra.mrb[0].mxu0 %v2599_v32  ;;  %v2673_v30 = vld [vmem:[%s3489_s0 + $0x1f8] ss:$36 sps:$4 sm:$0xff]  }
  0x24   :  { %1184 = vmatmul.mubr.bf16.vlgmr.msra.gmra.mrb[0].mxu1 %v2602_v34  ;;  %2344 = vmatpush3.bf16.msra.mxu0 %v2606_v37  ;;  %v2681_v32 = vld [vmem:[%s3489_s0 + $0x14] ss:$36 sps:$4 sm:$0xff]   ;;  %v2686_v34 = vld [vmem:[%s3490_s5] sm:$0xff]  }
  0x25   :  { %2408 = vmatpush3.bf16.msra.mxu1 %v2608_v39  ;;  %1094 = vmatprep.mubr.bf16.mxu0 %v2609_v40  ;;  %v2684_v35 = vld [vmem:[%s3489_s0 + $0x1c] ss:$36 sps:$4 sm:$0xff]   ;;  %v2689_v39 = vld [vmem:[%s3489_s0 + $0x64] ss:$36 sps:$4 sm:$0xff]  }
  0x26   :  { %1191 = vmatprep.mubr.bf16.mxu1 %v2611_v41  ;;  %2345 = vmatprep.subr.bf16.mxu0 %v2615_v44  ;;  %v2682_v37 = vld [vmem:[%s3489_s0 + $0x18] ss:$36 sps:$4 sm:$0xff]   ;;  %v2693_v40 = vld [vmem:[%s3488_s1 + $0x208] sm:$0xff]   ;;  %v2702_v44 = vld [vmem:[%s3490_s5 + $0x10] sm:$0xff]  }
  0x27   :  { %2409 = vmatprep.subr.bf16.mxu1 %v2617_v46  ;;  %v2687_v38 = vld [vmem:[%s3489_s0 + $0x5c] ss:$36 sps:$4 sm:$0xff]   ;;  %v2694_v41 = vld [vmem:[%s3490_s5 + $0x8] sm:$0xff]  }
  0x28   :  { %2346 = vmatpush3.bf16.msra.mxu0 %v2616_v45  ;;  %v2692_v45 = vld [vmem:[%s3489_s0 + $0x60] ss:$36 sps:$4 sm:$0xff]  }
  0x29   :  { %2410 = vmatpush3.bf16.msra.mxu1 %v2618_v47  ;;  %2347 = vmatprep.subr.bf16.mxu0 %v2625_v52  ;;  %v2695_v46 = vld [vmem:[%s3489_s0 + $0xa4] ss:$36 sps:$4 sm:$0xff]   ;;  %v2697_v47 = vld [vmem:[%s3489_s0 + $0xac] ss:$36 sps:$4 sm:$0xff]  }
  0x2a   :  { %2411 = vmatprep.subr.bf16.mxu1 %v2627_v54  ;;  %v2717_v52 = vld [vmem:[%s3488_s1 + $0x220] sm:$0xff]   ;;  %v2703_v54 = vld [vmem:[%s3489_s0 + $0xec] ss:$36 sps:$4 sm:$0xff]  }
  0x2b   :  { %1095 = vmatmul.mubr.bf16.gmra.mrb[4].mxu0 %v2613_v42  ;;  %v2691_v42 = vld [vmem:[%s3489_s0 + $0x58] ss:$36 sps:$4 sm:$0xff]  }
  0x2c   :  { %1192 = vmatmul.mubr.bf16.gmra.mrb[4].mxu1 %v2614_v43  ;;  %1102 = vmatprep.mubr.bf16.mxu0 %v2619_v48  ;;  %v2701_v43 = vld [vmem:[%s3488_s1 + $0x210] sm:$0xff]   ;;  %v2709_v48 = vld [vmem:[%s3488_s1 + $0x218] sm:$0xff]  }
  0x2d   :  { %1199 = vmatprep.mubr.bf16.mxu1 %v2621_v49  ;;  %2348 = vmatpush3.bf16.msra.mxu0 %v2626_v53  ;;  %v2710_v49 = vld [vmem:[%s3490_s5 + $0x18] sm:$0xff]   ;;  %v2718_v53 = vld [vmem:[%s3490_s5 + $0x20] sm:$0xff]  }
  0x2e   :  { %2412 = vmatpush3.bf16.msra.mxu1 %v2628_v55  ;;  %2349 = vmatprep.subr.bf16.mxu0 %v2635_v60  ;;  %v2705_v55 = vld [vmem:[%s3489_s0 + $0xf4] ss:$36 sps:$4 sm:$0xff]  }
  0x2f   :  { %2413 = vmatprep.subr.bf16.mxu1 %v2637_v62  ;;  %v2708_v60 = vld [vmem:[%s3489_s0 + $0xf0] ss:$36 sps:$4 sm:$0xff]  }
  0x30   :  { %v2711_v62 = vld [vmem:[%s3489_s0 + $0x134] ss:$36 sps:$4 sm:$0xff]  }
  0x31   :  { %2350 = vmatpush3.bf16.msra.mxu0 %v2636_v61  ;;  %v2734_v61 = vld [vmem:[%s3490_s5 + $0x30] sm:$0xff]  }
  0x32   :  { %2414 = vmatpush3.bf16.msra.mxu1 %v2638_v63  ;;  %2351 = vmatprep.subr.bf16.mxu0 %v2645_v3  ;;  %v2713_v63 = vld [vmem:[%s3489_s0 + $0x13c] ss:$36 sps:$4 sm:$0xff]  }
  0x33   :  { %1103 = vmatmul.mubr.bf16.gmra.mrb[8].mxu0 %v2623_v50  ;;  %2415 = vmatprep.subr.bf16.mxu1 %v2647_v6  ;;  %v2699_v50 = vld [vmem:[%s3489_s0 + $0xa0] ss:$36 sps:$4 sm:$0xff]   ;;  %v2716_v3 = vld [vmem:[%s3489_s0 + $0x138] ss:$36 sps:$4 sm:$0xff]  }
  0x34   :  { %1200 = vmatmul.mubr.bf16.gmra.mrb[8].mxu1 %v2624_v51  ;;  %1110 = vmatprep.mubr.bf16.mxu0 %v2629_v56  ;;  %v2700_v51 = vld [vmem:[%s3489_s0 + $0xa8] ss:$36 sps:$4 sm:$0xff]   ;;  %v2723_v6 = vld [vmem:[%s3489_s0 + $0x178] ss:$36 sps:$4 sm:$0xff]  }
  0x35   :  { %1207 = vmatprep.mubr.bf16.mxu1 %v2631_v57  ;;  %2352 = vmatpush3.bf16.msra.mxu0 %v2646_v5  ;;  %v2725_v56 = vld [vmem:[%s3488_s1 + $0x228] sm:$0xff]  }
  0x36   :  { %2416 = vmatpush3.bf16.msra.mxu1 %v2648_v7  ;;  %2353 = vmatprep.subr.bf16.mxu0 %v2655_v10  ;;  %v2726_v57 = vld [vmem:[%s3490_s5 + $0x28] sm:$0xff]   ;;  %v2724_v7 = vld [vmem:[%s3489_s0 + $0x180] ss:$36 sps:$4 sm:$0xff]  }
  0x37   :  { %2417 = vmatprep.subr.bf16.mxu1 %v2657_v13  ;;  %v2721_v5 = vld [vmem:[%s3489_s0 + $0x184] ss:$36 sps:$4 sm:$0xff]   ;;  %v2737_v13 = vld [vmem:[%s3489_s0 + $0x214] ss:$36 sps:$4 sm:$0xff]  }
  0x38   :  { %v2731_v10 = vld [vmem:[%s3489_s0 + $0x1c0] ss:$36 sps:$4 sm:$0xff]  }
  0x39   :  { %2354 = vmatpush3.bf16.msra.mxu0 %v2656_v11  ;;  %v2732_v11 = vld [vmem:[%s3489_s0 + $0x1c8] ss:$36 sps:$4 sm:$0xff]  }
  0x3a   :  { %2418 = vmatpush3.bf16.msra.mxu1 %v2658_v14  ;;  %2355 = vmatprep.subr.bf16.mxu0 %v2665_v18  ;;  %v2739_v14 = vld [vmem:[%s3489_s0 + $0x208] ss:$36 sps:$4 sm:$0xff]  }
  0x3b   :  { %1111 = vmatmul.mubr.bf16.gmra.mrb[12].mxu0 %v2633_v58  ;;  %2419 = vmatprep.subr.bf16.mxu1 %v2667_v20  ;;  %v2707_v58 = vld [vmem:[%s3489_s0 + $0xe8] ss:$36 sps:$4 sm:$0xff]   ;;  %v2747_v20 = vld [vmem:[%s3489_s0 + $0xb0] ss:$36 sps:$4 sm:$0xff]  }
  0x3c   :  { %1208 = vmatmul.mubr.bf16.gmra.mrb[12].mxu1 %v2634_v59  ;;  %1118 = vmatprep.mubr.bf16.mxu0 %v2639_v0  ;;  %v2733_v59 = vld [vmem:[%s3488_s1 + $0x230] sm:$0xff]   ;;  %v2741_v0 = vld [vmem:[%s3488_s1 + $0x238] sm:$0xff]   ;;  %v2745_v18 = vld [vmem:[%s3489_s0 + $0x68] ss:$36 sps:$4 sm:$0xff]  }
  0x3d   :  { %1215 = vmatprep.mubr.bf16.mxu1 %v2641_v1  ;;  %2356 = vmatpush3.bf16.msra.mxu0 %v2666_v19  ;;  %v2742_v1 = vld [vmem:[%s3490_s5 + $0x38] sm:$0xff]   ;;  %v2746_v19 = vld [vmem:[%s3491_s4 + $0x8] sm:$0xff]  }
  0x3e   :  { %2420 = vmatpush3.bf16.msra.mxu1 %v2668_v21  ;;  %2357 = vmatprep.subr.bf16.mxu0 %v2675_v26  ;;  %v2748_v21 = vld [vmem:[%s3491_s4 + $0x10] sm:$0xff]   ;;  %v2753_v26 = vld [vmem:[%s3489_s0 + $0x188] ss:$36 sps:$4 sm:$0xff]  }
  0x3f   :  { %2421 = vmatprep.subr.bf16.mxu1 %v2677_v28  ;;  %v2755_v28 = vld [vmem:[%s3489_s0 + $0x1d0] ss:$36 sps:$4 sm:$0xff]  }
  0x41   :  { %2358 = vmatpush3.bf16.msra.mxu0 %v2676_v27  ;;  %v2754_v27 = vld [vmem:[%s3491_s4 + $0x28] sm:$0xff]  }
  0x42   :  { %2422 = vmatpush3.bf16.msra.mxu1 %v2678_v29  ;;  %2503 = vmatprep.subr.bf16.mxu0 %v2685_v33  ;;  %v2756_v29 = vld [vmem:[%s3491_s4 + $0x30] sm:$0xff]  }
  0x43   :  { %1119 = vmatmul.mubr.bf16.gmra.mrb[16].mxu0 %v2643_v2  ;;  %2535 = vmatprep.subr.bf16.mxu1 %v2686_v34  ;;  %v2715_v2 = vld [vmem:[%s3489_s0 + $0x130] ss:$36 sps:$4 sm:$0xff]  }
  0x44   :  { %1216 = vmatmul.mubr.bf16.gmra.mrb[16].mxu1 %v2644_v4  ;;  %1126 = vmatprep.mubr.bf16.mxu0 %v2649_v8  ;;  %v2719_v4 = vld [vmem:[%s3489_s0 + $0x17c] ss:$36 sps:$4 sm:$0xff]   ;;  %v2727_v8 = vld [vmem:[%s3489_s0 + $0x1c4] ss:$36 sps:$4 sm:$0xff]  }
  0x45   :  { %1223 = vmatprep.mubr.bf16.mxu1 %v2651_v9  ;;  %v2729_v9 = vld [vmem:[%s3489_s0 + $0x1cc] ss:$36 sps:$4 sm:$0xff]  }
  0x4b   :  { %1127 = vmatmul.mubr.bf16.gmra.mrb[20].mxu0 %v2653_v12  ;;  %v2735_v12 = vld [vmem:[%s3489_s0 + $0x20c] ss:$36 sps:$4 sm:$0xff]  }
  0x4c   :  { %1224 = vmatmul.mubr.bf16.gmra.mrb[20].mxu1 %v2654_v15  ;;  %1134 = vmatprep.mubr.bf16.mxu0 %v2659_v16  ;;  %v2740_v15 = vld [vmem:[%s3489_s0 + $0x210] ss:$36 sps:$4 sm:$0xff]   ;;  %v2743_v16 = vld [vmem:[%s3489_s0 + $0x20] ss:$36 sps:$4 sm:$0xff]  }
  0x4d   :  { %1231 = vmatprep.mubr.bf16.mxu1 %v2661_v17  ;;  %v2744_v17 = vld [vmem:[%s3491_s4] sm:$0xff]  }
  0x53   :  { %1135 = vmatmul.mubr.bf16.gmra.mrb[24].mxu0 %v2663_v22  ;;  %v2749_v22 = vld [vmem:[%s3489_s0 + $0xf8] ss:$36 sps:$4 sm:$0xff]  }
  0x54   :  { %1232 = vmatmul.mubr.bf16.gmra.mrb[24].mxu1 %v2664_v23  ;;  %1142 = vmatprep.mubr.bf16.mxu0 %v2669_v24  ;;  %v2750_v23 = vld [vmem:[%s3491_s4 + $0x18] sm:$0xff]   ;;  %v2751_v24 = vld [vmem:[%s3489_s0 + $0x140] ss:$36 sps:$4 sm:$0xff]  }
  0x55   :  { %1239 = vmatprep.mubr.bf16.mxu1 %v2671_v25  ;;  %v2752_v25 = vld [vmem:[%s3491_s4 + $0x20] sm:$0xff]  }
  0x5b   :  { %1143 = vmatmul.mubr.bf16.gmra.mrb[28].mxu0 %v2673_v30  ;;  %v2757_v30 = vld [vmem:[%s3489_s0 + $0x218] ss:$36 sps:$4 sm:$0xff]  }
  0x5c   :  { %1240 = vmatmul.mubr.bf16.gmra.mrb[28].mxu1 %v2674_v31  ;;  %1280 = vmatprep.mubr.bf16.mxu0 %v2681_v32  ;;  %v2758_v31 = vld [vmem:[%s3491_s4 + $0x38] sm:$0xff]  }
  0x5d   :  { %1377 = vmatprep.mubr.bf16.mxu1 %v2684_v35 }
  0x63   :  { %1281 = vmatmul.mubr.bf16.vlgmr.msra.gmra.mrb[32].mxu0 %v2679_v36 }
  0x64   :  { %1378 = vmatmul.mubr.bf16.vlgmr.msra.gmra.mrb[32].mxu1 %v2682_v37  ;;  %2504 = vmatpush3.bf16.msra.mxu0 %v2685_v33 }
  0x65   :  { %2536 = vmatpush3.bf16.msra.mxu1 %v2686_v34  ;;  %1288 = vmatprep.mubr.bf16.mxu0 %v2687_v38 }
  0x66   :  { %1385 = vmatprep.mubr.bf16.mxu1 %v2689_v39  ;;  %2505 = vmatprep.subr.bf16.mxu0 %v2693_v40 }
  0x67   :  { %2537 = vmatprep.subr.bf16.mxu1 %v2694_v41 }
  0x68   :  { %2506 = vmatpush3.bf16.msra.mxu0 %v2693_v40 }
  0x69   :  { %2538 = vmatpush3.bf16.msra.mxu1 %v2694_v41  ;;  %2507 = vmatprep.subr.bf16.mxu0 %v2701_v43 }
  0x6a   :  { %2539 = vmatprep.subr.bf16.mxu1 %v2702_v44 }
  0x6b   :  { %1289 = vmatmul.mubr.bf16.gmra.mrb[36].mxu0 %v2691_v42 }
  0x6c   :  { %1386 = vmatmul.mubr.bf16.gmra.mrb[36].mxu1 %v2692_v45  ;;  %1296 = vmatprep.mubr.bf16.mxu0 %v2695_v46 }
  0x6d   :  { %1393 = vmatprep.mubr.bf16.mxu1 %v2697_v47  ;;  %2508 = vmatpush3.bf16.msra.mxu0 %v2701_v43 }
  0x6e   :  { %2540 = vmatpush3.bf16.msra.mxu1 %v2702_v44  ;;  %2509 = vmatprep.subr.bf16.mxu0 %v2709_v48 }
  0x6f   :  { %2541 = vmatprep.subr.bf16.mxu1 %v2710_v49 }
  0x71   :  { %2510 = vmatpush3.bf16.msra.mxu0 %v2709_v48 }
  0x72   :  { %2542 = vmatpush3.bf16.msra.mxu1 %v2710_v49  ;;  %2511 = vmatprep.subr.bf16.mxu0 %v2717_v52 }
  0x73   :  { %1297 = vmatmul.mubr.bf16.gmra.mrb[40].mxu0 %v2699_v50  ;;  %2543 = vmatprep.subr.bf16.mxu1 %v2718_v53 }
  0x74   :  { %1394 = vmatmul.mubr.bf16.gmra.mrb[40].mxu1 %v2700_v51  ;;  %1304 = vmatprep.mubr.bf16.mxu0 %v2703_v54 }
  0x75   :  { %1401 = vmatprep.mubr.bf16.mxu1 %v2705_v55  ;;  %2512 = vmatpush3.bf16.msra.mxu0 %v2717_v52 }
  0x76   :  { %2544 = vmatpush3.bf16.msra.mxu1 %v2718_v53  ;;  %2513 = vmatprep.subr.bf16.mxu0 %v2725_v56 }
  0x77   :  { %2545 = vmatprep.subr.bf16.mxu1 %v2726_v57 }
  0x79   :  { %2514 = vmatpush3.bf16.msra.mxu0 %v2725_v56 }
  0x7a   :  { %2546 = vmatpush3.bf16.msra.mxu1 %v2726_v57  ;;  %2515 = vmatprep.subr.bf16.mxu0 %v2733_v59 }
  0x7b   :  { %1305 = vmatmul.mubr.bf16.gmra.mrb[44].mxu0 %v2707_v58  ;;  %2547 = vmatprep.subr.bf16.mxu1 %v2734_v61 }
  0x7c   :  { %1402 = vmatmul.mubr.bf16.gmra.mrb[44].mxu1 %v2708_v60  ;;  %1312 = vmatprep.mubr.bf16.mxu0 %v2711_v62 }
  0x7d   :  { %1409 = vmatprep.mubr.bf16.mxu1 %v2713_v63  ;;  %2516 = vmatpush3.bf16.msra.mxu0 %v2733_v59 }
  0x7e   :  { %2548 = vmatpush3.bf16.msra.mxu1 %v2734_v61  ;;  %2517 = vmatprep.subr.bf16.mxu0 %v2741_v0 }
  0x7f   :  { %2549 = vmatprep.subr.bf16.mxu1 %v2742_v1 }
  0x81   :  { %2518 = vmatpush3.bf16.msra.mxu0 %v2741_v0 }
  0x82   :  { %2550 = vmatpush3.bf16.msra.mxu1 %v2742_v1 }
  0x83   :  { %1313 = vmatmul.mubr.bf16.gmra.mrb[48].mxu0 %v2715_v2 }
  0x84   :  { %1410 = vmatmul.mubr.bf16.gmra.mrb[48].mxu1 %v2716_v3  ;;  %1320 = vmatprep.mubr.bf16.mxu0 %v2719_v4 }
  0x85   :  { %1417 = vmatprep.mubr.bf16.mxu1 %v2721_v5 }
  0x8b   :  { %1321 = vmatmul.mubr.bf16.gmra.mrb[52].mxu0 %v2723_v6 }
  0x8c   :  { %1418 = vmatmul.mubr.bf16.gmra.mrb[52].mxu1 %v2724_v7  ;;  %1328 = vmatprep.mubr.bf16.mxu0 %v2727_v8 }
  0x8d   :  { %1425 = vmatprep.mubr.bf16.mxu1 %v2729_v9 }
  0x93   :  { %1329 = vmatmul.mubr.bf16.gmra.mrb[56].mxu0 %v2731_v10 }
  0x94   :  { %1426 = vmatmul.mubr.bf16.gmra.mrb[56].mxu1 %v2732_v11  ;;  %1336 = vmatprep.mubr.bf16.mxu0 %v2735_v12 }
  0x95   :  { %1433 = vmatprep.mubr.bf16.mxu1 %v2737_v13 }
  0x9b   :  { %1337 = vmatmul.mubr.bf16.gmra.mrb[60].mxu0 %v2739_v14 }
  0x9c   :  { %1434 = vmatmul.mubr.bf16.gmra.mrb[60].mxu1 %v2740_v15  ;;  %2519 = vmatprep.mubr.bf16.mxu0 %v2743_v16 }
  0x9d   :  { %2551 = vmatprep.mubr.bf16.mxu1 %v2744_v17 }
  0xa3   :  { %2520 = vmatmul.mubr.bf16.vlgmr.msra.gmra.mrb[64].mxu0 %v2745_v18 }
  0xa4   :  { %2552 = vmatmul.mubr.bf16.vlgmr.msra.gmra.mrb[64].mxu1 %v2746_v19  ;;  %2523 = vmatprep.mubr.bf16.mxu0 %v2747_v20 }
  0xa5   :  { %2555 = vmatprep.mubr.bf16.mxu1 %v2748_v21 }
  0xab   :  { %2524 = vmatmul.mubr.bf16.gmra.mrb[68].mxu0 %v2749_v22 }
  0xac   :  { %2556 = vmatmul.mubr.bf16.gmra.mrb[68].mxu1 %v2750_v23  ;;  %2527 = vmatprep.mubr.bf16.mxu0 %v2751_v24 }
  0xad   :  { %2559 = vmatprep.mubr.bf16.mxu1 %v2752_v25 }
  0xb3   :  { %2528 = vmatmul.mubr.bf16.gmra.mrb[72].mxu0 %v2753_v26 }
  0xb4   :  { %2560 = vmatmul.mubr.bf16.gmra.mrb[72].mxu1 %v2754_v27  ;;  %2531 = vmatprep.mubr.bf16.mxu0 %v2755_v28 }
  0xb5   :  { %2563 = vmatprep.mubr.bf16.mxu1 %v2756_v29 }
  0xbb   :  { %2532 = vmatmul.mubr.bf16.gmra.mrb[76].mxu0 %v2757_v30 }
  0xbc   :  { %2564 = vmatmul.mubr.bf16.gmra.mrb[76].mxu1 %v2758_v31 }
  0xf6   :  { %v2231_v32 = vpop.f32.mrb[0].mxu0 }
  0xf7   :  { %v2295_v33 = vpop.f32.mrb[0].mxu1  ;;  %v2232_v34 = vpop.f32.mrb[1].mxu0 }
  0xf8   :  { %v2233_v35 = vadd.f32 %v2232_v34, %v2231_v32  ;;  %v2296_v36 = vpop.f32.mrb[1].mxu1  ;;  %v2234_v37 = vpop.f32.mrb[2].mxu0 }
  0xf9   :  { %v2297_v38 = vadd.f32 %v2296_v36, %v2295_v33  ;;  %v2298_v39 = vpop.f32.mrb[2].mxu1  ;;  %v2235_v40 = vpop.f32.mrb[3].mxu0 }
  0xfa   :  { %v2236_v41 = vadd.f32 %v2235_v40, %v2234_v37  ;;  %v2299_v42 = vpop.f32.mrb[3].mxu1 }
  0xfb   :  { %v3284_v43 = vadd.f32 %v2297_v38, %v2233_v35  ;;  %v2300_v44 = vadd.f32 %v2299_v42, %v2298_v39 }
  0xfd   :  { %v3286_v45 = vadd.f32 %v2300_v44, %v2236_v41 }
  0xfe   :  { %v2237_v46 = vpop.f32.mrb[4].mxu0 }
  0xff   :  { %v2301_v47 = vpop.f32.mrb[4].mxu1  ;;  %v2238_v48 = vpop.f32.mrb[5].mxu0 }
 0x100   :  { %v2239_v49 = vadd.f32 %v2238_v48, %v2237_v46  ;;  %v2302_v50 = vpop.f32.mrb[5].mxu1  ;;  %v2240_v51 = vpop.f32.mrb[6].mxu0 }
 0x101   :  { %v2303_v52 = vadd.f32 %v2302_v50, %v2301_v47  ;;  %v2304_v53 = vpop.f32.mrb[6].mxu1  ;;  %v2241_v54 = vpop.f32.mrb[7].mxu0 }
 0x102   :  { %v2242_v55 = vadd.f32 %v2241_v54, %v2240_v51  ;;  %v2305_v56 = vpop.f32.mrb[7].mxu1 }
 0x103   :  { %v3288_v57 = vadd.f32 %v2303_v52, %v2239_v49  ;;  %v2306_v58 = vadd.f32 %v2305_v56, %v2304_v53 }
 0x105   :  { %v3290_v59 = vadd.f32 %v2306_v58, %v2242_v55 }
 0x106   :  { %v2243_v60 = vpop.f32.mrb[8].mxu0 }
 0x107   :  { %v2307_v61 = vpop.f32.mrb[8].mxu1  ;;  %v2244_v62 = vpop.f32.mrb[9].mxu0 }
 0x108   :  { %v2245_v63 = vadd.f32 %v2244_v62, %v2243_v60  ;;  %v2308_v0 = vpop.f32.mrb[9].mxu1  ;;  %v2246_v1 = vpop.f32.mrb[10].mxu0 }
 0x109   :  { %v2309_v2 = vadd.f32 %v2308_v0, %v2307_v61  ;;  %v2310_v3 = vpop.f32.mrb[10].mxu1  ;;  %v2247_v4 = vpop.f32.mrb[11].mxu0 }
 0x10a   :  { %v2248_v5 = vadd.f32 %v2247_v4, %v2246_v1  ;;  %v2311_v6 = vpop.f32.mrb[11].mxu1 }
 0x10b   :  { %v3292_v7 = vadd.f32 %v2309_v2, %v2245_v63  ;;  %v2312_v8 = vadd.f32 %v2311_v6, %v2310_v3 }
 0x10d   :  { %v3294_v9 = vadd.f32 %v2312_v8, %v2248_v5 }
 0x10e   :  { %v2249_v10 = vpop.f32.mrb[12].mxu0 }
 0x10f   :  { %v2313_v11 = vpop.f32.mrb[12].mxu1  ;;  %v2250_v12 = vpop.f32.mrb[13].mxu0 }
 0x110   :  { %v2251_v13 = vadd.f32 %v2250_v12, %v2249_v10  ;;  %v2314_v14 = vpop.f32.mrb[13].mxu1  ;;  %v2252_v15 = vpop.f32.mrb[14].mxu0 }
 0x111   :  { %v2315_v16 = vadd.f32 %v2314_v14, %v2313_v11  ;;  %v2316_v17 = vpop.f32.mrb[14].mxu1  ;;  %v2253_v18 = vpop.f32.mrb[15].mxu0 }
 0x112   :  { %v2254_v19 = vadd.f32 %v2253_v18, %v2252_v15  ;;  %v2317_v20 = vpop.f32.mrb[15].mxu1 }
 0x113   :  { %v3296_v21 = vadd.f32 %v2315_v16, %v2251_v13  ;;  %v2318_v22 = vadd.f32 %v2317_v20, %v2316_v17 }
 0x115   :  { %v3298_v23 = vadd.f32 %v2318_v22, %v2254_v19 }
 0x116   :  { %v2255_v24 = vpop.f32.mrb[16].mxu0 }
 0x117   :  { %v2319_v25 = vpop.f32.mrb[16].mxu1  ;;  %v2256_v26 = vpop.f32.mrb[17].mxu0 }
 0x118   :  { %v2257_v27 = vadd.f32 %v2256_v26, %v2255_v24  ;;  %v2320_v28 = vpop.f32.mrb[17].mxu1  ;;  %v2258_v29 = vpop.f32.mrb[18].mxu0 }
 0x119   :  { %v2321_v30 = vadd.f32 %v2320_v28, %v2319_v25  ;;  %v2322_v31 = vpop.f32.mrb[18].mxu1  ;;  %v2259_v32 = vpop.f32.mrb[19].mxu0 }
 0x11a   :  { %v2260_v33 = vadd.f32 %v2259_v32, %v2258_v29  ;;  %v2323_v34 = vpop.f32.mrb[19].mxu1 }
 0x11b   :  { %v3300_v35 = vadd.f32 %v2321_v30, %v2257_v27  ;;  %v2324_v36 = vadd.f32 %v2323_v34, %v2322_v31 }
 0x11d   :  { %v3302_v37 = vadd.f32 %v2324_v36, %v2260_v33 }
 0x11e   :  { %v2261_v38 = vpop.f32.mrb[20].mxu0 }
 0x11f   :  { %v2325_v39 = vpop.f32.mrb[20].mxu1  ;;  %v2262_v40 = vpop.f32.mrb[21].mxu0 }
 0x120   :  { %v2263_v41 = vadd.f32 %v2262_v40, %v2261_v38  ;;  %v2326_v42 = vpop.f32.mrb[21].mxu1  ;;  %v2264_v44 = vpop.f32.mrb[22].mxu0 }
 0x121   :  { %v2327_v46 = vadd.f32 %v2326_v42, %v2325_v39  ;;  %v2328_v47 = vpop.f32.mrb[22].mxu1  ;;  %v2265_v48 = vpop.f32.mrb[23].mxu0 }
 0x122   :  { %v2266_v49 = vadd.f32 %v2265_v48, %v2264_v44  ;;  %v2329_v50 = vpop.f32.mrb[23].mxu1 }
 0x123   :  { %v3304_v51 = vadd.f32 %v2327_v46, %v2263_v41  ;;  %v2330_v52 = vadd.f32 %v2329_v50, %v2328_v47 }
 0x125   :  { %v3306_v53 = vadd.f32 %v2330_v52, %v2266_v49 }
 0x126   :  { %v2267_v54 = vpop.f32.mrb[24].mxu0 }
 0x127   :  { %v2331_v55 = vpop.f32.mrb[24].mxu1  ;;  %v2268_v56 = vpop.f32.mrb[25].mxu0 }
 0x128   :  { %v2269_v58 = vadd.f32 %v2268_v56, %v2267_v54  ;;  %v2332_v60 = vpop.f32.mrb[25].mxu1  ;;  %v2270_v61 = vpop.f32.mrb[26].mxu0 }
 0x129   :  { %v2333_v62 = vadd.f32 %v2332_v60, %v2331_v55  ;;  %v2334_v63 = vpop.f32.mrb[26].mxu1  ;;  %v2271_v0 = vpop.f32.mrb[27].mxu0 }
 0x12a   :  { %v2272_v1 = vadd.f32 %v2271_v0, %v2270_v61  ;;  %v2335_v2 = vpop.f32.mrb[27].mxu1 }
 0x12b   :  { %v3308_v3 = vadd.f32 %v2333_v62, %v2269_v58  ;;  %v2336_v4 = vadd.f32 %v2335_v2, %v2334_v63 }
 0x12d   :  { %v3310_v5 = vadd.f32 %v2336_v4, %v2272_v1 }
 0x12e   :  { %v2273_v6 = vpop.f32.mrb[28].mxu0 }
 0x12f   :  { %v2337_v8 = vpop.f32.mrb[28].mxu1  ;;  %v2274_v10 = vpop.f32.mrb[29].mxu0 }
 0x130   :  { %v2275_v11 = vadd.f32 %v2274_v10, %v2273_v6  ;;  %v2338_v12 = vpop.f32.mrb[29].mxu1  ;;  %v2276_v13 = vpop.f32.mrb[30].mxu0 }
 0x131   :  { %v2339_v14 = vadd.f32 %v2338_v12, %v2337_v8  ;;  %v2340_v15 = vpop.f32.mrb[30].mxu1  ;;  %v2277_v16 = vpop.f32.mrb[31].mxu0 }
 0x132   :  { %v2278_v17 = vadd.f32 %v2277_v16, %v2276_v13  ;;  %v2341_v18 = vpop.f32.mrb[31].mxu1 }
 0x133   :  { %v3312_v19 = vadd.f32 %v2339_v14, %v2275_v11  ;;  %v2342_v20 = vadd.f32 %v2341_v18, %v2340_v15 }
 0x135   :  { %v3314_v22 = vadd.f32 %v2342_v20, %v2278_v17 }
 0x136   :  { %v2359_v24 = vpop.f32.mrb[32].mxu0 }
 0x137   :  { %v2423_v25 = vpop.f32.mrb[32].mxu1  ;;  %v2360_v26 = vpop.f32.mrb[33].mxu0 }
 0x138   :  { %v2361_v27 = vadd.f32 %v2360_v26, %v2359_v24  ;;  %v2424_v28 = vpop.f32.mrb[33].mxu1  ;;  %v2362_v29 = vpop.f32.mrb[34].mxu0 }
 0x139   :  { %v2425_v30 = vadd.f32 %v2424_v28, %v2423_v25  ;;  %v2426_v31 = vpop.f32.mrb[34].mxu1  ;;  %v2363_v32 = vpop.f32.mrb[35].mxu0 }
 0x13a   :  { %v1283_v33 = vadd.f32 %v2361_v27, %v3284_v43  ;;  %v2364_v34 = vadd.f32 %v2363_v32, %v2362_v29  ;;  %v2427_v36 = vpop.f32.mrb[35].mxu1 }
 0x13b   :  { %v2428_v38 = vadd.f32 %v2427_v36, %v2426_v31 }
 0x13c   :  { %v1286_v39 = vadd.f32 %v2364_v34, %v3286_v45  ;;  %v3318_v40 = vadd.f32 %v2425_v30, %v1283_v33 }
 0x13e   :  { %v2365_v41 = vpop.f32.mrb[36].mxu0  ;;  %v3320_v42 = vadd.f32 %v2428_v38, %v1286_v39 }
 0x13f   :  { %v2429_v44 = vpop.f32.mrb[36].mxu1  ;;  %v2366_v46 = vpop.f32.mrb[37].mxu0 }
 0x140   :  { %v2367_v47 = vadd.f32 %v2366_v46, %v2365_v41  ;;  %v2430_v48 = vpop.f32.mrb[37].mxu1  ;;  %v2368_v49 = vpop.f32.mrb[38].mxu0 }
 0x141   :  { %v2431_v50 = vadd.f32 %v2430_v48, %v2429_v44  ;;  %v2432_v52 = vpop.f32.mrb[38].mxu1  ;;  %v2369_v54 = vpop.f32.mrb[39].mxu0 }
 0x142   :  { %v1291_v43 = vadd.f32 %v2367_v47, %v3288_v57  ;;  %v2370_v55 = vadd.f32 %v2369_v54, %v2368_v49  ;;  %v2433_v56 = vpop.f32.mrb[39].mxu1 }
 0x143   :  { %v2434_v58 = vadd.f32 %v2433_v56, %v2432_v52 }
 0x144   :  { %v1294_v45 = vadd.f32 %v2370_v55, %v3290_v59  ;;  %v3324_v60 = vadd.f32 %v2431_v50, %v1291_v43 }
 0x146   :  { %v2371_v61 = vpop.f32.mrb[40].mxu0  ;;  %v3326_v62 = vadd.f32 %v2434_v58, %v1294_v45 }
 0x147   :  { %v2435_v63 = vpop.f32.mrb[40].mxu1  ;;  %v2372_v0 = vpop.f32.mrb[41].mxu0 }
 0x148   :  { %v2373_v1 = vadd.f32 %v2372_v0, %v2371_v61  ;;  %v2436_v2 = vpop.f32.mrb[41].mxu1  ;;  %v2374_v4 = vpop.f32.mrb[42].mxu0 }
 0x149   :  { %v2437_v6 = vadd.f32 %v2436_v2, %v2435_v63  ;;  %v2438_v8 = vpop.f32.mrb[42].mxu1  ;;  %v2375_v10 = vpop.f32.mrb[43].mxu0 }
 0x14a   :  { %v1299_v57 = vadd.f32 %v2373_v1, %v3292_v7  ;;  %v2376_v11 = vadd.f32 %v2375_v10, %v2374_v4  ;;  %v2439_v12 = vpop.f32.mrb[43].mxu1 }
 0x14b   :  { %v2440_v13 = vadd.f32 %v2439_v12, %v2438_v8 }
 0x14c   :  { %v1302_v59 = vadd.f32 %v2376_v11, %v3294_v9  ;;  %v3330_v14 = vadd.f32 %v2437_v6, %v1299_v57 }
 0x14e   :  { %v2377_v15 = vpop.f32.mrb[44].mxu0  ;;  %v3332_v16 = vadd.f32 %v2440_v13, %v1302_v59 }
 0x14f   :  { %v2441_v17 = vpop.f32.mrb[44].mxu1  ;;  %v2378_v18 = vpop.f32.mrb[45].mxu0 }
 0x150   :  { %v2379_v20 = vadd.f32 %v2378_v18, %v2377_v15  ;;  %v2442_v24 = vpop.f32.mrb[45].mxu1  ;;  %v2380_v25 = vpop.f32.mrb[46].mxu0 }
 0x151   :  { %v2443_v26 = vadd.f32 %v2442_v24, %v2441_v17  ;;  %v2444_v27 = vpop.f32.mrb[46].mxu1  ;;  %v2381_v28 = vpop.f32.mrb[47].mxu0 }
 0x152   :  { %v1307_v7 = vadd.f32 %v2379_v20, %v3296_v21  ;;  %v2382_v29 = vadd.f32 %v2381_v28, %v2380_v25  ;;  %v2445_v30 = vpop.f32.mrb[47].mxu1 }
 0x153   :  { %v2446_v31 = vadd.f32 %v2445_v30, %v2444_v27 }
 0x154   :  { %v1310_v9 = vadd.f32 %v2382_v29, %v3298_v23  ;;  %v3336_v32 = vadd.f32 %v2443_v26, %v1307_v7 }
 0x156   :  { %v2383_v33 = vpop.f32.mrb[48].mxu0  ;;  %v3338_v34 = vadd.f32 %v2446_v31, %v1310_v9 }
 0x157   :  { %v2447_v36 = vpop.f32.mrb[48].mxu1  ;;  %v2384_v38 = vpop.f32.mrb[49].mxu0 }
 0x158   :  { %v2385_v39 = vadd.f32 %v2384_v38, %v2383_v33  ;;  %v2448_v41 = vpop.f32.mrb[49].mxu1  ;;  %v2386_v44 = vpop.f32.mrb[50].mxu0 }
 0x159   :  { %v2449_v46 = vadd.f32 %v2448_v41, %v2447_v36  ;;  %v2450_v47 = vpop.f32.mrb[50].mxu1  ;;  %v2387_v48 = vpop.f32.mrb[51].mxu0 }
 0x15a   :  { %v1315_v21 = vadd.f32 %v2385_v39, %v3300_v35  ;;  %v2388_v49 = vadd.f32 %v2387_v48, %v2386_v44  ;;  %v2451_v50 = vpop.f32.mrb[51].mxu1 }
 0x15b   :  { %v2452_v52 = vadd.f32 %v2451_v50, %v2450_v47  ;;  %v3370_v50 = vld [vmem:[%s3493_s2] ss:$0 sm:$0xff] }
 0x15c   :  { %v1318_v23 = vadd.f32 %v2388_v49, %v3302_v37  ;;  %v3342_v54 = vadd.f32 %v2449_v46, %v1315_v21  ;;  %v3365_v21 = vld [vmem:[%s3492_s6] ss:$0 sm:$0xff] }
 0x15e   :  { %v2389_v43 = vpop.f32.mrb[52].mxu0  ;;  %v3344_v55 = vadd.f32 %v2452_v52, %v1318_v23 }
 0x15f   :  { %v2453_v56 = vpop.f32.mrb[52].mxu1  ;;  %v2390_v58 = vpop.f32.mrb[53].mxu0 }
 0x160   :  { %v2391_v45 = vadd.f32 %v2390_v58, %v2389_v43  ;;  %v2454_v61 = vpop.f32.mrb[53].mxu1  ;;  %v2392_v63 = vpop.f32.mrb[54].mxu0 }
 0x161   :  { %v2455_v0 = vadd.f32 %v2454_v61, %v2453_v56  ;;  %v2456_v1 = vpop.f32.mrb[54].mxu1  ;;  %v2393_v2 = vpop.f32.mrb[55].mxu0  ;;  %v3383_v56 = vld [vmem:[%s3495_s3] ss:$0 sm:$0xff] }
 0x162   :  { %v1323_v35 = vadd.f32 %v2391_v45, %v3304_v51  ;;  %v2394_v4 = vadd.f32 %v2393_v2, %v2392_v63  ;;  %v2457_v6 = vpop.f32.mrb[55].mxu1 }
 0x163   :  { %v2458_v8 = vadd.f32 %v2457_v6, %v2456_v1 }
 0x164   :  { %v1326_v37 = vadd.f32 %v2394_v4, %v3306_v53  ;;  %v3348_v10 = vadd.f32 %v2455_v0, %v1323_v35 }
 0x166   :  { %v2395_v57 = vpop.f32.mrb[56].mxu0  ;;  %v3350_v11 = vadd.f32 %v2458_v8, %v1326_v37 }
 0x167   :  { %v2459_v12 = vpop.f32.mrb[56].mxu1  ;;  %v2396_v13 = vpop.f32.mrb[57].mxu0 }
 0x168   :  { %v2397_v59 = vadd.f32 %v2396_v13, %v2395_v57  ;;  %v2460_v15 = vpop.f32.mrb[57].mxu1  ;;  %v2398_v17 = vpop.f32.mrb[58].mxu0 }
 0x169   :  { %v2461_v18 = vadd.f32 %v2460_v15, %v2459_v12  ;;  %v2462_v20 = vpop.f32.mrb[58].mxu1  ;;  %v2399_v24 = vpop.f32.mrb[59].mxu0 }
 0x16a   :  { %v1331_v51 = vadd.f32 %v2397_v59, %v3308_v3  ;;  %v2400_v25 = vadd.f32 %v2399_v24, %v2398_v17  ;;  %v2463_v26 = vpop.f32.mrb[59].mxu1 }
 0x16b   :  { %v2464_v27 = vadd.f32 %v2463_v26, %v2462_v20 }
 0x16c   :  { %v1334_v53 = vadd.f32 %v2400_v25, %v3310_v5  ;;  %v3354_v28 = vadd.f32 %v2461_v18, %v1331_v51 }
 0x16e   :  { %v2401_v7 = vpop.f32.mrb[60].mxu0  ;;  %v3356_v29 = vadd.f32 %v2464_v27, %v1334_v53 }
 0x16f   :  { %v2465_v30 = vpop.f32.mrb[60].mxu1  ;;  %v2402_v31 = vpop.f32.mrb[61].mxu0 }
 0x170   :  { %v2403_v9 = vadd.f32 %v2402_v31, %v2401_v7  ;;  %v2466_v33 = vpop.f32.mrb[61].mxu1  ;;  %v2404_v36 = vpop.f32.mrb[62].mxu0 }
 0x171   :  { %v2467_v38 = vadd.f32 %v2466_v33, %v2465_v30  ;;  %v2468_v39 = vpop.f32.mrb[62].mxu1  ;;  %v2405_v41 = vpop.f32.mrb[63].mxu0 }
 0x172   :  { %v1339_v3 = vadd.f32 %v2403_v9, %v3312_v19  ;;  %v2406_v44 = vadd.f32 %v2405_v41, %v2404_v36  ;;  %v2469_v46 = vpop.f32.mrb[63].mxu1 }
 0x173   :  { %v2470_v47 = vadd.f32 %v2469_v46, %v2468_v39 }
 0x174   :  { %v1342_v5 = vadd.f32 %v2406_v44, %v3314_v22  ;;  %v3360_v48 = vadd.f32 %v2467_v38, %v1339_v3  ;;  %v3378_v22 = vld [vmem:[%s3494_s7] ss:$0 sm:$0xff] }
 0x176   :  { %v2521_v49 = vpop.f32.mrb[64].mxu0  ;;  %v3372_v52 = vadd.f32 %v2470_v47, %v1342_v5 }
 0x177   :  { %v1485_v19 = vadd.f32 %v2521_v49, %v3324_v60  ;;  %v2553_v23 = vpop.f32.mrb[64].mxu1  ;;  %v1476_v43 = vpop.f32.mrb[65].mxu0 }
 0x178   :  { %v1819_v58 = vmul.f32 %v2553_v23, %v3365_v21  ;;  %v1477_v45 = vadd.f32 %v1476_v43, %v3318_v40  ;;  %v1747_v61 = vpop.f32.mrb[65].mxu1  ;;  %v2522_v63 = vpop.f32.mrb[66].mxu0 }
 0x179   :  { %v1548_v60 = vmul.f32 %v3370_v50, %v1485_v19  ;;  %v1817_v0 = vmul.f32 %v3365_v21, %v1747_v61  ;;  %v1488_v1 = vadd.f32 %v2522_v63, %v3326_v62  ;;  %v2554_v2 = vpop.f32.mrb[66].mxu1  ;;  %v1479_v35 = vpop.f32.mrb[67].mxu0 }
 0x17a   :  { %v1842_v4 = vadd.f32 %v3378_v22, %v1819_v58  ;;  %v1546_v6 = vmul.f32 %v3370_v50, %v1477_v45  ;;  %v1820_v8 = vmul.f32 %v2554_v2, %v3365_v21  ;;  %v1480_v37 = vadd.f32 %v1479_v35, %v3320_v42  ;;  %v1750_v57 = vpop.f32.mrb[67].mxu1 }
 0x17b   :  { %v1571_v40 = vadd.f32 %v3383_v56, %v1548_v60  ;;  %v1840_v12 = vadd.f32 %v3378_v22, %v1817_v0  ;;  %v1549_v13 = vmul.f32 %v3370_v50, %v1488_v1  ;;  %v1818_v59 = vmul.f32 %v3365_v21, %v1750_v57 }
 0x17c   :  { %v1569_v62 = vadd.f32 %v3383_v56, %v1546_v6  ;;  %v1547_v15 = vmul.f32 %v3370_v50, %v1480_v37  ;;  %v1843_v20 = vadd.f32 %v3378_v22, %v1820_v8 }
 0x17d   :  { %v1858_v17 = vadd.f32 %v1842_v4, %v1571_v40  ;;  %v1572_v18 = vadd.f32 %v3383_v56, %v1549_v13  ;;  %v1841_v51 = vadd.f32 %v3378_v22, %v1818_v59 }
 0x17e   :  { %v1856_v24 = vadd.f32 %v1840_v12, %v1569_v62  ;;  %v1570_v42 = vadd.f32 %v3383_v56, %v1547_v15  ;;  %v2525_v25 = vpop.f32.mrb[68].mxu0 }
 0x17f   :  { %v1874_v26 = vmax.f32 %v1858_v17, 0.0  ;;  %v1859_v27 = vadd.f32 %v1843_v20, %v1572_v18  ;;  %v1501_v53 = vadd.f32 %v2525_v25, %v3336_v32  ;;  %v2557_v7 = vpop.f32.mrb[68].mxu1  ;;  %v1492_v30 = vpop.f32.mrb[69].mxu0 }
 0x180   :  { %v1872_v31 = vmax.f32 %v1856_v24, 0.0  ;;  %v1857_v9 = vadd.f32 %v1841_v51, %v1570_v42  ;;  %v1823_v33 = vmul.f32 %v2557_v7, %v3365_v21  ;;  %v1493_v36 = vadd.f32 %v1492_v30, %v3330_v14  ;;  %v1763_v38 = vpop.f32.mrb[69].mxu1  ;;  %v2526_v39 = vpop.f32.mrb[70].mxu0 }
 0x181   :  { %v1875_v41 = vmax.f32 %v1859_v27, 0.0  ;;  %v1552_v3 = vmul.f32 %v3370_v50, %v1501_v53  ;;  %v1821_v44 = vmul.f32 %v3365_v21, %v1763_v38  ;;  %v1504_v46 = vadd.f32 %v2526_v39, %v3338_v34  ;;  %v2558_v47 = vpop.f32.mrb[70].mxu1  ;;  %v1495_v5 = vpop.f32.mrb[71].mxu0 }
 0x182   :  { %v1873_v32 = vmax.f32 %v1857_v9, 0.0  ;;  %v1846_v49 = vadd.f32 %v3378_v22, %v1823_v33  ;;  %v1550_v19 = vmul.f32 %v3370_v50, %v1493_v36  ;;  %v1824_v23 = vmul.f32 %v2558_v47, %v3365_v21  ;;  %v1766_v43 = vpop.f32.mrb[71].mxu1 }
 0x183   :  { %v2176_v14 = vpack.c.bf16 %v1875_v41, %v1874_v26  ;;  %v1575_v58 = vadd.f32 %v3383_v56, %v1552_v3  ;;  %v1844_v45 = vadd.f32 %v3378_v22, %v1821_v44  ;;  %v1553_v61 = vmul.f32 %v3370_v50, %v1504_v46 }
 0x184   :  { %v2171_v63 = vpack.c.bf16 %v1873_v32, %v1872_v31  ;;  %v1573_v34 = vadd.f32 %v3383_v56, %v1550_v19  ;;  %v1496_v60 = vadd.f32 %v1495_v5, %v3332_v16  ;;  %v1847_v2 = vadd.f32 %v3378_v22, %v1824_v23 }
 0x185   :  { %2208 = vst [vmem:[%s3496_s8 + $0x8] sm:$0xff] %v2176_v14   ;;  %v1862_v0 = vadd.f32 %v1846_v49, %v1575_v58  ;;  %v1576_v1 = vadd.f32 %v3383_v56, %v1553_v61  ;;  %v1822_v35 = vmul.f32 %v3365_v21, %v1766_v43 }
 0x186   :  { %2172 = vst [vmem:[%s3496_s8] sm:$0xff] %v2171_v63   ;;  %v1860_v4 = vadd.f32 %v1844_v45, %v1573_v34  ;;  %v1551_v6 = vmul.f32 %v3370_v50, %v1496_v60  ;;  %v2529_v8 = vpop.f32.mrb[72].mxu0 }
 0x187   :  { %v1878_v16 = vmax.f32 %v1862_v0, 0.0  ;;  %v1863_v37 = vadd.f32 %v1847_v2, %v1576_v1  ;;  %v1517_v57 = vadd.f32 %v2529_v8, %v3348_v10  ;;  %v2561_v40 = vpop.f32.mrb[72].mxu1  ;;  %v1508_v12 = vpop.f32.mrb[73].mxu0  ;;  %v1845_v59 = vadd.f32 %v3378_v22, %v1822_v35 }
 0x188   :  { %v1574_v13 = vadd.f32 %v3383_v56, %v1551_v6  ;;  %v1827_v62 = vmul.f32 %v2561_v40, %v3365_v21  ;;  %v1509_v15 = vadd.f32 %v1508_v12, %v3342_v54  ;;  %v1779_v17 = vpop.f32.mrb[73].mxu1  ;;  %v2530_v18 = vpop.f32.mrb[74].mxu0  ;;  %v1876_v36 = vmax.f32 %v1860_v4, 0.0 }
 0x189   :  { %v1879_v20 = vmax.f32 %v1863_v37, 0.0  ;;  %v1556_v24 = vmul.f32 %v3370_v50, %v1517_v57  ;;  %v1825_v42 = vmul.f32 %v3365_v21, %v1779_v17  ;;  %v1520_v51 = vadd.f32 %v2530_v18, %v3350_v11  ;;  %v2562_v10 = vpop.f32.mrb[74].mxu1  ;;  %v1511_v25 = vpop.f32.mrb[75].mxu0 }
 0x18a   :  { %v1861_v26 = vadd.f32 %v1845_v59, %v1574_v13  ;;  %v1850_v27 = vadd.f32 %v3378_v22, %v1827_v62  ;;  %v1554_v53 = vmul.f32 %v3370_v50, %v1509_v15  ;;  %v1828_v7 = vmul.f32 %v2562_v10, %v3365_v21  ;;  %v1782_v30 = vpop.f32.mrb[75].mxu1 }
 0x18b   :  { %v2186_v54 = vpack.c.bf16 %v1879_v20, %v1878_v16  ;;  %v1579_v31 = vadd.f32 %v3383_v56, %v1556_v24  ;;  %v1848_v9 = vadd.f32 %v3378_v22, %v1825_v42  ;;  %v1557_v33 = vmul.f32 %v3370_v50, %v1520_v51 }
 0x18c   :  { %v1877_v38 = vmax.f32 %v1861_v26, 0.0  ;;  %v1577_v11 = vadd.f32 %v3383_v56, %v1554_v53  ;;  %v1512_v39 = vadd.f32 %v1511_v25, %v3344_v55  ;;  %v1851_v44 = vadd.f32 %v3378_v22, %v1828_v7 }
 0x18d   :  { %2210 = vst [vmem:[%s3496_s8 + $0x18] sm:$0xff] %v2186_v54   ;;  %v1866_v41 = vadd.f32 %v1850_v27, %v1579_v31  ;;  %v1580_v3 = vadd.f32 %v3383_v56, %v1557_v33  ;;  %v1826_v46 = vmul.f32 %v3365_v21, %v1782_v30 }
 0x18e   :  { %v2181_v47 = vpack.c.bf16 %v1877_v38, %v1876_v36  ;;  %v1864_v5 = vadd.f32 %v1848_v9, %v1577_v11  ;;  %v1555_v32 = vmul.f32 %v3370_v50, %v1512_v39  ;;  %v2533_v49 = vpop.f32.mrb[76].mxu0 }
 0x18f   :  { %v1882_v19 = vmax.f32 %v1866_v41, 0.0  ;;  %v1867_v23 = vadd.f32 %v1851_v44, %v1580_v3  ;;  %v1533_v55 = vadd.f32 %v2533_v49, %v3360_v48  ;;  %v2565_v43 = vpop.f32.mrb[76].mxu1  ;;  %v1524_v14 = vpop.f32.mrb[77].mxu0  ;;  %v1849_v45 = vadd.f32 %v3378_v22, %v1826_v46 }
 0x190   :  { %2209 = vst [vmem:[%s3496_s8 + $0x10] sm:$0xff] %v2181_v47   ;;  %v1578_v58 = vadd.f32 %v3383_v56, %v1555_v32  ;;  %v1831_v61 = vmul.f32 %v2565_v43, %v3365_v21  ;;  %v1525_v63 = vadd.f32 %v1524_v14, %v3354_v28  ;;  %v1795_v34 = vpop.f32.mrb[77].mxu1  ;;  %v2534_v60 = vpop.f32.mrb[78].mxu0  ;;  %v1880_v59 = vmax.f32 %v1864_v5, 0.0 }
 0x191   :  { %v1883_v0 = vmax.f32 %v1867_v23, 0.0  ;;  %v1560_v1 = vmul.f32 %v3370_v50, %v1533_v55  ;;  %v1829_v48 = vmul.f32 %v3365_v21, %v1795_v34  ;;  %v1536_v2 = vadd.f32 %v2534_v60, %v3372_v52  ;;  %v2566_v35 = vpop.f32.mrb[78].mxu1  ;;  %v1527_v4 = vpop.f32.mrb[79].mxu0 }
 0x192   :  { %v1865_v6 = vadd.f32 %v1849_v45, %v1578_v58  ;;  %v1854_v8 = vadd.f32 %v3378_v22, %v1831_v61  ;;  %v1558_v16 = vmul.f32 %v3370_v50, %v1525_v63  ;;  %v1832_v37 = vmul.f32 %v2566_v35, %v3365_v21  ;;  %v1798_v57 = vpop.f32.mrb[79].mxu1 }
 0x193   :  { %v2196_v28 = vpack.c.bf16 %v1883_v0, %v1882_v19  ;;  %v1583_v40 = vadd.f32 %v3383_v56, %v1560_v1  ;;  %v1852_v12 = vadd.f32 %v3378_v22, %v1829_v48  ;;  %v1561_v13 = vmul.f32 %v3370_v50, %v1536_v2 }
 0x194   :  { %v1881_v62 = vmax.f32 %v1865_v6, 0.0  ;;  %v1581_v52 = vadd.f32 %v3383_v56, %v1558_v16  ;;  %v1528_v15 = vadd.f32 %v1527_v4, %v3356_v29  ;;  %v1855_v20 = vadd.f32 %v3378_v22, %v1832_v37 }
 0x195   :  { %2212 = vst [vmem:[%s3496_s8 + $0x28] sm:$0xff] %v2196_v28   ;;  %v1870_v17 = vadd.f32 %v1854_v8, %v1583_v40  ;;  %v1584_v18 = vadd.f32 %v3383_v56, %v1561_v13  ;;  %v1830_v24 = vmul.f32 %v3365_v21, %v1798_v57 }
 0x196   :  { %v2191_v42 = vpack.c.bf16 %v1881_v62, %v1880_v59  ;;  %v1868_v51 = vadd.f32 %v1852_v12, %v1581_v52  ;;  %v1559_v10 = vmul.f32 %v3370_v50, %v1528_v15 }
 0x197   :  { %v1871_v25 = vadd.f32 %v1855_v20, %v1584_v18  ;;  %v1853_v26 = vadd.f32 %v3378_v22, %v1830_v24  ;;  %v1886_v27 = vmax.f32 %v1870_v17, 0.0 }
 0x198   :  { %2211 = vst [vmem:[%s3496_s8 + $0x20] sm:$0xff] %v2191_v42   ;;  %v1582_v29 = vadd.f32 %v3383_v56, %v1559_v10  ;;  %v1884_v54 = vmax.f32 %v1868_v51, 0.0 }
 0x199   :  { %v1887_v53 = vmax.f32 %v1871_v25, 0.0 }
 0x19a   :  { %v1869_v7 = vadd.f32 %v1853_v26, %v1582_v29 }
 0x19b   :  { %v2206_v30 = vpack.c.bf16 %v1887_v53, %v1886_v27 }
 0x19c   :  { %v1885_v31 = vmax.f32 %v1869_v7, 0.0 }
 0x19d   :  { %2214 = vst [vmem:[%s3496_s8 + $0x38] sm:$0xff] %v2206_v30  }
 0x19e   :  { %v2201_v21 = vpack.c.bf16 %v1885_v31, %v1884_v54 }
 0x1a0   :  { %2213 = vst [vmem:[%s3496_s8 + $0x30] sm:$0xff] %v2201_v21  }

// kernel: _lambda_.33
= control target key start
LH: loop header
LB: loop body
LE: loop exit
PB: predicated region body
PF: predicated region fallthrough
CT: control target
= control target key end

     0   :  { %s1659_s1 = inlined_call_operand.vmem [shape: bf16[1152,128], index: 1, kind: input, shape index: {}]   ;;  %s1660_s0 = inlined_call_operand.vmem [shape: bf16[32,1152], index: 0, kind: input, shape index: {}]   ;;  %s1661_s2 = inlined_call_operand.vmem [shape: f32[1,128], index: 2, kind: input, shape index: {}]   ;;  %s1662_s3 = inlined_call_operand.vmem [shape: f32[1,128], index: 3, kind: input, shape index: {}]   ;;  %s1663_s4 = inlined_call_operand.vmem [shape: bf16[32,128], index: 4, kind: output, shape index: {}]  }
   0x1   :  { %v1254_v0 = vld [vmem:[%s1659_s1 + $0x40] sm:$0xff]   ;;  %v1258_v4 = vld [vmem:[%s1659_s1 + $0x48] sm:$0xff]   ;;  %v1262_v8 = vld [vmem:[%s1659_s1 + $0x50] sm:$0xff]  }
   0x2   :  { %v1255_v1 = vld [vmem:[%s1659_s1 + $0xc0] sm:$0xff]   ;;  %1112 = vmatprep.subr.bf16.mxu0 %v1254_v0  ;;  %v1259_v5 = vld [vmem:[%s1659_s1 + $0xc8] sm:$0xff]   ;;  %v1263_v9 = vld [vmem:[%s1659_s1 + $0xd0] sm:$0xff]  }
   0x3   :  { %v1256_v2 = vld [vmem:[%s1659_s1] sm:$0xff]   ;;  %1140 = vmatprep.subr.bf16.mxu1 %v1255_v1  ;;  %v1260_v6 = vld [vmem:[%s1659_s1 + $0x8] sm:$0xff]   ;;  %v1264_v10 = vld [vmem:[%s1659_s1 + $0x10] sm:$0xff]  }
   0x4   :  { %v1257_v3 = vld [vmem:[%s1659_s1 + $0x80] sm:$0xff]   ;;  %1113 = vmatpush3.bf16.msra.mxu0 %v1256_v2  ;;  %v1261_v7 = vld [vmem:[%s1659_s1 + $0x88] sm:$0xff]   ;;  %v1265_v11 = vld [vmem:[%s1659_s1 + $0x90] sm:$0xff]  }
   0x5   :  { %1141 = vmatpush3.bf16.msra.mxu1 %v1257_v3  ;;  %1114 = vmatprep.subr.bf16.mxu0 %v1258_v4  ;;  %v1266_v12 = vld [vmem:[%s1659_s1 + $0x58] sm:$0xff]   ;;  %v1270_v16 = vld [vmem:[%s1659_s1 + $0x60] sm:$0xff]   ;;  %v1274_v20 = vld [vmem:[%s1659_s1 + $0x68] sm:$0xff]  }
   0x6   :  { %1142 = vmatprep.subr.bf16.mxu1 %v1259_v5  ;;  %v1267_v13 = vld [vmem:[%s1659_s1 + $0xd8] sm:$0xff]   ;;  %v1271_v17 = vld [vmem:[%s1659_s1 + $0xe0] sm:$0xff]   ;;  %v1275_v21 = vld [vmem:[%s1659_s1 + $0xe8] sm:$0xff]  }
   0x7   :  { %v1268_v14 = vld [vmem:[%s1659_s1 + $0x18] sm:$0xff]   ;;  %v1272_v18 = vld [vmem:[%s1659_s1 + $0x20] sm:$0xff]   ;;  %v1276_v22 = vld [vmem:[%s1659_s1 + $0x28] sm:$0xff]  }
   0x8   :  { %1115 = vmatpush3.bf16.msra.mxu0 %v1260_v6  ;;  %v1269_v15 = vld [vmem:[%s1659_s1 + $0x98] sm:$0xff]   ;;  %v1273_v19 = vld [vmem:[%s1659_s1 + $0xa0] sm:$0xff]   ;;  %v1277_v23 = vld [vmem:[%s1659_s1 + $0xa8] sm:$0xff]  }
   0x9   :  { %1143 = vmatpush3.bf16.msra.mxu1 %v1261_v7  ;;  %1116 = vmatprep.subr.bf16.mxu0 %v1262_v8  ;;  %v1278_v24 = vld [vmem:[%s1659_s1 + $0x70] sm:$0xff]   ;;  %v1282_v28 = vld [vmem:[%s1659_s1 + $0x78] sm:$0xff]   ;;  %v1286_v32 = vld [vmem:[%s1660_s0] ss:$36 sps:$4 sm:$0xff]  }
   0xa   :  { %1144 = vmatprep.subr.bf16.mxu1 %v1263_v9  ;;  %v1279_v25 = vld [vmem:[%s1659_s1 + $0xf0] sm:$0xff]   ;;  %v1283_v29 = vld [vmem:[%s1659_s1 + $0xf8] sm:$0xff]   ;;  %v1288_v33 = vld [vmem:[%s1660_s0 + $0x4] ss:$36 sps:$4 sm:$0xff]  }
   0xb   :  { %v1280_v26 = vld [vmem:[%s1659_s1 + $0x30] sm:$0xff]   ;;  %v1284_v30 = vld [vmem:[%s1659_s1 + $0x38] sm:$0xff]   ;;  %v1289_v34 = vld [vmem:[%s1660_s0 + $0x8] ss:$36 sps:$4 sm:$0xff]   ;;  %738 = vmatprep.mubr.bf16.mxu0 %v1288_v33 }
   0xc   :  { %1117 = vmatpush3.bf16.msra.mxu0 %v1264_v10  ;;  %v1281_v27 = vld [vmem:[%s1659_s1 + $0xb0] sm:$0xff]   ;;  %v1285_v31 = vld [vmem:[%s1659_s1 + $0xb8] sm:$0xff]   ;;  %v1292_v36 = vld [vmem:[%s1659_s1 + $0x140] sm:$0xff]  }
   0xd   :  { %1145 = vmatpush3.bf16.msra.mxu1 %v1265_v11  ;;  %1118 = vmatprep.subr.bf16.mxu0 %v1266_v12  ;;  %v1291_v35 = vld [vmem:[%s1660_s0 + $0xc] ss:$36 sps:$4 sm:$0xff]   ;;  %v1293_v37 = vld [vmem:[%s1659_s1 + $0x100] sm:$0xff]   ;;  %v1304_v48 = vld [vmem:[%s1659_s1 + $0x158] sm:$0xff]  }
   0xe   :  { %1146 = vmatprep.subr.bf16.mxu1 %v1267_v13  ;;  %787 = vmatprep.mubr.bf16.mxu1 %v1291_v35  ;;  %v1294_v38 = vld [vmem:[%s1659_s1 + $0x1c0] sm:$0xff]   ;;  %v1296_v40 = vld [vmem:[%s1659_s1 + $0x148] sm:$0xff]   ;;  %v1300_v44 = vld [vmem:[%s1659_s1 + $0x150] sm:$0xff]  }
   0xf   :  { %v1295_v39 = vld [vmem:[%s1659_s1 + $0x180] sm:$0xff]   ;;  %v1297_v41 = vld [vmem:[%s1659_s1 + $0x108] sm:$0xff]   ;;  %v1301_v45 = vld [vmem:[%s1659_s1 + $0x110] sm:$0xff]  }
  0x10   :  { %1119 = vmatpush3.bf16.msra.mxu0 %v1268_v14  ;;  %v1298_v42 = vld [vmem:[%s1659_s1 + $0x1c8] sm:$0xff]   ;;  %v1302_v46 = vld [vmem:[%s1659_s1 + $0x1d0] sm:$0xff]   ;;  %v1305_v49 = vld [vmem:[%s1659_s1 + $0x118] sm:$0xff]  }
  0x11   :  { %1147 = vmatpush3.bf16.msra.mxu1 %v1269_v15  ;;  %1120 = vmatprep.subr.bf16.mxu0 %v1270_v16  ;;  %v1299_v43 = vld [vmem:[%s1659_s1 + $0x188] sm:$0xff]   ;;  %v1303_v47 = vld [vmem:[%s1659_s1 + $0x190] sm:$0xff]   ;;  %v1306_v50 = vld [vmem:[%s1659_s1 + $0x1d8] sm:$0xff]  }
  0x12   :  { %1148 = vmatprep.subr.bf16.mxu1 %v1271_v17  ;;  %v1307_v51 = vld [vmem:[%s1659_s1 + $0x198] sm:$0xff]   ;;  %v1308_v52 = vld [vmem:[%s1659_s1 + $0x160] sm:$0xff]   ;;  %v1312_v56 = vld [vmem:[%s1659_s1 + $0x168] sm:$0xff]  }
  0x13   :  { %v1309_v53 = vld [vmem:[%s1659_s1 + $0x120] sm:$0xff]   ;;  %v1313_v57 = vld [vmem:[%s1660_s0 + $0x4c] ss:$36 sps:$4 sm:$0xff]   ;;  %v1315_v58 = vld [vmem:[%s1660_s0 + $0x54] ss:$36 sps:$4 sm:$0xff]  }
  0x14   :  { %1121 = vmatpush3.bf16.msra.mxu0 %v1272_v18  ;;  %v1310_v54 = vld [vmem:[%s1659_s1 + $0x1e0] sm:$0xff]   ;;  %v1317_v59 = vld [vmem:[%s1659_s1 + $0x128] sm:$0xff]   ;;  %v1319_v61 = vld [vmem:[%s1660_s0 + $0x50] ss:$36 sps:$4 sm:$0xff]  }
  0x15   :  { %1149 = vmatpush3.bf16.msra.mxu1 %v1273_v19  ;;  %1122 = vmatprep.subr.bf16.mxu0 %v1274_v20  ;;  %v1311_v55 = vld [vmem:[%s1659_s1 + $0x1a0] sm:$0xff]   ;;  %v1318_v60 = vld [vmem:[%s1660_s0 + $0x48] ss:$36 sps:$4 sm:$0xff]   ;;  %v1322_v0 = vld [vmem:[%s1659_s1 + $0x170] sm:$0xff]  }
  0x16   :  { %1150 = vmatprep.subr.bf16.mxu1 %v1275_v21  ;;  %v1320_v62 = vld [vmem:[%s1659_s1 + $0x1e8] sm:$0xff]   ;;  %v1323_v1 = vld [vmem:[%s1659_s1 + $0x130] sm:$0xff]   ;;  %v1326_v4 = vld [vmem:[%s1659_s1 + $0x178] sm:$0xff]  }
  0x17   :  { %v1321_v63 = vld [vmem:[%s1659_s1 + $0x1a8] sm:$0xff]   ;;  %v1324_v2 = vld [vmem:[%s1659_s1 + $0x1f0] sm:$0xff]   ;;  %v1327_v5 = vld [vmem:[%s1659_s1 + $0x138] sm:$0xff]  }
  0x18   :  { %1123 = vmatpush3.bf16.msra.mxu0 %v1276_v22  ;;  %v1325_v3 = vld [vmem:[%s1659_s1 + $0x1b0] sm:$0xff]   ;;  %v1328_v6 = vld [vmem:[%s1659_s1 + $0x1f8] sm:$0xff]   ;;  %v1333_v10 = vld [vmem:[%s1659_s1 + $0x200] sm:$0xff]  }
  0x19   :  { %1151 = vmatpush3.bf16.msra.mxu1 %v1277_v23  ;;  %1124 = vmatprep.subr.bf16.mxu0 %v1278_v24  ;;  %v1329_v7 = vld [vmem:[%s1660_s0 + $0x10] ss:$36 sps:$4 sm:$0xff]   ;;  %v1332_v9 = vld [vmem:[%s1659_s1 + $0x1b8] sm:$0xff]   ;;  %v1337_v13 = vld [vmem:[%s1659_s1 + $0x208] sm:$0xff]  }
  0x1a   :  { %1152 = vmatprep.subr.bf16.mxu1 %v1279_v25  ;;  %v1331_v8 = vld [vmem:[%s1660_s0 + $0x14] ss:$36 sps:$4 sm:$0xff]   ;;  %v1336_v12 = vld [vmem:[%s1660_s0 + $0x1c] ss:$36 sps:$4 sm:$0xff]   ;;  %v1342_v17 = vld [vmem:[%s1660_s0 + $0x64] ss:$36 sps:$4 sm:$0xff]  }
  0x1b   :  { %v1334_v11 = vld [vmem:[%s1660_s0 + $0x18] ss:$36 sps:$4 sm:$0xff]   ;;  %v1341_v16 = vld [vmem:[%s1659_s1 + $0x210] sm:$0xff]   ;;  %v1344_v18 = vld [vmem:[%s1660_s0 + $0x60] ss:$36 sps:$4 sm:$0xff]  }
  0x1c   :  { %1125 = vmatpush3.bf16.msra.mxu0 %v1280_v26  ;;  %v1338_v14 = vld [vmem:[%s1660_s0 + $0x5c] ss:$36 sps:$4 sm:$0xff]   ;;  %v1347_v22 = vld [vmem:[%s1659_s1 + $0x228] sm:$0xff]   ;;  %v1348_v23 = vld [vmem:[%s1659_s1 + $0x230] sm:$0xff]  }
  0x1d   :  { %1153 = vmatpush3.bf16.msra.mxu1 %v1281_v27  ;;  %1126 = vmatprep.subr.bf16.mxu0 %v1282_v28  ;;  %v1340_v15 = vld [vmem:[%s1660_s0 + $0x58] ss:$36 sps:$4 sm:$0xff]   ;;  %v1346_v20 = vld [vmem:[%s1659_s1 + $0x220] sm:$0xff]   ;;  %v1351_v25 = vld [vmem:[%s1660_s0 + $0x68] ss:$36 sps:$4 sm:$0xff]  }
  0x1e   :  { %1154 = vmatprep.subr.bf16.mxu1 %v1283_v29  ;;  %v1345_v19 = vld [vmem:[%s1659_s1 + $0x218] sm:$0xff]   ;;  %v1350_v21 = vld [vmem:[%s1660_s0 + $0x20] ss:$36 sps:$4 sm:$0xff]  }
  0x1f   :  { %v1349_v24 = vld [vmem:[%s1659_s1 + $0x238] sm:$0xff]  }
  0x20   :  { %1127 = vmatpush3.bf16.msra.mxu0 %v1284_v30 }
  0x21   :  { %1155 = vmatpush3.bf16.msra.mxu1 %v1285_v31  ;;  %1168 = vmatprep.subr.bf16.mxu0 %v1292_v36 }
  0x22   :  { %1196 = vmatprep.subr.bf16.mxu1 %v1294_v38 }
  0x23   :  { %739 = vmatmul.mubr.bf16.vlgmr.msra.gmra.mrb[0].mxu0 %v1286_v32 }
  0x24   :  { %788 = vmatmul.mubr.bf16.vlgmr.msra.gmra.mrb[0].mxu1 %v1289_v34  ;;  %1169 = vmatpush3.bf16.msra.mxu0 %v1293_v37 }
  0x25   :  { %1197 = vmatpush3.bf16.msra.mxu1 %v1295_v39  ;;  %1170 = vmatprep.subr.bf16.mxu0 %v1296_v40 }
  0x26   :  { %1198 = vmatprep.subr.bf16.mxu1 %v1298_v42  ;;  %746 = vmatprep.mubr.bf16.mxu0 %v1313_v57 }
  0x27   :  { %795 = vmatprep.mubr.bf16.mxu1 %v1315_v58 }
  0x28   :  { %1171 = vmatpush3.bf16.msra.mxu0 %v1297_v41 }
  0x29   :  { %1199 = vmatpush3.bf16.msra.mxu1 %v1299_v43  ;;  %1172 = vmatprep.subr.bf16.mxu0 %v1300_v44 }
  0x2a   :  { %1200 = vmatprep.subr.bf16.mxu1 %v1302_v46 }
  0x2b   :  { %747 = vmatmul.mubr.bf16.gmra.mrb[4].mxu0 %v1318_v60 }
  0x2c   :  { %1173 = vmatpush3.bf16.msra.mxu0 %v1301_v45  ;;  %796 = vmatmul.mubr.bf16.gmra.mrb[4].mxu1 %v1319_v61 }
  0x2d   :  { %1201 = vmatpush3.bf16.msra.mxu1 %v1303_v47  ;;  %1174 = vmatprep.subr.bf16.mxu0 %v1304_v48 }
  0x2e   :  { %1202 = vmatprep.subr.bf16.mxu1 %v1306_v50  ;;  %836 = vmatprep.mubr.bf16.mxu0 %v1331_v8 }
  0x2f   :  { %885 = vmatprep.mubr.bf16.mxu1 %v1336_v12 }
  0x30   :  { %1175 = vmatpush3.bf16.msra.mxu0 %v1305_v49 }
  0x31   :  { %1203 = vmatpush3.bf16.msra.mxu1 %v1307_v51  ;;  %1176 = vmatprep.subr.bf16.mxu0 %v1308_v52 }
  0x32   :  { %1204 = vmatprep.subr.bf16.mxu1 %v1310_v54 }
  0x34   :  { %1177 = vmatpush3.bf16.msra.mxu0 %v1309_v53 }
  0x35   :  { %1205 = vmatpush3.bf16.msra.mxu1 %v1311_v55  ;;  %1178 = vmatprep.subr.bf16.mxu0 %v1312_v56 }
  0x36   :  { %1206 = vmatprep.subr.bf16.mxu1 %v1320_v62 }
  0x38   :  { %1179 = vmatpush3.bf16.msra.mxu0 %v1317_v59 }
  0x39   :  { %1207 = vmatpush3.bf16.msra.mxu1 %v1321_v63  ;;  %1180 = vmatprep.subr.bf16.mxu0 %v1322_v0 }
  0x3a   :  { %1208 = vmatprep.subr.bf16.mxu1 %v1324_v2 }
  0x3c   :  { %1181 = vmatpush3.bf16.msra.mxu0 %v1323_v1 }
  0x3d   :  { %1209 = vmatpush3.bf16.msra.mxu1 %v1325_v3  ;;  %1182 = vmatprep.subr.bf16.mxu0 %v1326_v4 }
  0x3e   :  { %1210 = vmatprep.subr.bf16.mxu1 %v1328_v6 }
  0x40   :  { %1183 = vmatpush3.bf16.msra.mxu0 %v1327_v5 }
  0x41   :  { %1211 = vmatpush3.bf16.msra.mxu1 %v1332_v9  ;;  %1234 = vmatprep.subr.bf16.mxu0 %v1333_v10 }
  0x43   :  { %837 = vmatmul.mubr.bf16.vlgmr.msra.gmra.mrb[8].mxu0 %v1329_v7 }
  0x44   :  { %1235 = vmatpush3.bf16.msra.mxu0 %v1333_v10  ;;  %886 = vmatmul.mubr.bf16.vlgmr.msra.gmra.mrb[8].mxu1 %v1334_v11 }
  0x45   :  { %1236 = vmatprep.subr.bf16.mxu0 %v1337_v13  ;;  %844 = vmatprep.mubr.bf16.mxu0 %v1338_v14 }
  0x46   :  { %893 = vmatprep.mubr.bf16.mxu1 %v1342_v17 }
  0x48   :  { %1237 = vmatpush3.bf16.msra.mxu0 %v1337_v13 }
  0x49   :  { %1238 = vmatprep.subr.bf16.mxu0 %v1341_v16 }
  0x4b   :  { %845 = vmatmul.mubr.bf16.gmra.mrb[12].mxu0 %v1340_v15 }
  0x4c   :  { %1239 = vmatpush3.bf16.msra.mxu0 %v1341_v16  ;;  %894 = vmatmul.mubr.bf16.gmra.mrb[12].mxu1 %v1344_v18 }
  0x4d   :  { %1240 = vmatprep.subr.bf16.mxu0 %v1345_v19  ;;  %1250 = vmatprep.mubr.bf16.mxu0 %v1350_v21 }
  0x50   :  { %1241 = vmatpush3.bf16.msra.mxu0 %v1345_v19 }
  0x51   :  { %1242 = vmatprep.subr.bf16.mxu0 %v1346_v20 }
  0x54   :  { %1243 = vmatpush3.bf16.msra.mxu0 %v1346_v20 }
  0x55   :  { %1244 = vmatprep.subr.bf16.mxu0 %v1347_v22 }
  0x58   :  { %1245 = vmatpush3.bf16.msra.mxu0 %v1347_v22 }
  0x59   :  { %1246 = vmatprep.subr.bf16.mxu0 %v1348_v23 }
  0x5c   :  { %1247 = vmatpush3.bf16.msra.mxu0 %v1348_v23  ;;  %v1091_v23 = vld [vmem:[%s1661_s2] ss:$0 sm:$0xff] }
  0x5d   :  { %1248 = vmatprep.subr.bf16.mxu0 %v1349_v24 }
  0x60   :  { %1249 = vmatpush3.bf16.msra.mxu0 %v1349_v24 }
  0x63   :  { %1251 = vmatmul.mubr.bf16.vlgmr.msra.gmra.mrb[16].mxu0 %v1351_v25 }
  0xf6   :  { %v1128_v26 = vpop.f32.mrb[0].mxu0 }
  0xf7   :  { %v1156_v27 = vpop.f32.mrb[0].mxu1  ;;  %v1129_v28 = vpop.f32.mrb[1].mxu0 }
  0xf8   :  { %v1130_v29 = vadd.f32 %v1129_v28, %v1128_v26  ;;  %v1157_v30 = vpop.f32.mrb[1].mxu1  ;;  %v1131_v31 = vpop.f32.mrb[2].mxu0  ;;  %v1092_v26 = vld [vmem:[%s1662_s3] ss:$0 sm:$0xff] }
  0xf9   :  { %v1158_v32 = vadd.f32 %v1157_v30, %v1156_v27  ;;  %v1159_v33 = vpop.f32.mrb[2].mxu1  ;;  %v1132_v34 = vpop.f32.mrb[3].mxu0 }
  0xfa   :  { %v1133_v35 = vadd.f32 %v1132_v34, %v1131_v31  ;;  %v1160_v36 = vpop.f32.mrb[3].mxu1 }
  0xfb   :  { %v790_v37 = vadd.f32 %v1158_v32, %v1130_v29  ;;  %v1161_v38 = vadd.f32 %v1160_v36, %v1159_v33 }
  0xfd   :  { %v793_v39 = vadd.f32 %v1161_v38, %v1133_v35 }
  0xfe   :  { %v1134_v40 = vpop.f32.mrb[4].mxu0 }
  0xff   :  { %v1162_v41 = vpop.f32.mrb[4].mxu1  ;;  %v1135_v42 = vpop.f32.mrb[5].mxu0 }
 0x100   :  { %v1163_v43 = vpop.f32.mrb[5].mxu1  ;;  %v1136_v44 = vadd.f32 %v1135_v42, %v1134_v40  ;;  %v1137_v46 = vpop.f32.mrb[6].mxu0 }
 0x101   :  { %v1164_v45 = vadd.f32 %v1163_v43, %v1162_v41  ;;  %v1165_v47 = vpop.f32.mrb[6].mxu1  ;;  %v1138_v48 = vpop.f32.mrb[7].mxu0 }
 0x102   :  { %v1166_v49 = vpop.f32.mrb[7].mxu1  ;;  %v1139_v51 = vadd.f32 %v1138_v48, %v1137_v46 }
 0x103   :  { %v798_v50 = vadd.f32 %v1164_v45, %v1136_v44  ;;  %v1167_v52 = vadd.f32 %v1166_v49, %v1165_v47 }
 0x105   :  { %v801_v53 = vadd.f32 %v1167_v52, %v1139_v51 }
 0x116   :  { %v1184_v54 = vpop.f32.mrb[8].mxu0 }
 0x117   :  { %v1185_v55 = vpop.f32.mrb[9].mxu0  ;;  %v1212_v58 = vpop.f32.mrb[8].mxu1 }
 0x118   :  { %v1186_v56 = vadd.f32 %v1185_v55, %v1184_v54  ;;  %v1187_v57 = vpop.f32.mrb[10].mxu0  ;;  %v1213_v62 = vpop.f32.mrb[9].mxu1 }
 0x119   :  { %v1188_v59 = vpop.f32.mrb[11].mxu0  ;;  %v1214_v63 = vadd.f32 %v1213_v62, %v1212_v58  ;;  %v1215_v0 = vpop.f32.mrb[10].mxu1 }
 0x11a   :  { %v839_v60 = vadd.f32 %v1186_v56, %v790_v37  ;;  %v1189_v61 = vadd.f32 %v1188_v59, %v1187_v57  ;;  %v1216_v2 = vpop.f32.mrb[11].mxu1 }
 0x11b   :  { %v1217_v3 = vadd.f32 %v1216_v2, %v1215_v0 }
 0x11c   :  { %v842_v1 = vadd.f32 %v1189_v61, %v793_v39  ;;  %v888_v4 = vadd.f32 %v1214_v63, %v839_v60 }
 0x11e   :  { %v1190_v5 = vpop.f32.mrb[12].mxu0  ;;  %v891_v7 = vadd.f32 %v1217_v3, %v842_v1 }
 0x11f   :  { %v1191_v6 = vpop.f32.mrb[13].mxu0  ;;  %v1218_v10 = vpop.f32.mrb[12].mxu1 }
 0x120   :  { %v1192_v8 = vadd.f32 %v1191_v6, %v1190_v5  ;;  %v1193_v9 = vpop.f32.mrb[14].mxu0  ;;  %v1219_v14 = vpop.f32.mrb[13].mxu1 }
 0x121   :  { %v1194_v11 = vpop.f32.mrb[15].mxu0  ;;  %v1220_v15 = vadd.f32 %v1219_v14, %v1218_v10  ;;  %v1221_v16 = vpop.f32.mrb[14].mxu1 }
 0x122   :  { %v847_v12 = vadd.f32 %v1192_v8, %v798_v50  ;;  %v1195_v13 = vadd.f32 %v1194_v11, %v1193_v9  ;;  %v1222_v18 = vpop.f32.mrb[15].mxu1 }
 0x123   :  { %v1223_v19 = vadd.f32 %v1222_v18, %v1221_v16 }
 0x124   :  { %v850_v17 = vadd.f32 %v1195_v13, %v801_v53  ;;  %v896_v20 = vadd.f32 %v1220_v15, %v847_v12 }
 0x126   :  { %v899_v21 = vadd.f32 %v1223_v19, %v850_v17 }
 0x136   :  { %v1252_v22 = vpop.f32.mrb[16].mxu0 }
 0x137   :  { %v945_v24 = vadd.f32 %v1252_v22, %v896_v20  ;;  %v936_v25 = vpop.f32.mrb[17].mxu0 }
 0x138   :  { %v937_v27 = vadd.f32 %v936_v25, %v888_v4  ;;  %v1253_v28 = vpop.f32.mrb[18].mxu0 }
 0x139   :  { %v960_v29 = vmul.f32 %v1091_v23, %v945_v24  ;;  %v948_v30 = vadd.f32 %v1253_v28, %v899_v21  ;;  %v939_v31 = vpop.f32.mrb[19].mxu0 }
 0x13a   :  { %v958_v32 = vmul.f32 %v1091_v23, %v937_v27  ;;  %v940_v33 = vadd.f32 %v939_v31, %v891_v7 }
 0x13b   :  { %v971_v34 = vadd.f32 %v1092_v26, %v960_v29  ;;  %v961_v35 = vmul.f32 %v1091_v23, %v948_v30 }
 0x13c   :  { %v969_v36 = vadd.f32 %v1092_v26, %v958_v32  ;;  %v959_v37 = vmul.f32 %v1091_v23, %v940_v33 }
 0x13d   :  { %v972_v38 = vadd.f32 %v1092_v26, %v961_v35  ;;  %v975_v40 = vmax.f32 %v971_v34, 0.0 }
 0x13e   :  { %v970_v39 = vadd.f32 %v1092_v26, %v959_v37  ;;  %v973_v42 = vmax.f32 %v969_v36, 0.0 }
 0x13f   :  { %v976_v41 = vmax.f32 %v972_v38, 0.0 }
 0x140   :  { %v974_v43 = vmax.f32 %v970_v39, 0.0 }
 0x141   :  { %v1109_v44 = vpack.c.bf16 %v976_v41, %v975_v40 }
 0x142   :  { %v1104_v45 = vpack.c.bf16 %v974_v43, %v973_v42 }
 0x143   :  { %1111 = vst [vmem:[%s1663_s4 + $0x8] sm:$0xff] %v1109_v44  }
 0x144   :  { %1105 = vst [vmem:[%s1663_s4] sm:$0xff] %v1104_v45  }

// kernel: _lambda_.39
= control target key start
LH: loop header
LB: loop body
LE: loop exit
PB: predicated region body
PF: predicated region fallthrough
CT: control target
= control target key end

     0   :  { %v247_v1 = vmov 0.0   ;;  %vm248_vm0 = vmmov 0   ;;  %s307_s0 = inlined_call_operand.vmem [shape: bf16[2,16,128], index: 0, kind: input, shape index: {}]   ;;  %s308_s1 = inlined_call_operand.vmem [shape: bf16[128,128], index: 1, kind: input, shape index: {}]   ;;  %s309_s2 = inlined_call_operand.hbm [shape: f32[2,128], index: 2, kind: output, shape index: {}]  }
   0x1   :  { %v215_v0 = vld [vmem:[%s308_s1] sm:$0xff]   ;;  %192 = vmatprep.subr.bf16.mxu0 %v247_v1  ;;  %v216_v2 = vld [vmem:[%s308_s1 + $0x8] sm:$0xff]   ;;  %208 = vmatprep.mubr.msk.bf16.mxu0 %vm248_vm0, %v247_v1  ;;  %v217_v3 = vld [vmem:[%s308_s1 + $0x10] sm:$0xff]  }
   0x2   :  { %193 = vmatpush3.bf16.msra.mxu0 %v215_v0  ;;  %v175_v4 = vld [vmem:[%s307_s0] sm:$0xff]   ;;  %v182_v5 = vld [vmem:[%s307_s0 + $0x8] sm:$0xff]  }
   0x3   :  { %194 = vmatprep.subr.bf16.mxu0 %v247_v1 }
   0x6   :  { %195 = vmatpush3.bf16.msra.mxu0 %v216_v2 }
   0x7   :  { %196 = vmatprep.subr.bf16.mxu0 %v247_v1 }
   0x8   :  { %7 = vsyncpa [#allocation3], 0  ;;  %v176_v6 = vunpack.c.l.bf16 %v175_v4  ;;  %v177_v7 = vunpack.c.h.bf16 %v175_v4  ;;  %v180_v8 = vunpack.c.l.bf16 %v182_v5  ;;  %v181_v9 = vunpack.c.h.bf16 %v182_v5  ;;  %v218_v10 = vld [vmem:[%s308_s1 + $0x18] sm:$0xff]   ;;  %v219_v15 = vld [vmem:[%s308_s1 + $0x20] sm:$0xff]   ;;  %s249_s28 = smov [#allocation2]  }
   0x9   :  { %v220_v20 = vld [vmem:[%s308_s1 + $0x28] sm:$0xff]   ;;  %v221_v25 = vld [vmem:[%s308_s1 + $0x30] sm:$0xff]   ;;  %v222_v30 = vld [vmem:[%s308_s1 + $0x38] sm:$0xff]   ;;  %vm59_vm1 = vcmask 1041409   ;;  %s158_s29 = sshll.u32 %s249_s28, 4  ;;  %s159_s29 = int_to_ptr.vmem [resolvable:$true] %s158_s29 }
   0xa   :  { %197 = vmatpush3.bf16.msra.mxu0 %v217_v3  ;;  %v21_v11 = vadd.f32 %v177_v7, %v176_v6  ;;  %v28_v12 = vadd.f32 %v181_v9, %v180_v8  ;;  %s223_s30 = scalar_lea.vmem %s159_s29, 32  ;;  %p228_p1 = scmp.lt.s32.totalorder %s159_s29, %s159_s29 }
   0xb   :  { %198 = vmatprep.subr.bf16.mxu0 %v247_v1  ;;  %p224_p0 = scmp.ne.s32.totalorder %s159_s29, %s223_s30  ;;  %p229_p2 = scmp.lt.s32.totalorder %s223_s30, %s223_s30 }
   0xc   :  { %v22_v13 = vrot.slane %v21_v11, 4  ;;  %v29_v14 = vrot.slane %v28_v12, 4 }
   0xd   :  { %p230_p3 = por %p229_p2, %p228_p1 }
   0xe   :  { %199 = vmatpush3.bf16.msra.mxu0 %v218_v10  ;;  %v23_v16 = vadd.f32 %v22_v13, %v21_v11  ;;  %v30_v17 = vadd.f32 %v29_v14, %v28_v12 }
   0xf   :  { %200 = vmatprep.subr.bf16.mxu0 %v247_v1  ;;  %p231_p4 = pnand %p230_p3, %p224_p0 }
  0x10   :  { %v24_v18 = vrot.slane %v23_v16, 2  ;;  %v31_v19 = vrot.slane %v30_v17, 2 }
  0x12   :  { %201 = vmatpush3.bf16.msra.mxu0 %v219_v15  ;;  %v25_v21 = vadd.f32 %v24_v18, %v23_v16  ;;  %v32_v22 = vadd.f32 %v31_v19, %v30_v17 }
  0x13   :  { %202 = vmatprep.subr.bf16.mxu0 %v247_v1 }
  0x14   :  { %v26_v23 = vrot.slane %v25_v21, 1  ;;  %v33_v24 = vrot.slane %v32_v22, 1 }
  0x16   :  { %203 = vmatpush3.bf16.msra.mxu0 %v220_v20  ;;  %v27_v26 = vadd.f32 %v26_v23, %v25_v21  ;;  %v34_v27 = vadd.f32 %v33_v24, %v32_v22 }
  0x17   :  { %204 = vmatprep.subr.bf16.mxu0 %v247_v1 }
  0x18   :  { %v35_v28 = vmul.f32 0.0625, %v27_v26  ;;  %v36_v29 = vmul.f32 0.0625, %v34_v27 }
  0x1a   :  { %205 = vmatpush3.bf16.msra.mxu0 %v221_v25  ;;  %v37_v31 = vpack.c.bf16 %v35_v28, %v35_v28  ;;  %v38_v32 = vpack.c.bf16 %v36_v29, %v36_v29 }
  0x1b   :  { %206 = vmatprep.subr.bf16.mxu0 %v247_v1 }
  0x1c   :  { %v57_v33 = vunpack.c.l.b16 %v37_v31  ;;  %v58_v34 = vunpack.c.l.b16 %v38_v32 }
  0x1e   :  { %207 = vmatpush3.bf16.msra.mxu0 %v222_v30  ;;  %v60_v35 = vsel %vm59_vm1, %v58_v34, %v57_v33 }
  0x1f   :  { %v61_v36 = vpack.c.b16 %v60_v35, %v60_v35 }
  0x21   :  { %209 = vmatmul.mubr.bf16.vlgmr.msra.gmra.mrb[0].mxu0 %v61_v36 }
  0xf4   :  { %v145_v37 = vpop.f32.mrb[0].mxu0 }
  0xf5   :  { %151 = vst [vmem:[#allocation2] sm:$0x3] %v145_v37  ;;  %v210_v38 = vpop.f32.mrb[1].mxu0 }
  0xf6   :  { %v148_v39 = vpop.f32.mrb[2].mxu0 }
  0xf7   :  { %234 = shalt.err (!%p231_p4)
}
  0xf8   :  { %s235_s4 = scalar_lea.hbm %s309_s2, 32 }
  0xf9   :  { %p236_p5 = scmp.ne.s32.totalorder %s309_s2, %s235_s4  ;;  %p239_p6 = scmp.lt.u32.totalorder %s235_s4, %s309_s2 }
  0xfb   :  { %p241_p7 = pnand %p239_p6, %p236_p5 }
  0xfd   :  { %244 = shalt.err (!%p241_p7)
}
  0xfe   :  { %161 = dma.vmem_to_hbm [thread:$0]  %s159_s29, 32, %s309_s2, [#allocation3]   ;;  %v211_v40 = vpop.f32.mrb[3].mxu0 }
  0xff   :  { %245 = dma.done.wait [#allocation3], 32  }
 0x100   :  { %246 = vsyncadd [#allocation3], 4294967264 }
 0x101   :  { %165 = vsyncpa [#allocation3], 1 }

// kernel: _lambda_.34
= control target key start
LH: loop header
LB: loop body
LE: loop exit
PB: predicated region body
PF: predicated region fallthrough
CT: control target
= control target key end

     0   :  { %s1934_s1 = inlined_call_operand.vmem [shape: bf16[1152,128], index: 1, kind: input, shape index: {}]   ;;  %s1935_s0 = inlined_call_operand.vmem [shape: bf16[32,1152], index: 0, kind: input, shape index: {}]   ;;  %s1936_s5 = inlined_call_operand.vmem [shape: bf16[128,128], index: 5, kind: input, shape index: {}]   ;;  %s1937_s4 = inlined_call_operand.vmem [shape: bf16[32,128], index: 4, kind: input, shape index: {}]   ;;  %s1938_s6 = inlined_call_operand.vmem [shape: f32[1,128], index: 6, kind: input, shape index: {}]   ;;  %s1939_s2 = inlined_call_operand.vmem [shape: f32[1,128], index: 2, kind: input, shape index: {}]   ;;  %s1940_s7 = inlined_call_operand.vmem [shape: f32[1,128], index: 7, kind: input, shape index: {}]   ;;  %s1941_s3 = inlined_call_operand.vmem [shape: f32[1,128], index: 3, kind: input, shape index: {}]   ;;  %s1942_s8 = inlined_call_operand.vmem [shape: bf16[32,128], index: 8, kind: output, shape index: {}]  }
   0x1   :  { %v1463_v0 = vld [vmem:[%s1934_s1 + $0x40] sm:$0xff]   ;;  %v1467_v4 = vld [vmem:[%s1934_s1 + $0x48] sm:$0xff]   ;;  %v1471_v8 = vld [vmem:[%s1934_s1 + $0x50] sm:$0xff]  }
   0x2   :  { %v1464_v1 = vld [vmem:[%s1934_s1 + $0xc0] sm:$0xff]   ;;  %1291 = vmatprep.subr.bf16.mxu0 %v1463_v0  ;;  %v1468_v5 = vld [vmem:[%s1934_s1 + $0xc8] sm:$0xff]   ;;  %v1472_v9 = vld [vmem:[%s1934_s1 + $0xd0] sm:$0xff]  }
   0x3   :  { %v1465_v2 = vld [vmem:[%s1934_s1] sm:$0xff]   ;;  %1319 = vmatprep.subr.bf16.mxu1 %v1464_v1  ;;  %v1469_v6 = vld [vmem:[%s1934_s1 + $0x8] sm:$0xff]   ;;  %v1473_v10 = vld [vmem:[%s1934_s1 + $0x10] sm:$0xff]  }
   0x4   :  { %v1466_v3 = vld [vmem:[%s1934_s1 + $0x80] sm:$0xff]   ;;  %1292 = vmatpush3.bf16.msra.mxu0 %v1465_v2  ;;  %v1470_v7 = vld [vmem:[%s1934_s1 + $0x88] sm:$0xff]   ;;  %v1474_v11 = vld [vmem:[%s1934_s1 + $0x90] sm:$0xff]  }
   0x5   :  { %1320 = vmatpush3.bf16.msra.mxu1 %v1466_v3  ;;  %1293 = vmatprep.subr.bf16.mxu0 %v1467_v4  ;;  %v1475_v12 = vld [vmem:[%s1934_s1 + $0x58] sm:$0xff]   ;;  %v1479_v16 = vld [vmem:[%s1934_s1 + $0x60] sm:$0xff]   ;;  %v1483_v20 = vld [vmem:[%s1934_s1 + $0x68] sm:$0xff]  }
   0x6   :  { %1321 = vmatprep.subr.bf16.mxu1 %v1468_v5  ;;  %v1476_v13 = vld [vmem:[%s1934_s1 + $0xd8] sm:$0xff]   ;;  %v1480_v17 = vld [vmem:[%s1934_s1 + $0xe0] sm:$0xff]   ;;  %v1484_v21 = vld [vmem:[%s1934_s1 + $0xe8] sm:$0xff]  }
   0x7   :  { %v1477_v14 = vld [vmem:[%s1934_s1 + $0x18] sm:$0xff]   ;;  %v1481_v18 = vld [vmem:[%s1934_s1 + $0x20] sm:$0xff]   ;;  %v1485_v22 = vld [vmem:[%s1934_s1 + $0x28] sm:$0xff]  }
   0x8   :  { %1294 = vmatpush3.bf16.msra.mxu0 %v1469_v6  ;;  %v1478_v15 = vld [vmem:[%s1934_s1 + $0x98] sm:$0xff]   ;;  %v1482_v19 = vld [vmem:[%s1934_s1 + $0xa0] sm:$0xff]   ;;  %v1486_v23 = vld [vmem:[%s1934_s1 + $0xa8] sm:$0xff]  }
   0x9   :  { %1322 = vmatpush3.bf16.msra.mxu1 %v1470_v7  ;;  %1295 = vmatprep.subr.bf16.mxu0 %v1471_v8  ;;  %v1487_v24 = vld [vmem:[%s1934_s1 + $0x70] sm:$0xff]   ;;  %v1491_v28 = vld [vmem:[%s1934_s1 + $0x78] sm:$0xff]   ;;  %v1495_v32 = vld [vmem:[%s1935_s0] ss:$36 sps:$4 sm:$0xff]  }
   0xa   :  { %1323 = vmatprep.subr.bf16.mxu1 %v1472_v9  ;;  %v1488_v25 = vld [vmem:[%s1934_s1 + $0xf0] sm:$0xff]   ;;  %v1492_v29 = vld [vmem:[%s1934_s1 + $0xf8] sm:$0xff]   ;;  %v1497_v33 = vld [vmem:[%s1935_s0 + $0x4] ss:$36 sps:$4 sm:$0xff]  }
   0xb   :  { %v1489_v26 = vld [vmem:[%s1934_s1 + $0x30] sm:$0xff]   ;;  %v1493_v30 = vld [vmem:[%s1934_s1 + $0x38] sm:$0xff]   ;;  %v1498_v34 = vld [vmem:[%s1935_s0 + $0x8] ss:$36 sps:$4 sm:$0xff]   ;;  %750 = vmatprep.mubr.bf16.mxu0 %v1497_v33 }
   0xc   :  { %1296 = vmatpush3.bf16.msra.mxu0 %v1473_v10  ;;  %v1490_v27 = vld [vmem:[%s1934_s1 + $0xb0] sm:$0xff]   ;;  %v1494_v31 = vld [vmem:[%s1934_s1 + $0xb8] sm:$0xff]   ;;  %v1501_v36 = vld [vmem:[%s1934_s1 + $0x140] sm:$0xff]  }
   0xd   :  { %1324 = vmatpush3.bf16.msra.mxu1 %v1474_v11  ;;  %1297 = vmatprep.subr.bf16.mxu0 %v1475_v12  ;;  %v1500_v35 = vld [vmem:[%s1935_s0 + $0xc] ss:$36 sps:$4 sm:$0xff]   ;;  %v1502_v37 = vld [vmem:[%s1934_s1 + $0x1c0] sm:$0xff]   ;;  %v1513_v48 = vld [vmem:[%s1934_s1 + $0x158] sm:$0xff]  }
   0xe   :  { %1325 = vmatprep.subr.bf16.mxu1 %v1476_v13  ;;  %799 = vmatprep.mubr.bf16.mxu1 %v1500_v35  ;;  %v1503_v38 = vld [vmem:[%s1934_s1 + $0x100] sm:$0xff]   ;;  %v1505_v40 = vld [vmem:[%s1934_s1 + $0x148] sm:$0xff]   ;;  %v1509_v44 = vld [vmem:[%s1934_s1 + $0x150] sm:$0xff]  }
   0xf   :  { %v1504_v39 = vld [vmem:[%s1934_s1 + $0x180] sm:$0xff]   ;;  %v1506_v41 = vld [vmem:[%s1934_s1 + $0x1c8] sm:$0xff]   ;;  %v1510_v45 = vld [vmem:[%s1934_s1 + $0x1d0] sm:$0xff]  }
  0x10   :  { %1298 = vmatpush3.bf16.msra.mxu0 %v1477_v14  ;;  %v1507_v42 = vld [vmem:[%s1934_s1 + $0x108] sm:$0xff]   ;;  %v1511_v46 = vld [vmem:[%s1934_s1 + $0x110] sm:$0xff]   ;;  %v1514_v49 = vld [vmem:[%s1934_s1 + $0x1d8] sm:$0xff]  }
  0x11   :  { %1326 = vmatpush3.bf16.msra.mxu1 %v1478_v15  ;;  %1299 = vmatprep.subr.bf16.mxu0 %v1479_v16  ;;  %v1508_v43 = vld [vmem:[%s1934_s1 + $0x188] sm:$0xff]   ;;  %v1512_v47 = vld [vmem:[%s1934_s1 + $0x190] sm:$0xff]   ;;  %v1515_v50 = vld [vmem:[%s1934_s1 + $0x118] sm:$0xff]  }
  0x12   :  { %1327 = vmatprep.subr.bf16.mxu1 %v1480_v17  ;;  %v1516_v51 = vld [vmem:[%s1934_s1 + $0x198] sm:$0xff]   ;;  %v1517_v52 = vld [vmem:[%s1934_s1 + $0x160] sm:$0xff]   ;;  %v1521_v56 = vld [vmem:[%s1934_s1 + $0x168] sm:$0xff]  }
  0x13   :  { %v1518_v53 = vld [vmem:[%s1934_s1 + $0x1e0] sm:$0xff]   ;;  %v1522_v57 = vld [vmem:[%s1934_s1 + $0x1e8] sm:$0xff]   ;;  %v1525_v59 = vld [vmem:[%s1935_s0 + $0x54] ss:$36 sps:$4 sm:$0xff]  }
  0x14   :  { %1300 = vmatpush3.bf16.msra.mxu0 %v1481_v18  ;;  %v1519_v54 = vld [vmem:[%s1934_s1 + $0x120] sm:$0xff]   ;;  %v1523_v58 = vld [vmem:[%s1935_s0 + $0x4c] ss:$36 sps:$4 sm:$0xff]   ;;  %v1535_v4 = vld [vmem:[%s1934_s1 + $0x178] sm:$0xff]  }
  0x15   :  { %1328 = vmatpush3.bf16.msra.mxu1 %v1482_v19  ;;  %1301 = vmatprep.subr.bf16.mxu0 %v1483_v20  ;;  %v1520_v55 = vld [vmem:[%s1934_s1 + $0x1a0] sm:$0xff]   ;;  %v1527_v60 = vld [vmem:[%s1934_s1 + $0x128] sm:$0xff]   ;;  %v1530_v63 = vld [vmem:[%s1935_s0 + $0x50] ss:$36 sps:$4 sm:$0xff]  }
  0x16   :  { %1329 = vmatprep.subr.bf16.mxu1 %v1484_v21  ;;  %v1528_v61 = vld [vmem:[%s1934_s1 + $0x1a8] sm:$0xff]   ;;  %v1531_v0 = vld [vmem:[%s1934_s1 + $0x170] sm:$0xff]   ;;  %v1536_v5 = vld [vmem:[%s1934_s1 + $0x1f8] sm:$0xff]  }
  0x17   :  { %v1529_v62 = vld [vmem:[%s1935_s0 + $0x48] ss:$36 sps:$4 sm:$0xff]   ;;  %v1532_v1 = vld [vmem:[%s1934_s1 + $0x1f0] sm:$0xff]   ;;  %v1537_v6 = vld [vmem:[%s1934_s1 + $0x138] sm:$0xff]  }
  0x18   :  { %1302 = vmatpush3.bf16.msra.mxu0 %v1485_v22  ;;  %v1533_v2 = vld [vmem:[%s1934_s1 + $0x130] sm:$0xff]   ;;  %v1538_v7 = vld [vmem:[%s1934_s1 + $0x1b8] sm:$0xff]   ;;  %v1545_v12 = vld [vmem:[%s1934_s1 + $0x200] sm:$0xff]  }
  0x19   :  { %1330 = vmatpush3.bf16.msra.mxu1 %v1486_v23  ;;  %1303 = vmatprep.subr.bf16.mxu0 %v1487_v24  ;;  %v1534_v3 = vld [vmem:[%s1934_s1 + $0x1b0] sm:$0xff]   ;;  %v1542_v10 = vld [vmem:[%s1935_s0 + $0x18] ss:$36 sps:$4 sm:$0xff]   ;;  %v1546_v13 = vld [vmem:[%s1936_s5] sm:$0xff]  }
  0x1a   :  { %1331 = vmatprep.subr.bf16.mxu1 %v1488_v25  ;;  %v1539_v8 = vld [vmem:[%s1935_s0 + $0x10] ss:$36 sps:$4 sm:$0xff]   ;;  %v1544_v11 = vld [vmem:[%s1935_s0 + $0x1c] ss:$36 sps:$4 sm:$0xff]   ;;  %v1547_v14 = vld [vmem:[%s1934_s1 + $0x208] sm:$0xff]  }
  0x1b   :  { %v1541_v9 = vld [vmem:[%s1935_s0 + $0x14] ss:$36 sps:$4 sm:$0xff]   ;;  %v1548_v15 = vld [vmem:[%s1936_s5 + $0x8] sm:$0xff]   ;;  %v1549_v16 = vld [vmem:[%s1935_s0 + $0x5c] ss:$36 sps:$4 sm:$0xff]  }
  0x1c   :  { %1304 = vmatpush3.bf16.msra.mxu0 %v1489_v26  ;;  %v1551_v17 = vld [vmem:[%s1935_s0 + $0x58] ss:$36 sps:$4 sm:$0xff]   ;;  %v1552_v18 = vld [vmem:[%s1934_s1 + $0x210] sm:$0xff]   ;;  %v1554_v20 = vld [vmem:[%s1935_s0 + $0x64] ss:$36 sps:$4 sm:$0xff]  }
  0x1d   :  { %1332 = vmatpush3.bf16.msra.mxu1 %v1490_v27  ;;  %1305 = vmatprep.subr.bf16.mxu0 %v1491_v28  ;;  %v1553_v19 = vld [vmem:[%s1936_s5 + $0x10] sm:$0xff]   ;;  %v1556_v21 = vld [vmem:[%s1935_s0 + $0x60] ss:$36 sps:$4 sm:$0xff]   ;;  %v1557_v22 = vld [vmem:[%s1934_s1 + $0x218] sm:$0xff]  }
  0x1e   :  { %1333 = vmatprep.subr.bf16.mxu1 %v1492_v29  ;;  %v1558_v23 = vld [vmem:[%s1936_s5 + $0x18] sm:$0xff]   ;;  %v1559_v24 = vld [vmem:[%s1934_s1 + $0x220] sm:$0xff]   ;;  %v1561_v26 = vld [vmem:[%s1934_s1 + $0x228] sm:$0xff]  }
  0x1f   :  { %v1560_v25 = vld [vmem:[%s1936_s5 + $0x20] sm:$0xff]   ;;  %v1562_v27 = vld [vmem:[%s1936_s5 + $0x28] sm:$0xff]   ;;  %v1563_v28 = vld [vmem:[%s1934_s1 + $0x230] sm:$0xff]  }
  0x20   :  { %1306 = vmatpush3.bf16.msra.mxu0 %v1493_v30  ;;  %v1567_v29 = vld [vmem:[%s1935_s0 + $0x20] ss:$36 sps:$4 sm:$0xff]   ;;  %v1566_v33 = vld [vmem:[%s1936_s5 + $0x38] sm:$0xff]   ;;  %v1570_v35 = vld [vmem:[%s1937_s4 + $0x8] sm:$0xff]  }
  0x21   :  { %1334 = vmatpush3.bf16.msra.mxu1 %v1494_v31  ;;  %1347 = vmatprep.subr.bf16.mxu0 %v1501_v36  ;;  %v1568_v30 = vld [vmem:[%s1937_s4] sm:$0xff]   ;;  %v1564_v31 = vld [vmem:[%s1936_s5 + $0x30] sm:$0xff]  }
  0x22   :  { %1375 = vmatprep.subr.bf16.mxu1 %v1502_v37 }
  0x23   :  { %751 = vmatmul.mubr.bf16.vlgmr.msra.gmra.mrb[0].mxu0 %v1495_v32  ;;  %v1565_v32 = vld [vmem:[%s1934_s1 + $0x238] sm:$0xff]  }
  0x24   :  { %800 = vmatmul.mubr.bf16.vlgmr.msra.gmra.mrb[0].mxu1 %v1498_v34  ;;  %1348 = vmatpush3.bf16.msra.mxu0 %v1503_v38  ;;  %v1569_v34 = vld [vmem:[%s1935_s0 + $0x68] ss:$36 sps:$4 sm:$0xff]  }
  0x25   :  { %1376 = vmatpush3.bf16.msra.mxu1 %v1504_v39  ;;  %1349 = vmatprep.subr.bf16.mxu0 %v1505_v40 }
  0x26   :  { %1377 = vmatprep.subr.bf16.mxu1 %v1506_v41  ;;  %758 = vmatprep.mubr.bf16.mxu0 %v1523_v58 }
  0x27   :  { %807 = vmatprep.mubr.bf16.mxu1 %v1525_v59 }
  0x28   :  { %1350 = vmatpush3.bf16.msra.mxu0 %v1507_v42 }
  0x29   :  { %1378 = vmatpush3.bf16.msra.mxu1 %v1508_v43  ;;  %1351 = vmatprep.subr.bf16.mxu0 %v1509_v44 }
  0x2a   :  { %1379 = vmatprep.subr.bf16.mxu1 %v1510_v45 }
  0x2b   :  { %759 = vmatmul.mubr.bf16.gmra.mrb[4].mxu0 %v1529_v62 }
  0x2c   :  { %1352 = vmatpush3.bf16.msra.mxu0 %v1511_v46  ;;  %808 = vmatmul.mubr.bf16.gmra.mrb[4].mxu1 %v1530_v63 }
  0x2d   :  { %1380 = vmatpush3.bf16.msra.mxu1 %v1512_v47  ;;  %1353 = vmatprep.subr.bf16.mxu0 %v1513_v48 }
  0x2e   :  { %1381 = vmatprep.subr.bf16.mxu1 %v1514_v49  ;;  %848 = vmatprep.mubr.bf16.mxu0 %v1541_v9 }
  0x2f   :  { %897 = vmatprep.mubr.bf16.mxu1 %v1544_v11 }
  0x30   :  { %1354 = vmatpush3.bf16.msra.mxu0 %v1515_v50 }
  0x31   :  { %1382 = vmatpush3.bf16.msra.mxu1 %v1516_v51  ;;  %1355 = vmatprep.subr.bf16.mxu0 %v1517_v52 }
  0x32   :  { %1383 = vmatprep.subr.bf16.mxu1 %v1518_v53 }
  0x34   :  { %1356 = vmatpush3.bf16.msra.mxu0 %v1519_v54 }
  0x35   :  { %1384 = vmatpush3.bf16.msra.mxu1 %v1520_v55  ;;  %1357 = vmatprep.subr.bf16.mxu0 %v1521_v56 }
  0x36   :  { %1385 = vmatprep.subr.bf16.mxu1 %v1522_v57 }
  0x38   :  { %1358 = vmatpush3.bf16.msra.mxu0 %v1527_v60 }
  0x39   :  { %1386 = vmatpush3.bf16.msra.mxu1 %v1528_v61  ;;  %1359 = vmatprep.subr.bf16.mxu0 %v1531_v0 }
  0x3a   :  { %1387 = vmatprep.subr.bf16.mxu1 %v1532_v1 }
  0x3c   :  { %1360 = vmatpush3.bf16.msra.mxu0 %v1533_v2 }
  0x3d   :  { %1388 = vmatpush3.bf16.msra.mxu1 %v1534_v3  ;;  %1361 = vmatprep.subr.bf16.mxu0 %v1535_v4 }
  0x3e   :  { %1389 = vmatprep.subr.bf16.mxu1 %v1536_v5 }
  0x40   :  { %1362 = vmatpush3.bf16.msra.mxu0 %v1537_v6 }
  0x41   :  { %1390 = vmatpush3.bf16.msra.mxu1 %v1538_v7  ;;  %1423 = vmatprep.subr.bf16.mxu0 %v1545_v12 }
  0x42   :  { %1443 = vmatprep.subr.bf16.mxu1 %v1546_v13 }
  0x43   :  { %849 = vmatmul.mubr.bf16.vlgmr.msra.gmra.mrb[8].mxu0 %v1539_v8 }
  0x44   :  { %898 = vmatmul.mubr.bf16.vlgmr.msra.gmra.mrb[8].mxu1 %v1542_v10  ;;  %1424 = vmatpush3.bf16.msra.mxu0 %v1545_v12 }
  0x45   :  { %1444 = vmatpush3.bf16.msra.mxu1 %v1546_v13  ;;  %1425 = vmatprep.subr.bf16.mxu0 %v1547_v14 }
  0x46   :  { %1445 = vmatprep.subr.bf16.mxu1 %v1548_v15  ;;  %856 = vmatprep.mubr.bf16.mxu0 %v1549_v16 }
  0x47   :  { %905 = vmatprep.mubr.bf16.mxu1 %v1554_v20 }
  0x48   :  { %1426 = vmatpush3.bf16.msra.mxu0 %v1547_v14 }
  0x49   :  { %1446 = vmatpush3.bf16.msra.mxu1 %v1548_v15  ;;  %1427 = vmatprep.subr.bf16.mxu0 %v1552_v18 }
  0x4a   :  { %1447 = vmatprep.subr.bf16.mxu1 %v1553_v19 }
  0x4b   :  { %857 = vmatmul.mubr.bf16.gmra.mrb[12].mxu0 %v1551_v17 }
  0x4c   :  { %1428 = vmatpush3.bf16.msra.mxu0 %v1552_v18  ;;  %906 = vmatmul.mubr.bf16.gmra.mrb[12].mxu1 %v1556_v21 }
  0x4d   :  { %1448 = vmatpush3.bf16.msra.mxu1 %v1553_v19  ;;  %1429 = vmatprep.subr.bf16.mxu0 %v1557_v22 }
  0x4e   :  { %1449 = vmatprep.subr.bf16.mxu1 %v1558_v23  ;;  %1439 = vmatprep.mubr.bf16.mxu0 %v1567_v29 }
  0x4f   :  { %1459 = vmatprep.mubr.bf16.mxu1 %v1568_v30 }
  0x50   :  { %1430 = vmatpush3.bf16.msra.mxu0 %v1557_v22 }
  0x51   :  { %1450 = vmatpush3.bf16.msra.mxu1 %v1558_v23  ;;  %1431 = vmatprep.subr.bf16.mxu0 %v1559_v24 }
  0x52   :  { %1451 = vmatprep.subr.bf16.mxu1 %v1560_v25 }
  0x54   :  { %1432 = vmatpush3.bf16.msra.mxu0 %v1559_v24 }
  0x55   :  { %1452 = vmatpush3.bf16.msra.mxu1 %v1560_v25  ;;  %1433 = vmatprep.subr.bf16.mxu0 %v1561_v26 }
  0x56   :  { %1453 = vmatprep.subr.bf16.mxu1 %v1562_v27 }
  0x58   :  { %1434 = vmatpush3.bf16.msra.mxu0 %v1561_v26 }
  0x59   :  { %1454 = vmatpush3.bf16.msra.mxu1 %v1562_v27  ;;  %1435 = vmatprep.subr.bf16.mxu0 %v1563_v28 }
  0x5a   :  { %1455 = vmatprep.subr.bf16.mxu1 %v1564_v31 }
  0x5c   :  { %1436 = vmatpush3.bf16.msra.mxu0 %v1563_v28 }
  0x5d   :  { %1456 = vmatpush3.bf16.msra.mxu1 %v1564_v31  ;;  %1437 = vmatprep.subr.bf16.mxu0 %v1565_v32 }
  0x5e   :  { %1457 = vmatprep.subr.bf16.mxu1 %v1566_v33 }
  0x60   :  { %1438 = vmatpush3.bf16.msra.mxu0 %v1565_v32  ;;  %v1270_v32 = vld [vmem:[%s1938_s6] ss:$0 sm:$0xff] }
  0x61   :  { %1458 = vmatpush3.bf16.msra.mxu1 %v1566_v33 }
  0x63   :  { %1440 = vmatmul.mubr.bf16.vlgmr.msra.gmra.mrb[16].mxu0 %v1569_v34  ;;  %v1258_v34 = vld [vmem:[%s1939_s2] ss:$0 sm:$0xff] }
  0x64   :  { %1460 = vmatmul.mubr.bf16.vlgmr.msra.gmra.mrb[16].mxu1 %v1570_v35 }
  0xf6   :  { %v1307_v36 = vpop.f32.mrb[0].mxu0 }
  0xf7   :  { %v1335_v37 = vpop.f32.mrb[0].mxu1  ;;  %v1308_v38 = vpop.f32.mrb[1].mxu0 }
  0xf8   :  { %v1309_v39 = vadd.f32 %v1308_v38, %v1307_v36  ;;  %v1336_v40 = vpop.f32.mrb[1].mxu1  ;;  %v1310_v41 = vpop.f32.mrb[2].mxu0 }
  0xf9   :  { %v1337_v42 = vadd.f32 %v1336_v40, %v1335_v37  ;;  %v1338_v43 = vpop.f32.mrb[2].mxu1  ;;  %v1311_v44 = vpop.f32.mrb[3].mxu0  ;;  %v1271_v37 = vld [vmem:[%s1940_s7] ss:$0 sm:$0xff] }
  0xfa   :  { %v1312_v45 = vadd.f32 %v1311_v44, %v1310_v41  ;;  %v1339_v46 = vpop.f32.mrb[3].mxu1 }
  0xfb   :  { %v802_v47 = vadd.f32 %v1337_v42, %v1309_v39  ;;  %v1340_v48 = vadd.f32 %v1339_v46, %v1338_v43  ;;  %v1259_v39 = vld [vmem:[%s1941_s3] ss:$0 sm:$0xff] }
  0xfd   :  { %v805_v49 = vadd.f32 %v1340_v48, %v1312_v45 }
  0xfe   :  { %v1313_v50 = vpop.f32.mrb[4].mxu0 }
  0xff   :  { %v1341_v51 = vpop.f32.mrb[4].mxu1  ;;  %v1314_v52 = vpop.f32.mrb[5].mxu0 }
 0x100   :  { %v1315_v53 = vadd.f32 %v1314_v52, %v1313_v50  ;;  %v1342_v54 = vpop.f32.mrb[5].mxu1  ;;  %v1316_v55 = vpop.f32.mrb[6].mxu0 }
 0x101   :  { %v1343_v56 = vadd.f32 %v1342_v54, %v1341_v51  ;;  %v1344_v57 = vpop.f32.mrb[6].mxu1  ;;  %v1317_v58 = vpop.f32.mrb[7].mxu0 }
 0x102   :  { %v1318_v59 = vadd.f32 %v1317_v58, %v1316_v55  ;;  %v1345_v60 = vpop.f32.mrb[7].mxu1 }
 0x103   :  { %v810_v61 = vadd.f32 %v1343_v56, %v1315_v53  ;;  %v1346_v62 = vadd.f32 %v1345_v60, %v1344_v57 }
 0x105   :  { %v813_v63 = vadd.f32 %v1346_v62, %v1318_v59 }
 0x116   :  { %v1363_v0 = vpop.f32.mrb[8].mxu0 }
 0x117   :  { %v1391_v1 = vpop.f32.mrb[8].mxu1  ;;  %v1364_v2 = vpop.f32.mrb[9].mxu0 }
 0x118   :  { %v1365_v3 = vadd.f32 %v1364_v2, %v1363_v0  ;;  %v1392_v4 = vpop.f32.mrb[9].mxu1  ;;  %v1366_v5 = vpop.f32.mrb[10].mxu0 }
 0x119   :  { %v1393_v6 = vadd.f32 %v1392_v4, %v1391_v1  ;;  %v1394_v7 = vpop.f32.mrb[10].mxu1  ;;  %v1367_v8 = vpop.f32.mrb[11].mxu0 }
 0x11a   :  { %v851_v9 = vadd.f32 %v1365_v3, %v802_v47  ;;  %v1368_v10 = vadd.f32 %v1367_v8, %v1366_v5  ;;  %v1395_v11 = vpop.f32.mrb[11].mxu1 }
 0x11b   :  { %v1396_v12 = vadd.f32 %v1395_v11, %v1394_v7 }
 0x11c   :  { %v854_v13 = vadd.f32 %v1368_v10, %v805_v49  ;;  %v900_v14 = vadd.f32 %v1393_v6, %v851_v9 }
 0x11e   :  { %v1369_v15 = vpop.f32.mrb[12].mxu0  ;;  %v903_v16 = vadd.f32 %v1396_v12, %v854_v13 }
 0x11f   :  { %v1370_v17 = vpop.f32.mrb[13].mxu0  ;;  %v1397_v20 = vpop.f32.mrb[12].mxu1 }
 0x120   :  { %v1371_v18 = vadd.f32 %v1370_v17, %v1369_v15  ;;  %v1372_v19 = vpop.f32.mrb[14].mxu0  ;;  %v1398_v22 = vpop.f32.mrb[13].mxu1 }
 0x121   :  { %v1373_v21 = vpop.f32.mrb[15].mxu0  ;;  %v1399_v25 = vadd.f32 %v1398_v22, %v1397_v20  ;;  %v1400_v26 = vpop.f32.mrb[14].mxu1 }
 0x122   :  { %v859_v23 = vadd.f32 %v1371_v18, %v810_v61  ;;  %v1374_v24 = vadd.f32 %v1373_v21, %v1372_v19  ;;  %v1401_v27 = vpop.f32.mrb[15].mxu1 }
 0x123   :  { %v1402_v29 = vadd.f32 %v1401_v27, %v1400_v26 }
 0x124   :  { %v862_v28 = vadd.f32 %v1374_v24, %v813_v63  ;;  %v908_v30 = vadd.f32 %v1399_v25, %v859_v23 }
 0x126   :  { %v911_v31 = vadd.f32 %v1402_v29, %v862_v28 }
 0x136   :  { %v1441_v33 = vpop.f32.mrb[16].mxu0 }
 0x137   :  { %v957_v35 = vadd.f32 %v1441_v33, %v908_v30  ;;  %v1461_v36 = vpop.f32.mrb[16].mxu1  ;;  %v948_v38 = vpop.f32.mrb[17].mxu0 }
 0x138   :  { %v1123_v40 = vmul.f32 %v1461_v36, %v1270_v32  ;;  %v949_v41 = vadd.f32 %v948_v38, %v900_v14  ;;  %v1099_v42 = vpop.f32.mrb[17].mxu1  ;;  %v1442_v43 = vpop.f32.mrb[18].mxu0 }
 0x139   :  { %v972_v44 = vmul.f32 %v1258_v34, %v957_v35  ;;  %v1121_v45 = vmul.f32 %v1270_v32, %v1099_v42  ;;  %v960_v46 = vadd.f32 %v1442_v43, %v911_v31  ;;  %v1462_v47 = vpop.f32.mrb[18].mxu1  ;;  %v951_v48 = vpop.f32.mrb[19].mxu0 }
 0x13a   :  { %v1134_v49 = vadd.f32 %v1271_v37, %v1123_v40  ;;  %v970_v50 = vmul.f32 %v1258_v34, %v949_v41  ;;  %v1124_v51 = vmul.f32 %v1462_v47, %v1270_v32  ;;  %v952_v52 = vadd.f32 %v951_v48, %v903_v16  ;;  %v1102_v53 = vpop.f32.mrb[19].mxu1 }
 0x13b   :  { %v983_v54 = vadd.f32 %v1259_v39, %v972_v44  ;;  %v1132_v55 = vadd.f32 %v1271_v37, %v1121_v45  ;;  %v973_v56 = vmul.f32 %v1258_v34, %v960_v46  ;;  %v1122_v57 = vmul.f32 %v1270_v32, %v1102_v53 }
 0x13c   :  { %v981_v58 = vadd.f32 %v1259_v39, %v970_v50  ;;  %v971_v59 = vmul.f32 %v1258_v34, %v952_v52  ;;  %v1135_v62 = vadd.f32 %v1271_v37, %v1124_v51 }
 0x13d   :  { %v1138_v60 = vadd.f32 %v1134_v49, %v983_v54  ;;  %v984_v61 = vadd.f32 %v1259_v39, %v973_v56  ;;  %v1133_v1 = vadd.f32 %v1271_v37, %v1122_v57 }
 0x13e   :  { %v1136_v63 = vadd.f32 %v1132_v55, %v981_v58  ;;  %v982_v0 = vadd.f32 %v1259_v39, %v971_v59 }
 0x13f   :  { %v1139_v2 = vadd.f32 %v1135_v62, %v984_v61  ;;  %v1142_v4 = vmax.f32 %v1138_v60, 0.0 }
 0x140   :  { %v1137_v3 = vadd.f32 %v1133_v1, %v982_v0  ;;  %v1140_v6 = vmax.f32 %v1136_v63, 0.0 }
 0x141   :  { %v1143_v5 = vmax.f32 %v1139_v2, 0.0 }
 0x142   :  { %v1141_v7 = vmax.f32 %v1137_v3, 0.0 }
 0x143   :  { %v1288_v8 = vpack.c.bf16 %v1143_v5, %v1142_v4 }
 0x144   :  { %v1283_v9 = vpack.c.bf16 %v1141_v7, %v1140_v6 }
 0x145   :  { %1290 = vst [vmem:[%s1942_s8 + $0x8] sm:$0xff] %v1288_v8  }
 0x146   :  { %1284 = vst [vmem:[%s1942_s8] sm:$0xff] %v1283_v9  }

</bundles_post_ra>
